<compile_context>
chip_gen: v5e
topology: v5e:2x2
jax: 0.10.0
libtpu: 0.0.40
codegen_flags: <defaults>
</compile_context>

<pallas_src>
import jax
import jax.numpy as jnp
from jax.experimental import pallas as pl
from jax.experimental.pallas import tpu as pltpu


EMBED_LEN = 32
FEATURE_LEN = 68            # 64 context features + 4 action features (see module)
HIDDEN = (1024, 512, 256, 128, 64, 1)
IN_DIM = FEATURE_LEN * EMBED_LEN                       # 2176 = 17 * 128
LAYER_DIMS = tuple(zip((IN_DIM,) + HIDDEN[:-1], HIDDEN))

_MAX_TILE_B = 128           # batch tile when B is large (MXU row dim friendly)
_VMEM_LIMIT = 40 * 1024 * 1024   # < 64 MiB (v7x physical); plenty on v5e/v6e


def _critic_mlp_kernel(x_ref,
                       w1, b1, w2, b2, w3, b3, w4, b4, w5, b5, w6, b6,
                       out_ref):
    """Full MLP for one batch tile.

    x_ref   : (TILE_B, 2176) bf16 activations
    w1..w5  : (in, out) bf16 weights (pre-transposed), b1..b5 (1, out) f32
    w6      : (1, 64) f32 final-layer row, b6 (1, 1) f32
    out_ref : (TILE_B, 1) f32
    """
    # Layer 1: bf16 x bf16 -> f32 accumulate on the MXU, bias + ReLU in f32.
    h = jnp.maximum(
        jnp.dot(x_ref[...], w1[...], preferred_element_type=jnp.float32)
        + b1[...], 0.0)
    # Layers 2..5: cast activation to bf16 for the MXU, keep f32 accumulation.
    for w_ref, b_ref in ((w2, b2), (w3, b3), (w4, b4), (w5, b5)):
        h = jnp.maximum(
            jnp.dot(h.astype(jnp.bfloat16), w_ref[...],
                    preferred_element_type=jnp.float32)
            + b_ref[...], 0.0)
    # Final 64 -> 1 layer as a VPU multiply + XLU lane reduction (no N=1 MXU
    # push).  h: (TILE_B, 64) f32, w6: (1, 64) f32 -> (TILE_B, 1).
    out_ref[...] = jnp.sum(h * w6[...], axis=-1, keepdims=True) + b6[...]


def critic_forward(x_ids, params):
    """x_ids: (B, FEATURE_LEN) int32.  Returns (B, 1) float32."""
    base_embedding = params["base_embedding"]          # (10000, 32) f32
    B = x_ids.shape[0]

    # --- glue: embedding gather + flatten (matches x.view(-1,1) -> table[ids]
    # -> view).  Cast to bf16 so the kernel's activation DMA is half-width too.
    flat_ids = x_ids.reshape(-1)                       # (B*F,)
    emb = jnp.take(base_embedding, flat_ids, axis=0)   # (B*F, 32)
    mlp_in = emb.reshape(B, IN_DIM).astype(jnp.bfloat16)

    # --- batch padding / tiling ---------------------------------------------
    if B <= _MAX_TILE_B:
        tile_b = max(8, -(-B // 8) * 8)                # round up to sublane (8)
    else:
        tile_b = _MAX_TILE_B
    b_pad = -(-B // tile_b) * tile_b
    if b_pad != B:
        mlp_in = jnp.pad(mlp_in, ((0, b_pad - B), (0, 0)))
    grid = (b_pad // tile_b,)

    # --- parameter operands (matmul weights pre-transposed to (in, out)) ----
    weight_args = []
    for li in range(6):
        weight_args.append(params[f"w{li + 1}"])
        weight_args.append(params[f"b{li + 1}"])

    # Activation tile walks the batch axis; weights/biases use a constant block
    # index so they stay resident in VMEM across batch tiles.
    in_specs = [pl.BlockSpec((tile_b, IN_DIM), lambda i: (i, 0))]
    for arg in weight_args:
        in_specs.append(pl.BlockSpec(arg.shape, lambda i: (0, 0)))
    out_specs = pl.BlockSpec((tile_b, 1), lambda i: (i, 0))

    # Advisory cost estimate (kernel is HBM-bandwidth bound on weight fetch).
    flops = 2 * b_pad * sum(din * dout for din, dout in LAYER_DIMS)
    weight_bytes = sum(din * dout * 2 for din, dout in LAYER_DIMS[:5]) + 64 * 4
    bias_bytes = sum(dout * 4 for _, dout in LAYER_DIMS)
    bytes_accessed = weight_bytes + bias_bytes + b_pad * IN_DIM * 2 + b_pad * 4
    cost = pl.CostEstimate(flops=flops, transcendentals=0,
                           bytes_accessed=bytes_accessed)

    out = pl.pallas_call(
        _critic_mlp_kernel,
        out_shape=jax.ShapeDtypeStruct((b_pad, 1), jnp.float32),
        grid=grid,
        in_specs=in_specs,
        out_specs=out_specs,
        compiler_params=pltpu.CompilerParams(
            dimension_semantics=("parallel",),      # shard batch tiles across TCs
            vmem_limit_bytes=_VMEM_LIMIT,
        ),
        cost_estimate=cost,
    )(mlp_in, *weight_args)
    return out[:B]


def init_params(key):
    """Deterministic parameter init mimicking the torch module's shapes.

    Matmul weights (layers 1-5) are stored pre-transposed as (in, out) bf16;
    biases are (1, out) f32; the final 64->1 layer is stored as a (1, 64) f32
    row (w6) plus a (1, 1) f32 bias (b6).
    """
    params = {}
    key, k_emb = jax.random.split(key)
    # torch.randn(10000, 32)
    params["base_embedding"] = jax.random.normal(
        k_emb, (10000, EMBED_LEN), dtype=jnp.float32)

    for li, (din, dout) in enumerate(LAYER_DIMS):
        key, kw, kb = jax.random.split(key, 3)
        bound = 1.0 / jnp.sqrt(jnp.float32(din))       # torch.nn.Linear default
        w = jax.random.uniform(kw, (din, dout), minval=-bound, maxval=bound,
                               dtype=jnp.float32)
        b = jax.random.uniform(kb, (1, dout), minval=-bound, maxval=bound,
                               dtype=jnp.float32)
        if li < 5:
            params[f"w{li + 1}"] = w.astype(jnp.bfloat16)   # (in, out) bf16
            params[f"b{li + 1}"] = b                        # (1, out) f32
        else:
            # Final layer kept as an f32 row vector for the VPU reduce.
            params[f"w{li + 1}"] = w.reshape(1, din)        # (1, 64) f32
            params[f"b{li + 1}"] = b                        # (1, 1) f32
    return params


def reference_forward(x_ids, params):
    """Pure-JAX reference mirroring the kernel's bf16-weight numerics."""
    B = x_ids.shape[0]
    emb = jnp.take(params["base_embedding"], x_ids.reshape(-1), axis=0)
    h = emb.reshape(B, IN_DIM).astype(jnp.bfloat16)
    h = jnp.maximum(
        jnp.dot(h, params["w1"], preferred_element_type=jnp.float32)
        + params["b1"], 0.0)
    for li in range(2, 6):
        h = jnp.maximum(
            jnp.dot(h.astype(jnp.bfloat16), params[f"w{li}"],
                    preferred_element_type=jnp.float32)
            + params[f"b{li}"], 0.0)
    return jnp.sum(h * params["w6"], axis=-1, keepdims=True) + params["b6"]


if __name__ == "__main__":
    key = jax.random.PRNGKey(0)
    key, k_params, k_ids, k_ids2 = jax.random.split(key, 4)

    params = init_params(k_params)

    # Small batch (single tile path). Integer feature ids in [0, 10000) — same
    # role as IDGenerator outputs.
    batch = 8
    x_ids = jax.random.randint(
        k_ids, (batch, FEATURE_LEN), minval=0, maxval=10000, dtype=jnp.int32)

    y = critic_forward(x_ids, params)
    y = jax.block_until_ready(y)
    y_ref = reference_forward(x_ids, params)
    assert y.shape == (batch, 1)
    assert jnp.allclose(y, y_ref, rtol=1e-2, atol=1e-2), "mismatch vs reference"

    # Non-multiple-of-8 batch (exercises padding + un-pad slice).
    batch2 = 13
    x_ids2 = jax.random.randint(
        k_ids2, (batch2, FEATURE_LEN), minval=0, maxval=10000, dtype=jnp.int32)
    y2 = jax.block_until_ready(critic_forward(x_ids2, params))
    y2_ref = reference_forward(x_ids2, params)
    assert y2.shape == (batch2, 1)
    assert jnp.allclose(y2, y2_ref, rtol=1e-2, atol=1e-2), "mismatch (padded)"

    print("KERNEL_OK")
</pallas_src>

<mosaic_0001>
module attributes {stable_mosaic.version = 11 : i64} {
  func.func @_critic_mlp_kernel(%arg0: i32, %arg1: memref<8x2176xbf16, #tpu.memory_space<vmem>>, %arg2: memref<2176x1024xbf16, #tpu.memory_space<vmem>>, %arg3: memref<1x1024xf32, #tpu.memory_space<vmem>>, %arg4: memref<1024x512xbf16, #tpu.memory_space<vmem>>, %arg5: memref<1x512xf32, #tpu.memory_space<vmem>>, %arg6: memref<512x256xbf16, #tpu.memory_space<vmem>>, %arg7: memref<1x256xf32, #tpu.memory_space<vmem>>, %arg8: memref<256x128xbf16, #tpu.memory_space<vmem>>, %arg9: memref<1x128xf32, #tpu.memory_space<vmem>>, %arg10: memref<128x64xbf16, #tpu.memory_space<vmem>>, %arg11: memref<1x64xf32, #tpu.memory_space<vmem>>, %arg12: memref<1x64xf32, #tpu.memory_space<vmem>>, %arg13: memref<1x1xf32, #tpu.memory_space<vmem>>, %arg14: memref<8x1xf32, #tpu.memory_space<vmem>>) attributes {dimension_semantics = [#tpu.dimension_semantics<parallel>], iteration_bounds = array<i64: 1>, scalar_prefetch = 0 : i64, scratch_operands = 0 : i64, tpu.core_type = #tpu.core_type<tc>, window_params = [{transform_indices = @transform_0, window_bounds = array<i64: 8, 2176>}, {pipeline_mode = #tpu.pipeline_mode<synchronous>, transform_indices = @transform_1, window_bounds = array<i64: 2176, 1024>}, {pipeline_mode = #tpu.pipeline_mode<synchronous>, transform_indices = @transform_2, window_bounds = array<i64: 1, 1024>}, {pipeline_mode = #tpu.pipeline_mode<synchronous>, transform_indices = @transform_3, window_bounds = array<i64: 1024, 512>}, {pipeline_mode = #tpu.pipeline_mode<synchronous>, transform_indices = @transform_4, window_bounds = array<i64: 1, 512>}, {pipeline_mode = #tpu.pipeline_mode<synchronous>, transform_indices = @transform_5, window_bounds = array<i64: 512, 256>}, {pipeline_mode = #tpu.pipeline_mode<synchronous>, transform_indices = @transform_6, window_bounds = array<i64: 1, 256>}, {pipeline_mode = #tpu.pipeline_mode<synchronous>, transform_indices = @transform_7, window_bounds = array<i64: 256, 128>}, {pipeline_mode = #tpu.pipeline_mode<synchronous>, transform_indices = @transform_8, window_bounds = array<i64: 1, 128>}, {pipeline_mode = #tpu.pipeline_mode<synchronous>, transform_indices = @transform_9, window_bounds = array<i64: 128, 64>}, {pipeline_mode = #tpu.pipeline_mode<synchronous>, transform_indices = @transform_10, window_bounds = array<i64: 1, 64>}, {pipeline_mode = #tpu.pipeline_mode<synchronous>, transform_indices = @transform_11, window_bounds = array<i64: 1, 64>}, {pipeline_mode = #tpu.pipeline_mode<synchronous>, transform_indices = @transform_12, window_bounds = array<i64: 1, 1>}, {transform_indices = @transform_13, window_bounds = array<i64: 8, 1>}]} {
    %c0 = arith.constant 0 : index
    %c0_0 = arith.constant 0 : index
    %0 = vector.load %arg1[%c0, %c0_0] : memref<8x2176xbf16, #tpu.memory_space<vmem>>, vector<8x2176xbf16>
    %c0_1 = arith.constant 0 : index
    %c0_2 = arith.constant 0 : index
    %1 = vector.load %arg2[%c0_1, %c0_2] : memref<2176x1024xbf16, #tpu.memory_space<vmem>>, vector<2176x1024xbf16>
    %cst = arith.constant dense<0.000000e+00> : vector<8x1024xf32>
    %2 = tpu.matmul %0, %1, %cst {dimension_numbers = #tpu.dot_dimension_numbers<[1], [0], [0], [1], [0, 0, 1, 1], [], []>} : vector<8x2176xbf16>, vector<2176x1024xbf16>, vector<8x1024xf32> -> vector<8x1024xf32>
    %c0_3 = arith.constant 0 : index
    %c0_4 = arith.constant 0 : index
    %3 = vector.load %arg3[%c0_3, %c0_4] : memref<1x1024xf32, #tpu.memory_space<vmem>>, vector<1x1024xf32>
    %4 = vector.broadcast %3 : vector<1x1024xf32> to vector<8x1024xf32>
    %5 = arith.addf %2, %4 : vector<8x1024xf32>
    %cst_5 = arith.constant 0.000000e+00 : f32
    %6 = vector.broadcast %cst_5 : f32 to vector<8x1024xf32>
    %7 = arith.maximumf %5, %6 : vector<8x1024xf32>
    %8 = arith.truncf %7 : vector<8x1024xf32> to vector<8x1024xbf16>
    %c0_6 = arith.constant 0 : index
    %c0_7 = arith.constant 0 : index
    %9 = vector.load %arg4[%c0_6, %c0_7] : memref<1024x512xbf16, #tpu.memory_space<vmem>>, vector<1024x512xbf16>
    %cst_8 = arith.constant dense<0.000000e+00> : vector<8x512xf32>
    %10 = tpu.matmul %8, %9, %cst_8 {dimension_numbers = #tpu.dot_dimension_numbers<[1], [0], [0], [1], [0, 0, 1, 1], [], []>} : vector<8x1024xbf16>, vector<1024x512xbf16>, vector<8x512xf32> -> vector<8x512xf32>
    %c0_9 = arith.constant 0 : index
    %c0_10 = arith.constant 0 : index
    %11 = vector.load %arg5[%c0_9, %c0_10] : memref<1x512xf32, #tpu.memory_space<vmem>>, vector<1x512xf32>
    %12 = vector.broadcast %11 : vector<1x512xf32> to vector<8x512xf32>
    %13 = arith.addf %10, %12 : vector<8x512xf32>
    %cst_11 = arith.constant 0.000000e+00 : f32
    %14 = vector.broadcast %cst_11 : f32 to vector<8x512xf32>
    %15 = arith.maximumf %13, %14 : vector<8x512xf32>
    %16 = arith.truncf %15 : vector<8x512xf32> to vector<8x512xbf16>
    %c0_12 = arith.constant 0 : index
    %c0_13 = arith.constant 0 : index
    %17 = vector.load %arg6[%c0_12, %c0_13] : memref<512x256xbf16, #tpu.memory_space<vmem>>, vector<512x256xbf16>
    %cst_14 = arith.constant dense<0.000000e+00> : vector<8x256xf32>
    %18 = tpu.matmul %16, %17, %cst_14 {dimension_numbers = #tpu.dot_dimension_numbers<[1], [0], [0], [1], [0, 0, 1, 1], [], []>} : vector<8x512xbf16>, vector<512x256xbf16>, vector<8x256xf32> -> vector<8x256xf32>
    %c0_15 = arith.constant 0 : index
    %c0_16 = arith.constant 0 : index
    %19 = vector.load %arg7[%c0_15, %c0_16] : memref<1x256xf32, #tpu.memory_space<vmem>>, vector<1x256xf32>
    %20 = vector.broadcast %19 : vector<1x256xf32> to vector<8x256xf32>
    %21 = arith.addf %18, %20 : vector<8x256xf32>
    %cst_17 = arith.constant 0.000000e+00 : f32
    %22 = vector.broadcast %cst_17 : f32 to vector<8x256xf32>
    %23 = arith.maximumf %21, %22 : vector<8x256xf32>
    %24 = arith.truncf %23 : vector<8x256xf32> to vector<8x256xbf16>
    %c0_18 = arith.constant 0 : index
    %c0_19 = arith.constant 0 : index
    %25 = vector.load %arg8[%c0_18, %c0_19] : memref<256x128xbf16, #tpu.memory_space<vmem>>, vector<256x128xbf16>
    %cst_20 = arith.constant dense<0.000000e+00> : vector<8x128xf32>
    %26 = tpu.matmul %24, %25, %cst_20 {dimension_numbers = #tpu.dot_dimension_numbers<[1], [0], [0], [1], [0, 0, 1, 1], [], []>} : vector<8x256xbf16>, vector<256x128xbf16>, vector<8x128xf32> -> vector<8x128xf32>
    %c0_21 = arith.constant 0 : index
    %c0_22 = arith.constant 0 : index
    %27 = vector.load %arg9[%c0_21, %c0_22] : memref<1x128xf32, #tpu.memory_space<vmem>>, vector<1x128xf32>
    %28 = vector.broadcast %27 : vector<1x128xf32> to vector<8x128xf32>
    %29 = arith.addf %26, %28 : vector<8x128xf32>
    %cst_23 = arith.constant 0.000000e+00 : f32
    %30 = vector.broadcast %cst_23 : f32 to vector<8x128xf32>
    %31 = arith.maximumf %29, %30 : vector<8x128xf32>
    %32 = arith.truncf %31 : vector<8x128xf32> to vector<8x128xbf16>
    %c0_24 = arith.constant 0 : index
    %c0_25 = arith.constant 0 : index
    %33 = vector.load %arg10[%c0_24, %c0_25] : memref<128x64xbf16, #tpu.memory_space<vmem>>, vector<128x64xbf16>
    %cst_26 = arith.constant dense<0.000000e+00> : vector<8x64xf32>
    %34 = tpu.matmul %32, %33, %cst_26 {dimension_numbers = #tpu.dot_dimension_numbers<[1], [0], [0], [1], [0, 0, 1, 1], [], []>} : vector<8x128xbf16>, vector<128x64xbf16>, vector<8x64xf32> -> vector<8x64xf32>
    %c0_27 = arith.constant 0 : index
    %c0_28 = arith.constant 0 : index
    %35 = vector.load %arg11[%c0_27, %c0_28] : memref<1x64xf32, #tpu.memory_space<vmem>>, vector<1x64xf32>
    %36 = vector.broadcast %35 : vector<1x64xf32> to vector<8x64xf32>
    %37 = arith.addf %34, %36 : vector<8x64xf32>
    %cst_29 = arith.constant 0.000000e+00 : f32
    %38 = vector.broadcast %cst_29 : f32 to vector<8x64xf32>
    %39 = arith.maximumf %37, %38 : vector<8x64xf32>
    %c0_30 = arith.constant 0 : index
    %c0_31 = arith.constant 0 : index
    %40 = vector.load %arg12[%c0_30, %c0_31] : memref<1x64xf32, #tpu.memory_space<vmem>>, vector<1x64xf32>
    %41 = vector.broadcast %40 : vector<1x64xf32> to vector<8x64xf32>
    %42 = arith.mulf %39, %41 : vector<8x64xf32>
    %cst_32 = arith.constant dense<0.000000e+00> : vector<8xf32>
    %43 = vector.multi_reduction <add>, %42, %cst_32 [1] : vector<8x64xf32> to vector<8xf32>
    %44 = vector.shape_cast %43 : vector<8xf32> to vector<8x1xf32>
    %c0_33 = arith.constant 0 : index
    %c0_34 = arith.constant 0 : index
    %45 = vector.load %arg13[%c0_33, %c0_34] : memref<1x1xf32, #tpu.memory_space<vmem>>, vector<1x1xf32>
    %46 = vector.broadcast %45 : vector<1x1xf32> to vector<8x1xf32>
    %47 = arith.addf %44, %46 : vector<8x1xf32>
    %c0_35 = arith.constant 0 : index
    %c0_36 = arith.constant 0 : index
    %48 = vector.load %arg14[%c0_35, %c0_36] : memref<8x1xf32, #tpu.memory_space<vmem>>, vector<8x1xf32>
    tpu.vector_store %arg14[%c0_35, %c0_36], %47 {strides = array<i32>} : memref<8x1xf32, #tpu.memory_space<vmem>>, vector<8x1xf32>,
    return
  }
  func.func @transform_0(%arg0: i32) -> (i32, i32) {
    %c0_i32 = arith.constant 0 : i32
    %c0_i32_0 = arith.constant 0 : i32
    return %arg0, %c0_i32 : i32, i32
  }
  func.func @transform_1(%arg0: i32) -> (i32, i32) {
    %c0_i32 = arith.constant 0 : i32
    %c0_i32_0 = arith.constant 0 : i32
    %c0_i32_1 = arith.constant 0 : i32
    return %c0_i32, %c0_i32_0 : i32, i32
  }
  func.func @transform_2(%arg0: i32) -> (i32, i32) {
    %c0_i32 = arith.constant 0 : i32
    %c0_i32_0 = arith.constant 0 : i32
    %c0_i32_1 = arith.constant 0 : i32
    return %c0_i32, %c0_i32_0 : i32, i32
  }
  func.func @transform_3(%arg0: i32) -> (i32, i32) {
    %c0_i32 = arith.constant 0 : i32
    %c0_i32_0 = arith.constant 0 : i32
    %c0_i32_1 = arith.constant 0 : i32
    return %c0_i32, %c0_i32_0 : i32, i32
  }
  func.func @transform_4(%arg0: i32) -> (i32, i32) {
    %c0_i32 = arith.constant 0 : i32
    %c0_i32_0 = arith.constant 0 : i32
    %c0_i32_1 = arith.constant 0 : i32
    return %c0_i32, %c0_i32_0 : i32, i32
  }
  func.func @transform_5(%arg0: i32) -> (i32, i32) {
    %c0_i32 = arith.constant 0 : i32
    %c0_i32_0 = arith.constant 0 : i32
    %c0_i32_1 = arith.constant 0 : i32
    return %c0_i32, %c0_i32_0 : i32, i32
  }
  func.func @transform_6(%arg0: i32) -> (i32, i32) {
    %c0_i32 = arith.constant 0 : i32
    %c0_i32_0 = arith.constant 0 : i32
    %c0_i32_1 = arith.constant 0 : i32
    return %c0_i32, %c0_i32_0 : i32, i32
  }
  func.func @transform_7(%arg0: i32) -> (i32, i32) {
    %c0_i32 = arith.constant 0 : i32
    %c0_i32_0 = arith.constant 0 : i32
    %c0_i32_1 = arith.constant 0 : i32
    return %c0_i32, %c0_i32_0 : i32, i32
  }
  func.func @transform_8(%arg0: i32) -> (i32, i32) {
    %c0_i32 = arith.constant 0 : i32
    %c0_i32_0 = arith.constant 0 : i32
    %c0_i32_1 = arith.constant 0 : i32
    return %c0_i32, %c0_i32_0 : i32, i32
  }
  func.func @transform_9(%arg0: i32) -> (i32, i32) {
    %c0_i32 = arith.constant 0 : i32
    %c0_i32_0 = arith.constant 0 : i32
    %c0_i32_1 = arith.constant 0 : i32
    return %c0_i32, %c0_i32_0 : i32, i32
  }
  func.func @transform_10(%arg0: i32) -> (i32, i32) {
    %c0_i32 = arith.constant 0 : i32
    %c0_i32_0 = arith.constant 0 : i32
    %c0_i32_1 = arith.constant 0 : i32
    return %c0_i32, %c0_i32_0 : i32, i32
  }
  func.func @transform_11(%arg0: i32) -> (i32, i32) {
    %c0_i32 = arith.constant 0 : i32
    %c0_i32_0 = arith.constant 0 : i32
    %c0_i32_1 = arith.constant 0 : i32
    return %c0_i32, %c0_i32_0 : i32, i32
  }
  func.func @transform_12(%arg0: i32) -> (i32, i32) {
    %c0_i32 = arith.constant 0 : i32
    %c0_i32_0 = arith.constant 0 : i32
    %c0_i32_1 = arith.constant 0 : i32
    return %c0_i32, %c0_i32_0 : i32, i32
  }
  func.func @transform_13(%arg0: i32) -> (i32, i32) {
    %c0_i32 = arith.constant 0 : i32
    %c0_i32_0 = arith.constant 0 : i32
    return %arg0, %c0_i32 : i32, i32
  }
}

</mosaic_0001>

<bundles_post_ra>
// kernel: tpu_custom_call.1
= control target key start
LH: loop header
LB: loop body
LE: loop exit
PB: predicated region body
PF: predicated region fallthrough
CT: control target
= control target key end

     0   :  { %s19363_s0 = inlined_call_operand.hbm [shape: bf16[8,2176], index: 0, kind: input, shape index: {}]   ;;  %s19364_s1 = inlined_call_operand.hbm [shape: bf16[2176,1024], index: 1, kind: input, shape index: {}]   ;;  %s19365_s2 = inlined_call_operand.hbm [shape: f32[1,1024], index: 2, kind: input, shape index: {}]   ;;  %s19366_s3 = inlined_call_operand.hbm [shape: bf16[1024,512], index: 3, kind: input, shape index: {}]   ;;  %s19367_s4 = inlined_call_operand.hbm [shape: f32[1,512], index: 4, kind: input, shape index: {}]   ;;  %s19368_s5 = inlined_call_operand.hbm [shape: bf16[512,256], index: 5, kind: input, shape index: {}]   ;;  %s19369_s6 = inlined_call_operand.hbm [shape: f32[1,256], index: 6, kind: input, shape index: {}]   ;;  %s19370_s7 = inlined_call_operand.hbm [shape: bf16[256,128], index: 7, kind: input, shape index: {}]   ;;  %s19371_s8 = inlined_call_operand.hbm [shape: f32[1,128], index: 8, kind: input, shape index: {}]   ;;  %s19372_s9 = inlined_call_operand.vmem [shape: bf16[128,64], index: 9, kind: input, shape index: {}]   ;;  %s19373_s10 = inlined_call_operand.hbm [shape: f32[1,64], index: 10, kind: input, shape index: {}]   ;;  %s19374_s11 = inlined_call_operand.hbm [shape: f32[1,64], index: 11, kind: input, shape index: {}]   ;;  %s19375_s12 = inlined_call_operand.<no memory space> [shape: f32[1,1], index: 12, kind: input, shape index: {}]   ;;  %s19376_s13 = inlined_call_operand.vmem [shape: f32[8,1], index: 13, kind: output, shape index: {}]  }
   0x1   :  { %v18_v0 = vstv %s19375_s12 }
   0x2   :  { %19 = vst [vmem:[#allocation2] sm:$0x1] %v18_v0 }
   0x3   :  { %20 = vsyncpa [#allocation4], 0 }
   0x4   :  { %21 = vsyncpa [#allocation6], 0 }
   0x5   :  { %22 = vsyncpa [#allocation9], 0 }
   0x6   :  { %23 = vsyncpa [#allocation12], 0 }
   0x7   :  { %24 = vsyncpa [#allocation15], 0  ;;  %s41_s29 = sshll.u32 %s19364_s1, 4  ;;  %s42_s29 = int_to_ptr.hbm [resolvable:$true] %s41_s29 }
   0x8   :  { %25 = vsyncpa [#allocation18], 0  ;;  %s18805_s30 = smov [#allocation5]   ;;  %s65_s17 = sshll.u32 %s19366_s3, 4  ;;  %s66_s17 = int_to_ptr.hbm [resolvable:$true] %s65_s17 }
   0x9   :  { %s43_s14 = sshll.u32 %s18805_s30, 4  ;;  %s18806_s12 = smov 512   ;;  %s44_s14 = int_to_ptr.vmem [resolvable:$true] %s43_s14 }
   0xa   :  { %s18807_s18 = smov 32   ;;  %s18808_s19 = smov [#allocation8]  }
   0xb   :  { %49 = dma.hbm_to_vmem [thread:$0]  %s42_s29, 139264, %s44_s14, [#allocation6], %s18806_s12, %s18806_s12, %s18807_s18  }
   0xc   :  { %s67_s20 = sshll.u32 %s18808_s19, 4  ;;  %s18809_s21 = smov 256   ;;  %s68_s20 = int_to_ptr.vmem [resolvable:$true] %s67_s20 }
   0xd   :  { %s18810_s22 = smov 16   ;;  %s89_s24 = sshll.u32 %s19368_s5, 4  ;;  %s90_s24 = int_to_ptr.hbm [resolvable:$true] %s89_s24 }
   0xe   :  { %73 = dma.hbm_to_vmem [thread:$0]  %s66_s17, 32768, %s68_s20, [#allocation9], %s18809_s21, %s18809_s21, %s18810_s22  }
   0xf   :  { %s18811_s25 = smov [#allocation11]   ;;  %s113_s28 = sshll.u32 %s19370_s7, 4  ;;  %s114_s28 = int_to_ptr.hbm [resolvable:$true] %s113_s28 }
  0x10   :  { %s91_s26 = sshll.u32 %s18811_s25, 4  ;;  %s18812_s29 = smov 128   ;;  %s92_s26 = int_to_ptr.vmem [resolvable:$true] %s91_s26 }
  0x11   :  { %s18813_s30 = smov 8   ;;  %s18814_s14 = smov [#allocation14]  }
  0x12   :  { %97 = dma.hbm_to_vmem [thread:$0]  %s90_s24, 8192, %s92_s26, [#allocation12], %s18812_s29, %s18812_s29, %s18813_s30  }
  0x13   :  { %s115_s15 = sshll.u32 %s18814_s14, 4  ;;  %s18815_s16 = smov 64   ;;  %s116_s15 = int_to_ptr.vmem [resolvable:$true] %s115_s15 }
  0x14   :  { %s18816_s17 = smov 4   ;;  %s140_s18 = sshll.u32 %s19373_s10, 4  ;;  %s141_s18 = int_to_ptr.hbm [resolvable:$true] %s140_s18 }
  0x15   :  { %121 = dma.hbm_to_vmem [thread:$0]  %s114_s28, 2048, %s116_s15, [#allocation15], %s18815_s16, %s18815_s16, %s18816_s17  }
  0x16   :  { %s18817_s19 = smov [#allocation17]   ;;  %s31_s22 = sshll.u32 %s19363_s0, 4  ;;  %s32_s22 = int_to_ptr.hbm [resolvable:$true] %s31_s22 }
  0x17   :  { %s142_s20 = sshll.u32 %s18817_s19, 4  ;;  %s18818_s1 = smov [#allocation3]   ;;  %s143_s20 = int_to_ptr.vmem [resolvable:$true] %s142_s20 }
  0x18   :  { %145 = dma.hbm_to_vmem [thread:$0]  %s141_s18, 16, %s143_s20, [#allocation18]  }
  0x19   :  { %s33_s23 = sshll.u32 %s18818_s1, 4  ;;  %s55_s26 = sshll.u32 %s19365_s2, 4  ;;  %s34_s23 = int_to_ptr.vmem [resolvable:$true] %s33_s23  ;;  %s56_s26 = int_to_ptr.hbm [resolvable:$true] %s55_s26 }
  0x1a   :  { %36 = dma.hbm_to_vmem [thread:$0]  %s32_s22, 1088, %s34_s23, [#allocation4]  }
  0x1b   :  { %s79_s3 = sshll.u32 %s19367_s4, 4  ;;  %s18819_s28 = smov [#allocation7]   ;;  %s80_s3 = int_to_ptr.hbm [resolvable:$true] %s79_s3 }
  0x1c   :  { %s57_s29 = sshll.u32 %s18819_s28, 4  ;;  %s18820_s0 = smov [#allocation10]   ;;  %s58_s29 = int_to_ptr.vmem [resolvable:$true] %s57_s29 }
  0x1d   :  { %60 = dma.hbm_to_vmem [thread:$0]  %s56_s26, 128, %s58_s29, [#allocation6]  }
  0x1e   :  { %s81_s30 = sshll.u32 %s18820_s0, 4  ;;  %s103_s16 = sshll.u32 %s19369_s6, 4  ;;  %s82_s30 = int_to_ptr.vmem [resolvable:$true] %s81_s30  ;;  %s104_s16 = int_to_ptr.hbm [resolvable:$true] %s103_s16 }
  0x1f   :  { %84 = dma.hbm_to_vmem [thread:$0]  %s80_s3, 64, %s82_s30, [#allocation9]  }
  0x20   :  { %s127_s12 = sshll.u32 %s19371_s8, 4  ;;  %s18821_s5 = smov [#allocation13]   ;;  %s128_s12 = int_to_ptr.hbm [resolvable:$true] %s127_s12 }
  0x21   :  { %s105_s4 = sshll.u32 %s18821_s5, 4  ;;  %s18822_s18 = smov [#allocation16]   ;;  %s106_s4 = int_to_ptr.vmem [resolvable:$true] %s105_s4 }
  0x22   :  { %108 = dma.hbm_to_vmem [thread:$0]  %s104_s16, 32, %s106_s4, [#allocation12]  }
  0x23   :  { %s129_s19 = sshll.u32 %s18822_s18, 4  ;;  %s151_s7 = sshll.u32 %s19374_s11, 4  ;;  %s130_s19 = int_to_ptr.vmem [resolvable:$true] %s129_s19  ;;  %s152_s7 = int_to_ptr.hbm [resolvable:$true] %s151_s7 }
  0x24   :  { %132 = dma.hbm_to_vmem [thread:$0]  %s128_s12, 16, %s130_s19, [#allocation15]  }
  0x25   :  { %s18823_s6 = smov [#allocation19]  }
  0x26   :  { %s153_s22 = sshll.u32 %s18823_s6, 4  ;;  %s154_s22 = int_to_ptr.vmem [resolvable:$true] %s153_s22 }
  0x27   :  { %156 = dma.hbm_to_vmem [thread:$0]  %s152_s7, 16, %s154_s22, [#allocation18]  }
  0x28   :  { %18793 = dma.done.wait [#allocation4], 1088  }
  0x29   :  { %18794 = vsyncadd [#allocation4], 4294966208 }
  0x2a   :  { %18795 = dma.done.wait [#allocation6], 139392  }
  0x2b   :  { %18796 = vsyncadd [#allocation6], 4294827904 }
  0x2c   :  { %18797 = dma.done.wait [#allocation9], 32832  }
  0x2d   :  { %18798 = vsyncadd [#allocation9], 4294934464 }
  0x2e   :  { %18799 = dma.done.wait [#allocation12], 8224  }
  0x2f   :  { %18800 = vsyncadd [#allocation12], 4294959072 }
  0x30   :  { %18801 = dma.done.wait [#allocation15], 2064  }
  0x31   :  { %18802 = vsyncadd [#allocation15], 4294965232 }
  0x32   :  { %18803 = dma.done.wait [#allocation18], 32  }
  0x33   :  { %18804 = vsyncadd [#allocation18], 4294967264  ;;  %v11564_v1 = vld [vmem:[#allocation5 + $0x1c0] sm:$0xf]  ;;  %vm11317_vm0 = vcmask 523264   ;;  %vm11326_vm1 = vcmask 7168  }
  0x34   :  { %v17126_v2 = vld [vmem:[#allocation5 + $0x1dc] sm:$0xf0] }
  0x35   :  { %v11820_v3 = vld [vmem:[#allocation5 + $0x3c0] sm:$0xf]  ;;  %v11565_v4 = vor.u32 %v17126_v2, %v11564_v1 }
  0x36   :  { %v17190_v5 = vld [vmem:[#allocation5 + $0x3dc] sm:$0xf0] }
  0x37   :  { %v12076_v6 = vld [vmem:[#allocation5 + $0x5c0] sm:$0xf]  ;;  %v11821_v8 = vor.u32 %v17190_v5, %v11820_v3  ;;  %6818 = vmatpush.bf16.msra.mxu0 %v11565_v4 }
  0x38   :  { %v17254_v7 = vld [vmem:[#allocation5 + $0x5dc] sm:$0xf0] }
  0x39   :  { %v12077_v9 = vor.u32 %v17254_v7, %v12076_v6  ;;  %v12332_v10 = vld [vmem:[#allocation5 + $0x7c0] sm:$0xf]  ;;  %6831 = vmatpush.bf16.msra.mxu1 %v11821_v8 }
  0x3a   :  { %v17318_v11 = vld [vmem:[#allocation5 + $0x7dc] sm:$0xf0] }
  0x3b   :  { %v11532_v12 = vld [vmem:[#allocation5 + $0x180] sm:$0xf]  ;;  %v12333_v13 = vor.u32 %v17318_v11, %v12332_v10  ;;  %6844 = vmatpush.bf16.msra.mxu2 %v12077_v9 }
  0x3c   :  { %v17118_v14 = vld [vmem:[#allocation5 + $0x19c] sm:$0xf0] }
  0x3d   :  { %v11788_v15 = vld [vmem:[#allocation5 + $0x380] sm:$0xf]  ;;  %v11533_v17 = vor.u32 %v17118_v14, %v11532_v12  ;;  %6857 = vmatpush.bf16.msra.mxu3 %v12333_v13 }
  0x3e   :  { %v17182_v16 = vld [vmem:[#allocation5 + $0x39c] sm:$0xf0] }
  0x3f   :  { %v11789_v18 = vor.u32 %v17182_v16, %v11788_v15  ;;  %v12044_v19 = vld [vmem:[#allocation5 + $0x580] sm:$0xf]  ;;  %6819 = vmatpush.bf16.msra.mxu0 %v11533_v17 }
  0x40   :  { %v17246_v20 = vld [vmem:[#allocation5 + $0x59c] sm:$0xf0] }
  0x41   :  { %v12300_v21 = vld [vmem:[#allocation5 + $0x780] sm:$0xf]  ;;  %v12045_v22 = vor.u32 %v17246_v20, %v12044_v19  ;;  %6832 = vmatpush.bf16.msra.mxu1 %v11789_v18 }
  0x42   :  { %v17310_v23 = vld [vmem:[#allocation5 + $0x79c] sm:$0xf0] }
  0x43   :  { %v11500_v24 = vld [vmem:[#allocation5 + $0x140] sm:$0xf]  ;;  %v12301_v26 = vor.u32 %v17310_v23, %v12300_v21  ;;  %6845 = vmatpush.bf16.msra.mxu2 %v12045_v22 }
  0x44   :  { %v17110_v25 = vld [vmem:[#allocation5 + $0x15c] sm:$0xf0] }
  0x45   :  { %v11756_v27 = vld [vmem:[#allocation5 + $0x340] sm:$0xf]  ;;  %v11501_v30 = vor.u32 %v17110_v25, %v11500_v24  ;;  %6858 = vmatpush.bf16.msra.mxu3 %v12301_v26 }
  0x46   :  { %v17174_v28 = vld [vmem:[#allocation5 + $0x35c] sm:$0xf0] }
  0x47   :  { %v12012_v29 = vld [vmem:[#allocation5 + $0x540] sm:$0xf]  ;;  %v11757_v34 = vor.u32 %v17174_v28, %v11756_v27  ;;  %6820 = vmatpush.bf16.msra.mxu0 %v11501_v30 }
  0x48   :  { %v17238_v31 = vld [vmem:[#allocation5 + $0x55c] sm:$0xf0] }
  0x49   :  { %v12268_v32 = vld [vmem:[#allocation5 + $0x740] sm:$0xf]  ;;  %v12013_v35 = vor.u32 %v17238_v31, %v12012_v29  ;;  %6833 = vmatpush.bf16.msra.mxu1 %v11757_v34 }
  0x4a   :  { %v17302_v33 = vld [vmem:[#allocation5 + $0x75c] sm:$0xf0] }
  0x4b   :  { %v11468_v36 = vld [vmem:[#allocation5 + $0x100] sm:$0xf]  ;;  %v12269_v39 = vor.u32 %v17302_v33, %v12268_v32  ;;  %6846 = vmatpush.bf16.msra.mxu2 %v12013_v35 }
  0x4c   :  { %v17102_v37 = vld [vmem:[#allocation5 + $0x11c] sm:$0xf0] }
  0x4d   :  { %v11724_v38 = vld [vmem:[#allocation5 + $0x300] sm:$0xf]  ;;  %v11469_v45 = vor.u32 %v17102_v37, %v11468_v36  ;;  %6859 = vmatpush.bf16.msra.mxu3 %v12269_v39 }
  0x4e   :  { %v17166_v40 = vld [vmem:[#allocation5 + $0x31c] sm:$0xf0] }
  0x4f   :  { %v11980_v41 = vld [vmem:[#allocation5 + $0x500] sm:$0xf]  ;;  %v11725_v46 = vor.u32 %v17166_v40, %v11724_v38  ;;  %6821 = vmatpush.bf16.msra.mxu0 %v11469_v45 }
  0x50   :  { %v17230_v42 = vld [vmem:[#allocation5 + $0x51c] sm:$0xf0] }
  0x51   :  { %v12236_v43 = vld [vmem:[#allocation5 + $0x700] sm:$0xf]  ;;  %v11981_v47 = vor.u32 %v17230_v42, %v11980_v41  ;;  %6834 = vmatpush.bf16.msra.mxu1 %v11725_v46 }
  0x52   :  { %v17294_v44 = vld [vmem:[#allocation5 + $0x71c] sm:$0xf0] }
  0x53   :  { %v11436_v48 = vld [vmem:[#allocation5 + $0xc0] sm:$0xf]  ;;  %v12237_v51 = vor.u32 %v17294_v44, %v12236_v43  ;;  %6847 = vmatpush.bf16.msra.mxu2 %v11981_v47 }
  0x54   :  { %v17094_v49 = vld [vmem:[#allocation5 + $0xdc] sm:$0xf0] }
  0x55   :  { %v11692_v50 = vld [vmem:[#allocation5 + $0x2c0] sm:$0xf]  ;;  %v11437_v57 = vor.u32 %v17094_v49, %v11436_v48  ;;  %6860 = vmatpush.bf16.msra.mxu3 %v12237_v51 }
  0x56   :  { %v17158_v52 = vld [vmem:[#allocation5 + $0x2dc] sm:$0xf0] }
  0x57   :  { %v11948_v53 = vld [vmem:[#allocation5 + $0x4c0] sm:$0xf]  ;;  %v11693_v58 = vor.u32 %v17158_v52, %v11692_v50  ;;  %6822 = vmatpush.bf16.msra.mxu0 %v11437_v57 }
  0x58   :  { %v17222_v54 = vld [vmem:[#allocation5 + $0x4dc] sm:$0xf0] }
  0x59   :  { %v12204_v55 = vld [vmem:[#allocation5 + $0x6c0] sm:$0xf]  ;;  %v11949_v59 = vor.u32 %v17222_v54, %v11948_v53  ;;  %6835 = vmatpush.bf16.msra.mxu1 %v11693_v58 }
  0x5a   :  { %v17286_v56 = vld [vmem:[#allocation5 + $0x6dc] sm:$0xf0] }
  0x5b   :  { %v11404_v60 = vld [vmem:[#allocation5 + $0x80] sm:$0xf]  ;;  %v12205_v63 = vor.u32 %v17286_v56, %v12204_v55  ;;  %6848 = vmatpush.bf16.msra.mxu2 %v11949_v59 }
  0x5c   :  { %v17086_v61 = vld [vmem:[#allocation5 + $0x9c] sm:$0xf0] }
  0x5d   :  { %v11660_v62 = vld [vmem:[#allocation5 + $0x280] sm:$0xf]  ;;  %v11405_v5 = vor.u32 %v17086_v61, %v11404_v60  ;;  %6861 = vmatpush.bf16.msra.mxu3 %v12205_v63 }
  0x5e   :  { %v17150_v0 = vld [vmem:[#allocation5 + $0x29c] sm:$0xf0] }
  0x5f   :  { %v11916_v1 = vld [vmem:[#allocation5 + $0x480] sm:$0xf]  ;;  %v11661_v6 = vor.u32 %v17150_v0, %v11660_v62  ;;  %6823 = vmatpush.bf16.msra.mxu0 %v11405_v5 }
  0x60   :  { %v17214_v2 = vld [vmem:[#allocation5 + $0x49c] sm:$0xf0] }
  0x61   :  { %v12172_v3 = vld [vmem:[#allocation5 + $0x680] sm:$0xf]  ;;  %v11917_v7 = vor.u32 %v17214_v2, %v11916_v1  ;;  %6836 = vmatpush.bf16.msra.mxu1 %v11661_v6 }
  0x62   :  { %v17278_v4 = vld [vmem:[#allocation5 + $0x69c] sm:$0xf0] }
  0x63   :  { %v11372_v8 = vld [vmem:[#allocation5 + $0x40] sm:$0xf]  ;;  %v12173_v11 = vor.u32 %v17278_v4, %v12172_v3  ;;  %6849 = vmatpush.bf16.msra.mxu2 %v11917_v7  ;;  %v204_v3 = vld [vmem:[#allocation3 + $0x8] sm:$0xff] }
  0x64   :  { %v17078_v9 = vld [vmem:[#allocation5 + $0x5c] sm:$0xf0] }
  0x65   :  { %v11628_v10 = vld [vmem:[#allocation5 + $0x240] sm:$0xf]  ;;  %v11373_v17 = vor.u32 %v17078_v9, %v11372_v8  ;;  %6862 = vmatpush.bf16.msra.mxu3 %v12173_v11  ;;  %v1329_v9 = vunpack.c.l.b16 %v204_v3  ;;  %v1330_v11 = vunpack.c.h.b16 %v204_v3 }
  0x66   :  { %v17142_v12 = vld [vmem:[#allocation5 + $0x25c] sm:$0xf0] }
  0x67   :  { %v11884_v13 = vld [vmem:[#allocation5 + $0x440] sm:$0xf]  ;;  %v11629_v20 = vor.u32 %v17142_v12, %v11628_v10  ;;  %6824 = vmatpush.bf16.msra.mxu0 %v11373_v17 }
  0x68   :  { %v17206_v14 = vld [vmem:[#allocation5 + $0x45c] sm:$0xf0] }
  0x69   :  { %v12140_v15 = vld [vmem:[#allocation5 + $0x640] sm:$0xf]  ;;  %v11885_v21 = vor.u32 %v17206_v14, %v11884_v13  ;;  %6837 = vmatpush.bf16.msra.mxu1 %v11629_v20 }
  0x6a   :  { %v17270_v16 = vld [vmem:[#allocation5 + $0x65c] sm:$0xf0] }
  0x6b   :  { %v11340_v18 = vld [vmem:[#allocation5] sm:$0xf]  ;;  %v12141_v25 = vor.u32 %v17270_v16, %v12140_v15  ;;  %6850 = vmatpush.bf16.msra.mxu2 %v11885_v21  ;;  %v18934_v21 = vpack.c.b16 %v1330_v11, %v1330_v11 }
  0x6c   :  { %v17070_v19 = vld [vmem:[#allocation5 + $0x1c] sm:$0xf0] }
  0x6d   :  { %v11596_v22 = vld [vmem:[#allocation5 + $0x200] sm:$0xf]  ;;  %v11341_v32 = vor.u32 %v17070_v19, %v11340_v18  ;;  %6863 = vmatpush.bf16.msra.mxu3 %v12141_v25  ;;  %v18930_v19 = vpack.c.b16 %v1329_v9, %v1329_v9 }
  0x6e   :  { %v17134_v23 = vld [vmem:[#allocation5 + $0x21c] sm:$0xf0] }
  0x6f   :  { %v11852_v24 = vld [vmem:[#allocation5 + $0x400] sm:$0xf]  ;;  %v11597_v36 = vor.u32 %v17134_v23, %v11596_v22  ;;  %6825 = vmatpush.bf16.msra.mxu0 %v11341_v32 }
  0x70   :  { %v17198_v26 = vld [vmem:[#allocation5 + $0x41c] sm:$0xf0] }
  0x71   :  { %v12108_v27 = vld [vmem:[#allocation5 + $0x600] sm:$0xf]  ;;  %v11853_v37 = vor.u32 %v17198_v26, %v11852_v24  ;;  %6838 = vmatpush.bf16.msra.mxu1 %v11597_v36 }
  0x72   :  { %v17262_v28 = vld [vmem:[#allocation5 + $0x61c] sm:$0xf0] }
  0x73   :  { %v12588_v29 = vld [vmem:[#allocation5 + $0x9c0] sm:$0xf]  ;;  %v12109_v40 = vor.u32 %v17262_v28, %v12108_v27  ;;  %6851 = vmatpush.bf16.msra.mxu2 %v11853_v37 }
  0x74   :  { %v17382_v30 = vld [vmem:[#allocation5 + $0x9dc] sm:$0xf0] }
  0x75   :  { %v12844_v31 = vld [vmem:[#allocation5 + $0xbc0] sm:$0xf]  ;;  %v12589_v41 = vor.u32 %v17382_v30, %v12588_v29  ;;  %6864 = vmatpush.bf16.msra.mxu3 %v12109_v40 }
  0x76   :  { %v17446_v33 = vld [vmem:[#allocation5 + $0xbdc] sm:$0xf0]  ;;  %6852 = vmatmul.bf16.vlgmr.msra.gmra.mxu2 %v18930_v19 }
  0x77   :  { %v13100_v34 = vld [vmem:[#allocation5 + $0xdc0] sm:$0xf]  ;;  %v12845_v42 = vor.u32 %v17446_v33, %v12844_v31  ;;  %6870 = vmatpush.bf16.msrb.mxu0 %v12589_v41 }
  0x78   :  { %v17510_v35 = vld [vmem:[#allocation5 + $0xddc] sm:$0xf0]  ;;  %6865 = vmatmul.bf16.vlgmr.msra.gmra.mxu3 %v18934_v21 }
  0x79   :  { %v13356_v38 = vld [vmem:[#allocation5 + $0xfc0] sm:$0xf]  ;;  %v13101_v43 = vor.u32 %v17510_v35, %v13100_v34  ;;  %6883 = vmatpush.bf16.msrb.mxu1 %v12845_v42 }
  0x7a   :  { %v17574_v39 = vld [vmem:[#allocation5 + $0xfdc] sm:$0xf0] }
  0x7b   :  { %v12556_v44 = vld [vmem:[#allocation5 + $0x980] sm:$0xf]  ;;  %v13357_v47 = vor.u32 %v17574_v39, %v13356_v38  ;;  %6896 = vmatpush.bf16.msrb.mxu2 %v13101_v43 }
  0x7c   :  { %v17374_v45 = vld [vmem:[#allocation5 + $0x99c] sm:$0xf0] }
  0x7d   :  { %v12812_v46 = vld [vmem:[#allocation5 + $0xb80] sm:$0xf]  ;;  %v12557_v53 = vor.u32 %v17374_v45, %v12556_v44  ;;  %6909 = vmatpush.bf16.msrb.mxu3 %v13357_v47 }
  0x7e   :  { %v17438_v48 = vld [vmem:[#allocation5 + $0xb9c] sm:$0xf0] }
  0x7f   :  { %v13068_v49 = vld [vmem:[#allocation5 + $0xd80] sm:$0xf]  ;;  %v12813_v55 = vor.u32 %v17438_v48, %v12812_v46  ;;  %6871 = vmatpush.bf16.msrb.mxu0 %v12557_v53 }
  0x80   :  { %v17502_v50 = vld [vmem:[#allocation5 + $0xd9c] sm:$0xf0] }
  0x81   :  { %v13324_v51 = vld [vmem:[#allocation5 + $0xf80] sm:$0xf]  ;;  %v13069_v56 = vor.u32 %v17502_v50, %v13068_v49  ;;  %6884 = vmatpush.bf16.msrb.mxu1 %v12813_v55 }
  0x82   :  { %v17566_v52 = vld [vmem:[#allocation5 + $0xf9c] sm:$0xf0] }
  0x83   :  { %v12524_v54 = vld [vmem:[#allocation5 + $0x940] sm:$0xf]  ;;  %v13325_v60 = vor.u32 %v17566_v52, %v13324_v51  ;;  %6897 = vmatpush.bf16.msrb.mxu2 %v13069_v56 }
  0x84   :  { %v17366_v57 = vld [vmem:[#allocation5 + $0x95c] sm:$0xf0] }
  0x85   :  { %v12780_v58 = vld [vmem:[#allocation5 + $0xb40] sm:$0xf]  ;;  %v12525_v1 = vor.u32 %v17366_v57, %v12524_v54  ;;  %6910 = vmatpush.bf16.msrb.mxu3 %v13325_v60 }
  0x86   :  { %v17430_v59 = vld [vmem:[#allocation5 + $0xb5c] sm:$0xf0] }
  0x87   :  { %v13036_v61 = vld [vmem:[#allocation5 + $0xd40] sm:$0xf]  ;;  %v12781_v2 = vor.u32 %v17430_v59, %v12780_v58  ;;  %6872 = vmatpush.bf16.msrb.mxu0 %v12525_v1 }
  0x88   :  { %v17494_v62 = vld [vmem:[#allocation5 + $0xd5c] sm:$0xf0] }
  0x89   :  { %v13292_v63 = vld [vmem:[#allocation5 + $0xf40] sm:$0xf]  ;;  %v13037_v5 = vor.u32 %v17494_v62, %v13036_v61  ;;  %6885 = vmatpush.bf16.msrb.mxu1 %v12781_v2 }
  0x8a   :  { %v17558_v0 = vld [vmem:[#allocation5 + $0xf5c] sm:$0xf0] }
  0x8b   :  { %v203_v4 = vld [vmem:[#allocation3] sm:$0xff]  ;;  %v13293_v12 = vor.u32 %v17558_v0, %v13292_v63  ;;  %6898 = vmatpush.bf16.msrb.mxu2 %v13037_v5 }
  0x8c   :  { %v12492_v6 = vld [vmem:[#allocation5 + $0x900] sm:$0xf]  ;;  %v1327_v10 = vunpack.c.l.b16 %v203_v4  ;;  %v1328_v16 = vunpack.c.h.b16 %v203_v4  ;;  %v206_v4 = vld [vmem:[#allocation3 + $0x18] sm:$0xff] }
  0x8d   :  { %v17358_v7 = vld [vmem:[#allocation5 + $0x91c] sm:$0xf0]  ;;  %6911 = vmatpush.bf16.msrb.mxu3 %v13293_v12 }
  0x8e   :  { %v12748_v8 = vld [vmem:[#allocation5 + $0xb00] sm:$0xf]  ;;  %v18932_v20 = vpack.c.b16 %v1327_v10, %v1327_v10  ;;  %v12493_v22 = vor.u32 %v17358_v7, %v12492_v6  ;;  %v18936_v23 = vpack.c.b16 %v1328_v16, %v1328_v16  ;;  %v1333_v16 = vunpack.c.l.b16 %v206_v4 }
  0x8f   :  { %v17422_v13 = vld [vmem:[#allocation5 + $0xb1c] sm:$0xf0] }
  0x90   :  { %v13004_v14 = vld [vmem:[#allocation5 + $0xd00] sm:$0xf]  ;;  %v12749_v24 = vor.u32 %v17422_v13, %v12748_v8  ;;  %6826 = vmatmul.bf16.vlgmr.msra.gmra.mxu0 %v18932_v20  ;;  %6839 = vmatmul.bf16.vlgmr.msra.gmra.mxu1 %v18936_v23  ;;  %v205_v8 = vld [vmem:[#allocation3 + $0x10] sm:$0xff] }
  0x91   :  { %v17486_v15 = vld [vmem:[#allocation5 + $0xd1c] sm:$0xf0]  ;;  %6873 = vmatpush.bf16.msrb.mxu0 %v12493_v22 }
  0x92   :  { %v13260_v17 = vld [vmem:[#allocation5 + $0xf00] sm:$0xf]  ;;  %v13005_v25 = vor.u32 %v17486_v15, %v13004_v14  ;;  %6886 = vmatpush.bf16.msrb.mxu1 %v12749_v24 }
  0x93   :  { %v17550_v18 = vld [vmem:[#allocation5 + $0xf1c] sm:$0xf0] }
  0x94   :  { %v12460_v26 = vld [vmem:[#allocation5 + $0x8c0] sm:$0xf]  ;;  %v13261_v29 = vor.u32 %v17550_v18, %v13260_v17  ;;  %6899 = vmatpush.bf16.msrb.mxu2 %v13005_v25  ;;  %v1331_v25 = vunpack.c.l.b16 %v205_v8 }
  0x95   :  { %v17350_v27 = vld [vmem:[#allocation5 + $0x8dc] sm:$0xf0] }
  0x96   :  { %v12716_v28 = vld [vmem:[#allocation5 + $0xac0] sm:$0xf]  ;;  %v12461_v35 = vor.u32 %v17350_v27, %v12460_v26  ;;  %6912 = vmatpush.bf16.msrb.mxu3 %v13261_v29  ;;  %v1334_v26 = vunpack.c.h.b16 %v206_v4  ;;  %v1332_v29 = vunpack.c.h.b16 %v205_v8 }
  0x97   :  { %v17414_v30 = vld [vmem:[#allocation5 + $0xadc] sm:$0xf0] }
  0x98   :  { %v12972_v31 = vld [vmem:[#allocation5 + $0xcc0] sm:$0xf]  ;;  %v12717_v36 = vor.u32 %v17414_v30, %v12716_v28  ;;  %6874 = vmatpush.bf16.msrb.mxu0 %v12461_v35 }
  0x99   :  { %v17478_v32 = vld [vmem:[#allocation5 + $0xcdc] sm:$0xf0] }
  0x9a   :  { %v13228_v33 = vld [vmem:[#allocation5 + $0xec0] sm:$0xf]  ;;  %v12973_v37 = vor.u32 %v17478_v32, %v12972_v31  ;;  %6887 = vmatpush.bf16.msrb.mxu1 %v12717_v36 }
  0x9b   :  { %v17542_v34 = vld [vmem:[#allocation5 + $0xedc] sm:$0xf0] }
  0x9c   :  { %v12428_v38 = vld [vmem:[#allocation5 + $0x880] sm:$0xf]  ;;  %v13229_v41 = vor.u32 %v17542_v34, %v13228_v33  ;;  %6900 = vmatpush.bf16.msrb.mxu2 %v12973_v37 }
  0x9d   :  { %v17342_v39 = vld [vmem:[#allocation5 + $0x89c] sm:$0xf0] }
  0x9e   :  { %v12684_v40 = vld [vmem:[#allocation5 + $0xa80] sm:$0xf]  ;;  %v12429_v47 = vor.u32 %v17342_v39, %v12428_v38  ;;  %6913 = vmatpush.bf16.msrb.mxu3 %v13229_v41  ;;  %v18942_v39 = vpack.c.b16 %v1333_v16, %v1333_v16 }
  0x9f   :  { %v17406_v42 = vld [vmem:[#allocation5 + $0xa9c] sm:$0xf0] }
  0xa0   :  { %v12940_v43 = vld [vmem:[#allocation5 + $0xc80] sm:$0xf]  ;;  %v12685_v48 = vor.u32 %v17406_v42, %v12684_v40  ;;  %6875 = vmatpush.bf16.msrb.mxu0 %v12429_v47  ;;  %v18944_v42 = vpack.c.b16 %v1331_v25, %v1331_v25 }
  0xa1   :  { %v17470_v44 = vld [vmem:[#allocation5 + $0xc9c] sm:$0xf0] }
  0xa2   :  { %v13196_v45 = vld [vmem:[#allocation5 + $0xe80] sm:$0xf]  ;;  %v12941_v49 = vor.u32 %v17470_v44, %v12940_v43  ;;  %6888 = vmatpush.bf16.msrb.mxu1 %v12685_v48  ;;  %v18946_v43 = vpack.c.b16 %v1334_v26, %v1334_v26 }
  0xa3   :  { %v17534_v46 = vld [vmem:[#allocation5 + $0xe9c] sm:$0xf0] }
  0xa4   :  { %v12396_v50 = vld [vmem:[#allocation5 + $0x840] sm:$0xf]  ;;  %v13197_v53 = vor.u32 %v17534_v46, %v13196_v45  ;;  %6901 = vmatpush.bf16.msrb.mxu2 %v12941_v49  ;;  %v18948_v45 = vpack.c.b16 %v1332_v29, %v1332_v29 }
  0xa5   :  { %v17334_v51 = vld [vmem:[#allocation5 + $0x85c] sm:$0xf0] }
  0xa6   :  { %v12652_v52 = vld [vmem:[#allocation5 + $0xa40] sm:$0xf]  ;;  %v12397_v60 = vor.u32 %v17334_v51, %v12396_v50  ;;  %6914 = vmatpush.bf16.msrb.mxu3 %v13197_v53 }
  0xa7   :  { %v17398_v54 = vld [vmem:[#allocation5 + $0xa5c] sm:$0xf0] }
  0xa8   :  { %v12908_v55 = vld [vmem:[#allocation5 + $0xc40] sm:$0xf]  ;;  %v12653_v0 = vor.u32 %v17398_v54, %v12652_v52  ;;  %6876 = vmatpush.bf16.msrb.mxu0 %v12397_v60 }
  0xa9   :  { %v17462_v56 = vld [vmem:[#allocation5 + $0xc5c] sm:$0xf0] }
  0xaa   :  { %v13164_v57 = vld [vmem:[#allocation5 + $0xe40] sm:$0xf]  ;;  %v12909_v1 = vor.u32 %v17462_v56, %v12908_v55  ;;  %6889 = vmatpush.bf16.msrb.mxu1 %v12653_v0 }
  0xab   :  { %v17526_v58 = vld [vmem:[#allocation5 + $0xe5c] sm:$0xf0] }
  0xac   :  { %v12364_v59 = vld [vmem:[#allocation5 + $0x800] sm:$0xf]  ;;  %v13165_v5 = vor.u32 %v17526_v58, %v13164_v57  ;;  %6902 = vmatpush.bf16.msrb.mxu2 %v12909_v1 }
  0xad   :  { %v17326_v61 = vld [vmem:[#allocation5 + $0x81c] sm:$0xf0] }
  0xae   :  { %v12620_v62 = vld [vmem:[#allocation5 + $0xa00] sm:$0xf]  ;;  %v12365_v12 = vor.u32 %v17326_v61, %v12364_v59  ;;  %6915 = vmatpush.bf16.msrb.mxu3 %v13165_v5 }
  0xaf   :  { %v17390_v63 = vld [vmem:[#allocation5 + $0xa1c] sm:$0xf0] }
  0xb0   :  { %v12876_v2 = vld [vmem:[#allocation5 + $0xc00] sm:$0xf]  ;;  %v12621_v17 = vor.u32 %v17390_v63, %v12620_v62  ;;  %6877 = vmatpush.bf16.msrb.mxu0 %v12365_v12 }
  0xb1   :  { %v17454_v3 = vld [vmem:[#allocation5 + $0xc1c] sm:$0xf0] }
  0xb2   :  { %v13132_v6 = vld [vmem:[#allocation5 + $0xe00] sm:$0xf]  ;;  %v12877_v18 = vor.u32 %v17454_v3, %v12876_v2  ;;  %6890 = vmatpush.bf16.msrb.mxu1 %v12621_v17 }
  0xb3   :  { %v17518_v7 = vld [vmem:[#allocation5 + $0xe1c] sm:$0xf0]  ;;  %6878 = vmatmul.bf16.vlgmr.msrb.gmra.mxu0 %v18944_v42 }
  0xb4   :  { %v13612_v9 = vld [vmem:[#allocation5 + $0x11c0] sm:$0xf]  ;;  %v13133_v27 = vor.u32 %v17518_v7, %v13132_v6  ;;  %6903 = vmatpush.bf16.msrb.mxu2 %v12877_v18 }
  0xb5   :  { %v17638_v10 = vld [vmem:[#allocation5 + $0x11dc] sm:$0xf0]  ;;  %6891 = vmatmul.bf16.vlgmr.msrb.gmra.mxu1 %v18948_v45 }
  0xb6   :  { %v13868_v11 = vld [vmem:[#allocation5 + $0x13c0] sm:$0xf]  ;;  %v13613_v28 = vor.u32 %v17638_v10, %v13612_v9  ;;  %6916 = vmatpush.bf16.msrb.mxu3 %v13133_v27 }
  0xb7   :  { %v17702_v13 = vld [vmem:[#allocation5 + $0x13dc] sm:$0xf0]  ;;  %6904 = vmatmul.bf16.vlgmr.msrb.gmra.mxu2 %v18942_v39 }
  0xb8   :  { %v14124_v14 = vld [vmem:[#allocation5 + $0x15c0] sm:$0xf]  ;;  %v13869_v30 = vor.u32 %v17702_v13, %v13868_v11  ;;  %6922 = vmatpush.bf16.msra.mxu0 %v13613_v28 }
  0xb9   :  { %v17766_v15 = vld [vmem:[#allocation5 + $0x15dc] sm:$0xf0]  ;;  %6917 = vmatmul.bf16.vlgmr.msrb.gmra.mxu3 %v18946_v43 }
  0xba   :  { %v14380_v22 = vld [vmem:[#allocation5 + $0x17c0] sm:$0xf]  ;;  %v14125_v31 = vor.u32 %v17766_v15, %v14124_v14  ;;  %6935 = vmatpush.bf16.msra.mxu1 %v13869_v30 }
  0xbb   :  { %v17830_v24 = vld [vmem:[#allocation5 + $0x17dc] sm:$0xf0] }
  0xbc   :  { %v13580_v32 = vld [vmem:[#allocation5 + $0x1180] sm:$0xf]  ;;  %v14381_v35 = vor.u32 %v17830_v24, %v14380_v22  ;;  %6948 = vmatpush.bf16.msra.mxu2 %v14125_v31 }
  0xbd   :  { %v17630_v33 = vld [vmem:[#allocation5 + $0x119c] sm:$0xf0] }
  0xbe   :  { %v13836_v34 = vld [vmem:[#allocation5 + $0x1380] sm:$0xf]  ;;  %v13581_v44 = vor.u32 %v17630_v33, %v13580_v32  ;;  %6961 = vmatpush.bf16.msra.mxu3 %v14381_v35 }
  0xbf   :  { %v17694_v36 = vld [vmem:[#allocation5 + $0x139c] sm:$0xf0] }
  0xc0   :  { %v14092_v37 = vld [vmem:[#allocation5 + $0x1580] sm:$0xf]  ;;  %v13837_v46 = vor.u32 %v17694_v36, %v13836_v34  ;;  %6923 = vmatpush.bf16.msra.mxu0 %v13581_v44 }
  0xc1   :  { %v17758_v38 = vld [vmem:[#allocation5 + $0x159c] sm:$0xf0] }
  0xc2   :  { %v14348_v40 = vld [vmem:[#allocation5 + $0x1780] sm:$0xf]  ;;  %v14093_v47 = vor.u32 %v17758_v38, %v14092_v37  ;;  %6936 = vmatpush.bf16.msra.mxu1 %v13837_v46 }
  0xc3   :  { %v17822_v41 = vld [vmem:[#allocation5 + $0x179c] sm:$0xf0] }
  0xc4   :  { %v13548_v48 = vld [vmem:[#allocation5 + $0x1140] sm:$0xf]  ;;  %v14349_v51 = vor.u32 %v17822_v41, %v14348_v40  ;;  %6949 = vmatpush.bf16.msra.mxu2 %v14093_v47 }
  0xc5   :  { %v17622_v49 = vld [vmem:[#allocation5 + $0x115c] sm:$0xf0] }
  0xc6   :  { %v13804_v50 = vld [vmem:[#allocation5 + $0x1340] sm:$0xf]  ;;  %v13549_v57 = vor.u32 %v17622_v49, %v13548_v48  ;;  %6962 = vmatpush.bf16.msra.mxu3 %v14349_v51 }
  0xc7   :  { %v17686_v52 = vld [vmem:[#allocation5 + $0x135c] sm:$0xf0] }
  0xc8   :  { %v14060_v53 = vld [vmem:[#allocation5 + $0x1540] sm:$0xf]  ;;  %v13805_v58 = vor.u32 %v17686_v52, %v13804_v50  ;;  %6924 = vmatpush.bf16.msra.mxu0 %v13549_v57 }
  0xc9   :  { %v17750_v54 = vld [vmem:[#allocation5 + $0x155c] sm:$0xf0] }
  0xca   :  { %v14316_v55 = vld [vmem:[#allocation5 + $0x1740] sm:$0xf]  ;;  %v14061_v59 = vor.u32 %v17750_v54, %v14060_v53  ;;  %6937 = vmatpush.bf16.msra.mxu1 %v13805_v58 }
  0xcb   :  { %v17814_v56 = vld [vmem:[#allocation5 + $0x175c] sm:$0xf0] }
  0xcc   :  { %v13516_v60 = vld [vmem:[#allocation5 + $0x1100] sm:$0xf]  ;;  %v14317_v63 = vor.u32 %v17814_v56, %v14316_v55  ;;  %6950 = vmatpush.bf16.msra.mxu2 %v14061_v59 }
  0xcd   :  { %v17614_v61 = vld [vmem:[#allocation5 + $0x111c] sm:$0xf0] }
  0xce   :  { %v13772_v62 = vld [vmem:[#allocation5 + $0x1300] sm:$0xf]  ;;  %v13517_v5 = vor.u32 %v17614_v61, %v13516_v60  ;;  %6963 = vmatpush.bf16.msra.mxu3 %v14317_v63 }
  0xcf   :  { %v17678_v0 = vld [vmem:[#allocation5 + $0x131c] sm:$0xf0] }
  0xd0   :  { %v14028_v1 = vld [vmem:[#allocation5 + $0x1500] sm:$0xf]  ;;  %v13773_v6 = vor.u32 %v17678_v0, %v13772_v62  ;;  %6925 = vmatpush.bf16.msra.mxu0 %v13517_v5  ;;  %v208_v62 = vld [vmem:[#allocation3 + $0x28] sm:$0xff] }
  0xd1   :  { %v17742_v2 = vld [vmem:[#allocation5 + $0x151c] sm:$0xf0] }
  0xd2   :  { %v14284_v3 = vld [vmem:[#allocation5 + $0x1700] sm:$0xf]  ;;  %v14029_v7 = vor.u32 %v17742_v2, %v14028_v1  ;;  %6938 = vmatpush.bf16.msra.mxu1 %v13773_v6 }
  0xd3   :  { %v17806_v4 = vld [vmem:[#allocation5 + $0x171c] sm:$0xf0] }
  0xd4   :  { %v13484_v8 = vld [vmem:[#allocation5 + $0x10c0] sm:$0xf]  ;;  %v14285_v11 = vor.u32 %v17806_v4, %v14284_v3  ;;  %6951 = vmatpush.bf16.msra.mxu2 %v14029_v7 }
  0xd5   :  { %v17606_v9 = vld [vmem:[#allocation5 + $0x10dc] sm:$0xf0] }
  0xd6   :  { %v13740_v10 = vld [vmem:[#allocation5 + $0x12c0] sm:$0xf]  ;;  %v13485_v17 = vor.u32 %v17606_v9, %v13484_v8  ;;  %6964 = vmatpush.bf16.msra.mxu3 %v14285_v11  ;;  %v1337_v11 = vunpack.c.l.b16 %v208_v62 }
  0xd7   :  { %v17670_v12 = vld [vmem:[#allocation5 + $0x12dc] sm:$0xf0] }
  0xd8   :  { %v13996_v13 = vld [vmem:[#allocation5 + $0x14c0] sm:$0xf]  ;;  %v13741_v18 = vor.u32 %v17670_v12, %v13740_v10  ;;  %6926 = vmatpush.bf16.msra.mxu0 %v13485_v17 }
  0xd9   :  { %v17734_v14 = vld [vmem:[#allocation5 + $0x14dc] sm:$0xf0] }
  0xda   :  { %v14252_v15 = vld [vmem:[#allocation5 + $0x16c0] sm:$0xf]  ;;  %v13997_v22 = vor.u32 %v17734_v14, %v13996_v13  ;;  %6939 = vmatpush.bf16.msra.mxu1 %v13741_v18 }
  0xdb   :  { %v17798_v16 = vld [vmem:[#allocation5 + $0x16dc] sm:$0xf0] }
  0xdc   :  { %v13452_v24 = vld [vmem:[#allocation5 + $0x1080] sm:$0xf]  ;;  %v14253_v27 = vor.u32 %v17798_v16, %v14252_v15  ;;  %6952 = vmatpush.bf16.msra.mxu2 %v13997_v22  ;;  %v1338_v15 = vunpack.c.h.b16 %v208_v62 }
  0xdd   :  { %v17598_v25 = vld [vmem:[#allocation5 + $0x109c] sm:$0xf0] }
  0xde   :  { %v13708_v26 = vld [vmem:[#allocation5 + $0x1280] sm:$0xf]  ;;  %v13453_v33 = vor.u32 %v17598_v25, %v13452_v24  ;;  %6965 = vmatpush.bf16.msra.mxu3 %v14253_v27 }
  0xdf   :  { %v17662_v28 = vld [vmem:[#allocation5 + $0x129c] sm:$0xf0] }
  0xe0   :  { %v13964_v29 = vld [vmem:[#allocation5 + $0x1480] sm:$0xf]  ;;  %v13709_v36 = vor.u32 %v17662_v28, %v13708_v26  ;;  %6927 = vmatpush.bf16.msra.mxu0 %v13453_v33 }
  0xe1   :  { %v17726_v30 = vld [vmem:[#allocation5 + $0x149c] sm:$0xf0] }
  0xe2   :  { %v14220_v31 = vld [vmem:[#allocation5 + $0x1680] sm:$0xf]  ;;  %v13965_v37 = vor.u32 %v17726_v30, %v13964_v29  ;;  %6940 = vmatpush.bf16.msra.mxu1 %v13709_v36  ;;  %v18956_v30 = vpack.c.b16 %v1337_v11, %v1337_v11 }
  0xe3   :  { %v17790_v32 = vld [vmem:[#allocation5 + $0x169c] sm:$0xf0] }
  0xe4   :  { %v13420_v34 = vld [vmem:[#allocation5 + $0x1040] sm:$0xf]  ;;  %v14221_v44 = vor.u32 %v17790_v32, %v14220_v31  ;;  %6953 = vmatpush.bf16.msra.mxu2 %v13965_v37 }
  0xe5   :  { %v17590_v35 = vld [vmem:[#allocation5 + $0x105c] sm:$0xf0] }
  0xe6   :  { %v13676_v38 = vld [vmem:[#allocation5 + $0x1240] sm:$0xf]  ;;  %v13421_v51 = vor.u32 %v17590_v35, %v13420_v34  ;;  %6966 = vmatpush.bf16.msra.mxu3 %v14221_v44  ;;  %v18960_v34 = vpack.c.b16 %v1338_v15, %v1338_v15 }
  0xe7   :  { %v17654_v40 = vld [vmem:[#allocation5 + $0x125c] sm:$0xf0] }
  0xe8   :  { %v13932_v41 = vld [vmem:[#allocation5 + $0x1440] sm:$0xf]  ;;  %v13677_v54 = vor.u32 %v17654_v40, %v13676_v38  ;;  %6928 = vmatpush.bf16.msra.mxu0 %v13421_v51 }
  0xe9   :  { %v17718_v46 = vld [vmem:[#allocation5 + $0x145c] sm:$0xf0] }
  0xea   :  { %v14188_v47 = vld [vmem:[#allocation5 + $0x1640] sm:$0xf]  ;;  %v13933_v55 = vor.u32 %v17718_v46, %v13932_v41  ;;  %6941 = vmatpush.bf16.msra.mxu1 %v13677_v54 }
  0xeb   :  { %v17782_v48 = vld [vmem:[#allocation5 + $0x165c] sm:$0xf0] }
  0xec   :  { %v13388_v49 = vld [vmem:[#allocation5 + $0x1000] sm:$0xf]  ;;  %v14189_v59 = vor.u32 %v17782_v48, %v14188_v47  ;;  %6954 = vmatpush.bf16.msra.mxu2 %v13933_v55 }
  0xed   :  { %v17582_v50 = vld [vmem:[#allocation5 + $0x101c] sm:$0xf0] }
  0xee   :  { %v13644_v52 = vld [vmem:[#allocation5 + $0x1200] sm:$0xf]  ;;  %v13389_v2 = vor.u32 %v17582_v50, %v13388_v49  ;;  %6967 = vmatpush.bf16.msra.mxu3 %v14189_v59 }
  0xef   :  { %v17646_v53 = vld [vmem:[#allocation5 + $0x121c] sm:$0xf0] }
  0xf0   :  { %v13900_v56 = vld [vmem:[#allocation5 + $0x1400] sm:$0xf]  ;;  %v13645_v7 = vor.u32 %v17646_v53, %v13644_v52  ;;  %6929 = vmatpush.bf16.msra.mxu0 %v13389_v2 }
  0xf1   :  { %v17710_v57 = vld [vmem:[#allocation5 + $0x141c] sm:$0xf0] }
  0xf2   :  { %v207_v58 = vld [vmem:[#allocation3 + $0x20] sm:$0xff]  ;;  %v13901_v8 = vor.u32 %v17710_v57, %v13900_v56  ;;  %6942 = vmatpush.bf16.msra.mxu1 %v13645_v7 }
  0xf3   :  { %v14156_v60 = vld [vmem:[#allocation5 + $0x1600] sm:$0xf]  ;;  %v1335_v6 = vunpack.c.l.b16 %v207_v58  ;;  %v1336_v12 = vunpack.c.h.b16 %v207_v58 }
  0xf4   :  { %v17774_v61 = vld [vmem:[#allocation5 + $0x161c] sm:$0xf0]  ;;  %6955 = vmatpush.bf16.msra.mxu2 %v13901_v8 }
  0xf5   :  { %v14636_v63 = vld [vmem:[#allocation5 + $0x19c0] sm:$0xf]  ;;  %v14157_v13 = vor.u32 %v17774_v61, %v14156_v60  ;;  %v18954_v26 = vpack.c.b16 %v1335_v6, %v1335_v6  ;;  %v18958_v31 = vpack.c.b16 %v1336_v12, %v1336_v12 }
  0xf6   :  { %v17894_v0 = vld [vmem:[#allocation5 + $0x19dc] sm:$0xf0] }
  0xf7   :  { %v14892_v1 = vld [vmem:[#allocation5 + $0x1bc0] sm:$0xf]  ;;  %v14637_v14 = vor.u32 %v17894_v0, %v14636_v63  ;;  %6968 = vmatpush.bf16.msra.mxu3 %v14157_v13  ;;  %6930 = vmatmul.bf16.vlgmr.msra.gmra.mxu0 %v18954_v26 }
  0xf8   :  { %v17958_v3 = vld [vmem:[#allocation5 + $0x1bdc] sm:$0xf0]  ;;  %6956 = vmatmul.bf16.vlgmr.msra.gmra.mxu2 %v18956_v30  ;;  %6943 = vmatmul.bf16.vlgmr.msra.gmra.mxu1 %v18958_v31 }
  0xf9   :  { %v15148_v4 = vld [vmem:[#allocation5 + $0x1dc0] sm:$0xf]  ;;  %v14893_v16 = vor.u32 %v17958_v3, %v14892_v1  ;;  %6974 = vmatpush.bf16.msrb.mxu0 %v14637_v14 }
  0xfa   :  { %v18022_v5 = vld [vmem:[#allocation5 + $0x1ddc] sm:$0xf0]  ;;  %6969 = vmatmul.bf16.vlgmr.msra.gmra.mxu3 %v18960_v34 }
  0xfb   :  { %v15404_v9 = vld [vmem:[#allocation5 + $0x1fc0] sm:$0xf]  ;;  %v15149_v17 = vor.u32 %v18022_v5, %v15148_v4  ;;  %6987 = vmatpush.bf16.msrb.mxu1 %v14893_v16 }
  0xfc   :  { %v18086_v10 = vld [vmem:[#allocation5 + $0x1fdc] sm:$0xf0] }
  0xfd   :  { %v14604_v18 = vld [vmem:[#allocation5 + $0x1980] sm:$0xf]  ;;  %v15405_v25 = vor.u32 %v18086_v10, %v15404_v9  ;;  %7000 = vmatpush.bf16.msrb.mxu2 %v15149_v17 }
  0xfe   :  { %v17886_v22 = vld [vmem:[#allocation5 + $0x199c] sm:$0xf0] }
  0xff   :  { %v14860_v24 = vld [vmem:[#allocation5 + $0x1b80] sm:$0xf]  ;;  %v14605_v35 = vor.u32 %v17886_v22, %v14604_v18  ;;  %7013 = vmatpush.bf16.msrb.mxu3 %v15405_v25 }
 0x100   :  { %v17950_v27 = vld [vmem:[#allocation5 + $0x1b9c] sm:$0xf0] }
 0x101   :  { %v15116_v28 = vld [vmem:[#allocation5 + $0x1d80] sm:$0xf]  ;;  %v14861_v36 = vor.u32 %v17950_v27, %v14860_v24  ;;  %6975 = vmatpush.bf16.msrb.mxu0 %v14605_v35 }
 0x102   :  { %v18014_v29 = vld [vmem:[#allocation5 + $0x1d9c] sm:$0xf0] }
 0x103   :  { %v15372_v32 = vld [vmem:[#allocation5 + $0x1f80] sm:$0xf]  ;;  %v15117_v37 = vor.u32 %v18014_v29, %v15116_v28  ;;  %6988 = vmatpush.bf16.msrb.mxu1 %v14861_v36 }
 0x104   :  { %v18078_v33 = vld [vmem:[#allocation5 + $0x1f9c] sm:$0xf0] }
 0x105   :  { %v14572_v38 = vld [vmem:[#allocation5 + $0x1940] sm:$0xf]  ;;  %v15373_v44 = vor.u32 %v18078_v33, %v15372_v32  ;;  %7001 = vmatpush.bf16.msrb.mxu2 %v15117_v37 }
 0x106   :  { %v17878_v40 = vld [vmem:[#allocation5 + $0x195c] sm:$0xf0] }
 0x107   :  { %v14828_v41 = vld [vmem:[#allocation5 + $0x1b40] sm:$0xf]  ;;  %v14573_v51 = vor.u32 %v17878_v40, %v14572_v38  ;;  %7014 = vmatpush.bf16.msrb.mxu3 %v15373_v44 }
 0x108   :  { %v17942_v46 = vld [vmem:[#allocation5 + $0x1b5c] sm:$0xf0] }
 0x109   :  { %v15084_v47 = vld [vmem:[#allocation5 + $0x1d40] sm:$0xf]  ;;  %v14829_v52 = vor.u32 %v17942_v46, %v14828_v41  ;;  %6976 = vmatpush.bf16.msrb.mxu0 %v14573_v51 }
 0x10a   :  { %v18006_v48 = vld [vmem:[#allocation5 + $0x1d5c] sm:$0xf0] }
 0x10b   :  { %v15340_v49 = vld [vmem:[#allocation5 + $0x1f40] sm:$0xf]  ;;  %v15085_v53 = vor.u32 %v18006_v48, %v15084_v47  ;;  %6989 = vmatpush.bf16.msrb.mxu1 %v14829_v52 }
 0x10c   :  { %v18070_v50 = vld [vmem:[#allocation5 + $0x1f5c] sm:$0xf0] }
 0x10d   :  { %v14540_v54 = vld [vmem:[#allocation5 + $0x1900] sm:$0xf]  ;;  %v15341_v57 = vor.u32 %v18070_v50, %v15340_v49  ;;  %7002 = vmatpush.bf16.msrb.mxu2 %v15085_v53 }
 0x10e   :  { %v17870_v55 = vld [vmem:[#allocation5 + $0x191c] sm:$0xf0] }
 0x10f   :  { %v14796_v56 = vld [vmem:[#allocation5 + $0x1b00] sm:$0xf]  ;;  %v14541_v63 = vor.u32 %v17870_v55, %v14540_v54  ;;  %7015 = vmatpush.bf16.msrb.mxu3 %v15341_v57 }
 0x110   :  { %v17934_v58 = vld [vmem:[#allocation5 + $0x1b1c] sm:$0xf0] }
 0x111   :  { %v15052_v59 = vld [vmem:[#allocation5 + $0x1d00] sm:$0xf]  ;;  %v14797_v0 = vor.u32 %v17934_v58, %v14796_v56  ;;  %6977 = vmatpush.bf16.msrb.mxu0 %v14541_v63  ;;  %v209_v56 = vld [vmem:[#allocation3 + $0x30] sm:$0xff]  ;;  %v17122_v63 = vld [vmem:[#allocation5 + $0x1c4] sm:$0xf] }
 0x112   :  { %v17998_v60 = vld [vmem:[#allocation5 + $0x1d1c] sm:$0xf0] }
 0x113   :  { %v15308_v61 = vld [vmem:[#allocation5 + $0x1f00] sm:$0xf]  ;;  %v15053_v1 = vor.u32 %v17998_v60, %v15052_v59  ;;  %6990 = vmatpush.bf16.msrb.mxu1 %v14797_v0  ;;  %v210_v60 = vld [vmem:[#allocation3 + $0x38] sm:$0xff] }
 0x114   :  { %v18062_v62 = vld [vmem:[#allocation5 + $0x1f1c] sm:$0xf0] }
 0x115   :  { %v14508_v2 = vld [vmem:[#allocation5 + $0x18c0] sm:$0xf]  ;;  %v15309_v5 = vor.u32 %v18062_v62, %v15308_v61  ;;  %7003 = vmatpush.bf16.msrb.mxu2 %v15053_v1  ;;  %v11566_v1 = vld [vmem:[#allocation5 + $0x1e0] sm:$0xf0] }
 0x116   :  { %v17862_v3 = vld [vmem:[#allocation5 + $0x18dc] sm:$0xf0] }
 0x117   :  { %v14764_v4 = vld [vmem:[#allocation5 + $0x1ac0] sm:$0xf]  ;;  %v14509_v11 = vor.u32 %v17862_v3, %v14508_v2  ;;  %7016 = vmatpush.bf16.msrb.mxu3 %v15309_v5  ;;  %v17186_v2 = vld [vmem:[#allocation5 + $0x3c4] sm:$0xf] }
 0x118   :  { %v17926_v6 = vld [vmem:[#allocation5 + $0x1adc] sm:$0xf0]  ;;  %v11822_v3 = vld [vmem:[#allocation5 + $0x3e0] sm:$0xf0] }
 0x119   :  { %v15020_v7 = vld [vmem:[#allocation5 + $0x1cc0] sm:$0xf]  ;;  %v14765_v12 = vor.u32 %v17926_v6, %v14764_v4  ;;  %6978 = vmatpush.bf16.msrb.mxu0 %v14509_v11  ;;  %v1339_v4 = vunpack.c.l.b16 %v209_v56 }
 0x11a   :  { %v17990_v8 = vld [vmem:[#allocation5 + $0x1cdc] sm:$0xf0] }
 0x11b   :  { %v15276_v9 = vld [vmem:[#allocation5 + $0x1ec0] sm:$0xf]  ;;  %v15021_v13 = vor.u32 %v17990_v8, %v15020_v7  ;;  %6991 = vmatpush.bf16.msrb.mxu1 %v14765_v12  ;;  %v17250_v7 = vld [vmem:[#allocation5 + $0x5c4] sm:$0xf] }
 0x11c   :  { %v18054_v10 = vld [vmem:[#allocation5 + $0x1edc] sm:$0xf0]  ;;  %v12078_v8 = vld [vmem:[#allocation5 + $0x5e0] sm:$0xf0] }
 0x11d   :  { %v14476_v14 = vld [vmem:[#allocation5 + $0x1880] sm:$0xf]  ;;  %v15277_v17 = vor.u32 %v18054_v10, %v15276_v9  ;;  %7004 = vmatpush.bf16.msrb.mxu2 %v15021_v13  ;;  %v1341_v9 = vunpack.c.l.b16 %v210_v60  ;;  %v1340_v10 = vunpack.c.h.b16 %v209_v56  ;;  %v1342_v13 = vunpack.c.h.b16 %v210_v60  ;;  %v11470_v60 = vld [vmem:[#allocation5 + $0x120] sm:$0xf0] }
 0x11e   :  { %v17854_v15 = vld [vmem:[#allocation5 + $0x189c] sm:$0xf0] }
 0x11f   :  { %v14732_v16 = vld [vmem:[#allocation5 + $0x1a80] sm:$0xf]  ;;  %v14477_v28 = vor.u32 %v17854_v15, %v14476_v14  ;;  %7017 = vmatpush.bf16.msrb.mxu3 %v15277_v17  ;;  %v11569_v14 = vor.u32 %v17122_v63, %v11566_v1  ;;  %v11825_v15 = vor.u32 %v17186_v2, %v11822_v3  ;;  %v17226_v63 = vld [vmem:[#allocation5 + $0x504] sm:$0xf] }
 0x120   :  { %v17918_v18 = vld [vmem:[#allocation5 + $0x1a9c] sm:$0xf0] }
 0x121   :  { %v14988_v22 = vld [vmem:[#allocation5 + $0x1c80] sm:$0xf]  ;;  %v14733_v29 = vor.u32 %v17918_v18, %v14732_v16  ;;  %6979 = vmatpush.bf16.msrb.mxu0 %v14477_v28  ;;  %v17114_v18 = vld [vmem:[#allocation5 + $0x184] sm:$0xf] }
 0x122   :  { %v17982_v24 = vld [vmem:[#allocation5 + $0x1c9c] sm:$0xf0]  ;;  %v11790_v28 = vld [vmem:[#allocation5 + $0x3a0] sm:$0xf0] }
 0x123   :  { %v15244_v25 = vld [vmem:[#allocation5 + $0x1e80] sm:$0xf]  ;;  %v14989_v32 = vor.u32 %v17982_v24, %v14988_v22  ;;  %6992 = vmatpush.bf16.msrb.mxu1 %v14733_v29  ;;  %v12081_v22 = vor.u32 %v17250_v7, %v12078_v8  ;;  %v18966_v24 = vpack.c.b16 %v1339_v4, %v1339_v4  ;;  %v18968_v29 = vpack.c.b16 %v1341_v9, %v1341_v9  ;;  %v11438_v8 = vld [vmem:[#allocation5 + $0xe0] sm:$0xf0] }
 0x124   :  { %v18046_v27 = vld [vmem:[#allocation5 + $0x1e9c] sm:$0xf0]  ;;  %v17154_v9 = vld [vmem:[#allocation5 + $0x2c4] sm:$0xf] }
 0x125   :  { %v14444_v33 = vld [vmem:[#allocation5 + $0x1840] sm:$0xf]  ;;  %v15245_v37 = vor.u32 %v18046_v27, %v15244_v25  ;;  %7005 = vmatpush.bf16.msrb.mxu2 %v14989_v32  ;;  %v11534_v25 = vld [vmem:[#allocation5 + $0x1a0] sm:$0xf0]  ;;  %v18970_v32 = vpack.c.b16 %v1340_v10, %v1340_v10 }
 0x126   :  { %v17846_v35 = vld [vmem:[#allocation5 + $0x185c] sm:$0xf0]  ;;  %v17178_v27 = vld [vmem:[#allocation5 + $0x384] sm:$0xf] }
 0x127   :  { %v14700_v36 = vld [vmem:[#allocation5 + $0x1a40] sm:$0xf]  ;;  %v14445_v48 = vor.u32 %v17846_v35, %v14444_v33  ;;  %7018 = vmatpush.bf16.msrb.mxu3 %v15245_v37  ;;  %v17242_v33 = vld [vmem:[#allocation5 + $0x584] sm:$0xf] }
 0x128   :  { %v17910_v38 = vld [vmem:[#allocation5 + $0x1a5c] sm:$0xf0]  ;;  %v12046_v35 = vld [vmem:[#allocation5 + $0x5a0] sm:$0xf0] }
 0x129   :  { %v14956_v40 = vld [vmem:[#allocation5 + $0x1c40] sm:$0xf]  ;;  %v14701_v52 = vor.u32 %v17910_v38, %v14700_v36  ;;  %6980 = vmatpush.bf16.msrb.mxu0 %v14445_v48  ;;  %v18972_v36 = vpack.c.b16 %v1342_v13, %v1342_v13  ;;  %v11537_v38 = vor.u32 %v17114_v18, %v11534_v25  ;;  %v11502_v48 = vld [vmem:[#allocation5 + $0x160] sm:$0xf0] }
 0x12a   :  { %v17974_v41 = vld [vmem:[#allocation5 + $0x1c5c] sm:$0xf0]  ;;  %v11694_v10 = vld [vmem:[#allocation5 + $0x2e0] sm:$0xf0] }
 0x12b   :  { %v15212_v44 = vld [vmem:[#allocation5 + $0x1e40] sm:$0xf]  ;;  %v14957_v53 = vor.u32 %v17974_v41, %v14956_v40  ;;  %6993 = vmatpush.bf16.msrb.mxu1 %v14701_v52  ;;  %v11793_v40 = vor.u32 %v17178_v27, %v11790_v28  ;;  %v12014_v52 = vld [vmem:[#allocation5 + $0x560] sm:$0xf0] }
 0x12c   :  { %v18038_v46 = vld [vmem:[#allocation5 + $0x1e5c] sm:$0xf0]  ;;  %v17082_v18 = vld [vmem:[#allocation5 + $0x84] sm:$0xf] }
 0x12d   :  { %v14412_v47 = vld [vmem:[#allocation5 + $0x1800] sm:$0xf]  ;;  %v15213_v57 = vor.u32 %v18038_v46, %v15212_v44  ;;  %7006 = vmatpush.bf16.msrb.mxu2 %v14957_v53  ;;  %v17106_v46 = vld [vmem:[#allocation5 + $0x144] sm:$0xf] }
 0x12e   :  { %v17838_v49 = vld [vmem:[#allocation5 + $0x181c] sm:$0xf0]  ;;  %v11406_v25 = vld [vmem:[#allocation5 + $0xa0] sm:$0xf0] }
 0x12f   :  { %v14668_v50 = vld [vmem:[#allocation5 + $0x1a00] sm:$0xf]  ;;  %v14413_v0 = vor.u32 %v17838_v49, %v14412_v47  ;;  %7019 = vmatpush.bf16.msrb.mxu3 %v15213_v57  ;;  %v12049_v47 = vor.u32 %v17242_v33, %v12046_v35  ;;  %v17170_v49 = vld [vmem:[#allocation5 + $0x344] sm:$0xf] }
 0x130   :  { %v17902_v51 = vld [vmem:[#allocation5 + $0x1a1c] sm:$0xf0]  ;;  %v17146_v27 = vld [vmem:[#allocation5 + $0x284] sm:$0xf] }
 0x131   :  { %v14924_v54 = vld [vmem:[#allocation5 + $0x1c00] sm:$0xf]  ;;  %v14669_v5 = vor.u32 %v17902_v51, %v14668_v50  ;;  %6981 = vmatpush.bf16.msrb.mxu0 %v14413_v0  ;;  %v11758_v50 = vld [vmem:[#allocation5 + $0x360] sm:$0xf0] }
 0x132   :  { %v17966_v55 = vld [vmem:[#allocation5 + $0x1c1c] sm:$0xf0]  ;;  %v17234_v51 = vld [vmem:[#allocation5 + $0x544] sm:$0xf] }
 0x133   :  { %v15180_v58 = vld [vmem:[#allocation5 + $0x1e00] sm:$0xf]  ;;  %v14925_v6 = vor.u32 %v17966_v55, %v14924_v54  ;;  %6994 = vmatpush.bf16.msrb.mxu1 %v14669_v5  ;;  %v11505_v54 = vor.u32 %v17106_v46, %v11502_v48  ;;  %v11761_v55 = vor.u32 %v17170_v49, %v11758_v50  ;;  %v11982_v0 = vld [vmem:[#allocation5 + $0x520] sm:$0xf0] }
 0x134   :  { %v18030_v59 = vld [vmem:[#allocation5 + $0x1e1c] sm:$0xf0]  ;;  %6982 = vmatmul.bf16.vlgmr.msrb.gmra.mxu0 %v18966_v24  ;;  %v11985_v7 = vor.u32 %v17226_v63, %v11982_v0  ;;  %v11662_v28 = vld [vmem:[#allocation5 + $0x2a0] sm:$0xf0] }
 0x135   :  { %v15660_v61 = vld [vmem:[#allocation5 + $0x21c0] sm:$0xf]  ;;  %v15181_v11 = vor.u32 %v18030_v59, %v15180_v58  ;;  %7007 = vmatpush.bf16.msrb.mxu2 %v14925_v6  ;;  %v17098_v58 = vld [vmem:[#allocation5 + $0x104] sm:$0xf]  ;;  %v12017_v59 = vor.u32 %v17234_v51, %v12014_v52 }
 0x136   :  { %v18150_v62 = vld [vmem:[#allocation5 + $0x21dc] sm:$0xf0]  ;;  %6995 = vmatmul.bf16.vlgmr.msrb.gmra.mxu1 %v18970_v32  ;;  %v11473_v2 = vor.u32 %v17098_v58, %v11470_v60  ;;  %v17090_v6 = vld [vmem:[#allocation5 + $0xc4] sm:$0xf] }
 0x137   :  { %v15661_v12 = vor.u32 %v18150_v62, %v15660_v61  ;;  %v15628_v16 = vld [vmem:[#allocation5 + $0x2180] sm:$0xf]  ;;  %7020 = vmatpush.bf16.msrb.mxu3 %v15181_v11  ;;  %7039 = vmatpush.bf16.msra.mxu1 %v11569_v14  ;;  %v17162_v61 = vld [vmem:[#allocation5 + $0x304] sm:$0xf]  ;;  %v11441_v14 = vor.u32 %v17090_v6, %v11438_v8 }
 0x138   :  { %v18142_v17 = vld [vmem:[#allocation5 + $0x219c] sm:$0xf0]  ;;  %7008 = vmatmul.bf16.vlgmr.msrb.gmra.mxu2 %v18968_v29  ;;  %v11726_v62 = vld [vmem:[#allocation5 + $0x320] sm:$0xf0] }
 0x139   :  { %7026 = vmatpush.bf16.msra.mxu0 %v15661_v12  ;;  %v15629_v37 = vor.u32 %v18142_v17, %v15628_v16  ;;  %7052 = vmatpush.bf16.msra.mxu2 %v11825_v15  ;;  %v15596_v41 = vld [vmem:[#allocation5 + $0x2140] sm:$0xf]  ;;  %v11729_v3 = vor.u32 %v17162_v61, %v11726_v62  ;;  %v17218_v11 = vld [vmem:[#allocation5 + $0x4c4] sm:$0xf]  ;;  %v11697_v15 = vor.u32 %v17154_v9, %v11694_v10  ;;  %v211_v61 = vld [vmem:[#allocation3 + $0x40] sm:$0xf] }
 0x13a   :  { %v18134_v44 = vld [vmem:[#allocation5 + $0x215c] sm:$0xf0]  ;;  %7021 = vmatmul.bf16.vlgmr.msrb.gmra.mxu3 %v18972_v36  ;;  %v11950_v12 = vld [vmem:[#allocation5 + $0x4e0] sm:$0xf0]  ;;  %v1343_v9 = vunpack.c.l.b16 %v211_v61 }
 0x13b   :  { %7065 = vmatpush.bf16.msra.mxu3 %v12081_v22  ;;  %v15597_v53 = vor.u32 %v18134_v44, %v15596_v41  ;;  %7040 = vmatpush.bf16.msra.mxu1 %v11537_v38  ;;  %v15564_v56 = vld [vmem:[#allocation5 + $0x2100] sm:$0xf]  ;;  %v11953_v22 = vor.u32 %v17218_v11, %v11950_v12  ;;  %v17210_v33 = vld [vmem:[#allocation5 + $0x484] sm:$0xf]  ;;  %v11409_v38 = vor.u32 %v17082_v18, %v11406_v25 }
 0x13c   :  { %v18126_v57 = vld [vmem:[#allocation5 + $0x211c] sm:$0xf0]  ;;  %v11918_v35 = vld [vmem:[#allocation5 + $0x4a0] sm:$0xf0] }
 0x13d   :  { %7027 = vmatpush.bf16.msra.mxu0 %v15629_v37  ;;  %7053 = vmatpush.bf16.msra.mxu2 %v11793_v40  ;;  %v15565_v1 = vor.u32 %v18126_v57, %v15564_v56  ;;  %v15532_v4 = vld [vmem:[#allocation5 + $0x20c0] sm:$0xf]  ;;  %v11665_v40 = vor.u32 %v17146_v27, %v11662_v28  ;;  %v17074_v46 = vld [vmem:[#allocation5 + $0x44] sm:$0xf]  ;;  %v18978_v28 = vpack.c.b16 %v1343_v9, %v1343_v9 }
 0x13e   :  { %v18118_v5 = vld [vmem:[#allocation5 + $0x20dc] sm:$0xf0]  ;;  %v11374_v48 = vld [vmem:[#allocation5 + $0x60] sm:$0xf0] }
 0x13f   :  { %7066 = vmatpush.bf16.msra.mxu3 %v12049_v47  ;;  %7041 = vmatpush.bf16.msra.mxu1 %v11505_v54  ;;  %v15533_v13 = vor.u32 %v18118_v5, %v15532_v4  ;;  %v15500_v16 = vld [vmem:[#allocation5 + $0x2080] sm:$0xf]  ;;  %v11921_v47 = vor.u32 %v17210_v33, %v11918_v35  ;;  %v17138_v49 = vld [vmem:[#allocation5 + $0x244] sm:$0xf]  ;;  %v11377_v57 = vor.u32 %v17074_v46, %v11374_v48 }
 0x140   :  { %v18110_v17 = vld [vmem:[#allocation5 + $0x209c] sm:$0xf0]  ;;  %v11630_v50 = vld [vmem:[#allocation5 + $0x260] sm:$0xf0] }
 0x141   :  { %7028 = vmatpush.bf16.msra.mxu0 %v15597_v53  ;;  %7054 = vmatpush.bf16.msra.mxu2 %v11761_v55  ;;  %v15501_v37 = vor.u32 %v18110_v17, %v15500_v16  ;;  %v15468_v41 = vld [vmem:[#allocation5 + $0x2040] sm:$0xf]  ;;  %v17202_v51 = vld [vmem:[#allocation5 + $0x444] sm:$0xf]  ;;  %v11633_v58 = vor.u32 %v17138_v49, %v11630_v50 }
 0x142   :  { %v18102_v44 = vld [vmem:[#allocation5 + $0x205c] sm:$0xf0]  ;;  %v11886_v52 = vld [vmem:[#allocation5 + $0x460] sm:$0xf0] }
 0x143   :  { %7067 = vmatpush.bf16.msra.mxu3 %v12017_v59  ;;  %7042 = vmatpush.bf16.msra.mxu1 %v11473_v2  ;;  %v15469_v53 = vor.u32 %v18102_v44, %v15468_v41  ;;  %v15436_v54 = vld [vmem:[#allocation5 + $0x2000] sm:$0xf]  ;;  %v17066_v56 = vld [vmem:[#allocation5 + $0x4] sm:$0xf]  ;;  %v11889_v62 = vor.u32 %v17202_v51, %v11886_v52 }
 0x144   :  { %v18094_v55 = vld [vmem:[#allocation5 + $0x201c] sm:$0xf0]  ;;  %v11342_v59 = vld [vmem:[#allocation5 + $0x20] sm:$0xf0] }
 0x145   :  { %7029 = vmatpush.bf16.msra.mxu0 %v15565_v1  ;;  %7055 = vmatpush.bf16.msra.mxu2 %v11729_v3  ;;  %v17130_v60 = vld [vmem:[#allocation5 + $0x204] sm:$0xf]  ;;  %v15437_v5 = vor.u32 %v18094_v55, %v15436_v54  ;;  %v11345_v10 = vor.u32 %v17066_v56, %v11342_v59 }
 0x146   :  { %v11598_v63 = vld [vmem:[#allocation5 + $0x220] sm:$0xf0] }
 0x147   :  { %7068 = vmatpush.bf16.msra.mxu3 %v11985_v7  ;;  %7043 = vmatpush.bf16.msra.mxu1 %v11441_v14  ;;  %v17194_v0 = vld [vmem:[#allocation5 + $0x404] sm:$0xf]  ;;  %v11601_v11 = vor.u32 %v17130_v60, %v11598_v63 }
 0x148   :  { %v11854_v1 = vld [vmem:[#allocation5 + $0x420] sm:$0xf0] }
 0x149   :  { %7030 = vmatpush.bf16.msra.mxu0 %v15533_v13  ;;  %7056 = vmatpush.bf16.msra.mxu2 %v11697_v15  ;;  %v17314_v2 = vld [vmem:[#allocation5 + $0x7c4] sm:$0xf]  ;;  %v11857_v14 = vor.u32 %v17194_v0, %v11854_v1 }
 0x14a   :  { %v12334_v3 = vld [vmem:[#allocation5 + $0x7e0] sm:$0xf0] }
 0x14b   :  { %7069 = vmatpush.bf16.msra.mxu3 %v11953_v22  ;;  %7044 = vmatpush.bf16.msra.mxu1 %v11409_v38  ;;  %v17378_v4 = vld [vmem:[#allocation5 + $0x9c4] sm:$0xf]  ;;  %v12337_v15 = vor.u32 %v17314_v2, %v12334_v3 }
 0x14c   :  { %v12590_v6 = vld [vmem:[#allocation5 + $0x9e0] sm:$0xf0] }
 0x14d   :  { %7031 = vmatpush.bf16.msra.mxu0 %v15501_v37  ;;  %7057 = vmatpush.bf16.msra.mxu2 %v11665_v40  ;;  %v17442_v7 = vld [vmem:[#allocation5 + $0xbc4] sm:$0xf]  ;;  %v12593_v16 = vor.u32 %v17378_v4, %v12590_v6 }
 0x14e   :  { %v12846_v8 = vld [vmem:[#allocation5 + $0xbe0] sm:$0xf0] }
 0x14f   :  { %7070 = vmatpush.bf16.msra.mxu3 %v11921_v47  ;;  %7045 = vmatpush.bf16.msra.mxu1 %v11377_v57  ;;  %v17506_v12 = vld [vmem:[#allocation5 + $0xdc4] sm:$0xf]  ;;  %v12849_v17 = vor.u32 %v17442_v7, %v12846_v8 }
 0x150   :  { %v13102_v13 = vld [vmem:[#allocation5 + $0xde0] sm:$0xf0] }
 0x151   :  { %7032 = vmatpush.bf16.msra.mxu0 %v15469_v53  ;;  %7058 = vmatpush.bf16.msra.mxu2 %v11633_v58  ;;  %v17306_v18 = vld [vmem:[#allocation5 + $0x784] sm:$0xf]  ;;  %v13105_v27 = vor.u32 %v17506_v12, %v13102_v13 }
 0x152   :  { %v12302_v22 = vld [vmem:[#allocation5 + $0x7a0] sm:$0xf0] }
 0x153   :  { %7071 = vmatpush.bf16.msra.mxu3 %v11889_v62  ;;  %v17370_v25 = vld [vmem:[#allocation5 + $0x984] sm:$0xf]  ;;  %7046 = vmatpush.bf16.msra.mxu1 %v11345_v10  ;;  %v12305_v41 = vor.u32 %v17306_v18, %v12302_v22 }
 0x154   :  { %v12558_v33 = vld [vmem:[#allocation5 + $0x9a0] sm:$0xf0] }
 0x155   :  { %7033 = vmatpush.bf16.msra.mxu0 %v15437_v5  ;;  %v17434_v35 = vld [vmem:[#allocation5 + $0xb84] sm:$0xf]  ;;  %7059 = vmatpush.bf16.msra.mxu2 %v11601_v11  ;;  %v12561_v44 = vor.u32 %v17370_v25, %v12558_v33 }
 0x156   :  { %v12814_v37 = vld [vmem:[#allocation5 + $0xba0] sm:$0xf0]  ;;  %7047 = vmatmul.bf16.vlgmr.msra.gmra.mxu1 %v18932_v20 }
 0x157   :  { %v17498_v38 = vld [vmem:[#allocation5 + $0xd84] sm:$0xf]  ;;  %7072 = vmatpush.bf16.msra.mxu3 %v11857_v14  ;;  %7091 = vmatpush.bf16.msrb.mxu1 %v12593_v16  ;;  %v12817_v46 = vor.u32 %v17434_v35, %v12814_v37 }
 0x158   :  { %v13070_v40 = vld [vmem:[#allocation5 + $0xda0] sm:$0xf0]  ;;  %7034 = vmatmul.bf16.vlgmr.msra.gmra.mxu0 %v18978_v28  ;;  %7060 = vmatmul.bf16.vlgmr.msra.gmra.mxu2 %v18936_v23 }
 0x159   :  { %7078 = vmatpush.bf16.msrb.mxu0 %v12337_v15  ;;  %7104 = vmatpush.bf16.msrb.mxu2 %v12849_v17  ;;  %v17298_v47 = vld [vmem:[#allocation5 + $0x744] sm:$0xf]  ;;  %v13073_v50 = vor.u32 %v17498_v38, %v13070_v40 }
 0x15a   :  { %v12270_v48 = vld [vmem:[#allocation5 + $0x760] sm:$0xf0]  ;;  %7073 = vmatmul.bf16.vlgmr.msra.gmra.mxu3 %v18930_v19 }
 0x15b   :  { %v17362_v49 = vld [vmem:[#allocation5 + $0x944] sm:$0xf]  ;;  %7117 = vmatpush.bf16.msrb.mxu3 %v13105_v27  ;;  %v12273_v56 = vor.u32 %v17298_v47, %v12270_v48  ;;  %7092 = vmatpush.bf16.msrb.mxu1 %v12561_v44  ;;  %v6827_v48 = vpop.f32.mrf.mxu0 }
 0x15c   :  { %v12526_v51 = vld [vmem:[#allocation5 + $0x960] sm:$0xf0] }
 0x15d   :  { %v17426_v52 = vld [vmem:[#allocation5 + $0xb44] sm:$0xf]  ;;  %7079 = vmatpush.bf16.msrb.mxu0 %v12305_v41  ;;  %7105 = vmatpush.bf16.msrb.mxu2 %v12817_v46  ;;  %v12529_v57 = vor.u32 %v17362_v49, %v12526_v51 }
 0x15e   :  { %v12782_v53 = vld [vmem:[#allocation5 + $0xb60] sm:$0xf0] }
 0x15f   :  { %v17490_v54 = vld [vmem:[#allocation5 + $0xd44] sm:$0xf]  ;;  %v12785_v58 = vor.u32 %v17426_v52, %v12782_v53  ;;  %7118 = vmatpush.bf16.msrb.mxu3 %v13073_v50  ;;  %7093 = vmatpush.bf16.msrb.mxu1 %v12529_v57 }
 0x160   :  { %v13038_v55 = vld [vmem:[#allocation5 + $0xd60] sm:$0xf0] }
 0x161   :  { %v17290_v59 = vld [vmem:[#allocation5 + $0x704] sm:$0xf]  ;;  %v13041_v62 = vor.u32 %v17490_v54, %v13038_v55  ;;  %7080 = vmatpush.bf16.msrb.mxu0 %v12273_v56  ;;  %7106 = vmatpush.bf16.msrb.mxu2 %v12785_v58  ;;  %v6840_v55 = vpop.f32.mrf.mxu1 }
 0x162   :  { %v12238_v60 = vld [vmem:[#allocation5 + $0x720] sm:$0xf0] }
 0x163   :  { %v17354_v61 = vld [vmem:[#allocation5 + $0x904] sm:$0xf]  ;;  %v12241_v4 = vor.u32 %v17290_v59, %v12238_v60  ;;  %7119 = vmatpush.bf16.msrb.mxu3 %v13041_v62 }
 0x164   :  { %v12494_v63 = vld [vmem:[#allocation5 + $0x920] sm:$0xf0] }
 0x165   :  { %v17418_v0 = vld [vmem:[#allocation5 + $0xb04] sm:$0xf]  ;;  %v12497_v6 = vor.u32 %v17354_v61, %v12494_v63  ;;  %7081 = vmatpush.bf16.msrb.mxu0 %v12241_v4 }
 0x166   :  { %v12750_v1 = vld [vmem:[#allocation5 + $0xb20] sm:$0xf0] }
 0x167   :  { %v17482_v2 = vld [vmem:[#allocation5 + $0xd04] sm:$0xf]  ;;  %v12753_v7 = vor.u32 %v17418_v0, %v12750_v1  ;;  %7094 = vmatpush.bf16.msrb.mxu1 %v12497_v6 }
 0x168   :  { %v13006_v3 = vld [vmem:[#allocation5 + $0xd20] sm:$0xf0] }
 0x169   :  { %v17282_v5 = vld [vmem:[#allocation5 + $0x6c4] sm:$0xf]  ;;  %v13009_v11 = vor.u32 %v17482_v2, %v13006_v3  ;;  %7107 = vmatpush.bf16.msrb.mxu2 %v12753_v7  ;;  %v6853_v7 = vpop.f32.mrf.mxu2 }
 0x16a   :  { %v12206_v8 = vld [vmem:[#allocation5 + $0x6e0] sm:$0xf0] }
 0x16b   :  { %v17346_v9 = vld [vmem:[#allocation5 + $0x8c4] sm:$0xf]  ;;  %v12209_v17 = vor.u32 %v17282_v5, %v12206_v8  ;;  %7120 = vmatpush.bf16.msrb.mxu3 %v13009_v11 }
 0x16c   :  { %v12462_v10 = vld [vmem:[#allocation5 + $0x8e0] sm:$0xf0] }
 0x16d   :  { %v17410_v12 = vld [vmem:[#allocation5 + $0xac4] sm:$0xf]  ;;  %v12465_v22 = vor.u32 %v17346_v9, %v12462_v10  ;;  %7082 = vmatpush.bf16.msrb.mxu0 %v12209_v17 }
 0x16e   :  { %v12718_v13 = vld [vmem:[#allocation5 + $0xae0] sm:$0xf0] }
 0x16f   :  { %v1300_v14 = vld [vmem:[#allocation7] sm:$0xff]  ;;  %v12721_v25 = vor.u32 %v17410_v12, %v12718_v13  ;;  %7095 = vmatpush.bf16.msrb.mxu1 %v12465_v22  ;;  %v6866_v13 = vpop.f32.mrf.mxu3 }
 0x170   :  { %v17474_v15 = vld [vmem:[#allocation5 + $0xcc4] sm:$0xf]  ;;  %v1302_v35 = vperm.slane %v1300_v14, 0 }
 0x171   :  { %v12974_v16 = vld [vmem:[#allocation5 + $0xce0] sm:$0xf0]  ;;  %7108 = vmatpush.bf16.msrb.mxu2 %v12721_v25 }
 0x172   :  { %v17274_v18 = vld [vmem:[#allocation5 + $0x684] sm:$0xf]  ;;  %v12977_v37 = vor.u32 %v17474_v15, %v12974_v16  ;;  %v6828_v54 = vadd.f32 %v6827_v48, %v1302_v35 }
 0x173   :  { %v12174_v27 = vld [vmem:[#allocation5 + $0x6a0] sm:$0xf0] }
 0x174   :  { %v17338_v33 = vld [vmem:[#allocation5 + $0x884] sm:$0xf]  ;;  %v12177_v47 = vor.u32 %v17274_v18, %v12174_v27  ;;  %7121 = vmatpush.bf16.msrb.mxu3 %v12977_v37  ;;  %v6841_v62 = vadd.f32 %v6840_v55, %v6828_v54 }
 0x175   :  { %v12430_v38 = vld [vmem:[#allocation5 + $0x8a0] sm:$0xf0] }
 0x176   :  { %v17402_v40 = vld [vmem:[#allocation5 + $0xa84] sm:$0xf]  ;;  %v12433_v49 = vor.u32 %v17338_v33, %v12430_v38  ;;  %7083 = vmatpush.bf16.msrb.mxu0 %v12177_v47  ;;  %v6854_v12 = vadd.f32 %v6853_v7, %v6841_v62  ;;  %v6829_v33 = vpop.f32.mrf.mxu0 }
 0x177   :  { %v12686_v41 = vld [vmem:[#allocation5 + $0xaa0] sm:$0xf0] }
 0x178   :  { %v17466_v44 = vld [vmem:[#allocation5 + $0xc84] sm:$0xf]  ;;  %v12689_v50 = vor.u32 %v17402_v40, %v12686_v41  ;;  %7096 = vmatpush.bf16.msrb.mxu1 %v12433_v49  ;;  %v18984_v27 = vadd.f32 %v6866_v13, %v6854_v12  ;;  %v6842_v41 = vpop.f32.mrf.mxu1 }
 0x179   :  { %v12942_v46 = vld [vmem:[#allocation5 + $0xca0] sm:$0xf0] }
 0x17a   :  { %v17266_v51 = vld [vmem:[#allocation5 + $0x644] sm:$0xf]  ;;  %v12945_v56 = vor.u32 %v17466_v44, %v12942_v46  ;;  %7109 = vmatpush.bf16.msrb.mxu2 %v12689_v50 }
 0x17b   :  { %v12142_v52 = vld [vmem:[#allocation5 + $0x660] sm:$0xf0] }
 0x17c   :  { %v17330_v53 = vld [vmem:[#allocation5 + $0x844] sm:$0xf]  ;;  %v12145_v63 = vor.u32 %v17266_v51, %v12142_v52  ;;  %7122 = vmatpush.bf16.msrb.mxu3 %v12945_v56 }
 0x17d   :  { %v12398_v57 = vld [vmem:[#allocation5 + $0x860] sm:$0xf0] }
 0x17e   :  { %v17394_v58 = vld [vmem:[#allocation5 + $0xa44] sm:$0xf]  ;;  %v12401_v2 = vor.u32 %v17330_v53, %v12398_v57  ;;  %7084 = vmatpush.bf16.msrb.mxu0 %v12145_v63  ;;  %v6879_v33 = vpop.f32.mrf.mxu0 }
 0x17f   :  { %v12654_v59 = vld [vmem:[#allocation5 + $0xa60] sm:$0xf0] }
 0x180   :  { %v17458_v60 = vld [vmem:[#allocation5 + $0xc44] sm:$0xf]  ;;  %v12657_v3 = vor.u32 %v17394_v58, %v12654_v59  ;;  %7097 = vmatpush.bf16.msrb.mxu1 %v12401_v2  ;;  %v6855_v58 = vpop.f32.mrf.mxu2 }
 0x181   :  { %v12910_v61 = vld [vmem:[#allocation5 + $0xc60] sm:$0xf0] }
 0x182   :  { %v17258_v0 = vld [vmem:[#allocation5 + $0x604] sm:$0xf]  ;;  %v12913_v8 = vor.u32 %v17458_v60, %v12910_v61  ;;  %7110 = vmatpush.bf16.msrb.mxu2 %v12657_v3  ;;  %v6868_v60 = vpop.f32.mrf.mxu3 }
 0x183   :  { %v12110_v1 = vld [vmem:[#allocation5 + $0x620] sm:$0xf0] }
 0x184   :  { %v17322_v4 = vld [vmem:[#allocation5 + $0x804] sm:$0xf]  ;;  %v12113_v17 = vor.u32 %v17258_v0, %v12110_v1  ;;  %7123 = vmatpush.bf16.msrb.mxu3 %v12913_v8 }
 0x185   :  { %v12366_v5 = vld [vmem:[#allocation5 + $0x820] sm:$0xf0] }
 0x186   :  { %v17386_v6 = vld [vmem:[#allocation5 + $0xa04] sm:$0xf]  ;;  %v12369_v35 = vor.u32 %v17322_v4, %v12366_v5  ;;  %7085 = vmatpush.bf16.msrb.mxu0 %v12113_v17 }
 0x187   :  { %v12622_v9 = vld [vmem:[#allocation5 + $0xa20] sm:$0xf0] }
 0x188   :  { %v17450_v10 = vld [vmem:[#allocation5 + $0xc04] sm:$0xf]  ;;  %v12625_v37 = vor.u32 %v17386_v6, %v12622_v9  ;;  %7098 = vmatpush.bf16.msrb.mxu1 %v12369_v35  ;;  %v6905_v60 = vpop.f32.mrf.mxu2 }
 0x189   :  { %v12878_v11 = vld [vmem:[#allocation5 + $0xc20] sm:$0xf0]  ;;  %7086 = vmatmul.bf16.vlgmr.msrb.gmra.mxu0 %v18934_v21 }
 0x18a   :  { %v17570_v14 = vld [vmem:[#allocation5 + $0xfc4] sm:$0xf]  ;;  %v12881_v44 = vor.u32 %v17450_v10, %v12878_v11  ;;  %7111 = vmatpush.bf16.msrb.mxu2 %v12625_v37 }
 0x18b   :  { %v13358_v15 = vld [vmem:[#allocation5 + $0xfe0] sm:$0xf0]  ;;  %7099 = vmatmul.bf16.vlgmr.msrb.gmra.mxu1 %v18944_v42 }
 0x18c   :  { %v17634_v16 = vld [vmem:[#allocation5 + $0x11c4] sm:$0xf]  ;;  %v13361_v46 = vor.u32 %v17570_v14, %v13358_v15  ;;  %7124 = vmatpush.bf16.msrb.mxu3 %v12881_v44  ;;  %v6880_v44 = vadd.f32 %v6879_v33, %v18984_v27 }
 0x18d   :  { %v13614_v18 = vld [vmem:[#allocation5 + $0x11e0] sm:$0xf0]  ;;  %7112 = vmatmul.bf16.vlgmr.msrb.gmra.mxu2 %v18948_v45 }
 0x18e   :  { %v17698_v22 = vld [vmem:[#allocation5 + $0x13c4] sm:$0xf]  ;;  %v13617_v47 = vor.u32 %v17634_v16, %v13614_v18  ;;  %7130 = vmatpush.bf16.msra.mxu0 %v13361_v46  ;;  %v6892_v46 = vpop.f32.mrf.mxu1 }
 0x18f   :  { %v13870_v25 = vld [vmem:[#allocation5 + $0x13e0] sm:$0xf0]  ;;  %7125 = vmatmul.bf16.vlgmr.msrb.gmra.mxu3 %v18942_v39 }
 0x190   :  { %v17762_v38 = vld [vmem:[#allocation5 + $0x15c4] sm:$0xf]  ;;  %v13873_v48 = vor.u32 %v17698_v22, %v13870_v25  ;;  %7143 = vmatpush.bf16.msra.mxu1 %v13617_v47 }
 0x191   :  { %v14126_v40 = vld [vmem:[#allocation5 + $0x15e0] sm:$0xf0] }
 0x192   :  { %v17562_v49 = vld [vmem:[#allocation5 + $0xf84] sm:$0xf]  ;;  %v14129_v52 = vor.u32 %v17762_v38, %v14126_v40  ;;  %7156 = vmatpush.bf16.msra.mxu2 %v13873_v48 }
 0x193   :  { %v13326_v50 = vld [vmem:[#allocation5 + $0xfa0] sm:$0xf0] }
 0x194   :  { %v17626_v51 = vld [vmem:[#allocation5 + $0x1184] sm:$0xf]  ;;  %v13329_v59 = vor.u32 %v17562_v49, %v13326_v50  ;;  %7169 = vmatpush.bf16.msra.mxu3 %v14129_v52 }
 0x195   :  { %v13582_v53 = vld [vmem:[#allocation5 + $0x11a0] sm:$0xf0] }
 0x196   :  { %v17690_v54 = vld [vmem:[#allocation5 + $0x1384] sm:$0xf]  ;;  %v13585_v61 = vor.u32 %v17626_v51, %v13582_v53  ;;  %7131 = vmatpush.bf16.msra.mxu0 %v13329_v59  ;;  %v6893_v53 = vadd.f32 %v6892_v46, %v6880_v44  ;;  %v6907_v44 = vpop.f32.mrf.mxu2 }
 0x197   :  { %v13838_v55 = vld [vmem:[#allocation5 + $0x13a0] sm:$0xf0] }
 0x198   :  { %v17754_v56 = vld [vmem:[#allocation5 + $0x1584] sm:$0xf]  ;;  %v13841_v62 = vor.u32 %v17690_v54, %v13838_v55  ;;  %7144 = vmatpush.bf16.msra.mxu1 %v13585_v61 }
 0x199   :  { %v14094_v57 = vld [vmem:[#allocation5 + $0x15a0] sm:$0xf0] }
 0x19a   :  { %v17554_v63 = vld [vmem:[#allocation5 + $0xf44] sm:$0xf]  ;;  %v14097_v2 = vor.u32 %v17754_v56, %v14094_v57  ;;  %7157 = vmatpush.bf16.msra.mxu2 %v13841_v62 }
 0x19b   :  { %v13294_v0 = vld [vmem:[#allocation5 + $0xf60] sm:$0xf0] }
 0x19c   :  { %v17618_v1 = vld [vmem:[#allocation5 + $0x1144] sm:$0xf]  ;;  %v13297_v8 = vor.u32 %v17554_v63, %v13294_v0  ;;  %7170 = vmatpush.bf16.msra.mxu3 %v14097_v2  ;;  %v6906_v0 = vadd.f32 %v6905_v60, %v6893_v53 }
 0x19d   :  { %v13550_v3 = vld [vmem:[#allocation5 + $0x1160] sm:$0xf0] }
 0x19e   :  { %v17682_v4 = vld [vmem:[#allocation5 + $0x1344] sm:$0xf]  ;;  %v13553_v9 = vor.u32 %v17618_v1, %v13550_v3  ;;  %7132 = vmatpush.bf16.msra.mxu0 %v13297_v8  ;;  %v6918_v1 = vpop.f32.mrf.mxu3 }
 0x19f   :  { %v13806_v5 = vld [vmem:[#allocation5 + $0x1360] sm:$0xf0] }
 0x1a0   :  { %v17746_v6 = vld [vmem:[#allocation5 + $0x1544] sm:$0xf]  ;;  %v13809_v10 = vor.u32 %v17682_v4, %v13806_v5  ;;  %7145 = vmatpush.bf16.msra.mxu1 %v13553_v9  ;;  %v18991_v5 = vadd.f32 %v6918_v1, %v6906_v0 }
 0x1a1   :  { %v14062_v7 = vld [vmem:[#allocation5 + $0x1560] sm:$0xf0] }
 0x1a2   :  { %v17546_v11 = vld [vmem:[#allocation5 + $0xf04] sm:$0xf]  ;;  %v14065_v14 = vor.u32 %v17746_v6, %v14062_v7  ;;  %7158 = vmatpush.bf16.msra.mxu2 %v13809_v10  ;;  %v6881_v6 = vpop.f32.mrf.mxu0 }
 0x1a3   :  { %v13262_v12 = vld [vmem:[#allocation5 + $0xf20] sm:$0xf0] }
 0x1a4   :  { %v17610_v13 = vld [vmem:[#allocation5 + $0x1104] sm:$0xf]  ;;  %v13265_v25 = vor.u32 %v17546_v11, %v13262_v12  ;;  %7171 = vmatpush.bf16.msra.mxu3 %v14065_v14  ;;  %v6894_v12 = vpop.f32.mrf.mxu1 }
 0x1a5   :  { %v13518_v15 = vld [vmem:[#allocation5 + $0x1120] sm:$0xf0] }
 0x1a6   :  { %v17674_v16 = vld [vmem:[#allocation5 + $0x1304] sm:$0xf]  ;;  %v13521_v35 = vor.u32 %v17610_v13, %v13518_v15  ;;  %7133 = vmatpush.bf16.msra.mxu0 %v13265_v25 }
 0x1a7   :  { %v13774_v17 = vld [vmem:[#allocation5 + $0x1320] sm:$0xf0] }
 0x1a8   :  { %v17738_v18 = vld [vmem:[#allocation5 + $0x1504] sm:$0xf]  ;;  %v13777_v37 = vor.u32 %v17674_v16, %v13774_v17  ;;  %7146 = vmatpush.bf16.msra.mxu1 %v13521_v35 }
 0x1a9   :  { %v14030_v22 = vld [vmem:[#allocation5 + $0x1520] sm:$0xf0] }
 0x1aa   :  { %v17538_v38 = vld [vmem:[#allocation5 + $0xec4] sm:$0xf]  ;;  %v14033_v47 = vor.u32 %v17738_v18, %v14030_v22  ;;  %7159 = vmatpush.bf16.msra.mxu2 %v13777_v37 }
 0x1ab   :  { %v13230_v40 = vld [vmem:[#allocation5 + $0xee0] sm:$0xf0] }
 0x1ac   :  { %v17602_v41 = vld [vmem:[#allocation5 + $0x10c4] sm:$0xf]  ;;  %v13233_v54 = vor.u32 %v17538_v38, %v13230_v40  ;;  %7172 = vmatpush.bf16.msra.mxu3 %v14033_v47 }
 0x1ad   :  { %v13486_v48 = vld [vmem:[#allocation5 + $0x10e0] sm:$0xf0] }
 0x1ae   :  { %v17666_v49 = vld [vmem:[#allocation5 + $0x12c4] sm:$0xf]  ;;  %v13489_v55 = vor.u32 %v17602_v41, %v13486_v48  ;;  %7134 = vmatpush.bf16.msra.mxu0 %v13233_v54 }
 0x1af   :  { %v13742_v50 = vld [vmem:[#allocation5 + $0x12e0] sm:$0xf0] }
 0x1b0   :  { %v17730_v51 = vld [vmem:[#allocation5 + $0x14c4] sm:$0xf]  ;;  %v13745_v56 = vor.u32 %v17666_v49, %v13742_v50  ;;  %7147 = vmatpush.bf16.msra.mxu1 %v13489_v55  ;;  %v6920_v50 = vpop.f32.mrf.mxu3 }
 0x1b1   :  { %v13998_v52 = vld [vmem:[#allocation5 + $0x14e0] sm:$0xf0] }
 0x1b2   :  { %v17530_v57 = vld [vmem:[#allocation5 + $0xe84] sm:$0xf]  ;;  %v14001_v27 = vor.u32 %v17730_v51, %v13998_v52  ;;  %7160 = vmatpush.bf16.msra.mxu2 %v13745_v56 }
 0x1b3   :  { %v13198_v58 = vld [vmem:[#allocation5 + $0xea0] sm:$0xf0] }
 0x1b4   :  { %v17594_v59 = vld [vmem:[#allocation5 + $0x1084] sm:$0xf]  ;;  %v13201_v4 = vor.u32 %v17530_v57, %v13198_v58  ;;  %7173 = vmatpush.bf16.msra.mxu3 %v14001_v27 }
 0x1b5   :  { %v13454_v61 = vld [vmem:[#allocation5 + $0x10a0] sm:$0xf0] }
 0x1b6   :  { %v17658_v62 = vld [vmem:[#allocation5 + $0x1284] sm:$0xf]  ;;  %v13457_v7 = vor.u32 %v17594_v59, %v13454_v61  ;;  %7135 = vmatpush.bf16.msra.mxu0 %v13201_v4 }
 0x1b7   :  { %v13710_v63 = vld [vmem:[#allocation5 + $0x12a0] sm:$0xf0] }
 0x1b8   :  { %v17722_v2 = vld [vmem:[#allocation5 + $0x1484] sm:$0xf]  ;;  %v13713_v8 = vor.u32 %v17658_v62, %v13710_v63  ;;  %7148 = vmatpush.bf16.msra.mxu1 %v13457_v7 }
 0x1b9   :  { %v13966_v3 = vld [vmem:[#allocation5 + $0x14a0] sm:$0xf0] }
 0x1ba   :  { %v17522_v9 = vld [vmem:[#allocation5 + $0xe44] sm:$0xf]  ;;  %v13969_v13 = vor.u32 %v17722_v2, %v13966_v3  ;;  %7161 = vmatpush.bf16.msra.mxu2 %v13713_v8 }
 0x1bb   :  { %v13166_v10 = vld [vmem:[#allocation5 + $0xe60] sm:$0xf0] }
 0x1bc   :  { %v17586_v11 = vld [vmem:[#allocation5 + $0x1044] sm:$0xf]  ;;  %v13169_v22 = vor.u32 %v17522_v9, %v13166_v10  ;;  %7174 = vmatpush.bf16.msra.mxu3 %v13969_v13 }
 0x1bd   :  { %v13422_v14 = vld [vmem:[#allocation5 + $0x1060] sm:$0xf0] }
 0x1be   :  { %v17650_v15 = vld [vmem:[#allocation5 + $0x1244] sm:$0xf]  ;;  %v13425_v35 = vor.u32 %v17586_v11, %v13422_v14  ;;  %7136 = vmatpush.bf16.msra.mxu0 %v13169_v22 }
 0x1bf   :  { %v13678_v16 = vld [vmem:[#allocation5 + $0x1260] sm:$0xf0] }
 0x1c0   :  { %v17714_v17 = vld [vmem:[#allocation5 + $0x1444] sm:$0xf]  ;;  %v13681_v37 = vor.u32 %v17650_v15, %v13678_v16  ;;  %7149 = vmatpush.bf16.msra.mxu1 %v13425_v35 }
 0x1c1   :  { %v13934_v18 = vld [vmem:[#allocation5 + $0x1460] sm:$0xf0] }
 0x1c2   :  { %v17514_v25 = vld [vmem:[#allocation5 + $0xe04] sm:$0xf]  ;;  %v13937_v46 = vor.u32 %v17714_v17, %v13934_v18  ;;  %7162 = vmatpush.bf16.msra.mxu2 %v13681_v37 }
 0x1c3   :  { %v13134_v33 = vld [vmem:[#allocation5 + $0xe20] sm:$0xf0] }
 0x1c4   :  { %v17578_v38 = vld [vmem:[#allocation5 + $0x1004] sm:$0xf]  ;;  %v13137_v54 = vor.u32 %v17514_v25, %v13134_v33  ;;  %7175 = vmatpush.bf16.msra.mxu3 %v13937_v46 }
 0x1c5   :  { %v13390_v40 = vld [vmem:[#allocation5 + $0x1020] sm:$0xf0] }
 0x1c6   :  { %v17642_v41 = vld [vmem:[#allocation5 + $0x1204] sm:$0xf]  ;;  %v13393_v58 = vor.u32 %v17578_v38, %v13390_v40  ;;  %7137 = vmatpush.bf16.msra.mxu0 %v13137_v54 }
 0x1c7   :  { %v13646_v47 = vld [vmem:[#allocation5 + $0x1220] sm:$0xf0] }
 0x1c8   :  { %v17706_v48 = vld [vmem:[#allocation5 + $0x1404] sm:$0xf]  ;;  %v13649_v59 = vor.u32 %v17642_v41, %v13646_v47  ;;  %7150 = vmatpush.bf16.msra.mxu1 %v13393_v58 }
 0x1c9   :  { %v13902_v49 = vld [vmem:[#allocation5 + $0x1420] sm:$0xf0]  ;;  %7138 = vmatmul.bf16.vlgmr.msra.gmra.mxu0 %v18946_v43 }
 0x1ca   :  { %v17826_v51 = vld [vmem:[#allocation5 + $0x17c4] sm:$0xf]  ;;  %v13905_v61 = vor.u32 %v17706_v48, %v13902_v49  ;;  %7163 = vmatpush.bf16.msra.mxu2 %v13649_v59 }
 0x1cb   :  { %v14382_v52 = vld [vmem:[#allocation5 + $0x17e0] sm:$0xf0]  ;;  %7151 = vmatmul.bf16.vlgmr.msra.gmra.mxu1 %v18954_v26 }
 0x1cc   :  { %v17890_v53 = vld [vmem:[#allocation5 + $0x19c4] sm:$0xf]  ;;  %v14385_v62 = vor.u32 %v17826_v51, %v14382_v52  ;;  %7176 = vmatpush.bf16.msra.mxu3 %v13905_v61  ;;  %v6931_v51 = vpop.f32.mrf.mxu0 }
 0x1cd   :  { %v14638_v55 = vld [vmem:[#allocation5 + $0x19e0] sm:$0xf0]  ;;  %7164 = vmatmul.bf16.vlgmr.msra.gmra.mxu2 %v18958_v31  ;;  %v6932_v54 = vadd.f32 %v6931_v51, %v18991_v5 }
 0x1ce   :  { %v17954_v56 = vld [vmem:[#allocation5 + $0x1bc4] sm:$0xf]  ;;  %v14641_v63 = vor.u32 %v17890_v53, %v14638_v55  ;;  %7182 = vmatpush.bf16.msrb.mxu0 %v14385_v62 }
 0x1cf   :  { %v14894_v57 = vld [vmem:[#allocation5 + $0x1be0] sm:$0xf0]  ;;  %7177 = vmatmul.bf16.vlgmr.msra.gmra.mxu3 %v18956_v30 }
 0x1d0   :  { %v18018_v60 = vld [vmem:[#allocation5 + $0x1dc4] sm:$0xf]  ;;  %v14897_v0 = vor.u32 %v17954_v56, %v14894_v57  ;;  %7195 = vmatpush.bf16.msrb.mxu1 %v14641_v63  ;;  %v6944_v56 = vpop.f32.mrf.mxu1 }
 0x1d1   :  { %v15150_v27 = vld [vmem:[#allocation5 + $0x1de0] sm:$0xf0]  ;;  %v6945_v62 = vadd.f32 %v6944_v56, %v6932_v54 }
 0x1d2   :  { %v17818_v1 = vld [vmem:[#allocation5 + $0x1784] sm:$0xf]  ;;  %v15153_v4 = vor.u32 %v18018_v60, %v15150_v27  ;;  %7208 = vmatpush.bf16.msrb.mxu2 %v14897_v0 }
 0x1d3   :  { %v14350_v2 = vld [vmem:[#allocation5 + $0x17a0] sm:$0xf0] }
 0x1d4   :  { %v17882_v3 = vld [vmem:[#allocation5 + $0x1984] sm:$0xf]  ;;  %v14353_v11 = vor.u32 %v17818_v1, %v14350_v2  ;;  %7221 = vmatpush.bf16.msrb.mxu3 %v15153_v4 }
 0x1d5   :  { %v14606_v6 = vld [vmem:[#allocation5 + $0x19a0] sm:$0xf0] }
 0x1d6   :  { %v17946_v7 = vld [vmem:[#allocation5 + $0x1b84] sm:$0xf]  ;;  %v14609_v12 = vor.u32 %v17882_v3, %v14606_v6  ;;  %7183 = vmatpush.bf16.msrb.mxu0 %v14353_v11  ;;  %v6957_v11 = vpop.f32.mrf.mxu2 }
 0x1d7   :  { %v14862_v8 = vld [vmem:[#allocation5 + $0x1ba0] sm:$0xf0] }
 0x1d8   :  { %v18010_v9 = vld [vmem:[#allocation5 + $0x1d84] sm:$0xf]  ;;  %v14865_v13 = vor.u32 %v17946_v7, %v14862_v8  ;;  %7196 = vmatpush.bf16.msrb.mxu1 %v14609_v12 }
 0x1d9   :  { %v15118_v10 = vld [vmem:[#allocation5 + $0x1da0] sm:$0xf0] }
 0x1da   :  { %v17810_v14 = vld [vmem:[#allocation5 + $0x1744] sm:$0xf]  ;;  %v15121_v17 = vor.u32 %v18010_v9, %v15118_v10  ;;  %7209 = vmatpush.bf16.msrb.mxu2 %v14865_v13 }
 0x1db   :  { %v14318_v15 = vld [vmem:[#allocation5 + $0x1760] sm:$0xf0] }
 0x1dc   :  { %v17874_v16 = vld [vmem:[#allocation5 + $0x1944] sm:$0xf]  ;;  %v14321_v37 = vor.u32 %v17810_v14, %v14318_v15  ;;  %7222 = vmatpush.bf16.msrb.mxu3 %v15121_v17  ;;  %v6958_v15 = vadd.f32 %v6957_v11, %v6945_v62  ;;  %v17191_v11 = vld [vmem:[#allocation5 + $0x3e4] sm:$0xf0] }
 0x1dd   :  { %v14574_v18 = vld [vmem:[#allocation5 + $0x1960] sm:$0xf0] }
 0x1de   :  { %v17938_v22 = vld [vmem:[#allocation5 + $0x1b44] sm:$0xf]  ;;  %v14577_v38 = vor.u32 %v17874_v16, %v14574_v18  ;;  %7184 = vmatpush.bf16.msrb.mxu0 %v14321_v37  ;;  %v6970_v16 = vpop.f32.mrf.mxu3 }
 0x1df   :  { %v14830_v25 = vld [vmem:[#allocation5 + $0x1b60] sm:$0xf0] }
 0x1e0   :  { %v18002_v33 = vld [vmem:[#allocation5 + $0x1d44] sm:$0xf]  ;;  %v14833_v40 = vor.u32 %v17938_v22, %v14830_v25  ;;  %7197 = vmatpush.bf16.msrb.mxu1 %v14577_v38  ;;  %v6933_v22 = vpop.f32.mrf.mxu0 }
 0x1e1   :  { %v15086_v35 = vld [vmem:[#allocation5 + $0x1d60] sm:$0xf0] }
 0x1e2   :  { %v17802_v41 = vld [vmem:[#allocation5 + $0x1704] sm:$0xf]  ;;  %v15089_v47 = vor.u32 %v18002_v33, %v15086_v35  ;;  %7210 = vmatpush.bf16.msrb.mxu2 %v14833_v40  ;;  %v6946_v33 = vpop.f32.mrf.mxu1  ;;  %v18998_v35 = vadd.f32 %v6970_v16, %v6958_v15 }
 0x1e3   :  { %v14286_v44 = vld [vmem:[#allocation5 + $0x1720] sm:$0xf0]  ;;  %v11540_v33 = vld [vmem:[#allocation5 + $0x188] sm:$0xf] }
 0x1e4   :  { %v17866_v46 = vld [vmem:[#allocation5 + $0x1904] sm:$0xf]  ;;  %v14289_v55 = vor.u32 %v17802_v41, %v14286_v44  ;;  %7223 = vmatpush.bf16.msrb.mxu3 %v15089_v47 }
 0x1e5   :  { %v14542_v48 = vld [vmem:[#allocation5 + $0x1920] sm:$0xf0] }
 0x1e6   :  { %v17930_v49 = vld [vmem:[#allocation5 + $0x1b04] sm:$0xf]  ;;  %v14545_v57 = vor.u32 %v17866_v46, %v14542_v48  ;;  %7185 = vmatpush.bf16.msrb.mxu0 %v14289_v55 }
 0x1e7   :  { %v14798_v50 = vld [vmem:[#allocation5 + $0x1b20] sm:$0xf0] }
 0x1e8   :  { %v17994_v52 = vld [vmem:[#allocation5 + $0x1d04] sm:$0xf]  ;;  %v14801_v58 = vor.u32 %v17930_v49, %v14798_v50  ;;  %7198 = vmatpush.bf16.msrb.mxu1 %v14545_v57 }
 0x1e9   :  { %v15054_v53 = vld [vmem:[#allocation5 + $0x1d20] sm:$0xf0] }
 0x1ea   :  { %v17794_v59 = vld [vmem:[#allocation5 + $0x16c4] sm:$0xf]  ;;  %v15057_v61 = vor.u32 %v17994_v52, %v15054_v53  ;;  %7211 = vmatpush.bf16.msrb.mxu2 %v14801_v58 }
 0x1eb   :  { %v14254_v60 = vld [vmem:[#allocation5 + $0x16e0] sm:$0xf0] }
 0x1ec   :  { %v17858_v27 = vld [vmem:[#allocation5 + $0x18c4] sm:$0xf]  ;;  %v14257_v4 = vor.u32 %v17794_v59, %v14254_v60  ;;  %7224 = vmatpush.bf16.msrb.mxu3 %v15057_v61 }
 0x1ed   :  { %v14510_v63 = vld [vmem:[#allocation5 + $0x18e0] sm:$0xf0] }
 0x1ee   :  { %v17922_v0 = vld [vmem:[#allocation5 + $0x1ac4] sm:$0xf]  ;;  %v14513_v5 = vor.u32 %v17858_v27, %v14510_v63  ;;  %7186 = vmatpush.bf16.msrb.mxu0 %v14257_v4  ;;  %v6959_v63 = vpop.f32.mrf.mxu2 }
 0x1ef   :  { %v14766_v1 = vld [vmem:[#allocation5 + $0x1ae0] sm:$0xf0]  ;;  %v11476_v63 = vld [vmem:[#allocation5 + $0x108] sm:$0xf] }
 0x1f0   :  { %v17986_v2 = vld [vmem:[#allocation5 + $0x1cc4] sm:$0xf]  ;;  %v14769_v6 = vor.u32 %v17922_v0, %v14766_v1  ;;  %7199 = vmatpush.bf16.msrb.mxu1 %v14513_v5 }
 0x1f1   :  { %v15022_v3 = vld [vmem:[#allocation5 + $0x1ce0] sm:$0xf0] }
 0x1f2   :  { %v17786_v7 = vld [vmem:[#allocation5 + $0x1684] sm:$0xf]  ;;  %v15025_v10 = vor.u32 %v17986_v2, %v15022_v3  ;;  %7212 = vmatpush.bf16.msrb.mxu2 %v14769_v6  ;;  %v6972_v3 = vpop.f32.mrf.mxu3  ;;  %v11572_v6 = vld [vmem:[#allocation5 + $0x1c8] sm:$0xf] }
 0x1f3   :  { %v14222_v8 = vld [vmem:[#allocation5 + $0x16a0] sm:$0xf0]  ;;  %v17167_v3 = vld [vmem:[#allocation5 + $0x324] sm:$0xf0] }
 0x1f4   :  { %v17850_v9 = vld [vmem:[#allocation5 + $0x1884] sm:$0xf]  ;;  %v14225_v25 = vor.u32 %v17786_v7, %v14222_v8  ;;  %7225 = vmatpush.bf16.msrb.mxu3 %v15025_v10  ;;  %v17127_v7 = vld [vmem:[#allocation5 + $0x1e4] sm:$0xf0] }
 0x1f5   :  { %v14478_v12 = vld [vmem:[#allocation5 + $0x18a0] sm:$0xf0]  ;;  %v11828_v10 = vld [vmem:[#allocation5 + $0x3c8] sm:$0xf]  ;;  %v11573_v15 = vor.u32 %v17127_v7, %v11572_v6  ;;  %v6996_v6 = vpop.f32.mrf.mxu1 }
 0x1f6   :  { %v17914_v13 = vld [vmem:[#allocation5 + $0x1a84] sm:$0xf]  ;;  %v14481_v37 = vor.u32 %v17850_v9, %v14478_v12  ;;  %7187 = vmatpush.bf16.msrb.mxu0 %v14225_v25  ;;  %v11829_v22 = vor.u32 %v17191_v11, %v11828_v10 }
 0x1f7   :  { %v14734_v14 = vld [vmem:[#allocation5 + $0x1aa0] sm:$0xf0] }
 0x1f8   :  { %v17978_v17 = vld [vmem:[#allocation5 + $0x1c84] sm:$0xf]  ;;  %v14737_v38 = vor.u32 %v17914_v13, %v14734_v14  ;;  %7200 = vmatpush.bf16.msrb.mxu1 %v14481_v37  ;;  %v17119_v37 = vld [vmem:[#allocation5 + $0x1a4] sm:$0xf0] }
 0x1f9   :  { %v14990_v18 = vld [vmem:[#allocation5 + $0x1ca0] sm:$0xf0] }
 0x1fa   :  { %v17778_v40 = vld [vmem:[#allocation5 + $0x1644] sm:$0xf]  ;;  %v14993_v46 = vor.u32 %v17978_v17, %v14990_v18  ;;  %7213 = vmatpush.bf16.msrb.mxu2 %v14737_v38  ;;  %v11796_v38 = vld [vmem:[#allocation5 + $0x388] sm:$0xf] }
 0x1fb   :  { %v14190_v41 = vld [vmem:[#allocation5 + $0x1660] sm:$0xf0] }
 0x1fc   :  { %v17842_v44 = vld [vmem:[#allocation5 + $0x1844] sm:$0xf]  ;;  %v14193_v52 = vor.u32 %v17778_v40, %v14190_v41  ;;  %7226 = vmatpush.bf16.msrb.mxu3 %v14993_v46  ;;  %v17183_v40 = vld [vmem:[#allocation5 + $0x3a4] sm:$0xf0]  ;;  %v11541_v46 = vor.u32 %v17119_v37, %v11540_v33 }
 0x1fd   :  { %v14446_v47 = vld [vmem:[#allocation5 + $0x1860] sm:$0xf0] }
 0x1fe   :  { %v17906_v48 = vld [vmem:[#allocation5 + $0x1a44] sm:$0xf]  ;;  %v14449_v55 = vor.u32 %v17842_v44, %v14446_v47  ;;  %7188 = vmatpush.bf16.msrb.mxu0 %v14193_v52  ;;  %v11508_v52 = vld [vmem:[#allocation5 + $0x148] sm:$0xf] }
 0x1ff   :  { %v14702_v49 = vld [vmem:[#allocation5 + $0x1a60] sm:$0xf0] }
 0x200   :  { %v17970_v50 = vld [vmem:[#allocation5 + $0x1c44] sm:$0xf]  ;;  %v14705_v56 = vor.u32 %v17906_v48, %v14702_v49  ;;  %7201 = vmatpush.bf16.msrb.mxu1 %v14449_v55  ;;  %v17175_v55 = vld [vmem:[#allocation5 + $0x364] sm:$0xf0] }
 0x201   :  { %v14958_v51 = vld [vmem:[#allocation5 + $0x1c60] sm:$0xf0] }
 0x202   :  { %v17770_v53 = vld [vmem:[#allocation5 + $0x1604] sm:$0xf]  ;;  %v14961_v60 = vor.u32 %v17970_v50, %v14958_v51  ;;  %7214 = vmatpush.bf16.msrb.mxu2 %v14705_v56  ;;  %v11797_v50 = vor.u32 %v17183_v40, %v11796_v38 }
 0x203   :  { %v14158_v54 = vld [vmem:[#allocation5 + $0x1620] sm:$0xf0] }
 0x204   :  { %v17834_v57 = vld [vmem:[#allocation5 + $0x1804] sm:$0xf]  ;;  %v14161_v4 = vor.u32 %v17770_v53, %v14158_v54  ;;  %7227 = vmatpush.bf16.msrb.mxu3 %v14961_v60  ;;  %v17111_v53 = vld [vmem:[#allocation5 + $0x164] sm:$0xf0] }
 0x205   :  { %v14414_v58 = vld [vmem:[#allocation5 + $0x1820] sm:$0xf0]  ;;  %v11764_v54 = vld [vmem:[#allocation5 + $0x348] sm:$0xf] }
 0x206   :  { %v17898_v59 = vld [vmem:[#allocation5 + $0x1a04] sm:$0xf]  ;;  %v14417_v8 = vor.u32 %v17834_v57, %v14414_v58  ;;  %7189 = vmatpush.bf16.msrb.mxu0 %v14161_v4  ;;  %v11509_v58 = vor.u32 %v17111_v53, %v11508_v52 }
 0x207   :  { %v14670_v27 = vld [vmem:[#allocation5 + $0x1a20] sm:$0xf0] }
 0x208   :  { %v17962_v61 = vld [vmem:[#allocation5 + $0x1c04] sm:$0xf]  ;;  %v14673_v9 = vor.u32 %v17898_v59, %v14670_v27  ;;  %7202 = vmatpush.bf16.msrb.mxu1 %v14417_v8 }
 0x209   :  { %v14926_v62 = vld [vmem:[#allocation5 + $0x1c20] sm:$0xf0]  ;;  %7190 = vmatmul.bf16.vlgmr.msrb.gmra.mxu0 %v18960_v34 }
 0x20a   :  { %v18082_v0 = vld [vmem:[#allocation5 + $0x1fc4] sm:$0xf]  ;;  %v14929_v12 = vor.u32 %v17962_v61, %v14926_v62  ;;  %7215 = vmatpush.bf16.msrb.mxu2 %v14673_v9  ;;  %v11765_v61 = vor.u32 %v17175_v55, %v11764_v54  ;;  %v6998_v54 = vpop.f32.mrf.mxu1 }
 0x20b   :  { %v15406_v1 = vld [vmem:[#allocation5 + $0x1fe0] sm:$0xf0]  ;;  %7203 = vmatmul.bf16.vlgmr.msrb.gmra.mxu1 %v18966_v24  ;;  %v12564_v54 = vld [vmem:[#allocation5 + $0x988] sm:$0xf] }
 0x20c   :  { %v18146_v2 = vld [vmem:[#allocation5 + $0x21c4] sm:$0xf]  ;;  %v15409_v13 = vor.u32 %v18082_v0, %v15406_v1  ;;  %7228 = vmatpush.bf16.msrb.mxu3 %v14929_v12  ;;  %v17103_v0 = vld [vmem:[#allocation5 + $0x124] sm:$0xf0]  ;;  %v6983_v1 = vpop.f32.mrf.mxu0 }
 0x20d   :  { %v15662_v5 = vld [vmem:[#allocation5 + $0x21e0] sm:$0xf0]  ;;  %7216 = vmatmul.bf16.vlgmr.msrb.gmra.mxu2 %v18970_v32  ;;  %v6984_v4 = vadd.f32 %v6983_v1, %v18998_v35  ;;  %v11477_v8 = vor.u32 %v17103_v0, %v11476_v63  ;;  %v17079_v63 = vld [vmem:[#allocation5 + $0x64] sm:$0xf0] }
 0x20e   :  { %v15665_v14 = vor.u32 %v18146_v2, %v15662_v5  ;;  %v18074_v16 = vld [vmem:[#allocation5 + $0x1f84] sm:$0xf]  ;;  %7234 = vmatpush.bf16.msra.mxu0 %v15409_v13  ;;  %7260 = vmatpush.bf16.msra.mxu2 %v11573_v15  ;;  %v11732_v2 = vld [vmem:[#allocation5 + $0x308] sm:$0xf] }
 0x20f   :  { %v15374_v17 = vld [vmem:[#allocation5 + $0x1fa0] sm:$0xf0]  ;;  %7229 = vmatmul.bf16.vlgmr.msrb.gmra.mxu3 %v18968_v29  ;;  %v11733_v12 = vor.u32 %v17167_v3, %v11732_v2  ;;  %v6997_v13 = vadd.f32 %v6996_v6, %v6984_v4  ;;  %v11444_v15 = vld [vmem:[#allocation5 + $0xc8] sm:$0xf] }
 0x210   :  { %v18138_v18 = vld [vmem:[#allocation5 + $0x2184] sm:$0xf]  ;;  %v15377_v41 = vor.u32 %v18074_v16, %v15374_v17  ;;  %7247 = vmatpush.bf16.msra.mxu1 %v15665_v14  ;;  %7273 = vmatpush.bf16.msra.mxu3 %v11829_v22  ;;  %v17095_v16 = vld [vmem:[#allocation5 + $0xe4] sm:$0xf0] }
 0x211   :  { %v15630_v25 = vld [vmem:[#allocation5 + $0x21a0] sm:$0xf0]  ;;  %v11700_v17 = vld [vmem:[#allocation5 + $0x2c8] sm:$0xf] }
 0x212   :  { %v15633_v44 = vor.u32 %v18138_v18, %v15630_v25  ;;  %v18066_v47 = vld [vmem:[#allocation5 + $0x1f44] sm:$0xf]  ;;  %7235 = vmatpush.bf16.msra.mxu0 %v15377_v41  ;;  %7261 = vmatpush.bf16.msra.mxu2 %v11541_v46  ;;  %v17159_v18 = vld [vmem:[#allocation5 + $0x2e4] sm:$0xf0]  ;;  %v11445_v25 = vor.u32 %v17095_v16, %v11444_v15  ;;  %v7009_v41 = vpop.f32.mrf.mxu2 }
 0x213   :  { %v15342_v48 = vld [vmem:[#allocation5 + $0x1f60] sm:$0xf0]  ;;  %v11701_v40 = vor.u32 %v17159_v18, %v11700_v17  ;;  %v11412_v46 = vld [vmem:[#allocation5 + $0x88] sm:$0xf] }
 0x214   :  { %v18130_v49 = vld [vmem:[#allocation5 + $0x2144] sm:$0xf]  ;;  %v15345_v56 = vor.u32 %v18066_v47, %v15342_v48  ;;  %7248 = vmatpush.bf16.msra.mxu1 %v15633_v44  ;;  %7274 = vmatpush.bf16.msra.mxu3 %v11797_v50  ;;  %v17087_v47 = vld [vmem:[#allocation5 + $0xa4] sm:$0xf0]  ;;  %v7010_v48 = vadd.f32 %v7009_v41, %v6997_v13  ;;  %v6985_v52 = vpop.f32.mrf.mxu0 }
 0x215   :  { %v15598_v51 = vld [vmem:[#allocation5 + $0x2160] sm:$0xf0]  ;;  %v11668_v50 = vld [vmem:[#allocation5 + $0x288] sm:$0xf] }
 0x216   :  { %v15601_v57 = vor.u32 %v18130_v49, %v15598_v51  ;;  %v18058_v59 = vld [vmem:[#allocation5 + $0x1f04] sm:$0xf]  ;;  %7236 = vmatpush.bf16.msra.mxu0 %v15345_v56  ;;  %7262 = vmatpush.bf16.msra.mxu2 %v11509_v58  ;;  %v7022_v49 = vpop.f32.mrf.mxu3  ;;  %v17151_v51 = vld [vmem:[#allocation5 + $0x2a4] sm:$0xf0] }
 0x217   :  { %v15310_v60 = vld [vmem:[#allocation5 + $0x1f20] sm:$0xf0]  ;;  %v19005_v55 = vadd.f32 %v7022_v49, %v7010_v48  ;;  %v11636_v0 = vld [vmem:[#allocation5 + $0x248] sm:$0xf] }
 0x218   :  { %v18122_v27 = vld [vmem:[#allocation5 + $0x2104] sm:$0xf]  ;;  %v15313_v5 = vor.u32 %v18058_v59, %v15310_v60  ;;  %7249 = vmatpush.bf16.msra.mxu1 %v15601_v57  ;;  %7275 = vmatpush.bf16.msra.mxu3 %v11765_v61  ;;  %v11413_v57 = vor.u32 %v17087_v47, %v11412_v46  ;;  %v17143_v1 = vld [vmem:[#allocation5 + $0x264] sm:$0xf0] }
 0x219   :  { %v15566_v62 = vld [vmem:[#allocation5 + $0x2120] sm:$0xf0]  ;;  %v17135_v13 = vld [vmem:[#allocation5 + $0x224] sm:$0xf0] }
 0x21a   :  { %v15569_v7 = vor.u32 %v18122_v27, %v15566_v62  ;;  %v18050_v9 = vld [vmem:[#allocation5 + $0x1ec4] sm:$0xf]  ;;  %7237 = vmatpush.bf16.msra.mxu0 %v15313_v5  ;;  %7263 = vmatpush.bf16.msra.mxu2 %v11477_v8  ;;  %v11669_v27 = vor.u32 %v17151_v51, %v11668_v50  ;;  %v11380_v62 = vld [vmem:[#allocation5 + $0x48] sm:$0xf] }
 0x21b   :  { %v15278_v10 = vld [vmem:[#allocation5 + $0x1ee0] sm:$0xf0]  ;;  %v11381_v6 = vor.u32 %v17079_v63, %v11380_v62  ;;  %v12084_v15 = vld [vmem:[#allocation5 + $0x5c8] sm:$0xf] }
 0x21c   :  { %v18114_v11 = vld [vmem:[#allocation5 + $0x20c4] sm:$0xf]  ;;  %v15281_v22 = vor.u32 %v18050_v9, %v15278_v10  ;;  %7250 = vmatpush.bf16.msra.mxu1 %v15569_v7  ;;  %7276 = vmatpush.bf16.msra.mxu3 %v11733_v12  ;;  %v11348_v9 = vld [vmem:[#allocation5 + $0x8] sm:$0xf]  ;;  %v11637_v10 = vor.u32 %v17143_v1, %v11636_v0 }
 0x21d   :  { %v15534_v14 = vld [vmem:[#allocation5 + $0x20e0] sm:$0xf0]  ;;  %v11604_v12 = vld [vmem:[#allocation5 + $0x208] sm:$0xf] }
 0x21e   :  { %v15537_v35 = vor.u32 %v18114_v11, %v15534_v14  ;;  %v18042_v33 = vld [vmem:[#allocation5 + $0x1e84] sm:$0xf]  ;;  %7238 = vmatpush.bf16.msra.mxu0 %v15281_v22  ;;  %7264 = vmatpush.bf16.msra.mxu2 %v11445_v25  ;;  %v17071_v11 = vld [vmem:[#allocation5 + $0x24] sm:$0xf0]  ;;  %v7011_v14 = vpop.f32.mrf.mxu2  ;;  %v7024_v18 = vpop.f32.mrf.mxu3 }
 0x21f   :  { %v15246_v37 = vld [vmem:[#allocation5 + $0x1ea0] sm:$0xf0]  ;;  %v17255_v16 = vld [vmem:[#allocation5 + $0x5e4] sm:$0xf0] }
 0x220   :  { %v18106_v38 = vld [vmem:[#allocation5 + $0x2084] sm:$0xf]  ;;  %v15249_v53 = vor.u32 %v18042_v33, %v15246_v37  ;;  %7251 = vmatpush.bf16.msra.mxu1 %v15537_v35  ;;  %7277 = vmatpush.bf16.msra.mxu3 %v11701_v40  ;;  %v12340_v17 = vld [vmem:[#allocation5 + $0x7c8] sm:$0xf]  ;;  %v12085_v46 = vor.u32 %v17255_v16, %v12084_v15  ;;  %v7035_v16 = vpop.f32.mrf.mxu0 }
 0x221   :  { %v15502_v44 = vld [vmem:[#allocation5 + $0x20a0] sm:$0xf0]  ;;  %v17319_v35 = vld [vmem:[#allocation5 + $0x7e4] sm:$0xf0] }
 0x222   :  { %v15505_v56 = vor.u32 %v18106_v38, %v15502_v44  ;;  %v18034_v58 = vld [vmem:[#allocation5 + $0x1e44] sm:$0xf]  ;;  %7239 = vmatpush.bf16.msra.mxu0 %v15249_v53  ;;  %7265 = vmatpush.bf16.msra.mxu2 %v11413_v57  ;;  %v12596_v25 = vld [vmem:[#allocation5 + $0x9c8] sm:$0xf]  ;;  %v11349_v38 = vor.u32 %v17071_v11, %v11348_v9  ;;  %v11605_v44 = vor.u32 %v17135_v13, %v11604_v12 }
 0x223   :  { %v15214_v59 = vld [vmem:[#allocation5 + $0x1e60] sm:$0xf0]  ;;  %v17383_v33 = vld [vmem:[#allocation5 + $0x9e4] sm:$0xf0]  ;;  %v12341_v47 = vor.u32 %v17319_v35, %v12340_v17 }
 0x224   :  { %v18098_v60 = vld [vmem:[#allocation5 + $0x2044] sm:$0xf]  ;;  %v15217_v2 = vor.u32 %v18034_v58, %v15214_v59  ;;  %7252 = vmatpush.bf16.msra.mxu1 %v15505_v56  ;;  %7278 = vmatpush.bf16.msra.mxu3 %v11669_v27  ;;  %v12852_v40 = vld [vmem:[#allocation5 + $0xbc8] sm:$0xf]  ;;  %v12597_v48 = vor.u32 %v17383_v33, %v12596_v25  ;;  %v19012_v25 = vadd.f32 %v7035_v16, %v19005_v55 }
 0x225   :  { %v15470_v61 = vld [vmem:[#allocation5 + $0x2060] sm:$0xf0]  ;;  %v17447_v41 = vld [vmem:[#allocation5 + $0xbe4] sm:$0xf0] }
 0x226   :  { %v18026_v3 = vld [vmem:[#allocation5 + $0x1e04] sm:$0xf]  ;;  %v15473_v5 = vor.u32 %v18098_v60, %v15470_v61  ;;  %7240 = vmatpush.bf16.msra.mxu0 %v15217_v2  ;;  %7266 = vmatpush.bf16.msra.mxu2 %v11381_v6  ;;  %v12052_v49 = vld [vmem:[#allocation5 + $0x588] sm:$0xf]  ;;  %v12853_v52 = vor.u32 %v17447_v41, %v12852_v40 }
 0x227   :  { %v15182_v4 = vld [vmem:[#allocation5 + $0x1e20] sm:$0xf0]  ;;  %v17247_v50 = vld [vmem:[#allocation5 + $0x5a4] sm:$0xf0] }
 0x228   :  { %v18090_v7 = vld [vmem:[#allocation5 + $0x2004] sm:$0xf]  ;;  %v15185_v22 = vor.u32 %v18026_v3, %v15182_v4  ;;  %7253 = vmatpush.bf16.msra.mxu1 %v15473_v5  ;;  %7279 = vmatpush.bf16.msra.mxu3 %v11637_v10  ;;  %v12308_v51 = vld [vmem:[#allocation5 + $0x788] sm:$0xf]  ;;  %v12053_v59 = vor.u32 %v17247_v50, %v12052_v49 }
 0x229   :  { %v15438_v8 = vld [vmem:[#allocation5 + $0x2020] sm:$0xf0]  ;;  %v17311_v53 = vld [vmem:[#allocation5 + $0x7a4] sm:$0xf0] }
 0x22a   :  { %v15441_v37 = vor.u32 %v18090_v7, %v15438_v8  ;;  %7241 = vmatpush.bf16.msra.mxu0 %v15185_v22  ;;  %v17375_v56 = vld [vmem:[#allocation5 + $0x9a4] sm:$0xf0]  ;;  %7267 = vmatpush.bf16.msra.mxu2 %v11349_v38  ;;  %v12309_v60 = vor.u32 %v17311_v53, %v12308_v51  ;;  %v18521_v22 = vld [vmem:[#allocation7] sm:$0xff] }
 0x22b   :  { %v12820_v57 = vld [vmem:[#allocation5 + $0xb88] sm:$0xf]  ;;  %v12565_v27 = vor.u32 %v17375_v56, %v12564_v54  ;;  %v1303_v35 = vperm.slane %v18521_v22, 1 }
 0x22c   :  { %7254 = vmatpush.bf16.msra.mxu1 %v15441_v37  ;;  %v17439_v58 = vld [vmem:[#allocation5 + $0xba4] sm:$0xf0]  ;;  %7280 = vmatpush.bf16.msra.mxu3 %v11605_v44 }
 0x22d   :  { %v12020_v61 = vld [vmem:[#allocation5 + $0x548] sm:$0xf]  ;;  %7242 = vmatmul.bf16.vlgmr.msra.gmra.mxu0 %v18972_v36  ;;  %v12821_v0 = vor.u32 %v17439_v58, %v12820_v57  ;;  %7268 = vmatmul.bf16.vlgmr.msra.gmra.mxu2 %v18932_v20 }
 0x22e   :  { %7286 = vmatpush.bf16.msrb.mxu0 %v12085_v46  ;;  %7312 = vmatpush.bf16.msrb.mxu2 %v12597_v48  ;;  %v17239_v62 = vld [vmem:[#allocation5 + $0x564] sm:$0xf0]  ;;  %v7048_v46 = vpop.f32.mrf.mxu1 }
 0x22f   :  { %v12276_v63 = vld [vmem:[#allocation5 + $0x748] sm:$0xf]  ;;  %7255 = vmatmul.bf16.vlgmr.msra.gmra.mxu1 %v18978_v28  ;;  %v12021_v6 = vor.u32 %v17239_v62, %v12020_v61  ;;  %7281 = vmatmul.bf16.vlgmr.msra.gmra.mxu3 %v18936_v23  ;;  %v7049_v53 = vadd.f32 %v7048_v46, %v1303_v35 }
 0x230   :  { %7299 = vmatpush.bf16.msrb.mxu1 %v12341_v47  ;;  %7325 = vmatpush.bf16.msrb.mxu3 %v12853_v52  ;;  %v17303_v1 = vld [vmem:[#allocation5 + $0x764] sm:$0xf0] }
 0x231   :  { %v12532_v2 = vld [vmem:[#allocation5 + $0x948] sm:$0xf]  ;;  %v12277_v7 = vor.u32 %v17303_v1, %v12276_v63  ;;  %v7061_v63 = vpop.f32.mrf.mxu2 }
 0x232   :  { %v17367_v3 = vld [vmem:[#allocation5 + $0x964] sm:$0xf0]  ;;  %7287 = vmatpush.bf16.msrb.mxu0 %v12053_v59  ;;  %7313 = vmatpush.bf16.msrb.mxu2 %v12565_v27 }
 0x233   :  { %v12788_v4 = vld [vmem:[#allocation5 + $0xb48] sm:$0xf]  ;;  %v12533_v8 = vor.u32 %v17367_v3, %v12532_v2  ;;  %v7062_v3 = vadd.f32 %v7061_v63, %v7049_v53 }
 0x234   :  { %v17431_v5 = vld [vmem:[#allocation5 + $0xb64] sm:$0xf0]  ;;  %7300 = vmatpush.bf16.msrb.mxu1 %v12309_v60  ;;  %7326 = vmatpush.bf16.msrb.mxu3 %v12821_v0  ;;  %v7074_v0 = vpop.f32.mrf.mxu3 }
 0x235   :  { %v11988_v9 = vld [vmem:[#allocation5 + $0x508] sm:$0xf]  ;;  %v12789_v12 = vor.u32 %v17431_v5, %v12788_v4  ;;  %v7037_v4 = vpop.f32.mrf.mxu0 }
 0x236   :  { %v17231_v10 = vld [vmem:[#allocation5 + $0x524] sm:$0xf0]  ;;  %7288 = vmatpush.bf16.msrb.mxu0 %v12021_v6  ;;  %7314 = vmatpush.bf16.msrb.mxu2 %v12533_v8 }
 0x237   :  { %v12244_v11 = vld [vmem:[#allocation5 + $0x708] sm:$0xf]  ;;  %v11989_v33 = vor.u32 %v17231_v10, %v11988_v9 }
 0x238   :  { %v17295_v13 = vld [vmem:[#allocation5 + $0x724] sm:$0xf0]  ;;  %7301 = vmatpush.bf16.msrb.mxu1 %v12277_v7  ;;  %7327 = vmatpush.bf16.msrb.mxu3 %v12789_v12  ;;  %v7050_v12 = vpop.f32.mrf.mxu1 }
 0x239   :  { %v12500_v14 = vld [vmem:[#allocation5 + $0x908] sm:$0xf]  ;;  %v12245_v37 = vor.u32 %v17295_v13, %v12244_v11  ;;  %v19014_v11 = vadd.f32 %v7074_v0, %v7062_v3 }
 0x23a   :  { %v17359_v15 = vld [vmem:[#allocation5 + $0x924] sm:$0xf0]  ;;  %7289 = vmatpush.bf16.msrb.mxu0 %v11989_v33 }
 0x23b   :  { %v12756_v17 = vld [vmem:[#allocation5 + $0xb08] sm:$0xf]  ;;  %v12501_v38 = vor.u32 %v17359_v15, %v12500_v14 }
 0x23c   :  { %v17423_v18 = vld [vmem:[#allocation5 + $0xb24] sm:$0xf0]  ;;  %7302 = vmatpush.bf16.msrb.mxu1 %v12245_v37 }
 0x23d   :  { %v11956_v40 = vld [vmem:[#allocation5 + $0x4c8] sm:$0xf]  ;;  %v12757_v47 = vor.u32 %v17423_v18, %v12756_v17  ;;  %7315 = vmatpush.bf16.msrb.mxu2 %v12501_v38 }
 0x23e   :  { %v17223_v41 = vld [vmem:[#allocation5 + $0x4e4] sm:$0xf0] }
 0x23f   :  { %v12212_v44 = vld [vmem:[#allocation5 + $0x6c8] sm:$0xf]  ;;  %v11957_v55 = vor.u32 %v17223_v41, %v11956_v40  ;;  %7328 = vmatpush.bf16.msrb.mxu3 %v12757_v47 }
 0x240   :  { %v17287_v48 = vld [vmem:[#allocation5 + $0x6e4] sm:$0xf0] }
 0x241   :  { %v12468_v49 = vld [vmem:[#allocation5 + $0x8c8] sm:$0xf]  ;;  %v12213_v54 = vor.u32 %v17287_v48, %v12212_v44  ;;  %7290 = vmatpush.bf16.msrb.mxu0 %v11957_v55 }
 0x242   :  { %v17351_v50 = vld [vmem:[#allocation5 + $0x8e4] sm:$0xf0] }
 0x243   :  { %v12724_v51 = vld [vmem:[#allocation5 + $0xac8] sm:$0xf]  ;;  %v12469_v56 = vor.u32 %v17351_v50, %v12468_v49  ;;  %7303 = vmatpush.bf16.msrb.mxu1 %v12213_v54  ;;  %v7063_v50 = vpop.f32.mrf.mxu2 }
 0x244   :  { %v17415_v52 = vld [vmem:[#allocation5 + $0xae4] sm:$0xf0] }
 0x245   :  { %v11924_v57 = vld [vmem:[#allocation5 + $0x488] sm:$0xf]  ;;  %v12725_v60 = vor.u32 %v17415_v52, %v12724_v51  ;;  %7316 = vmatpush.bf16.msrb.mxu2 %v12469_v56  ;;  %v7076_v51 = vpop.f32.mrf.mxu3 }
 0x246   :  { %v17215_v58 = vld [vmem:[#allocation5 + $0x4a4] sm:$0xf0] }
 0x247   :  { %v12180_v59 = vld [vmem:[#allocation5 + $0x688] sm:$0xf]  ;;  %v11925_v5 = vor.u32 %v17215_v58, %v11924_v57  ;;  %7329 = vmatpush.bf16.msrb.mxu3 %v12725_v60 }
 0x248   :  { %v17279_v27 = vld [vmem:[#allocation5 + $0x6a4] sm:$0xf0] }
 0x249   :  { %v12436_v61 = vld [vmem:[#allocation5 + $0x888] sm:$0xf]  ;;  %v12181_v6 = vor.u32 %v17279_v27, %v12180_v59  ;;  %7291 = vmatpush.bf16.msrb.mxu0 %v11925_v5 }
 0x24a   :  { %v17343_v62 = vld [vmem:[#allocation5 + $0x8a4] sm:$0xf0] }
 0x24b   :  { %v12692_v1 = vld [vmem:[#allocation5 + $0xa88] sm:$0xf]  ;;  %v12437_v7 = vor.u32 %v17343_v62, %v12436_v61  ;;  %7304 = vmatpush.bf16.msrb.mxu1 %v12181_v6 }
 0x24c   :  { %v17407_v2 = vld [vmem:[#allocation5 + $0xaa4] sm:$0xf0] }
 0x24d   :  { %v11892_v8 = vld [vmem:[#allocation5 + $0x448] sm:$0xf]  ;;  %v12693_v13 = vor.u32 %v17407_v2, %v12692_v1  ;;  %7317 = vmatpush.bf16.msrb.mxu2 %v12437_v7 }
 0x24e   :  { %v17207_v9 = vld [vmem:[#allocation5 + $0x464] sm:$0xf0] }
 0x24f   :  { %v12148_v10 = vld [vmem:[#allocation5 + $0x648] sm:$0xf]  ;;  %v11893_v22 = vor.u32 %v17207_v9, %v11892_v8  ;;  %7330 = vmatpush.bf16.msrb.mxu3 %v12693_v13 }
 0x250   :  { %v17271_v14 = vld [vmem:[#allocation5 + $0x664] sm:$0xf0] }
 0x251   :  { %v12404_v15 = vld [vmem:[#allocation5 + $0x848] sm:$0xf]  ;;  %v12149_v37 = vor.u32 %v17271_v14, %v12148_v10  ;;  %7292 = vmatpush.bf16.msrb.mxu0 %v11893_v22 }
 0x252   :  { %v17335_v16 = vld [vmem:[#allocation5 + $0x864] sm:$0xf0] }
 0x253   :  { %v12660_v17 = vld [vmem:[#allocation5 + $0xa48] sm:$0xf]  ;;  %v12405_v38 = vor.u32 %v17335_v16, %v12404_v15  ;;  %7305 = vmatpush.bf16.msrb.mxu1 %v12149_v37 }
 0x254   :  { %v17399_v18 = vld [vmem:[#allocation5 + $0xa64] sm:$0xf0] }
 0x255   :  { %v11860_v35 = vld [vmem:[#allocation5 + $0x408] sm:$0xf]  ;;  %v12661_v46 = vor.u32 %v17399_v18, %v12660_v17  ;;  %7318 = vmatpush.bf16.msrb.mxu2 %v12405_v38 }
 0x256   :  { %v17199_v33 = vld [vmem:[#allocation5 + $0x424] sm:$0xf0] }
 0x257   :  { %v12116_v40 = vld [vmem:[#allocation5 + $0x608] sm:$0xf]  ;;  %v11861_v54 = vor.u32 %v17199_v33, %v11860_v35  ;;  %7331 = vmatpush.bf16.msrb.mxu3 %v12661_v46 }
 0x258   :  { %v17263_v41 = vld [vmem:[#allocation5 + $0x624] sm:$0xf0] }
 0x259   :  { %v12372_v44 = vld [vmem:[#allocation5 + $0x808] sm:$0xf]  ;;  %v12117_v59 = vor.u32 %v17263_v41, %v12116_v40  ;;  %7293 = vmatpush.bf16.msrb.mxu0 %v11861_v54 }
 0x25a   :  { %v17327_v47 = vld [vmem:[#allocation5 + $0x824] sm:$0xf0] }
 0x25b   :  { %v12628_v48 = vld [vmem:[#allocation5 + $0xa08] sm:$0xf]  ;;  %v12373_v60 = vor.u32 %v17327_v47, %v12372_v44  ;;  %7306 = vmatpush.bf16.msrb.mxu1 %v12117_v59 }
 0x25c   :  { %v17391_v49 = vld [vmem:[#allocation5 + $0xa24] sm:$0xf0]  ;;  %7294 = vmatmul.bf16.vlgmr.msrb.gmra.mxu0 %v18930_v19 }
 0x25d   :  { %v13108_v52 = vld [vmem:[#allocation5 + $0xdc8] sm:$0xf]  ;;  %v12629_v62 = vor.u32 %v17391_v49, %v12628_v48  ;;  %7319 = vmatpush.bf16.msrb.mxu2 %v12373_v60 }
 0x25e   :  { %v17511_v53 = vld [vmem:[#allocation5 + $0xde4] sm:$0xf0]  ;;  %7307 = vmatmul.bf16.vlgmr.msrb.gmra.mxu1 %v18934_v21 }
 0x25f   :  { %v13364_v55 = vld [vmem:[#allocation5 + $0xfc8] sm:$0xf]  ;;  %v13109_v63 = vor.u32 %v17511_v53, %v13108_v52  ;;  %7332 = vmatpush.bf16.msrb.mxu3 %v12629_v62  ;;  %v7100_v62 = vpop.f32.mrf.mxu1 }
 0x260   :  { %v17575_v56 = vld [vmem:[#allocation5 + $0xfe4] sm:$0xf0]  ;;  %7320 = vmatmul.bf16.vlgmr.msrb.gmra.mxu2 %v18944_v42 }
 0x261   :  { %v13620_v57 = vld [vmem:[#allocation5 + $0x11c8] sm:$0xf]  ;;  %v13365_v0 = vor.u32 %v17575_v56, %v13364_v55  ;;  %7338 = vmatpush.bf16.msra.mxu0 %v13109_v63  ;;  %v7087_v56 = vpop.f32.mrf.mxu0 }
 0x262   :  { %v17639_v58 = vld [vmem:[#allocation5 + $0x11e4] sm:$0xf0]  ;;  %7333 = vmatmul.bf16.vlgmr.msrb.gmra.mxu3 %v18948_v45 }
 0x263   :  { %v13876_v27 = vld [vmem:[#allocation5 + $0x13c8] sm:$0xf]  ;;  %v13621_v1 = vor.u32 %v17639_v58, %v13620_v57  ;;  %7351 = vmatpush.bf16.msra.mxu1 %v13365_v0 }
 0x264   :  { %v17703_v61 = vld [vmem:[#allocation5 + $0x13e4] sm:$0xf0] }
 0x265   :  { %v13076_v2 = vld [vmem:[#allocation5 + $0xd88] sm:$0xf]  ;;  %v13877_v5 = vor.u32 %v17703_v61, %v13876_v27  ;;  %7364 = vmatpush.bf16.msra.mxu2 %v13621_v1  ;;  %v7088_v61 = vadd.f32 %v7087_v56, %v19014_v11 }
 0x266   :  { %v17503_v3 = vld [vmem:[#allocation5 + $0xda4] sm:$0xf0] }
 0x267   :  { %v13332_v4 = vld [vmem:[#allocation5 + $0xf88] sm:$0xf]  ;;  %v13077_v12 = vor.u32 %v17503_v3, %v13076_v2  ;;  %7377 = vmatpush.bf16.msra.mxu3 %v13877_v5  ;;  %v7101_v5 = vadd.f32 %v7100_v62, %v7088_v61 }
 0x268   :  { %v17567_v6 = vld [vmem:[#allocation5 + $0xfa4] sm:$0xf0] }
 0x269   :  { %v13588_v7 = vld [vmem:[#allocation5 + $0x1188] sm:$0xf]  ;;  %v13333_v13 = vor.u32 %v17567_v6, %v13332_v4  ;;  %7339 = vmatpush.bf16.msra.mxu0 %v13077_v12 }
 0x26a   :  { %v17631_v8 = vld [vmem:[#allocation5 + $0x11a4] sm:$0xf0] }
 0x26b   :  { %v13844_v9 = vld [vmem:[#allocation5 + $0x1388] sm:$0xf]  ;;  %v13589_v14 = vor.u32 %v17631_v8, %v13588_v7  ;;  %7352 = vmatpush.bf16.msra.mxu1 %v13333_v13  ;;  %v7113_v13 = vpop.f32.mrf.mxu2 }
 0x26c   :  { %v17695_v10 = vld [vmem:[#allocation5 + $0x13a4] sm:$0xf0] }
 0x26d   :  { %v13044_v15 = vld [vmem:[#allocation5 + $0xd48] sm:$0xf]  ;;  %v13845_v18 = vor.u32 %v17695_v10, %v13844_v9  ;;  %7365 = vmatpush.bf16.msra.mxu2 %v13589_v14 }
 0x26e   :  { %v17495_v16 = vld [vmem:[#allocation5 + $0xd64] sm:$0xf0] }
 0x26f   :  { %v13300_v17 = vld [vmem:[#allocation5 + $0xf48] sm:$0xf]  ;;  %v13045_v40 = vor.u32 %v17495_v16, %v13044_v15  ;;  %7378 = vmatpush.bf16.msra.mxu3 %v13845_v18  ;;  %v7126_v18 = vpop.f32.mrf.mxu3 }
 0x270   :  { %v17559_v22 = vld [vmem:[#allocation5 + $0xf64] sm:$0xf0] }
 0x271   :  { %v13556_v35 = vld [vmem:[#allocation5 + $0x1148] sm:$0xf]  ;;  %v13301_v41 = vor.u32 %v17559_v22, %v13300_v17  ;;  %7340 = vmatpush.bf16.msra.mxu0 %v13045_v40  ;;  %v7114_v17 = vadd.f32 %v7113_v13, %v7101_v5 }
 0x272   :  { %v17623_v33 = vld [vmem:[#allocation5 + $0x1164] sm:$0xf0] }
 0x273   :  { %v13812_v37 = vld [vmem:[#allocation5 + $0x1348] sm:$0xf]  ;;  %v13557_v44 = vor.u32 %v17623_v33, %v13556_v35  ;;  %7353 = vmatpush.bf16.msra.mxu1 %v13301_v41  ;;  %v7115_v62 = vpop.f32.mrf.mxu2 }
 0x274   :  { %v17687_v38 = vld [vmem:[#allocation5 + $0x1364] sm:$0xf0] }
 0x275   :  { %v13012_v46 = vld [vmem:[#allocation5 + $0xd08] sm:$0xf]  ;;  %v13813_v49 = vor.u32 %v17687_v38, %v13812_v37  ;;  %7366 = vmatpush.bf16.msra.mxu2 %v13557_v44  ;;  %v19021_v37 = vadd.f32 %v7126_v18, %v7114_v17  ;;  %v7089_v38 = vpop.f32.mrf.mxu0 }
 0x276   :  { %v17487_v47 = vld [vmem:[#allocation5 + $0xd24] sm:$0xf0] }
 0x277   :  { %v13268_v48 = vld [vmem:[#allocation5 + $0xf08] sm:$0xf]  ;;  %v13013_v54 = vor.u32 %v17487_v47, %v13012_v46  ;;  %7379 = vmatpush.bf16.msra.mxu3 %v13813_v49 }
 0x278   :  { %v17551_v50 = vld [vmem:[#allocation5 + $0xf24] sm:$0xf0] }
 0x279   :  { %v13524_v51 = vld [vmem:[#allocation5 + $0x1108] sm:$0xf]  ;;  %v13269_v57 = vor.u32 %v17551_v50, %v13268_v48  ;;  %7341 = vmatpush.bf16.msra.mxu0 %v13013_v54  ;;  %v7102_v48 = vpop.f32.mrf.mxu1 }
 0x27a   :  { %v17615_v52 = vld [vmem:[#allocation5 + $0x1124] sm:$0xf0] }
 0x27b   :  { %v13780_v53 = vld [vmem:[#allocation5 + $0x1308] sm:$0xf]  ;;  %v13525_v58 = vor.u32 %v17615_v52, %v13524_v51  ;;  %7354 = vmatpush.bf16.msra.mxu1 %v13269_v57 }
 0x27c   :  { %v17679_v55 = vld [vmem:[#allocation5 + $0x1324] sm:$0xf0] }
 0x27d   :  { %v12980_v59 = vld [vmem:[#allocation5 + $0xcc8] sm:$0xf]  ;;  %v13781_v63 = vor.u32 %v17679_v55, %v13780_v53  ;;  %7367 = vmatpush.bf16.msra.mxu2 %v13525_v58 }
 0x27e   :  { %v17479_v60 = vld [vmem:[#allocation5 + $0xce4] sm:$0xf0] }
 0x27f   :  { %v13236_v27 = vld [vmem:[#allocation5 + $0xec8] sm:$0xf]  ;;  %v12981_v6 = vor.u32 %v17479_v60, %v12980_v59  ;;  %7380 = vmatpush.bf16.msra.mxu3 %v13781_v63 }
 0x280   :  { %v17543_v0 = vld [vmem:[#allocation5 + $0xee4] sm:$0xf0] }
 0x281   :  { %v13492_v1 = vld [vmem:[#allocation5 + $0x10c8] sm:$0xf]  ;;  %v13237_v7 = vor.u32 %v17543_v0, %v13236_v27  ;;  %7342 = vmatpush.bf16.msra.mxu0 %v12981_v6 }
 0x282   :  { %v17607_v2 = vld [vmem:[#allocation5 + $0x10e4] sm:$0xf0] }
 0x283   :  { %v13748_v3 = vld [vmem:[#allocation5 + $0x12c8] sm:$0xf]  ;;  %v13493_v8 = vor.u32 %v17607_v2, %v13492_v1  ;;  %7355 = vmatpush.bf16.msra.mxu1 %v13237_v7 }
 0x284   :  { %v17671_v4 = vld [vmem:[#allocation5 + $0x12e4] sm:$0xf0] }
 0x285   :  { %v12948_v9 = vld [vmem:[#allocation5 + $0xc88] sm:$0xf]  ;;  %v13749_v11 = vor.u32 %v17671_v4, %v13748_v3  ;;  %7368 = vmatpush.bf16.msra.mxu2 %v13493_v8  ;;  %v7128_v3 = vpop.f32.mrf.mxu3 }
 0x286   :  { %v17471_v10 = vld [vmem:[#allocation5 + $0xca4] sm:$0xf0] }
 0x287   :  { %v13204_v12 = vld [vmem:[#allocation5 + $0xe88] sm:$0xf]  ;;  %v12949_v33 = vor.u32 %v17471_v10, %v12948_v9  ;;  %7381 = vmatpush.bf16.msra.mxu3 %v13749_v11 }
 0x288   :  { %v17535_v14 = vld [vmem:[#allocation5 + $0xea4] sm:$0xf0] }
 0x289   :  { %v13460_v15 = vld [vmem:[#allocation5 + $0x1088] sm:$0xf]  ;;  %v13205_v40 = vor.u32 %v17535_v14, %v13204_v12  ;;  %7343 = vmatpush.bf16.msra.mxu0 %v12949_v33 }
 0x28a   :  { %v17599_v16 = vld [vmem:[#allocation5 + $0x10a4] sm:$0xf0] }
 0x28b   :  { %v13716_v22 = vld [vmem:[#allocation5 + $0x1288] sm:$0xf]  ;;  %v13461_v41 = vor.u32 %v17599_v16, %v13460_v15  ;;  %7356 = vmatpush.bf16.msra.mxu1 %v13205_v40 }
 0x28c   :  { %v17663_v35 = vld [vmem:[#allocation5 + $0x12a4] sm:$0xf0] }
 0x28d   :  { %v12916_v44 = vld [vmem:[#allocation5 + $0xc48] sm:$0xf]  ;;  %v13717_v49 = vor.u32 %v17663_v35, %v13716_v22  ;;  %7369 = vmatpush.bf16.msra.mxu2 %v13461_v41 }
 0x28e   :  { %v17463_v46 = vld [vmem:[#allocation5 + $0xc64] sm:$0xf0] }
 0x28f   :  { %v13172_v47 = vld [vmem:[#allocation5 + $0xe48] sm:$0xf]  ;;  %v12917_v54 = vor.u32 %v17463_v46, %v12916_v44  ;;  %7382 = vmatpush.bf16.msra.mxu3 %v13717_v49 }
 0x290   :  { %v17527_v50 = vld [vmem:[#allocation5 + $0xe64] sm:$0xf0] }
 0x291   :  { %v13428_v51 = vld [vmem:[#allocation5 + $0x1048] sm:$0xf]  ;;  %v13173_v58 = vor.u32 %v17527_v50, %v13172_v47  ;;  %7344 = vmatpush.bf16.msra.mxu0 %v12917_v54 }
 0x292   :  { %v17591_v52 = vld [vmem:[#allocation5 + $0x1064] sm:$0xf0] }
 0x293   :  { %v13684_v53 = vld [vmem:[#allocation5 + $0x1248] sm:$0xf]  ;;  %v13429_v59 = vor.u32 %v17591_v52, %v13428_v51  ;;  %7357 = vmatpush.bf16.msra.mxu1 %v13173_v58 }
 0x294   :  { %v17655_v55 = vld [vmem:[#allocation5 + $0x1264] sm:$0xf0] }
 0x295   :  { %v12884_v56 = vld [vmem:[#allocation5 + $0xc08] sm:$0xf]  ;;  %v13685_v63 = vor.u32 %v17655_v55, %v13684_v53  ;;  %7370 = vmatpush.bf16.msra.mxu2 %v13429_v59 }
 0x296   :  { %v17455_v57 = vld [vmem:[#allocation5 + $0xc24] sm:$0xf0] }
 0x297   :  { %v13140_v60 = vld [vmem:[#allocation5 + $0xe08] sm:$0xf]  ;;  %v12885_v7 = vor.u32 %v17455_v57, %v12884_v56  ;;  %7383 = vmatpush.bf16.msra.mxu3 %v13685_v63 }
 0x298   :  { %v17519_v27 = vld [vmem:[#allocation5 + $0xe24] sm:$0xf0] }
 0x299   :  { %v13396_v61 = vld [vmem:[#allocation5 + $0x1008] sm:$0xf]  ;;  %v13141_v12 = vor.u32 %v17519_v27, %v13140_v60  ;;  %7345 = vmatpush.bf16.msra.mxu0 %v12885_v7 }
 0x29a   :  { %v17583_v0 = vld [vmem:[#allocation5 + $0x1024] sm:$0xf0] }
 0x29b   :  { %v13652_v1 = vld [vmem:[#allocation5 + $0x1208] sm:$0xf]  ;;  %v13397_v13 = vor.u32 %v17583_v0, %v13396_v61  ;;  %7358 = vmatpush.bf16.msra.mxu1 %v13141_v12 }
 0x29c   :  { %v17647_v2 = vld [vmem:[#allocation5 + $0x1224] sm:$0xf0]  ;;  %7346 = vmatmul.bf16.vlgmr.msra.gmra.mxu0 %v18942_v39 }
 0x29d   :  { %v14132_v4 = vld [vmem:[#allocation5 + $0x15c8] sm:$0xf]  ;;  %v13653_v15 = vor.u32 %v17647_v2, %v13652_v1  ;;  %7371 = vmatpush.bf16.msra.mxu2 %v13397_v13 }
 0x29e   :  { %v17767_v5 = vld [vmem:[#allocation5 + $0x15e4] sm:$0xf0]  ;;  %7359 = vmatmul.bf16.vlgmr.msra.gmra.mxu1 %v18946_v43 }
 0x29f   :  { %v14388_v6 = vld [vmem:[#allocation5 + $0x17c8] sm:$0xf]  ;;  %v14133_v16 = vor.u32 %v17767_v5, %v14132_v4  ;;  %7384 = vmatpush.bf16.msra.mxu3 %v13653_v15  ;;  %v7139_v5 = vpop.f32.mrf.mxu0 }
 0x2a0   :  { %v17831_v8 = vld [vmem:[#allocation5 + $0x17e4] sm:$0xf0]  ;;  %7372 = vmatmul.bf16.vlgmr.msra.gmra.mxu2 %v18954_v26 }
 0x2a1   :  { %v14644_v9 = vld [vmem:[#allocation5 + $0x19c8] sm:$0xf]  ;;  %v14389_v17 = vor.u32 %v17831_v8, %v14388_v6  ;;  %7390 = vmatpush.bf16.msrb.mxu0 %v14133_v16  ;;  %v7140_v8 = vadd.f32 %v7139_v5, %v19021_v37 }
 0x2a2   :  { %v17895_v10 = vld [vmem:[#allocation5 + $0x19e4] sm:$0xf0]  ;;  %7385 = vmatmul.bf16.vlgmr.msra.gmra.mxu3 %v18958_v31 }
 0x2a3   :  { %v14900_v11 = vld [vmem:[#allocation5 + $0x1bc8] sm:$0xf]  ;;  %v14645_v18 = vor.u32 %v17895_v10, %v14644_v9  ;;  %7403 = vmatpush.bf16.msrb.mxu1 %v14389_v17  ;;  %v7152_v10 = vpop.f32.mrf.mxu1 }
 0x2a4   :  { %v17959_v14 = vld [vmem:[#allocation5 + $0x1be4] sm:$0xf0]  ;;  %v7153_v17 = vadd.f32 %v7152_v10, %v7140_v8 }
 0x2a5   :  { %v14100_v22 = vld [vmem:[#allocation5 + $0x1588] sm:$0xf]  ;;  %v14901_v38 = vor.u32 %v17959_v14, %v14900_v11  ;;  %7416 = vmatpush.bf16.msrb.mxu2 %v14645_v18 }
 0x2a6   :  { %v17759_v35 = vld [vmem:[#allocation5 + $0x15a4] sm:$0xf0] }
 0x2a7   :  { %v14356_v33 = vld [vmem:[#allocation5 + $0x1788] sm:$0xf]  ;;  %v14101_v48 = vor.u32 %v17759_v35, %v14100_v22  ;;  %7429 = vmatpush.bf16.msrb.mxu3 %v14901_v38 }
 0x2a8   :  { %v17823_v40 = vld [vmem:[#allocation5 + $0x17a4] sm:$0xf0] }
 0x2a9   :  { %v14612_v41 = vld [vmem:[#allocation5 + $0x1988] sm:$0xf]  ;;  %v14357_v49 = vor.u32 %v17823_v40, %v14356_v33  ;;  %7391 = vmatpush.bf16.msrb.mxu0 %v14101_v48 }
 0x2aa   :  { %v17887_v44 = vld [vmem:[#allocation5 + $0x19a4] sm:$0xf0] }
 0x2ab   :  { %v14868_v46 = vld [vmem:[#allocation5 + $0x1b88] sm:$0xf]  ;;  %v14613_v50 = vor.u32 %v17887_v44, %v14612_v41  ;;  %7404 = vmatpush.bf16.msrb.mxu1 %v14357_v49  ;;  %v7165_v49 = vpop.f32.mrf.mxu2 }
 0x2ac   :  { %v17951_v47 = vld [vmem:[#allocation5 + $0x1ba4] sm:$0xf0] }
 0x2ad   :  { %v14068_v51 = vld [vmem:[#allocation5 + $0x1548] sm:$0xf]  ;;  %v14869_v55 = vor.u32 %v17951_v47, %v14868_v46  ;;  %7417 = vmatpush.bf16.msrb.mxu2 %v14613_v50 }
 0x2ae   :  { %v17751_v52 = vld [vmem:[#allocation5 + $0x1564] sm:$0xf0] }
 0x2af   :  { %v14324_v53 = vld [vmem:[#allocation5 + $0x1748] sm:$0xf]  ;;  %v14069_v60 = vor.u32 %v17751_v52, %v14068_v51  ;;  %7430 = vmatpush.bf16.msrb.mxu3 %v14869_v55  ;;  %v7178_v55 = vpop.f32.mrf.mxu3 }
 0x2b0   :  { %v17815_v54 = vld [vmem:[#allocation5 + $0x1764] sm:$0xf0] }
 0x2b1   :  { %v14580_v56 = vld [vmem:[#allocation5 + $0x1948] sm:$0xf]  ;;  %v14325_v27 = vor.u32 %v17815_v54, %v14324_v53  ;;  %7392 = vmatpush.bf16.msrb.mxu0 %v14069_v60  ;;  %v7166_v53 = vadd.f32 %v7165_v49, %v7153_v17  ;;  %v17123_v49 = vld [vmem:[#allocation5 + $0x1cc] sm:$0xf] }
 0x2b2   :  { %v17879_v57 = vld [vmem:[#allocation5 + $0x1964] sm:$0xf0] }
 0x2b3   :  { %v14836_v58 = vld [vmem:[#allocation5 + $0x1b48] sm:$0xf]  ;;  %v14581_v61 = vor.u32 %v17879_v57, %v14580_v56  ;;  %7405 = vmatpush.bf16.msrb.mxu1 %v14325_v27  ;;  %v7141_v57 = vpop.f32.mrf.mxu0  ;;  %v19028_v60 = vadd.f32 %v7178_v55, %v7166_v53 }
 0x2b4   :  { %v17943_v59 = vld [vmem:[#allocation5 + $0x1b64] sm:$0xf0] }
 0x2b5   :  { %v14036_v62 = vld [vmem:[#allocation5 + $0x1508] sm:$0xf]  ;;  %v14837_v1 = vor.u32 %v17943_v59, %v14836_v58  ;;  %7418 = vmatpush.bf16.msrb.mxu2 %v14581_v61  ;;  %v7154_v59 = vpop.f32.mrf.mxu1 }
 0x2b6   :  { %v17743_v63 = vld [vmem:[#allocation5 + $0x1524] sm:$0xf0] }
 0x2b7   :  { %v14292_v0 = vld [vmem:[#allocation5 + $0x1708] sm:$0xf]  ;;  %v14037_v9 = vor.u32 %v17743_v63, %v14036_v62  ;;  %7431 = vmatpush.bf16.msrb.mxu3 %v14837_v1 }
 0x2b8   :  { %v17807_v2 = vld [vmem:[#allocation5 + $0x1724] sm:$0xf0] }
 0x2b9   :  { %v14548_v3 = vld [vmem:[#allocation5 + $0x1908] sm:$0xf]  ;;  %v14293_v12 = vor.u32 %v17807_v2, %v14292_v0  ;;  %7393 = vmatpush.bf16.msrb.mxu0 %v14037_v9 }
 0x2ba   :  { %v17871_v4 = vld [vmem:[#allocation5 + $0x1924] sm:$0xf0] }
 0x2bb   :  { %v14804_v6 = vld [vmem:[#allocation5 + $0x1b08] sm:$0xf]  ;;  %v14549_v13 = vor.u32 %v17871_v4, %v14548_v3  ;;  %7406 = vmatpush.bf16.msrb.mxu1 %v14293_v12 }
 0x2bc   :  { %v17935_v7 = vld [vmem:[#allocation5 + $0x1b24] sm:$0xf0] }
 0x2bd   :  { %v14004_v11 = vld [vmem:[#allocation5 + $0x14c8] sm:$0xf]  ;;  %v14805_v16 = vor.u32 %v17935_v7, %v14804_v6  ;;  %7419 = vmatpush.bf16.msrb.mxu2 %v14549_v13 }
 0x2be   :  { %v17735_v14 = vld [vmem:[#allocation5 + $0x14e4] sm:$0xf0] }
 0x2bf   :  { %v14260_v15 = vld [vmem:[#allocation5 + $0x16c8] sm:$0xf]  ;;  %v14005_v40 = vor.u32 %v17735_v14, %v14004_v11  ;;  %7432 = vmatpush.bf16.msrb.mxu3 %v14805_v16 }
 0x2c0   :  { %v17799_v18 = vld [vmem:[#allocation5 + $0x16e4] sm:$0xf0] }
 0x2c1   :  { %v14516_v22 = vld [vmem:[#allocation5 + $0x18c8] sm:$0xf]  ;;  %v14261_v37 = vor.u32 %v17799_v18, %v14260_v15  ;;  %7394 = vmatpush.bf16.msrb.mxu0 %v14005_v40  ;;  %v7180_v40 = vpop.f32.mrf.mxu3 }
 0x2c2   :  { %v17863_v35 = vld [vmem:[#allocation5 + $0x18e4] sm:$0xf0]  ;;  %v17099_v40 = vld [vmem:[#allocation5 + $0x10c] sm:$0xf] }
 0x2c3   :  { %v14772_v33 = vld [vmem:[#allocation5 + $0x1ac8] sm:$0xf]  ;;  %v14517_v41 = vor.u32 %v17863_v35, %v14516_v22  ;;  %7407 = vmatpush.bf16.msrb.mxu1 %v14261_v37  ;;  %v7167_v22 = vpop.f32.mrf.mxu2 }
 0x2c4   :  { %v17927_v38 = vld [vmem:[#allocation5 + $0x1ae4] sm:$0xf0] }
 0x2c5   :  { %v13972_v44 = vld [vmem:[#allocation5 + $0x1488] sm:$0xf]  ;;  %v14773_v48 = vor.u32 %v17927_v38, %v14772_v33  ;;  %7420 = vmatpush.bf16.msrb.mxu2 %v14517_v41 }
 0x2c6   :  { %v17727_v46 = vld [vmem:[#allocation5 + $0x14a4] sm:$0xf0] }
 0x2c7   :  { %v14228_v47 = vld [vmem:[#allocation5 + $0x1688] sm:$0xf]  ;;  %v13973_v58 = vor.u32 %v17727_v46, %v13972_v44  ;;  %7433 = vmatpush.bf16.msrb.mxu3 %v14773_v48 }
 0x2c8   :  { %v17791_v50 = vld [vmem:[#allocation5 + $0x16a4] sm:$0xf0] }
 0x2c9   :  { %v14484_v51 = vld [vmem:[#allocation5 + $0x1888] sm:$0xf]  ;;  %v14229_v27 = vor.u32 %v17791_v50, %v14228_v47  ;;  %7395 = vmatpush.bf16.msrb.mxu0 %v13973_v58  ;;  %v11574_v50 = vld [vmem:[#allocation5 + $0x1e8] sm:$0xf0] }
 0x2ca   :  { %v17855_v52 = vld [vmem:[#allocation5 + $0x18a4] sm:$0xf0]  ;;  %v11577_v58 = vor.u32 %v17123_v49, %v11574_v50 }
 0x2cb   :  { %v14740_v54 = vld [vmem:[#allocation5 + $0x1a88] sm:$0xf]  ;;  %v14485_v61 = vor.u32 %v17855_v52, %v14484_v51  ;;  %7408 = vmatpush.bf16.msrb.mxu1 %v14229_v27 }
 0x2cc   :  { %v17919_v56 = vld [vmem:[#allocation5 + $0x1aa4] sm:$0xf0] }
 0x2cd   :  { %v13940_v62 = vld [vmem:[#allocation5 + $0x1448] sm:$0xf]  ;;  %v14741_v1 = vor.u32 %v17919_v56, %v14740_v54  ;;  %7421 = vmatpush.bf16.msrb.mxu2 %v14485_v61 }
 0x2ce   :  { %v17719_v63 = vld [vmem:[#allocation5 + $0x1464] sm:$0xf0] }
 0x2cf   :  { %v14196_v0 = vld [vmem:[#allocation5 + $0x1648] sm:$0xf]  ;;  %v13941_v7 = vor.u32 %v17719_v63, %v13940_v62  ;;  %7434 = vmatpush.bf16.msrb.mxu3 %v14741_v1  ;;  %v17115_v62 = vld [vmem:[#allocation5 + $0x18c] sm:$0xf] }
 0x2d0   :  { %v17783_v2 = vld [vmem:[#allocation5 + $0x1664] sm:$0xf0]  ;;  %v11542_v63 = vld [vmem:[#allocation5 + $0x1a8] sm:$0xf0] }
 0x2d1   :  { %v14452_v3 = vld [vmem:[#allocation5 + $0x1848] sm:$0xf]  ;;  %v14197_v10 = vor.u32 %v17783_v2, %v14196_v0  ;;  %7396 = vmatpush.bf16.msrb.mxu0 %v13941_v7 }
 0x2d2   :  { %v17847_v4 = vld [vmem:[#allocation5 + $0x1864] sm:$0xf0] }
 0x2d3   :  { %v14708_v5 = vld [vmem:[#allocation5 + $0x1a48] sm:$0xf]  ;;  %v14453_v12 = vor.u32 %v17847_v4, %v14452_v3  ;;  %7409 = vmatpush.bf16.msrb.mxu1 %v14197_v10  ;;  %v17107_v10 = vld [vmem:[#allocation5 + $0x14c] sm:$0xf] }
 0x2d4   :  { %v17911_v6 = vld [vmem:[#allocation5 + $0x1a64] sm:$0xf0] }
 0x2d5   :  { %v13908_v8 = vld [vmem:[#allocation5 + $0x1408] sm:$0xf]  ;;  %v14709_v15 = vor.u32 %v17911_v6, %v14708_v5  ;;  %7422 = vmatpush.bf16.msrb.mxu2 %v14453_v12  ;;  %v11545_v6 = vor.u32 %v17115_v62, %v11542_v63  ;;  %v11510_v12 = vld [vmem:[#allocation5 + $0x168] sm:$0xf0] }
 0x2d6   :  { %v17711_v9 = vld [vmem:[#allocation5 + $0x1424] sm:$0xf0] }
 0x2d7   :  { %v14164_v13 = vld [vmem:[#allocation5 + $0x1608] sm:$0xf]  ;;  %v13909_v37 = vor.u32 %v17711_v9, %v13908_v8  ;;  %7435 = vmatpush.bf16.msrb.mxu3 %v14709_v15 }
 0x2d8   :  { %v17775_v11 = vld [vmem:[#allocation5 + $0x1624] sm:$0xf0] }
 0x2d9   :  { %v14420_v14 = vld [vmem:[#allocation5 + $0x1808] sm:$0xf]  ;;  %v14165_v47 = vor.u32 %v17775_v11, %v14164_v13  ;;  %7397 = vmatpush.bf16.msrb.mxu0 %v13909_v37  ;;  %v11478_v37 = vld [vmem:[#allocation5 + $0x128] sm:$0xf0] }
 0x2da   :  { %v17839_v16 = vld [vmem:[#allocation5 + $0x1824] sm:$0xf0] }
 0x2db   :  { %v14676_v17 = vld [vmem:[#allocation5 + $0x1a08] sm:$0xf]  ;;  %v14421_v48 = vor.u32 %v17839_v16, %v14420_v14  ;;  %7410 = vmatpush.bf16.msrb.mxu1 %v14165_v47 }
 0x2dc   :  { %v17903_v18 = vld [vmem:[#allocation5 + $0x1a24] sm:$0xf0]  ;;  %7398 = vmatmul.bf16.vlgmr.msrb.gmra.mxu0 %v18956_v30 }
 0x2dd   :  { %v15156_v35 = vld [vmem:[#allocation5 + $0x1dc8] sm:$0xf]  ;;  %v14677_v51 = vor.u32 %v17903_v18, %v14676_v17  ;;  %7423 = vmatpush.bf16.msrb.mxu2 %v14421_v48  ;;  %v11513_v18 = vor.u32 %v17107_v10, %v11510_v12 }
 0x2de   :  { %v18023_v33 = vld [vmem:[#allocation5 + $0x1de4] sm:$0xf0]  ;;  %7411 = vmatmul.bf16.vlgmr.msrb.gmra.mxu1 %v18960_v34 }
 0x2df   :  { %v15412_v38 = vld [vmem:[#allocation5 + $0x1fc8] sm:$0xf]  ;;  %v15157_v52 = vor.u32 %v18023_v33, %v15156_v35  ;;  %7436 = vmatpush.bf16.msrb.mxu3 %v14677_v51 }
 0x2e0   :  { %v18087_v41 = vld [vmem:[#allocation5 + $0x1fe4] sm:$0xf0]  ;;  %7424 = vmatmul.bf16.vlgmr.msrb.gmra.mxu2 %v18966_v24 }
 0x2e1   :  { %v15668_v44 = vld [vmem:[#allocation5 + $0x21c8] sm:$0xf]  ;;  %v15413_v53 = vor.u32 %v18087_v41, %v15412_v38  ;;  %7442 = vmatpush.bf16.msra.mxu0 %v15157_v52  ;;  %v7191_v38 = vpop.f32.mrf.mxu0  ;;  %v11481_v52 = vor.u32 %v17099_v40, %v11478_v37  ;;  %v11382_v40 = vld [vmem:[#allocation5 + $0x68] sm:$0xf0] }
 0x2e2   :  { %v18151_v46 = vld [vmem:[#allocation5 + $0x21e4] sm:$0xf0]  ;;  %7437 = vmatmul.bf16.vlgmr.msrb.gmra.mxu3 %v18970_v32  ;;  %v7192_v41 = vadd.f32 %v7191_v38, %v19028_v60  ;;  %v17075_v38 = vld [vmem:[#allocation5 + $0x4c] sm:$0xf] }
 0x2e3   :  { %v15669_v55 = vor.u32 %v18151_v46, %v15668_v44  ;;  %v15124_v54 = vld [vmem:[#allocation5 + $0x1d88] sm:$0xf]  ;;  %7455 = vmatpush.bf16.msra.mxu1 %v15413_v53  ;;  %7481 = vmatpush.bf16.msra.mxu3 %v11577_v58  ;;  %v7204_v46 = vpop.f32.mrf.mxu1  ;;  %v11446_v58 = vld [vmem:[#allocation5 + $0xe8] sm:$0xf0] }
 0x2e4   :  { %v18015_v56 = vld [vmem:[#allocation5 + $0x1da4] sm:$0xf0]  ;;  %v7205_v53 = vadd.f32 %v7204_v46, %v7192_v41 }
 0x2e5   :  { %v15380_v57 = vld [vmem:[#allocation5 + $0x1f88] sm:$0xf]  ;;  %v15125_v0 = vor.u32 %v18015_v56, %v15124_v54  ;;  %7468 = vmatpush.bf16.msra.mxu2 %v15669_v55 }
 0x2e6   :  { %v18079_v59 = vld [vmem:[#allocation5 + $0x1fa4] sm:$0xf0] }
 0x2e7   :  { %v15636_v27 = vld [vmem:[#allocation5 + $0x2188] sm:$0xf]  ;;  %v15381_v1 = vor.u32 %v18079_v59, %v15380_v57  ;;  %7443 = vmatpush.bf16.msra.mxu0 %v15125_v0  ;;  %7482 = vmatpush.bf16.msra.mxu3 %v11545_v6  ;;  %v17091_v57 = vld [vmem:[#allocation5 + $0xcc] sm:$0xf]  ;;  %v7230_v6 = vpop.f32.mrf.mxu3 }
 0x2e8   :  { %v18143_v61 = vld [vmem:[#allocation5 + $0x21a4] sm:$0xf0]  ;;  %v11449_v0 = vor.u32 %v17091_v57, %v11446_v58  ;;  %v11830_v57 = vld [vmem:[#allocation5 + $0x3e8] sm:$0xf0] }
 0x2e9   :  { %v15637_v2 = vor.u32 %v18143_v61, %v15636_v27  ;;  %v15092_v3 = vld [vmem:[#allocation5 + $0x1d48] sm:$0xf]  ;;  %7456 = vmatpush.bf16.msra.mxu1 %v15381_v1  ;;  %v7217_v1 = vpop.f32.mrf.mxu2  ;;  %v17251_v58 = vld [vmem:[#allocation5 + $0x5cc] sm:$0xf] }
 0x2ea   :  { %v18007_v4 = vld [vmem:[#allocation5 + $0x1d64] sm:$0xf0] }
 0x2eb   :  { %v15348_v5 = vld [vmem:[#allocation5 + $0x1f48] sm:$0xf]  ;;  %v15093_v13 = vor.u32 %v18007_v4, %v15092_v3  ;;  %7469 = vmatpush.bf16.msra.mxu2 %v15637_v2  ;;  %7483 = vmatpush.bf16.msra.mxu3 %v11513_v18  ;;  %v7206_v12 = vpop.f32.mrf.mxu1 }
 0x2ec   :  { %v18071_v7 = vld [vmem:[#allocation5 + $0x1f64] sm:$0xf0]  ;;  %v12054_v12 = vld [vmem:[#allocation5 + $0x5a8] sm:$0xf0] }
 0x2ed   :  { %v15604_v8 = vld [vmem:[#allocation5 + $0x2148] sm:$0xf]  ;;  %v15349_v11 = vor.u32 %v18071_v7, %v15348_v5  ;;  %7444 = vmatpush.bf16.msra.mxu0 %v15093_v13  ;;  %v7218_v5 = vadd.f32 %v7217_v1, %v7205_v53  ;;  %v17083_v7 = vld [vmem:[#allocation5 + $0x8c] sm:$0xf] }
 0x2ee   :  { %v18135_v9 = vld [vmem:[#allocation5 + $0x2164] sm:$0xf0]  ;;  %v17067_v53 = vld [vmem:[#allocation5 + $0xc] sm:$0xf] }
 0x2ef   :  { %v15605_v14 = vor.u32 %v18135_v9, %v15604_v8  ;;  %v15060_v15 = vld [vmem:[#allocation5 + $0x1d08] sm:$0xf]  ;;  %7457 = vmatpush.bf16.msra.mxu1 %v15349_v11  ;;  %7484 = vmatpush.bf16.msra.mxu3 %v11481_v52  ;;  %v11414_v8 = vld [vmem:[#allocation5 + $0xa8] sm:$0xf0]  ;;  %v7193_v9 = vpop.f32.mrf.mxu0  ;;  %v19035_v13 = vadd.f32 %v7230_v6, %v7218_v5 }
 0x2f0   :  { %v17999_v16 = vld [vmem:[#allocation5 + $0x1d24] sm:$0xf0]  ;;  %v11417_v18 = vor.u32 %v17083_v7, %v11414_v8  ;;  %v17379_v1 = vld [vmem:[#allocation5 + $0x9cc] sm:$0xf] }
 0x2f1   :  { %v15316_v17 = vld [vmem:[#allocation5 + $0x1f08] sm:$0xf]  ;;  %v15061_v44 = vor.u32 %v17999_v16, %v15060_v15  ;;  %7470 = vmatpush.bf16.msra.mxu2 %v15605_v14  ;;  %v17179_v7 = vld [vmem:[#allocation5 + $0x38c] sm:$0xf] }
 0x2f2   :  { %v18063_v22 = vld [vmem:[#allocation5 + $0x1f24] sm:$0xf0]  ;;  %v11798_v8 = vld [vmem:[#allocation5 + $0x3a8] sm:$0xf0] }
 0x2f3   :  { %v15572_v35 = vld [vmem:[#allocation5 + $0x2108] sm:$0xf]  ;;  %v15317_v47 = vor.u32 %v18063_v22, %v15316_v17  ;;  %7445 = vmatpush.bf16.msra.mxu0 %v15061_v44  ;;  %7485 = vmatpush.bf16.msra.mxu3 %v11449_v0  ;;  %v17243_v9 = vld [vmem:[#allocation5 + $0x58c] sm:$0xf] }
 0x2f4   :  { %v18127_v33 = vld [vmem:[#allocation5 + $0x2124] sm:$0xf0] }
 0x2f5   :  { %v15573_v48 = vor.u32 %v18127_v33, %v15572_v35  ;;  %v15028_v49 = vld [vmem:[#allocation5 + $0x1cc8] sm:$0xf]  ;;  %7458 = vmatpush.bf16.msra.mxu1 %v15317_v47 }
 0x2f6   :  { %v17991_v50 = vld [vmem:[#allocation5 + $0x1ce4] sm:$0xf0] }
 0x2f7   :  { %v15284_v51 = vld [vmem:[#allocation5 + $0x1ec8] sm:$0xf]  ;;  %v15029_v59 = vor.u32 %v17991_v50, %v15028_v49  ;;  %7471 = vmatpush.bf16.msra.mxu2 %v15573_v48  ;;  %7486 = vmatpush.bf16.msra.mxu3 %v11417_v18  ;;  %v12057_v18 = vor.u32 %v17243_v9, %v12054_v12  ;;  %v17347_v9 = vld [vmem:[#allocation5 + $0x8cc] sm:$0xf]  ;;  %v18522_v12 = vld [vmem:[#allocation7] sm:$0xff] }
 0x2f8   :  { %v18055_v55 = vld [vmem:[#allocation5 + $0x1ee4] sm:$0xf0] }
 0x2f9   :  { %v15540_v54 = vld [vmem:[#allocation5 + $0x20c8] sm:$0xf]  ;;  %v15285_v60 = vor.u32 %v18055_v55, %v15284_v51  ;;  %7446 = vmatpush.bf16.msra.mxu0 %v15029_v59  ;;  %v11385_v51 = vor.u32 %v17075_v38, %v11382_v40  ;;  %v11350_v55 = vld [vmem:[#allocation5 + $0x28] sm:$0xf0]  ;;  %v7232_v59 = vpop.f32.mrf.mxu3 }
 0x2fa   :  { %v18119_v56 = vld [vmem:[#allocation5 + $0x20e4] sm:$0xf0]  ;;  %v17235_v38 = vld [vmem:[#allocation5 + $0x54c] sm:$0xf] }
 0x2fb   :  { %v15541_v27 = vor.u32 %v18119_v56, %v15540_v54  ;;  %v14996_v61 = vld [vmem:[#allocation5 + $0x1c88] sm:$0xf]  ;;  %7459 = vmatpush.bf16.msra.mxu1 %v15285_v60  ;;  %v7219_v54 = vpop.f32.mrf.mxu2  ;;  %v17187_v56 = vld [vmem:[#allocation5 + $0x3cc] sm:$0xf]  ;;  %7487 = vmatpush.bf16.msra.mxu3 %v11385_v51 }
 0x2fc   :  { %v17983_v62 = vld [vmem:[#allocation5 + $0x1ca4] sm:$0xf0]  ;;  %v17163_v51 = vld [vmem:[#allocation5 + $0x30c] sm:$0xf] }
 0x2fd   :  { %v15252_v63 = vld [vmem:[#allocation5 + $0x1e88] sm:$0xf]  ;;  %v14997_v10 = vor.u32 %v17983_v62, %v14996_v61  ;;  %7472 = vmatpush.bf16.msra.mxu2 %v15541_v27  ;;  %v12086_v27 = vld [vmem:[#allocation5 + $0x5e8] sm:$0xf0] }
 0x2fe   :  { %v18047_v2 = vld [vmem:[#allocation5 + $0x1ea4] sm:$0xf0]  ;;  %v17315_v61 = vld [vmem:[#allocation5 + $0x7cc] sm:$0xf]  ;;  %v12089_v5 = vor.u32 %v17251_v58, %v12086_v27  ;;  %v7243_v58 = vpop.f32.mrf.mxu0 }
 0x2ff   :  { %v15508_v3 = vld [vmem:[#allocation5 + $0x2088] sm:$0xf]  ;;  %v15253_v11 = vor.u32 %v18047_v2, %v15252_v63  ;;  %7447 = vmatpush.bf16.msra.mxu0 %v14997_v10  ;;  %v12342_v62 = vld [vmem:[#allocation5 + $0x7e8] sm:$0xf0]  ;;  %v7244_v27 = vadd.f32 %v7243_v58, %v19035_v13  ;;  %v1304_v13 = vperm.slane %v18522_v12, 2 }
 0x300   :  { %v18111_v4 = vld [vmem:[#allocation5 + $0x20a4] sm:$0xf0]  ;;  %v12598_v2 = vld [vmem:[#allocation5 + $0x9e8] sm:$0xf0]  ;;  %v12345_v6 = vor.u32 %v17315_v61, %v12342_v62  ;;  %v7256_v62 = vpop.f32.mrf.mxu1 }
 0x301   :  { %v15509_v14 = vor.u32 %v18111_v4, %v15508_v3  ;;  %v14964_v15 = vld [vmem:[#allocation5 + $0x1c48] sm:$0xf]  ;;  %7460 = vmatpush.bf16.msra.mxu1 %v15253_v11  ;;  %v11353_v3 = vor.u32 %v17067_v53, %v11350_v55  ;;  %v11833_v4 = vor.u32 %v17187_v56, %v11830_v57  ;;  %v12601_v10 = vor.u32 %v17379_v1, %v12598_v2  ;;  %v17307_v11 = vld [vmem:[#allocation5 + $0x78c] sm:$0xf] }
 0x302   :  { %v17975_v16 = vld [vmem:[#allocation5 + $0x1c64] sm:$0xf0]  ;;  %v17227_v53 = vld [vmem:[#allocation5 + $0x50c] sm:$0xf] }
 0x303   :  { %v15220_v17 = vld [vmem:[#allocation5 + $0x1e48] sm:$0xf]  ;;  %v14965_v37 = vor.u32 %v17975_v16, %v14964_v15  ;;  %7473 = vmatpush.bf16.msra.mxu2 %v15509_v14  ;;  %v12310_v14 = vld [vmem:[#allocation5 + $0x7a8] sm:$0xf0]  ;;  %7488 = vmatpush.bf16.msra.mxu3 %v11353_v3 }
 0x304   :  { %v18039_v22 = vld [vmem:[#allocation5 + $0x1e64] sm:$0xf0]  ;;  %v17371_v15 = vld [vmem:[#allocation5 + $0x98c] sm:$0xf] }
 0x305   :  { %v15476_v35 = vld [vmem:[#allocation5 + $0x2048] sm:$0xf]  ;;  %v15221_v46 = vor.u32 %v18039_v22, %v15220_v17  ;;  %7448 = vmatpush.bf16.msra.mxu0 %v14965_v37  ;;  %v12566_v16 = vld [vmem:[#allocation5 + $0x9a8] sm:$0xf0]  ;;  %v11801_v17 = vor.u32 %v17179_v7, %v11798_v8  ;;  %v12313_v22 = vor.u32 %v17307_v11, %v12310_v14 }
 0x306   :  { %v18103_v33 = vld [vmem:[#allocation5 + $0x2064] sm:$0xf0]  ;;  %v12569_v40 = vor.u32 %v17371_v15, %v12566_v16  ;;  %v12022_v37 = vld [vmem:[#allocation5 + $0x568] sm:$0xf0]  ;;  %7489 = vmatmul.bf16.vlgmr.msra.gmra.mxu3 %v18932_v20 }
 0x307   :  { %v14932_v41 = vld [vmem:[#allocation5 + $0x1c08] sm:$0xf]  ;;  %v15477_v47 = vor.u32 %v18103_v33, %v15476_v35  ;;  %7461 = vmatpush.bf16.msra.mxu1 %v15221_v46  ;;  %v17171_v35 = vld [vmem:[#allocation5 + $0x34c] sm:$0xf]  ;;  %7533 = vmatpush.bf16.msrb.mxu3 %v12601_v10 }
 0x308   :  { %v17967_v44 = vld [vmem:[#allocation5 + $0x1c24] sm:$0xf0]  ;;  %v11766_v33 = vld [vmem:[#allocation5 + $0x368] sm:$0xf0] }
 0x309   :  { %v15188_v48 = vld [vmem:[#allocation5 + $0x1e08] sm:$0xf]  ;;  %v14933_v60 = vor.u32 %v17967_v44, %v14932_v41  ;;  %7474 = vmatpush.bf16.msra.mxu2 %v15477_v47  ;;  %v17299_v41 = vld [vmem:[#allocation5 + $0x74c] sm:$0xf] }
 0x30a   :  { %v18031_v49 = vld [vmem:[#allocation5 + $0x1e24] sm:$0xf0]  ;;  %v12278_v44 = vld [vmem:[#allocation5 + $0x768] sm:$0xf0] }
 0x30b   :  { %v15444_v50 = vld [vmem:[#allocation5 + $0x2008] sm:$0xf]  ;;  %v15189_v63 = vor.u32 %v18031_v49, %v15188_v48  ;;  %7449 = vmatpush.bf16.msra.mxu0 %v14933_v60  ;;  %v17363_v46 = vld [vmem:[#allocation5 + $0x94c] sm:$0xf]  ;;  %v11769_v48 = vor.u32 %v17171_v35, %v11766_v33  ;;  %v12025_v49 = vor.u32 %v17235_v38, %v12022_v37  ;;  %7534 = vmatpush.bf16.msrb.mxu3 %v12569_v40  ;;  %v7269_v40 = vpop.f32.mrf.mxu2 }
 0x30c   :  { %v18095_v52 = vld [vmem:[#allocation5 + $0x2024] sm:$0xf0]  ;;  %v12534_v47 = vld [vmem:[#allocation5 + $0x968] sm:$0xf0] }
 0x30d   :  { %v15445_v0 = vor.u32 %v18095_v52, %v15444_v50  ;;  %7462 = vmatpush.bf16.msra.mxu1 %v15189_v63  ;;  %v12281_v50 = vor.u32 %v17299_v41, %v12278_v44  ;;  %v11734_v52 = vld [vmem:[#allocation5 + $0x328] sm:$0xf0]  ;;  %v12537_v55 = vor.u32 %v17363_v46, %v12534_v47  ;;  %v7270_v44 = vadd.f32 %v7269_v40, %v1304_v13  ;;  %v7282_v46 = vpop.f32.mrf.mxu3  ;;  %v7245_v47 = vpop.f32.mrf.mxu0 }
 0x30e   :  { %7450 = vmatmul.bf16.vlgmr.msra.gmra.mxu0 %v18968_v29  ;;  %v11990_v54 = vld [vmem:[#allocation5 + $0x528] sm:$0xf0]  ;;  %v11737_v61 = vor.u32 %v17163_v51, %v11734_v52 }
 0x30f   :  { %7475 = vmatpush.bf16.msra.mxu2 %v15445_v0  ;;  %7494 = vmatpush.bf16.msrb.mxu0 %v11833_v4  ;;  %v17291_v56 = vld [vmem:[#allocation5 + $0x70c] sm:$0xf]  ;;  %v11993_v63 = vor.u32 %v17227_v53, %v11990_v54  ;;  %v19044_v54 = vadd.f32 %v7282_v46, %v7270_v44 }
 0x310   :  { %7463 = vmatmul.bf16.vlgmr.msra.gmra.mxu1 %v18972_v36  ;;  %v12246_v57 = vld [vmem:[#allocation5 + $0x728] sm:$0xf0]  ;;  %7535 = vmatpush.bf16.msrb.mxu3 %v12537_v55 }
 0x311   :  { %7507 = vmatpush.bf16.msrb.mxu1 %v12089_v5  ;;  %v17355_v59 = vld [vmem:[#allocation5 + $0x90c] sm:$0xf]  ;;  %v12249_v0 = vor.u32 %v17291_v56, %v12246_v57  ;;  %v19042_v5 = vadd.f32 %v7256_v62, %v7244_v27 }
 0x312   :  { %7476 = vmatmul.bf16.vlgmr.msra.gmra.mxu2 %v18978_v28  ;;  %v12502_v60 = vld [vmem:[#allocation5 + $0x928] sm:$0xf0] }
 0x313   :  { %7520 = vmatpush.bf16.msrb.mxu2 %v12345_v6  ;;  %7495 = vmatpush.bf16.msrb.mxu0 %v11801_v17  ;;  %v17155_v1 = vld [vmem:[#allocation5 + $0x2cc] sm:$0xf]  ;;  %v12505_v4 = vor.u32 %v17355_v59, %v12502_v60 }
 0x314   :  { %v11702_v2 = vld [vmem:[#allocation5 + $0x2e8] sm:$0xf0] }
 0x315   :  { %7508 = vmatpush.bf16.msrb.mxu1 %v12057_v18  ;;  %v17219_v3 = vld [vmem:[#allocation5 + $0x4cc] sm:$0xf]  ;;  %v11705_v11 = vor.u32 %v17155_v1, %v11702_v2  ;;  %7536 = vmatpush.bf16.msrb.mxu3 %v12505_v4 }
 0x316   :  { %v11958_v6 = vld [vmem:[#allocation5 + $0x4e8] sm:$0xf0] }
 0x317   :  { %7521 = vmatpush.bf16.msrb.mxu2 %v12313_v22  ;;  %7496 = vmatpush.bf16.msrb.mxu0 %v11769_v48  ;;  %v17283_v7 = vld [vmem:[#allocation5 + $0x6cc] sm:$0xf]  ;;  %v11961_v14 = vor.u32 %v17219_v3, %v11958_v6 }
 0x318   :  { %v12214_v8 = vld [vmem:[#allocation5 + $0x6e8] sm:$0xf0] }
 0x319   :  { %7509 = vmatpush.bf16.msrb.mxu1 %v12025_v49  ;;  %v12470_v10 = vld [vmem:[#allocation5 + $0x8e8] sm:$0xf0]  ;;  %v12217_v15 = vor.u32 %v17283_v7, %v12214_v8  ;;  %v7258_v49 = vpop.f32.mrf.mxu1 }
 0x31a   :  { %v17147_v16 = vld [vmem:[#allocation5 + $0x28c] sm:$0xf]  ;;  %v12473_v22 = vor.u32 %v17347_v9, %v12470_v10  ;;  %v7271_v10 = vpop.f32.mrf.mxu2 }
 0x31b   :  { %7522 = vmatpush.bf16.msrb.mxu2 %v12281_v50  ;;  %7497 = vmatpush.bf16.msrb.mxu0 %v11737_v61  ;;  %v11670_v17 = vld [vmem:[#allocation5 + $0x2a8] sm:$0xf0] }
 0x31c   :  { %v17211_v18 = vld [vmem:[#allocation5 + $0x48c] sm:$0xf]  ;;  %v11673_v48 = vor.u32 %v17147_v16, %v11670_v17  ;;  %7537 = vmatpush.bf16.msrb.mxu3 %v12473_v22 }
 0x31d   :  { %7510 = vmatpush.bf16.msrb.mxu1 %v11993_v63  ;;  %v11926_v35 = vld [vmem:[#allocation5 + $0x4a8] sm:$0xf0] }
 0x31e   :  { %v17275_v33 = vld [vmem:[#allocation5 + $0x68c] sm:$0xf]  ;;  %v11929_v50 = vor.u32 %v17211_v18, %v11926_v35 }
 0x31f   :  { %7523 = vmatpush.bf16.msrb.mxu2 %v12249_v0  ;;  %v12182_v38 = vld [vmem:[#allocation5 + $0x6a8] sm:$0xf0]  ;;  %7498 = vmatpush.bf16.msrb.mxu0 %v11705_v11 }
 0x320   :  { %v17339_v37 = vld [vmem:[#allocation5 + $0x88c] sm:$0xf]  ;;  %v12185_v51 = vor.u32 %v17275_v33, %v12182_v38 }
 0x321   :  { %v12438_v41 = vld [vmem:[#allocation5 + $0x8a8] sm:$0xf0]  ;;  %7511 = vmatpush.bf16.msrb.mxu1 %v11961_v14  ;;  %v7284_v14 = vpop.f32.mrf.mxu3 }
 0x322   :  { %v17139_v52 = vld [vmem:[#allocation5 + $0x24c] sm:$0xf]  ;;  %v12441_v56 = vor.u32 %v17339_v37, %v12438_v41 }
 0x323   :  { %7524 = vmatpush.bf16.msrb.mxu2 %v12217_v15  ;;  %v11638_v53 = vld [vmem:[#allocation5 + $0x268] sm:$0xf0]  ;;  %7499 = vmatpush.bf16.msrb.mxu0 %v11673_v48 }
 0x324   :  { %v17203_v55 = vld [vmem:[#allocation5 + $0x44c] sm:$0xf]  ;;  %v11641_v61 = vor.u32 %v17139_v52, %v11638_v53  ;;  %7538 = vmatpush.bf16.msrb.mxu3 %v12441_v56 }
 0x325   :  { %v11894_v57 = vld [vmem:[#allocation5 + $0x468] sm:$0xf0]  ;;  %7512 = vmatpush.bf16.msrb.mxu1 %v11929_v50 }
 0x326   :  { %v17267_v58 = vld [vmem:[#allocation5 + $0x64c] sm:$0xf]  ;;  %v11897_v0 = vor.u32 %v17203_v55, %v11894_v57 }
 0x327   :  { %v12150_v59 = vld [vmem:[#allocation5 + $0x668] sm:$0xf0]  ;;  %7525 = vmatpush.bf16.msrb.mxu2 %v12185_v51  ;;  %7500 = vmatpush.bf16.msrb.mxu0 %v11641_v61 }
 0x328   :  { %v17331_v60 = vld [vmem:[#allocation5 + $0x84c] sm:$0xf]  ;;  %v12153_v1 = vor.u32 %v17267_v58, %v12150_v59 }
 0x329   :  { %v12406_v27 = vld [vmem:[#allocation5 + $0x868] sm:$0xf0]  ;;  %7513 = vmatpush.bf16.msrb.mxu1 %v11897_v0 }
 0x32a   :  { %v17131_v62 = vld [vmem:[#allocation5 + $0x20c] sm:$0xf]  ;;  %v12409_v6 = vor.u32 %v17331_v60, %v12406_v27 }
 0x32b   :  { %v11606_v63 = vld [vmem:[#allocation5 + $0x228] sm:$0xf0]  ;;  %7526 = vmatpush.bf16.msrb.mxu2 %v12153_v1 }
 0x32c   :  { %v17195_v2 = vld [vmem:[#allocation5 + $0x40c] sm:$0xf]  ;;  %v11609_v15 = vor.u32 %v17131_v62, %v11606_v63  ;;  %7539 = vmatpush.bf16.msrb.mxu3 %v12409_v6 }
 0x32d   :  { %v11862_v3 = vld [vmem:[#allocation5 + $0x428] sm:$0xf0] }
 0x32e   :  { %v17259_v4 = vld [vmem:[#allocation5 + $0x60c] sm:$0xf]  ;;  %v11865_v22 = vor.u32 %v17195_v2, %v11862_v3  ;;  %7501 = vmatpush.bf16.msrb.mxu0 %v11609_v15 }
 0x32f   :  { %v12118_v7 = vld [vmem:[#allocation5 + $0x628] sm:$0xf0] }
 0x330   :  { %v17323_v8 = vld [vmem:[#allocation5 + $0x80c] sm:$0xf]  ;;  %v12121_v35 = vor.u32 %v17259_v4, %v12118_v7  ;;  %7514 = vmatpush.bf16.msrb.mxu1 %v11865_v22 }
 0x331   :  { %v12374_v9 = vld [vmem:[#allocation5 + $0x828] sm:$0xf0]  ;;  %7502 = vmatmul.bf16.vlgmr.msrb.gmra.mxu0 %v18936_v23 }
 0x332   :  { %v17443_v12 = vld [vmem:[#allocation5 + $0xbcc] sm:$0xf]  ;;  %v12377_v40 = vor.u32 %v17323_v8, %v12374_v9  ;;  %7527 = vmatpush.bf16.msrb.mxu2 %v12121_v35 }
 0x333   :  { %v12854_v13 = vld [vmem:[#allocation5 + $0xbe8] sm:$0xf0]  ;;  %7515 = vmatmul.bf16.vlgmr.msrb.gmra.mxu1 %v18930_v19 }
 0x334   :  { %v17507_v11 = vld [vmem:[#allocation5 + $0xdcc] sm:$0xf]  ;;  %v12857_v37 = vor.u32 %v17443_v12, %v12854_v13  ;;  %7540 = vmatpush.bf16.msrb.mxu3 %v12377_v40 }
 0x335   :  { %v13110_v16 = vld [vmem:[#allocation5 + $0xde8] sm:$0xf0]  ;;  %7528 = vmatmul.bf16.vlgmr.msrb.gmra.mxu2 %v18934_v21 }
 0x336   :  { %v17571_v17 = vld [vmem:[#allocation5 + $0xfcc] sm:$0xf]  ;;  %v13113_v41 = vor.u32 %v17507_v11, %v13110_v16  ;;  %7546 = vmatpush.bf16.msra.mxu0 %v12857_v37  ;;  %v7308_v37 = vpop.f32.mrf.mxu1 }
 0x337   :  { %v13366_v18 = vld [vmem:[#allocation5 + $0xfe8] sm:$0xf0]  ;;  %7541 = vmatmul.bf16.vlgmr.msrb.gmra.mxu3 %v18944_v42 }
 0x338   :  { %v17635_v33 = vld [vmem:[#allocation5 + $0x11cc] sm:$0xf]  ;;  %v13369_v44 = vor.u32 %v17571_v17, %v13366_v18  ;;  %7559 = vmatpush.bf16.msra.mxu1 %v13113_v41  ;;  %v7295_v17 = vpop.f32.mrf.mxu0 }
 0x339   :  { %v13622_v38 = vld [vmem:[#allocation5 + $0x11e8] sm:$0xf0]  ;;  %v7296_v40 = vadd.f32 %v7295_v17, %v19044_v54 }
 0x33a   :  { %v17435_v46 = vld [vmem:[#allocation5 + $0xb8c] sm:$0xf]  ;;  %v13625_v49 = vor.u32 %v17635_v33, %v13622_v38  ;;  %7572 = vmatpush.bf16.msra.mxu2 %v13369_v44 }
 0x33b   :  { %v12822_v47 = vld [vmem:[#allocation5 + $0xba8] sm:$0xf0] }
 0x33c   :  { %v17499_v48 = vld [vmem:[#allocation5 + $0xd8c] sm:$0xf]  ;;  %v12825_v56 = vor.u32 %v17435_v46, %v12822_v47  ;;  %7585 = vmatpush.bf16.msra.mxu3 %v13625_v49 }
 0x33d   :  { %v13078_v50 = vld [vmem:[#allocation5 + $0xda8] sm:$0xf0] }
 0x33e   :  { %v17563_v51 = vld [vmem:[#allocation5 + $0xf8c] sm:$0xf]  ;;  %v13081_v57 = vor.u32 %v17499_v48, %v13078_v50  ;;  %7547 = vmatpush.bf16.msra.mxu0 %v12825_v56  ;;  %v7309_v50 = vadd.f32 %v7308_v37, %v7296_v40 }
 0x33f   :  { %v13334_v52 = vld [vmem:[#allocation5 + $0xfa8] sm:$0xf0] }
 0x340   :  { %v17627_v53 = vld [vmem:[#allocation5 + $0x118c] sm:$0xf]  ;;  %v13337_v58 = vor.u32 %v17563_v51, %v13334_v52  ;;  %7560 = vmatpush.bf16.msra.mxu1 %v13081_v57 }
 0x341   :  { %v13590_v55 = vld [vmem:[#allocation5 + $0x11a8] sm:$0xf0] }
 0x342   :  { %v17427_v59 = vld [vmem:[#allocation5 + $0xb4c] sm:$0xf]  ;;  %v13593_v61 = vor.u32 %v17627_v53, %v13590_v55  ;;  %7573 = vmatpush.bf16.msra.mxu2 %v13337_v58  ;;  %v7321_v58 = vpop.f32.mrf.mxu2 }
 0x343   :  { %v12790_v60 = vld [vmem:[#allocation5 + $0xb68] sm:$0xf0] }
 0x344   :  { %v17491_v27 = vld [vmem:[#allocation5 + $0xd4c] sm:$0xf]  ;;  %v12793_v3 = vor.u32 %v17427_v59, %v12790_v60  ;;  %7586 = vmatpush.bf16.msra.mxu3 %v13593_v61  ;;  %v7322_v61 = vadd.f32 %v7321_v58, %v7309_v50 }
 0x345   :  { %v13046_v62 = vld [vmem:[#allocation5 + $0xd68] sm:$0xf0] }
 0x346   :  { %v17555_v63 = vld [vmem:[#allocation5 + $0xf4c] sm:$0xf]  ;;  %v13049_v4 = vor.u32 %v17491_v27, %v13046_v62  ;;  %7548 = vmatpush.bf16.msra.mxu0 %v12793_v3  ;;  %v7334_v62 = vpop.f32.mrf.mxu3  ;;  %v7297_v3 = vpop.f32.mrf.mxu0 }
 0x347   :  { %v13302_v0 = vld [vmem:[#allocation5 + $0xf68] sm:$0xf0] }
 0x348   :  { %v17619_v1 = vld [vmem:[#allocation5 + $0x114c] sm:$0xf]  ;;  %v13305_v6 = vor.u32 %v17555_v63, %v13302_v0  ;;  %7561 = vmatpush.bf16.msra.mxu1 %v13049_v4 }
 0x349   :  { %v13558_v2 = vld [vmem:[#allocation5 + $0x1168] sm:$0xf0] }
 0x34a   :  { %v17419_v7 = vld [vmem:[#allocation5 + $0xb0c] sm:$0xf]  ;;  %v13561_v10 = vor.u32 %v17619_v1, %v13558_v2  ;;  %7574 = vmatpush.bf16.msra.mxu2 %v13305_v6  ;;  %v19051_v2 = vadd.f32 %v7334_v62, %v7322_v61 }
 0x34b   :  { %v12758_v8 = vld [vmem:[#allocation5 + $0xb28] sm:$0xf0] }
 0x34c   :  { %v17483_v9 = vld [vmem:[#allocation5 + $0xd0c] sm:$0xf]  ;;  %v12761_v16 = vor.u32 %v17419_v7, %v12758_v8  ;;  %7587 = vmatpush.bf16.msra.mxu3 %v13561_v10  ;;  %v7310_v10 = vpop.f32.mrf.mxu1 }
 0x34d   :  { %v13014_v12 = vld [vmem:[#allocation5 + $0xd28] sm:$0xf0] }
 0x34e   :  { %v17547_v13 = vld [vmem:[#allocation5 + $0xf0c] sm:$0xf]  ;;  %v13017_v18 = vor.u32 %v17483_v9, %v13014_v12  ;;  %7549 = vmatpush.bf16.msra.mxu0 %v12761_v16 }
 0x34f   :  { %v13270_v11 = vld [vmem:[#allocation5 + $0xf28] sm:$0xf0] }
 0x350   :  { %v17611_v14 = vld [vmem:[#allocation5 + $0x110c] sm:$0xf]  ;;  %v13273_v22 = vor.u32 %v17547_v13, %v13270_v11  ;;  %7562 = vmatpush.bf16.msra.mxu1 %v13017_v18 }
 0x351   :  { %v13526_v15 = vld [vmem:[#allocation5 + $0x1128] sm:$0xf0] }
 0x352   :  { %v17411_v35 = vld [vmem:[#allocation5 + $0xacc] sm:$0xf]  ;;  %v13529_v41 = vor.u32 %v17611_v14, %v13526_v15  ;;  %7575 = vmatpush.bf16.msra.mxu2 %v13273_v22 }
 0x353   :  { %v12726_v33 = vld [vmem:[#allocation5 + $0xae8] sm:$0xf0] }
 0x354   :  { %v17475_v38 = vld [vmem:[#allocation5 + $0xccc] sm:$0xf]  ;;  %v12729_v51 = vor.u32 %v17411_v35, %v12726_v33  ;;  %7588 = vmatpush.bf16.msra.mxu3 %v13529_v41  ;;  %v7323_v41 = vpop.f32.mrf.mxu2 }
 0x355   :  { %v12982_v44 = vld [vmem:[#allocation5 + $0xce8] sm:$0xf0] }
 0x356   :  { %v17539_v46 = vld [vmem:[#allocation5 + $0xecc] sm:$0xf]  ;;  %v12985_v52 = vor.u32 %v17475_v38, %v12982_v44  ;;  %7550 = vmatpush.bf16.msra.mxu0 %v12729_v51 }
 0x357   :  { %v13238_v47 = vld [vmem:[#allocation5 + $0xee8] sm:$0xf0] }
 0x358   :  { %v17603_v48 = vld [vmem:[#allocation5 + $0x10cc] sm:$0xf]  ;;  %v13241_v53 = vor.u32 %v17539_v46, %v13238_v47  ;;  %7563 = vmatpush.bf16.msra.mxu1 %v12985_v52 }
 0x359   :  { %v13494_v49 = vld [vmem:[#allocation5 + $0x10e8] sm:$0xf0] }
 0x35a   :  { %v17403_v55 = vld [vmem:[#allocation5 + $0xa8c] sm:$0xf]  ;;  %v13497_v54 = vor.u32 %v17603_v48, %v13494_v49  ;;  %7576 = vmatpush.bf16.msra.mxu2 %v13241_v53  ;;  %v7336_v49 = vpop.f32.mrf.mxu3 }
 0x35b   :  { %v12694_v56 = vld [vmem:[#allocation5 + $0xaa8] sm:$0xf0] }
 0x35c   :  { %v17467_v57 = vld [vmem:[#allocation5 + $0xc8c] sm:$0xf]  ;;  %v12697_v1 = vor.u32 %v17403_v55, %v12694_v56  ;;  %7589 = vmatpush.bf16.msra.mxu3 %v13497_v54 }
 0x35d   :  { %v12950_v59 = vld [vmem:[#allocation5 + $0xca8] sm:$0xf0] }
 0x35e   :  { %v17531_v60 = vld [vmem:[#allocation5 + $0xe8c] sm:$0xf]  ;;  %v12953_v4 = vor.u32 %v17467_v57, %v12950_v59  ;;  %7551 = vmatpush.bf16.msra.mxu0 %v12697_v1 }
 0x35f   :  { %v13206_v27 = vld [vmem:[#allocation5 + $0xea8] sm:$0xf0] }
 0x360   :  { %v17595_v63 = vld [vmem:[#allocation5 + $0x108c] sm:$0xf]  ;;  %v13209_v6 = vor.u32 %v17531_v60, %v13206_v27  ;;  %7564 = vmatpush.bf16.msra.mxu1 %v12953_v4 }
 0x361   :  { %v13462_v0 = vld [vmem:[#allocation5 + $0x10a8] sm:$0xf0] }
 0x362   :  { %v17395_v7 = vld [vmem:[#allocation5 + $0xa4c] sm:$0xf]  ;;  %v13465_v12 = vor.u32 %v17595_v63, %v13462_v0  ;;  %7577 = vmatpush.bf16.msra.mxu2 %v13209_v6 }
 0x363   :  { %v12662_v8 = vld [vmem:[#allocation5 + $0xa68] sm:$0xf0] }
 0x364   :  { %v17459_v9 = vld [vmem:[#allocation5 + $0xc4c] sm:$0xf]  ;;  %v12665_v17 = vor.u32 %v17395_v7, %v12662_v8  ;;  %7590 = vmatpush.bf16.msra.mxu3 %v13465_v12 }
 0x365   :  { %v12918_v13 = vld [vmem:[#allocation5 + $0xc68] sm:$0xf0] }
 0x366   :  { %v17523_v11 = vld [vmem:[#allocation5 + $0xe4c] sm:$0xf]  ;;  %v12921_v35 = vor.u32 %v17459_v9, %v12918_v13  ;;  %7552 = vmatpush.bf16.msra.mxu0 %v12665_v17 }
 0x367   :  { %v13174_v14 = vld [vmem:[#allocation5 + $0xe68] sm:$0xf0] }
 0x368   :  { %v17587_v15 = vld [vmem:[#allocation5 + $0x104c] sm:$0xf]  ;;  %v13177_v33 = vor.u32 %v17523_v11, %v13174_v14  ;;  %7565 = vmatpush.bf16.msra.mxu1 %v12921_v35 }
 0x369   :  { %v13430_v16 = vld [vmem:[#allocation5 + $0x1068] sm:$0xf0] }
 0x36a   :  { %v17387_v18 = vld [vmem:[#allocation5 + $0xa0c] sm:$0xf]  ;;  %v13433_v44 = vor.u32 %v17587_v15, %v13430_v16  ;;  %7578 = vmatpush.bf16.msra.mxu2 %v13177_v33 }
 0x36b   :  { %v12630_v22 = vld [vmem:[#allocation5 + $0xa28] sm:$0xf0] }
 0x36c   :  { %v17451_v38 = vld [vmem:[#allocation5 + $0xc0c] sm:$0xf]  ;;  %v12633_v53 = vor.u32 %v17387_v18, %v12630_v22  ;;  %7591 = vmatpush.bf16.msra.mxu3 %v13433_v44 }
 0x36d   :  { %v12886_v40 = vld [vmem:[#allocation5 + $0xc28] sm:$0xf0] }
 0x36e   :  { %v17515_v37 = vld [vmem:[#allocation5 + $0xe0c] sm:$0xf]  ;;  %v12889_v58 = vor.u32 %v17451_v38, %v12886_v40  ;;  %7553 = vmatpush.bf16.msra.mxu0 %v12633_v53 }
 0x36f   :  { %v13142_v46 = vld [vmem:[#allocation5 + $0xe28] sm:$0xf0] }
 0x370   :  { %v17579_v47 = vld [vmem:[#allocation5 + $0x100c] sm:$0xf]  ;;  %v13145_v54 = vor.u32 %v17515_v37, %v13142_v46  ;;  %7566 = vmatpush.bf16.msra.mxu1 %v12889_v58  ;;  %v7360_v58 = vpop.f32.mrf.mxu1 }
 0x371   :  { %v13398_v48 = vld [vmem:[#allocation5 + $0x1028] sm:$0xf0]  ;;  %7554 = vmatmul.bf16.vlgmr.msra.gmra.mxu0 %v18948_v45 }
 0x372   :  { %v17699_v50 = vld [vmem:[#allocation5 + $0x13cc] sm:$0xf]  ;;  %v13401_v27 = vor.u32 %v17579_v47, %v13398_v48  ;;  %7579 = vmatpush.bf16.msra.mxu2 %v13145_v54 }
 0x373   :  { %v13878_v51 = vld [vmem:[#allocation5 + $0x13e8] sm:$0xf0]  ;;  %7567 = vmatmul.bf16.vlgmr.msra.gmra.mxu1 %v18942_v39 }
 0x374   :  { %v17763_v52 = vld [vmem:[#allocation5 + $0x15cc] sm:$0xf]  ;;  %v13881_v61 = vor.u32 %v17699_v50, %v13878_v51  ;;  %7592 = vmatpush.bf16.msra.mxu3 %v13401_v27 }
 0x375   :  { %v14134_v55 = vld [vmem:[#allocation5 + $0x15e8] sm:$0xf0]  ;;  %7580 = vmatmul.bf16.vlgmr.msra.gmra.mxu2 %v18946_v43 }
 0x376   :  { %v17827_v56 = vld [vmem:[#allocation5 + $0x17cc] sm:$0xf]  ;;  %v14137_v62 = vor.u32 %v17763_v52, %v14134_v55  ;;  %7598 = vmatpush.bf16.msrb.mxu0 %v13881_v61  ;;  %v7347_v52 = vpop.f32.mrf.mxu0 }
 0x377   :  { %v14390_v57 = vld [vmem:[#allocation5 + $0x17e8] sm:$0xf0]  ;;  %7593 = vmatmul.bf16.vlgmr.msra.gmra.mxu3 %v18954_v26 }
 0x378   :  { %v17891_v59 = vld [vmem:[#allocation5 + $0x19cc] sm:$0xf]  ;;  %v14393_v63 = vor.u32 %v17827_v56, %v14390_v57  ;;  %7611 = vmatpush.bf16.msrb.mxu1 %v14137_v62  ;;  %v7348_v56 = vadd.f32 %v7347_v52, %v19051_v2 }
 0x379   :  { %v14646_v60 = vld [vmem:[#allocation5 + $0x19e8] sm:$0xf0] }
 0x37a   :  { %v17691_v0 = vld [vmem:[#allocation5 + $0x138c] sm:$0xf]  ;;  %v14649_v4 = vor.u32 %v17891_v59, %v14646_v60  ;;  %7624 = vmatpush.bf16.msrb.mxu2 %v14393_v63  ;;  %v7361_v63 = vadd.f32 %v7360_v58, %v7348_v56 }
 0x37b   :  { %v13846_v1 = vld [vmem:[#allocation5 + $0x13a8] sm:$0xf0] }
 0x37c   :  { %v17755_v3 = vld [vmem:[#allocation5 + $0x158c] sm:$0xf]  ;;  %v13849_v12 = vor.u32 %v17691_v0, %v13846_v1  ;;  %7637 = vmatpush.bf16.msrb.mxu3 %v14649_v4 }
 0x37d   :  { %v14102_v6 = vld [vmem:[#allocation5 + $0x15a8] sm:$0xf0] }
 0x37e   :  { %v17819_v7 = vld [vmem:[#allocation5 + $0x178c] sm:$0xf]  ;;  %v14105_v13 = vor.u32 %v17755_v3, %v14102_v6  ;;  %7599 = vmatpush.bf16.msrb.mxu0 %v13849_v12 }
 0x37f   :  { %v14358_v8 = vld [vmem:[#allocation5 + $0x17a8] sm:$0xf0] }
 0x380   :  { %v17883_v9 = vld [vmem:[#allocation5 + $0x198c] sm:$0xf]  ;;  %v14361_v11 = vor.u32 %v17819_v7, %v14358_v8  ;;  %7612 = vmatpush.bf16.msrb.mxu1 %v14105_v13 }
 0x381   :  { %v14614_v10 = vld [vmem:[#allocation5 + $0x19a8] sm:$0xf0] }
 0x382   :  { %v17683_v14 = vld [vmem:[#allocation5 + $0x134c] sm:$0xf]  ;;  %v14617_v17 = vor.u32 %v17883_v9, %v14614_v10  ;;  %7625 = vmatpush.bf16.msrb.mxu2 %v14361_v11  ;;  %v7373_v11 = vpop.f32.mrf.mxu2 }
 0x383   :  { %v13814_v15 = vld [vmem:[#allocation5 + $0x1368] sm:$0xf0] }
 0x384   :  { %v17747_v16 = vld [vmem:[#allocation5 + $0x154c] sm:$0xf]  ;;  %v13817_v40 = vor.u32 %v17683_v14, %v13814_v15  ;;  %7638 = vmatpush.bf16.msrb.mxu3 %v14617_v17  ;;  %v7374_v17 = vadd.f32 %v7373_v11, %v7361_v63 }
 0x385   :  { %v14070_v18 = vld [vmem:[#allocation5 + $0x1568] sm:$0xf0] }
 0x386   :  { %v17811_v22 = vld [vmem:[#allocation5 + $0x174c] sm:$0xf]  ;;  %v14073_v37 = vor.u32 %v17747_v16, %v14070_v18  ;;  %7600 = vmatpush.bf16.msrb.mxu0 %v13817_v40  ;;  %v7386_v18 = vpop.f32.mrf.mxu3  ;;  %v7362_v40 = vpop.f32.mrf.mxu1 }
 0x387   :  { %v14326_v35 = vld [vmem:[#allocation5 + $0x1768] sm:$0xf0] }
 0x388   :  { %v17875_v33 = vld [vmem:[#allocation5 + $0x194c] sm:$0xf]  ;;  %v14329_v41 = vor.u32 %v17811_v22, %v14326_v35  ;;  %7613 = vmatpush.bf16.msrb.mxu1 %v14073_v37  ;;  %v19058_v37 = vadd.f32 %v7386_v18, %v7374_v17 }
 0x389   :  { %v14582_v38 = vld [vmem:[#allocation5 + $0x1968] sm:$0xf0] }
 0x38a   :  { %v17675_v44 = vld [vmem:[#allocation5 + $0x130c] sm:$0xf]  ;;  %v14585_v48 = vor.u32 %v17875_v33, %v14582_v38  ;;  %7626 = vmatpush.bf16.msrb.mxu2 %v14329_v41  ;;  %v7349_v33 = vpop.f32.mrf.mxu0 }
 0x38b   :  { %v13782_v46 = vld [vmem:[#allocation5 + $0x1328] sm:$0xf0] }
 0x38c   :  { %v17739_v47 = vld [vmem:[#allocation5 + $0x150c] sm:$0xf]  ;;  %v13785_v57 = vor.u32 %v17675_v44, %v13782_v46  ;;  %7639 = vmatpush.bf16.msrb.mxu3 %v14585_v48 }
 0x38d   :  { %v14038_v49 = vld [vmem:[#allocation5 + $0x1528] sm:$0xf0] }
 0x38e   :  { %v17803_v50 = vld [vmem:[#allocation5 + $0x170c] sm:$0xf]  ;;  %v14041_v54 = vor.u32 %v17739_v47, %v14038_v49  ;;  %7601 = vmatpush.bf16.msrb.mxu0 %v13785_v57 }
 0x38f   :  { %v14294_v51 = vld [vmem:[#allocation5 + $0x1728] sm:$0xf0] }
 0x390   :  { %v17867_v53 = vld [vmem:[#allocation5 + $0x190c] sm:$0xf]  ;;  %v14297_v59 = vor.u32 %v17803_v50, %v14294_v51  ;;  %7614 = vmatpush.bf16.msrb.mxu1 %v14041_v54 }
 0x391   :  { %v14550_v55 = vld [vmem:[#allocation5 + $0x1928] sm:$0xf0] }
 0x392   :  { %v17667_v60 = vld [vmem:[#allocation5 + $0x12cc] sm:$0xf]  ;;  %v14553_v62 = vor.u32 %v17867_v53, %v14550_v55  ;;  %7627 = vmatpush.bf16.msrb.mxu2 %v14297_v59 }
 0x393   :  { %v13750_v27 = vld [vmem:[#allocation5 + $0x12e8] sm:$0xf0] }
 0x394   :  { %v17731_v61 = vld [vmem:[#allocation5 + $0x14cc] sm:$0xf]  ;;  %v13753_v7 = vor.u32 %v17667_v60, %v13750_v27  ;;  %7640 = vmatpush.bf16.msrb.mxu3 %v14553_v62 }
 0x395   :  { %v14006_v0 = vld [vmem:[#allocation5 + $0x14e8] sm:$0xf0] }
 0x396   :  { %v17795_v1 = vld [vmem:[#allocation5 + $0x16cc] sm:$0xf]  ;;  %v14009_v2 = vor.u32 %v17731_v61, %v14006_v0  ;;  %7602 = vmatpush.bf16.msrb.mxu0 %v13753_v7 }
 0x397   :  { %v14262_v3 = vld [vmem:[#allocation5 + $0x16e8] sm:$0xf0] }
 0x398   :  { %v17859_v4 = vld [vmem:[#allocation5 + $0x18cc] sm:$0xf]  ;;  %v14265_v8 = vor.u32 %v17795_v1, %v14262_v3  ;;  %7615 = vmatpush.bf16.msrb.mxu1 %v14009_v2  ;;  %v7375_v3 = vpop.f32.mrf.mxu2  ;;  %v7388_v2 = vpop.f32.mrf.mxu3 }
 0x399   :  { %v14518_v6 = vld [vmem:[#allocation5 + $0x18e8] sm:$0xf0]  ;;  %v7399_v2 = vpop.f32.mrf.mxu0 }
 0x39a   :  { %v17659_v9 = vld [vmem:[#allocation5 + $0x128c] sm:$0xf]  ;;  %v14521_v13 = vor.u32 %v17859_v4, %v14518_v6  ;;  %7628 = vmatpush.bf16.msrb.mxu2 %v14265_v8 }
 0x39b   :  { %v13718_v10 = vld [vmem:[#allocation5 + $0x12a8] sm:$0xf0] }
 0x39c   :  { %v17723_v12 = vld [vmem:[#allocation5 + $0x148c] sm:$0xf]  ;;  %v13721_v38 = vor.u32 %v17659_v9, %v13718_v10  ;;  %7641 = vmatpush.bf16.msrb.mxu3 %v14521_v13 }
 0x39d   :  { %v13974_v14 = vld [vmem:[#allocation5 + $0x14a8] sm:$0xf0] }
 0x39e   :  { %v17787_v15 = vld [vmem:[#allocation5 + $0x168c] sm:$0xf]  ;;  %v13977_v41 = vor.u32 %v17723_v12, %v13974_v14  ;;  %7603 = vmatpush.bf16.msrb.mxu0 %v13721_v38 }
 0x39f   :  { %v14230_v16 = vld [vmem:[#allocation5 + $0x16a8] sm:$0xf0] }
 0x3a0   :  { %v17851_v22 = vld [vmem:[#allocation5 + $0x188c] sm:$0xf]  ;;  %v14233_v44 = vor.u32 %v17787_v15, %v14230_v16  ;;  %7616 = vmatpush.bf16.msrb.mxu1 %v13977_v41 }
 0x3a1   :  { %v14486_v35 = vld [vmem:[#allocation5 + $0x18a8] sm:$0xf0] }
 0x3a2   :  { %v17651_v46 = vld [vmem:[#allocation5 + $0x124c] sm:$0xf]  ;;  %v14489_v49 = vor.u32 %v17851_v22, %v14486_v35  ;;  %7629 = vmatpush.bf16.msrb.mxu2 %v14233_v44 }
 0x3a3   :  { %v13686_v47 = vld [vmem:[#allocation5 + $0x1268] sm:$0xf0] }
 0x3a4   :  { %v17715_v48 = vld [vmem:[#allocation5 + $0x144c] sm:$0xf]  ;;  %v13689_v56 = vor.u32 %v17651_v46, %v13686_v47  ;;  %7642 = vmatpush.bf16.msrb.mxu3 %v14489_v49 }
 0x3a5   :  { %v13942_v50 = vld [vmem:[#allocation5 + $0x1468] sm:$0xf0] }
 0x3a6   :  { %v17779_v51 = vld [vmem:[#allocation5 + $0x164c] sm:$0xf]  ;;  %v13945_v54 = vor.u32 %v17715_v48, %v13942_v50  ;;  %7604 = vmatpush.bf16.msrb.mxu0 %v13689_v56 }
 0x3a7   :  { %v14198_v52 = vld [vmem:[#allocation5 + $0x1668] sm:$0xf0] }
 0x3a8   :  { %v17843_v53 = vld [vmem:[#allocation5 + $0x184c] sm:$0xf]  ;;  %v14201_v59 = vor.u32 %v17779_v51, %v14198_v52  ;;  %7617 = vmatpush.bf16.msrb.mxu1 %v13945_v54 }
 0x3a9   :  { %v14454_v55 = vld [vmem:[#allocation5 + $0x1868] sm:$0xf0] }
 0x3aa   :  { %v17643_v57 = vld [vmem:[#allocation5 + $0x120c] sm:$0xf]  ;;  %v14457_v62 = vor.u32 %v17843_v53, %v14454_v55  ;;  %7630 = vmatpush.bf16.msrb.mxu2 %v14201_v59 }
 0x3ab   :  { %v13654_v58 = vld [vmem:[#allocation5 + $0x1228] sm:$0xf0] }
 0x3ac   :  { %v17707_v60 = vld [vmem:[#allocation5 + $0x140c] sm:$0xf]  ;;  %v13657_v8 = vor.u32 %v17643_v57, %v13654_v58  ;;  %7643 = vmatpush.bf16.msrb.mxu3 %v14457_v62 }
 0x3ad   :  { %v13910_v27 = vld [vmem:[#allocation5 + $0x1428] sm:$0xf0] }
 0x3ae   :  { %v17771_v61 = vld [vmem:[#allocation5 + $0x160c] sm:$0xf]  ;;  %v13913_v13 = vor.u32 %v17707_v60, %v13910_v27  ;;  %7605 = vmatpush.bf16.msrb.mxu0 %v13657_v8 }
 0x3af   :  { %v14166_v63 = vld [vmem:[#allocation5 + $0x1628] sm:$0xf0] }
 0x3b0   :  { %v17835_v0 = vld [vmem:[#allocation5 + $0x180c] sm:$0xf]  ;;  %v14169_v11 = vor.u32 %v17771_v61, %v14166_v63  ;;  %7618 = vmatpush.bf16.msrb.mxu1 %v13913_v13  ;;  %v7412_v13 = vpop.f32.mrf.mxu1 }
 0x3b1   :  { %v14422_v1 = vld [vmem:[#allocation5 + $0x1828] sm:$0xf0]  ;;  %7606 = vmatmul.bf16.vlgmr.msrb.gmra.mxu0 %v18958_v31 }
 0x3b2   :  { %v17955_v4 = vld [vmem:[#allocation5 + $0x1bcc] sm:$0xf]  ;;  %v14425_v16 = vor.u32 %v17835_v0, %v14422_v1  ;;  %7631 = vmatpush.bf16.msrb.mxu2 %v14169_v11 }
 0x3b3   :  { %v14902_v6 = vld [vmem:[#allocation5 + $0x1be8] sm:$0xf0]  ;;  %7619 = vmatmul.bf16.vlgmr.msrb.gmra.mxu1 %v18956_v30 }
 0x3b4   :  { %v18019_v7 = vld [vmem:[#allocation5 + $0x1dcc] sm:$0xf]  ;;  %v14905_v17 = vor.u32 %v17955_v4, %v14902_v6  ;;  %7644 = vmatpush.bf16.msrb.mxu3 %v14425_v16 }
 0x3b5   :  { %v15158_v9 = vld [vmem:[#allocation5 + $0x1de8] sm:$0xf0]  ;;  %7632 = vmatmul.bf16.vlgmr.msrb.gmra.mxu2 %v18960_v34 }
 0x3b6   :  { %v18083_v10 = vld [vmem:[#allocation5 + $0x1fcc] sm:$0xf]  ;;  %v15161_v18 = vor.u32 %v18019_v7, %v15158_v9  ;;  %7650 = vmatpush.bf16.msra.mxu0 %v14905_v17 }
 0x3b7   :  { %v15414_v12 = vld [vmem:[#allocation5 + $0x1fe8] sm:$0xf0]  ;;  %7645 = vmatmul.bf16.vlgmr.msrb.gmra.mxu3 %v18966_v24 }
 0x3b8   :  { %v18147_v14 = vld [vmem:[#allocation5 + $0x21cc] sm:$0xf]  ;;  %v15417_v22 = vor.u32 %v18083_v10, %v15414_v12  ;;  %7663 = vmatpush.bf16.msra.mxu1 %v15161_v18  ;;  %v7400_v10 = vadd.f32 %v7399_v2, %v19058_v37 }
 0x3b9   :  { %v15670_v15 = vld [vmem:[#allocation5 + $0x21e8] sm:$0xf0] }
 0x3ba   :  { %v17947_v35 = vld [vmem:[#allocation5 + $0x1b8c] sm:$0xf]  ;;  %v15673_v40 = vor.u32 %v18147_v14, %v15670_v15  ;;  %7676 = vmatpush.bf16.msra.mxu2 %v15417_v22  ;;  %v7413_v22 = vadd.f32 %v7412_v13, %v7400_v10 }
 0x3bb   :  { %v14870_v33 = vld [vmem:[#allocation5 + $0x1ba8] sm:$0xf0] }
 0x3bc   :  { %v18011_v38 = vld [vmem:[#allocation5 + $0x1d8c] sm:$0xf]  ;;  %v14873_v49 = vor.u32 %v17947_v35, %v14870_v33  ;;  %7689 = vmatpush.bf16.msra.mxu3 %v15673_v40 }
 0x3bd   :  { %v15126_v41 = vld [vmem:[#allocation5 + $0x1da8] sm:$0xf0] }
 0x3be   :  { %v18075_v44 = vld [vmem:[#allocation5 + $0x1f8c] sm:$0xf]  ;;  %v15129_v50 = vor.u32 %v18011_v38, %v15126_v41  ;;  %7651 = vmatpush.bf16.msra.mxu0 %v14873_v49 }
 0x3bf   :  { %v15382_v46 = vld [vmem:[#allocation5 + $0x1fa8] sm:$0xf0] }
 0x3c0   :  { %v18139_v47 = vld [vmem:[#allocation5 + $0x218c] sm:$0xf]  ;;  %v15385_v51 = vor.u32 %v18075_v44, %v15382_v46  ;;  %7664 = vmatpush.bf16.msra.mxu1 %v15129_v50 }
 0x3c1   :  { %v15638_v48 = vld [vmem:[#allocation5 + $0x21a8] sm:$0xf0] }
 0x3c2   :  { %v17939_v52 = vld [vmem:[#allocation5 + $0x1b4c] sm:$0xf]  ;;  %v15641_v56 = vor.u32 %v18139_v47, %v15638_v48  ;;  %7677 = vmatpush.bf16.msra.mxu2 %v15385_v51  ;;  %v7425_v51 = vpop.f32.mrf.mxu2 }
 0x3c3   :  { %v14838_v53 = vld [vmem:[#allocation5 + $0x1b68] sm:$0xf0] }
 0x3c4   :  { %v18003_v55 = vld [vmem:[#allocation5 + $0x1d4c] sm:$0xf]  ;;  %v14841_v27 = vor.u32 %v17939_v52, %v14838_v53  ;;  %7690 = vmatpush.bf16.msra.mxu3 %v15641_v56  ;;  %v7426_v56 = vadd.f32 %v7425_v51, %v7413_v22 }
 0x3c5   :  { %v15094_v57 = vld [vmem:[#allocation5 + $0x1d68] sm:$0xf0] }
 0x3c6   :  { %v18067_v58 = vld [vmem:[#allocation5 + $0x1f4c] sm:$0xf]  ;;  %v15097_v61 = vor.u32 %v18003_v55, %v15094_v57  ;;  %7652 = vmatpush.bf16.msra.mxu0 %v14841_v27  ;;  %v7438_v57 = vpop.f32.mrf.mxu3  ;;  %v7414_v27 = vpop.f32.mrf.mxu1 }
 0x3c7   :  { %v15350_v54 = vld [vmem:[#allocation5 + $0x1f68] sm:$0xf0] }
 0x3c8   :  { %v18131_v59 = vld [vmem:[#allocation5 + $0x214c] sm:$0xf]  ;;  %v15353_v62 = vor.u32 %v18067_v58, %v15350_v54  ;;  %7665 = vmatpush.bf16.msra.mxu1 %v15097_v61  ;;  %v19065_v61 = vadd.f32 %v7438_v57, %v7426_v56 }
 0x3c9   :  { %v15606_v60 = vld [vmem:[#allocation5 + $0x2168] sm:$0xf0] }
 0x3ca   :  { %v17931_v63 = vld [vmem:[#allocation5 + $0x1b0c] sm:$0xf]  ;;  %v15609_v3 = vor.u32 %v18131_v59, %v15606_v60  ;;  %7678 = vmatpush.bf16.msra.mxu2 %v15353_v62  ;;  %v7401_v59 = vpop.f32.mrf.mxu0 }
 0x3cb   :  { %v14806_v0 = vld [vmem:[#allocation5 + $0x1b28] sm:$0xf0]  ;;  %v17120_v59 = vld [vmem:[#allocation5 + $0x1ac] sm:$0xf0] }
 0x3cc   :  { %v17995_v1 = vld [vmem:[#allocation5 + $0x1d0c] sm:$0xf]  ;;  %v14809_v12 = vor.u32 %v17931_v63, %v14806_v0  ;;  %7691 = vmatpush.bf16.msra.mxu3 %v15609_v3 }
 0x3cd   :  { %v15062_v4 = vld [vmem:[#allocation5 + $0x1d28] sm:$0xf0] }
 0x3ce   :  { %v18059_v6 = vld [vmem:[#allocation5 + $0x1f0c] sm:$0xf]  ;;  %v15065_v11 = vor.u32 %v17995_v1, %v15062_v4  ;;  %7653 = vmatpush.bf16.msra.mxu0 %v14809_v12 }
 0x3cf   :  { %v15318_v7 = vld [vmem:[#allocation5 + $0x1f28] sm:$0xf0] }
 0x3d0   :  { %v18123_v8 = vld [vmem:[#allocation5 + $0x210c] sm:$0xf]  ;;  %v15321_v14 = vor.u32 %v18059_v6, %v15318_v7  ;;  %7666 = vmatpush.bf16.msra.mxu1 %v15065_v11 }
 0x3d1   :  { %v15574_v9 = vld [vmem:[#allocation5 + $0x2128] sm:$0xf0] }
 0x3d2   :  { %v17923_v15 = vld [vmem:[#allocation5 + $0x1acc] sm:$0xf]  ;;  %v15577_v18 = vor.u32 %v18123_v8, %v15574_v9  ;;  %7679 = vmatpush.bf16.msra.mxu2 %v15321_v14 }
 0x3d3   :  { %v14774_v16 = vld [vmem:[#allocation5 + $0x1ae8] sm:$0xf0] }
 0x3d4   :  { %v17987_v17 = vld [vmem:[#allocation5 + $0x1ccc] sm:$0xf]  ;;  %v14777_v44 = vor.u32 %v17923_v15, %v14774_v16  ;;  %7692 = vmatpush.bf16.msra.mxu3 %v15577_v18 }
 0x3d5   :  { %v15030_v35 = vld [vmem:[#allocation5 + $0x1ce8] sm:$0xf0] }
 0x3d6   :  { %v18051_v33 = vld [vmem:[#allocation5 + $0x1ecc] sm:$0xf]  ;;  %v15033_v37 = vor.u32 %v17987_v17, %v15030_v35  ;;  %7654 = vmatpush.bf16.msra.mxu0 %v14777_v44  ;;  %v11836_v44 = vld [vmem:[#allocation5 + $0x3d0] sm:$0xf] }
 0x3d7   :  { %v15286_v38 = vld [vmem:[#allocation5 + $0x1ee8] sm:$0xf0] }
 0x3d8   :  { %v18115_v40 = vld [vmem:[#allocation5 + $0x20cc] sm:$0xf]  ;;  %v15289_v46 = vor.u32 %v18051_v33, %v15286_v38  ;;  %7667 = vmatpush.bf16.msra.mxu1 %v15033_v37  ;;  %v7427_v38 = vpop.f32.mrf.mxu2  ;;  %v7440_v37 = vpop.f32.mrf.mxu3 }
 0x3d9   :  { %v15542_v41 = vld [vmem:[#allocation5 + $0x20e8] sm:$0xf0]  ;;  %v7451_v37 = vpop.f32.mrf.mxu0 }
 0x3da   :  { %v17915_v47 = vld [vmem:[#allocation5 + $0x1a8c] sm:$0xf]  ;;  %v15545_v50 = vor.u32 %v18115_v40, %v15542_v41  ;;  %7680 = vmatpush.bf16.msra.mxu2 %v15289_v46  ;;  %v11580_v40 = vld [vmem:[#allocation5 + $0x1d0] sm:$0xf] }
 0x3db   :  { %v14742_v48 = vld [vmem:[#allocation5 + $0x1aa8] sm:$0xf0]  ;;  %v17128_v41 = vld [vmem:[#allocation5 + $0x1ec] sm:$0xf0] }
 0x3dc   :  { %v17979_v49 = vld [vmem:[#allocation5 + $0x1c8c] sm:$0xf]  ;;  %v14745_v60 = vor.u32 %v17915_v47, %v14742_v48  ;;  %7693 = vmatpush.bf16.msra.mxu3 %v15545_v50  ;;  %v17192_v47 = vld [vmem:[#allocation5 + $0x3ec] sm:$0xf0]  ;;  %v11581_v56 = vor.u32 %v17128_v41, %v11580_v40 }
 0x3dd   :  { %v14998_v52 = vld [vmem:[#allocation5 + $0x1ca8] sm:$0xf0]  ;;  %v12092_v48 = vld [vmem:[#allocation5 + $0x5d0] sm:$0xf]  ;;  %v11837_v57 = vor.u32 %v17192_v47, %v11836_v44 }
 0x3de   :  { %v18043_v53 = vld [vmem:[#allocation5 + $0x1e8c] sm:$0xf]  ;;  %v15001_v62 = vor.u32 %v17979_v49, %v14998_v52  ;;  %7655 = vmatpush.bf16.msra.mxu0 %v14745_v60  ;;  %v17256_v49 = vld [vmem:[#allocation5 + $0x5ec] sm:$0xf0] }
 0x3df   :  { %v15254_v55 = vld [vmem:[#allocation5 + $0x1ea8] sm:$0xf0]  ;;  %v12348_v52 = vld [vmem:[#allocation5 + $0x7d0] sm:$0xf] }
 0x3e0   :  { %v18107_v58 = vld [vmem:[#allocation5 + $0x208c] sm:$0xf]  ;;  %v15257_v63 = vor.u32 %v18043_v53, %v15254_v55  ;;  %7668 = vmatpush.bf16.msra.mxu1 %v15001_v62  ;;  %v17320_v53 = vld [vmem:[#allocation5 + $0x7ec] sm:$0xf0] }
 0x3e1   :  { %v15510_v54 = vld [vmem:[#allocation5 + $0x20a8] sm:$0xf0]  ;;  %v11804_v60 = vld [vmem:[#allocation5 + $0x390] sm:$0xf]  ;;  %v12349_v27 = vor.u32 %v17320_v53, %v12348_v52 }
 0x3e2   :  { %v17907_v0 = vld [vmem:[#allocation5 + $0x1a4c] sm:$0xf]  ;;  %v15513_v4 = vor.u32 %v18107_v58, %v15510_v54  ;;  %7681 = vmatpush.bf16.msra.mxu2 %v15257_v63  ;;  %v12093_v58 = vor.u32 %v17256_v49, %v12092_v48  ;;  %v11548_v54 = vld [vmem:[#allocation5 + $0x190] sm:$0xf]  ;;  %v7452_v48 = vadd.f32 %v7451_v37, %v19065_v61 }
 0x3e3   :  { %v14710_v1 = vld [vmem:[#allocation5 + $0x1a68] sm:$0xf0]  ;;  %v17184_v62 = vld [vmem:[#allocation5 + $0x3ac] sm:$0xf0] }
 0x3e4   :  { %v17971_v3 = vld [vmem:[#allocation5 + $0x1c4c] sm:$0xf]  ;;  %v14713_v10 = vor.u32 %v17907_v0, %v14710_v1  ;;  %7694 = vmatpush.bf16.msra.mxu3 %v15513_v4  ;;  %v12060_v63 = vld [vmem:[#allocation5 + $0x590] sm:$0xf]  ;;  %v11549_v4 = vor.u32 %v17120_v59, %v11548_v54 }
 0x3e5   :  { %v14966_v6 = vld [vmem:[#allocation5 + $0x1c68] sm:$0xf0]  ;;  %v17248_v0 = vld [vmem:[#allocation5 + $0x5ac] sm:$0xf0] }
 0x3e6   :  { %v18035_v7 = vld [vmem:[#allocation5 + $0x1e4c] sm:$0xf]  ;;  %v14969_v11 = vor.u32 %v17971_v3, %v14966_v6  ;;  %7656 = vmatpush.bf16.msra.mxu0 %v14713_v10  ;;  %v12316_v1 = vld [vmem:[#allocation5 + $0x790] sm:$0xf]  ;;  %v11805_v6 = vor.u32 %v17184_v62, %v11804_v60 }
 0x3e7   :  { %v15222_v2 = vld [vmem:[#allocation5 + $0x1e68] sm:$0xf0]  ;;  %v17312_v3 = vld [vmem:[#allocation5 + $0x7ac] sm:$0xf0] }
 0x3e8   :  { %v18099_v8 = vld [vmem:[#allocation5 + $0x204c] sm:$0xf]  ;;  %v15225_v14 = vor.u32 %v18035_v7, %v15222_v2  ;;  %7669 = vmatpush.bf16.msra.mxu1 %v14969_v11  ;;  %v12061_v7 = vor.u32 %v17248_v0, %v12060_v63  ;;  %v11516_v2 = vld [vmem:[#allocation5 + $0x150] sm:$0xf]  ;;  %v12317_v10 = vor.u32 %v17312_v3, %v12316_v1 }
 0x3e9   :  { %v15478_v9 = vld [vmem:[#allocation5 + $0x2068] sm:$0xf0]  ;;  %v17240_v11 = vld [vmem:[#allocation5 + $0x56c] sm:$0xf0] }
 0x3ea   :  { %v17899_v12 = vld [vmem:[#allocation5 + $0x1a0c] sm:$0xf]  ;;  %v15481_v18 = vor.u32 %v18099_v8, %v15478_v9  ;;  %7682 = vmatpush.bf16.msra.mxu2 %v15225_v14  ;;  %v17112_v8 = vld [vmem:[#allocation5 + $0x16c] sm:$0xf0] }
 0x3eb   :  { %v14678_v13 = vld [vmem:[#allocation5 + $0x1a28] sm:$0xf0]  ;;  %v11772_v9 = vld [vmem:[#allocation5 + $0x350] sm:$0xf] }
 0x3ec   :  { %v17963_v15 = vld [vmem:[#allocation5 + $0x1c0c] sm:$0xf]  ;;  %v14681_v46 = vor.u32 %v17899_v12, %v14678_v13  ;;  %7695 = vmatpush.bf16.msra.mxu3 %v15481_v18  ;;  %v17176_v12 = vld [vmem:[#allocation5 + $0x36c] sm:$0xf0] }
 0x3ed   :  { %v14934_v16 = vld [vmem:[#allocation5 + $0x1c28] sm:$0xf0]  ;;  %v12028_v13 = vld [vmem:[#allocation5 + $0x550] sm:$0xf] }
 0x3ee   :  { %v18027_v17 = vld [vmem:[#allocation5 + $0x1e0c] sm:$0xf]  ;;  %v14937_v50 = vor.u32 %v17963_v15, %v14934_v16  ;;  %7657 = vmatpush.bf16.msra.mxu0 %v14681_v46  ;;  %v12284_v14 = vld [vmem:[#allocation5 + $0x750] sm:$0xf]  ;;  %v11517_v16 = vor.u32 %v17112_v8, %v11516_v2  ;;  %v12029_v18 = vor.u32 %v17240_v11, %v12028_v13  ;;  %v19074_v11 = vpop.f32.mrf.mxu3 }
 0x3ef   :  { %v15190_v22 = vld [vmem:[#allocation5 + $0x1e28] sm:$0xf0]  ;;  %v17304_v15 = vld [vmem:[#allocation5 + $0x76c] sm:$0xf0] }
 0x3f0   :  { %v18091_v35 = vld [vmem:[#allocation5 + $0x200c] sm:$0xf]  ;;  %v15193_v51 = vor.u32 %v18027_v17, %v15190_v22  ;;  %7670 = vmatpush.bf16.msra.mxu1 %v14937_v50  ;;  %v11773_v17 = vor.u32 %v17176_v12, %v11772_v9  ;;  %v11484_v22 = vld [vmem:[#allocation5 + $0x110] sm:$0xf]  ;;  %v12285_v38 = vor.u32 %v17304_v15, %v12284_v14  ;;  %v7464_v50 = vpop.f32.mrf.mxu1  ;;  %v7453_v14 = vpop.f32.mrf.mxu0 }
 0x3f1   :  { %v15446_v33 = vld [vmem:[#allocation5 + $0x2028] sm:$0xf0]  ;;  %7658 = vmatmul.bf16.vlgmr.msra.gmra.mxu0 %v18970_v32  ;;  %v17168_v40 = vld [vmem:[#allocation5 + $0x32c] sm:$0xf0] }
 0x3f2   :  { %v15449_v55 = vor.u32 %v18091_v35, %v15446_v33  ;;  %7683 = vmatpush.bf16.msra.mxu2 %v15193_v51  ;;  %7702 = vmatpush.bf16.msrb.mxu0 %v11581_v56  ;;  %v17104_v35 = vld [vmem:[#allocation5 + $0x12c] sm:$0xf0] }
 0x3f3   :  { %7671 = vmatmul.bf16.vlgmr.msra.gmra.mxu1 %v18968_v29  ;;  %v11740_v33 = vld [vmem:[#allocation5 + $0x310] sm:$0xf]  ;;  %v11485_v49 = vor.u32 %v17104_v35, %v11484_v22 }
 0x3f4   :  { %7696 = vmatpush.bf16.msra.mxu3 %v15449_v55  ;;  %7715 = vmatpush.bf16.msrb.mxu1 %v11837_v57  ;;  %v11996_v41 = vld [vmem:[#allocation5 + $0x510] sm:$0xf]  ;;  %v11741_v51 = vor.u32 %v17168_v40, %v11740_v33 }
 0x3f5   :  { %7684 = vmatmul.bf16.vlgmr.msra.gmra.mxu2 %v18972_v36  ;;  %v17232_v44 = vld [vmem:[#allocation5 + $0x52c] sm:$0xf0] }
 0x3f6   :  { %7728 = vmatpush.bf16.msrb.mxu2 %v12093_v58  ;;  %7703 = vmatpush.bf16.msrb.mxu0 %v11549_v4  ;;  %v12252_v46 = vld [vmem:[#allocation5 + $0x710] sm:$0xf]  ;;  %v11997_v52 = vor.u32 %v17232_v44, %v11996_v41  ;;  %v7465_v58 = vadd.f32 %v7464_v50, %v7452_v48 }
 0x3f7   :  { %7697 = vmatmul.bf16.vlgmr.msra.gmra.mxu3 %v18978_v28  ;;  %v17296_v47 = vld [vmem:[#allocation5 + $0x72c] sm:$0xf0] }
 0x3f8   :  { %7741 = vmatpush.bf16.msrb.mxu3 %v12349_v27  ;;  %7716 = vmatpush.bf16.msrb.mxu1 %v11805_v6  ;;  %v11452_v53 = vld [vmem:[#allocation5 + $0xd0] sm:$0xf]  ;;  %v12253_v57 = vor.u32 %v17296_v47, %v12252_v46 }
 0x3f9   :  { %v17096_v55 = vld [vmem:[#allocation5 + $0xec] sm:$0xf0] }
 0x3fa   :  { %7729 = vmatpush.bf16.msrb.mxu2 %v12061_v7  ;;  %7704 = vmatpush.bf16.msrb.mxu0 %v11517_v16  ;;  %v11708_v56 = vld [vmem:[#allocation5 + $0x2d0] sm:$0xf]  ;;  %v11453_v63 = vor.u32 %v17096_v55, %v11452_v53  ;;  %v7477_v7 = vpop.f32.mrf.mxu2  ;;  %v7466_v16 = vpop.f32.mrf.mxu1 }
 0x3fb   :  { %v17160_v54 = vld [vmem:[#allocation5 + $0x2ec] sm:$0xf0] }
 0x3fc   :  { %7742 = vmatpush.bf16.msrb.mxu3 %v12317_v10  ;;  %7717 = vmatpush.bf16.msrb.mxu1 %v11773_v17  ;;  %v11964_v59 = vld [vmem:[#allocation5 + $0x4d0] sm:$0xf]  ;;  %v11709_v61 = vor.u32 %v17160_v54, %v11708_v56  ;;  %v19072_v10 = vadd.f32 %v7477_v7, %v7465_v58 }
 0x3fd   :  { %v17224_v60 = vld [vmem:[#allocation5 + $0x4ec] sm:$0xf0] }
 0x3fe   :  { %7730 = vmatpush.bf16.msrb.mxu2 %v12029_v18  ;;  %v12220_v27 = vld [vmem:[#allocation5 + $0x6d0] sm:$0xf]  ;;  %7705 = vmatpush.bf16.msrb.mxu0 %v11485_v49  ;;  %v11965_v0 = vor.u32 %v17224_v60, %v11964_v59 }
 0x3ff   :  { %v17288_v62 = vld [vmem:[#allocation5 + $0x6ec] sm:$0xf0] }
 0x400   :  { %7743 = vmatpush.bf16.msrb.mxu3 %v12285_v38  ;;  %7718 = vmatpush.bf16.msrb.mxu1 %v11741_v51  ;;  %v11420_v1 = vld [vmem:[#allocation5 + $0x90] sm:$0xf]  ;;  %v12221_v6 = vor.u32 %v17288_v62, %v12220_v27 }
 0x401   :  { %v17088_v3 = vld [vmem:[#allocation5 + $0xac] sm:$0xf0] }
 0x402   :  { %7731 = vmatpush.bf16.msrb.mxu2 %v11997_v52  ;;  %v11676_v4 = vld [vmem:[#allocation5 + $0x290] sm:$0xf]  ;;  %7706 = vmatpush.bf16.msrb.mxu0 %v11453_v63  ;;  %v11421_v15 = vor.u32 %v17088_v3, %v11420_v1  ;;  %v7479_v59 = vpop.f32.mrf.mxu2  ;;  %v7492_v63 = vpop.f32.mrf.mxu3 }
 0x403   :  { %v17152_v2 = vld [vmem:[#allocation5 + $0x2ac] sm:$0xf0] }
 0x404   :  { %7744 = vmatpush.bf16.msrb.mxu3 %v12253_v57  ;;  %v11932_v8 = vld [vmem:[#allocation5 + $0x490] sm:$0xf]  ;;  %7719 = vmatpush.bf16.msrb.mxu1 %v11709_v61  ;;  %v11677_v17 = vor.u32 %v17152_v2, %v11676_v4 }
 0x405   :  { %v17216_v9 = vld [vmem:[#allocation5 + $0x4ac] sm:$0xf0] }
 0x406   :  { %v12188_v12 = vld [vmem:[#allocation5 + $0x690] sm:$0xf]  ;;  %7732 = vmatpush.bf16.msrb.mxu2 %v11965_v0  ;;  %v11933_v18 = vor.u32 %v17216_v9, %v11932_v8  ;;  %7707 = vmatpush.bf16.msrb.mxu0 %v11421_v15 }
 0x407   :  { %v17280_v13 = vld [vmem:[#allocation5 + $0x6ac] sm:$0xf0] }
 0x408   :  { %v11388_v22 = vld [vmem:[#allocation5 + $0x50] sm:$0xf]  ;;  %7745 = vmatpush.bf16.msrb.mxu3 %v12221_v6  ;;  %v12189_v38 = vor.u32 %v17280_v13, %v12188_v12  ;;  %7720 = vmatpush.bf16.msrb.mxu1 %v11677_v17 }
 0x409   :  { %v17080_v35 = vld [vmem:[#allocation5 + $0x6c] sm:$0xf0] }
 0x40a   :  { %v11644_v33 = vld [vmem:[#allocation5 + $0x250] sm:$0xf]  ;;  %v11389_v47 = vor.u32 %v17080_v35, %v11388_v22  ;;  %7733 = vmatpush.bf16.msrb.mxu2 %v11933_v18 }
 0x40b   :  { %v17144_v40 = vld [vmem:[#allocation5 + $0x26c] sm:$0xf0] }
 0x40c   :  { %v11900_v41 = vld [vmem:[#allocation5 + $0x450] sm:$0xf]  ;;  %v11645_v50 = vor.u32 %v17144_v40, %v11644_v33  ;;  %7746 = vmatpush.bf16.msrb.mxu3 %v12189_v38  ;;  %7708 = vmatpush.bf16.msrb.mxu0 %v11389_v47 }
 0x40d   :  { %v17208_v44 = vld [vmem:[#allocation5 + $0x46c] sm:$0xf0] }
 0x40e   :  { %v12156_v37 = vld [vmem:[#allocation5 + $0x650] sm:$0xf]  ;;  %v11901_v51 = vor.u32 %v17208_v44, %v11900_v41  ;;  %7721 = vmatpush.bf16.msrb.mxu1 %v11645_v50 }
 0x40f   :  { %v17272_v46 = vld [vmem:[#allocation5 + $0x66c] sm:$0xf0] }
 0x410   :  { %v11356_v48 = vld [vmem:[#allocation5 + $0x10] sm:$0xf]  ;;  %v12157_v56 = vor.u32 %v17272_v46, %v12156_v37  ;;  %7734 = vmatpush.bf16.msrb.mxu2 %v11901_v51 }
 0x411   :  { %v17072_v49 = vld [vmem:[#allocation5 + $0x2c] sm:$0xf0] }
 0x412   :  { %v11612_v52 = vld [vmem:[#allocation5 + $0x210] sm:$0xf]  ;;  %v11357_v61 = vor.u32 %v17072_v49, %v11356_v48  ;;  %7747 = vmatpush.bf16.msrb.mxu3 %v12157_v56  ;;  %v18523_v48 = vld [vmem:[#allocation7] sm:$0xff] }
 0x413   :  { %v17136_v53 = vld [vmem:[#allocation5 + $0x22c] sm:$0xf0]  ;;  %v1305_v49 = vperm.slane %v18523_v48, 3 }
 0x414   :  { %v11868_v55 = vld [vmem:[#allocation5 + $0x410] sm:$0xf]  ;;  %v11613_v4 = vor.u32 %v17136_v53, %v11612_v52  ;;  %7709 = vmatpush.bf16.msrb.mxu0 %v11357_v61 }
 0x415   :  { %v17200_v57 = vld [vmem:[#allocation5 + $0x42c] sm:$0xf0]  ;;  %v7491_v59 = vadd.f32 %v19074_v11, %v1305_v49 }
 0x416   :  { %v12124_v58 = vld [vmem:[#allocation5 + $0x610] sm:$0xf]  ;;  %v11869_v6 = vor.u32 %v17200_v57, %v11868_v55  ;;  %7722 = vmatpush.bf16.msrb.mxu1 %v11613_v4 }
 0x417   :  { %v17264_v54 = vld [vmem:[#allocation5 + $0x62c] sm:$0xf0]  ;;  %7710 = vmatmul.bf16.vlgmr.msrb.gmra.mxu0 %v18932_v20 }
 0x418   :  { %v12604_v60 = vld [vmem:[#allocation5 + $0x9d0] sm:$0xf]  ;;  %v12125_v8 = vor.u32 %v17264_v54, %v12124_v58  ;;  %7735 = vmatpush.bf16.msrb.mxu2 %v11869_v6 }
 0x419   :  { %v17384_v27 = vld [vmem:[#allocation5 + $0x9ec] sm:$0xf0]  ;;  %7723 = vmatmul.bf16.vlgmr.msrb.gmra.mxu1 %v18936_v23 }
 0x41a   :  { %v12860_v62 = vld [vmem:[#allocation5 + $0xbd0] sm:$0xf]  ;;  %v12605_v9 = vor.u32 %v17384_v27, %v12604_v60  ;;  %7748 = vmatpush.bf16.msrb.mxu3 %v12125_v8 }
 0x41b   :  { %v17448_v0 = vld [vmem:[#allocation5 + $0xbec] sm:$0xf0]  ;;  %7736 = vmatmul.bf16.vlgmr.msrb.gmra.mxu2 %v18930_v19 }
 0x41c   :  { %v13116_v1 = vld [vmem:[#allocation5 + $0xdd0] sm:$0xf]  ;;  %v12861_v12 = vor.u32 %v17448_v0, %v12860_v62  ;;  %7754 = vmatpush.bf16.msra.mxu0 %v12605_v9 }
 0x41d   :  { %v17512_v3 = vld [vmem:[#allocation5 + $0xdec] sm:$0xf0]  ;;  %7749 = vmatmul.bf16.vlgmr.msrb.gmra.mxu3 %v18934_v21 }
 0x41e   :  { %v13372_v7 = vld [vmem:[#allocation5 + $0xfd0] sm:$0xf]  ;;  %v13117_v13 = vor.u32 %v17512_v3, %v13116_v1  ;;  %7767 = vmatpush.bf16.msra.mxu1 %v12861_v12 }
 0x41f   :  { %v17576_v2 = vld [vmem:[#allocation5 + $0xfec] sm:$0xf0] }
 0x420   :  { %v12572_v14 = vld [vmem:[#allocation5 + $0x990] sm:$0xf]  ;;  %v13373_v17 = vor.u32 %v17576_v2, %v13372_v7  ;;  %7780 = vmatpush.bf16.msra.mxu2 %v13117_v13  ;;  %v7503_v7 = vpop.f32.mrf.mxu0 }
 0x421   :  { %v17376_v15 = vld [vmem:[#allocation5 + $0x9ac] sm:$0xf0]  ;;  %v7504_v13 = vadd.f32 %v7503_v7, %v7491_v59 }
 0x422   :  { %v12828_v16 = vld [vmem:[#allocation5 + $0xb90] sm:$0xf]  ;;  %v12573_v40 = vor.u32 %v17376_v15, %v12572_v14  ;;  %7793 = vmatpush.bf16.msra.mxu3 %v13373_v17  ;;  %v7516_v14 = vpop.f32.mrf.mxu1 }
 0x423   :  { %v17440_v18 = vld [vmem:[#allocation5 + $0xbac] sm:$0xf0] }
 0x424   :  { %v13084_v22 = vld [vmem:[#allocation5 + $0xd90] sm:$0xf]  ;;  %v12829_v44 = vor.u32 %v17440_v18, %v12828_v16  ;;  %7755 = vmatpush.bf16.msra.mxu0 %v12573_v40 }
 0x425   :  { %v17504_v35 = vld [vmem:[#allocation5 + $0xdac] sm:$0xf0] }
 0x426   :  { %v13340_v33 = vld [vmem:[#allocation5 + $0xf90] sm:$0xf]  ;;  %v13085_v37 = vor.u32 %v17504_v35, %v13084_v22  ;;  %7768 = vmatpush.bf16.msra.mxu1 %v12829_v44 }
 0x427   :  { %v17568_v38 = vld [vmem:[#allocation5 + $0xfac] sm:$0xf0] }
 0x428   :  { %v12540_v41 = vld [vmem:[#allocation5 + $0x950] sm:$0xf]  ;;  %v13341_v50 = vor.u32 %v17568_v38, %v13340_v33  ;;  %7781 = vmatpush.bf16.msra.mxu2 %v13085_v37  ;;  %v7517_v33 = vadd.f32 %v7516_v14, %v7504_v13 }
 0x429   :  { %v17368_v46 = vld [vmem:[#allocation5 + $0x96c] sm:$0xf0] }
 0x42a   :  { %v12796_v47 = vld [vmem:[#allocation5 + $0xb50] sm:$0xf]  ;;  %v12541_v57 = vor.u32 %v17368_v46, %v12540_v41  ;;  %7794 = vmatpush.bf16.msra.mxu3 %v13341_v50 }
 0x42b   :  { %v17432_v51 = vld [vmem:[#allocation5 + $0xb6c] sm:$0xf0] }
 0x42c   :  { %v13052_v52 = vld [vmem:[#allocation5 + $0xd50] sm:$0xf]  ;;  %v12797_v58 = vor.u32 %v17432_v51, %v12796_v47  ;;  %7756 = vmatpush.bf16.msra.mxu0 %v12541_v57  ;;  %v7529_v47 = vpop.f32.mrf.mxu2 }
 0x42d   :  { %v17496_v53 = vld [vmem:[#allocation5 + $0xd6c] sm:$0xf0] }
 0x42e   :  { %v13308_v55 = vld [vmem:[#allocation5 + $0xf50] sm:$0xf]  ;;  %v13053_v54 = vor.u32 %v17496_v53, %v13052_v52  ;;  %7769 = vmatpush.bf16.msra.mxu1 %v12797_v58  ;;  %v7530_v52 = vadd.f32 %v7529_v47, %v7517_v33  ;;  %v7542_v53 = vpop.f32.mrf.mxu3 }
 0x42f   :  { %v17560_v56 = vld [vmem:[#allocation5 + $0xf6c] sm:$0xf0] }
 0x430   :  { %v12508_v60 = vld [vmem:[#allocation5 + $0x910] sm:$0xf]  ;;  %v13309_v63 = vor.u32 %v17560_v56, %v13308_v55  ;;  %7782 = vmatpush.bf16.msra.mxu2 %v13053_v54  ;;  %v19081_v58 = vadd.f32 %v7542_v53, %v7530_v52  ;;  %v7505_v54 = vpop.f32.mrf.mxu0 }
 0x431   :  { %v17360_v27 = vld [vmem:[#allocation5 + $0x92c] sm:$0xf0] }
 0x432   :  { %v12764_v62 = vld [vmem:[#allocation5 + $0xb10] sm:$0xf]  ;;  %v12509_v6 = vor.u32 %v17360_v27, %v12508_v60  ;;  %7795 = vmatpush.bf16.msra.mxu3 %v13309_v63 }
 0x433   :  { %v17424_v61 = vld [vmem:[#allocation5 + $0xb2c] sm:$0xf0] }
 0x434   :  { %v13020_v0 = vld [vmem:[#allocation5 + $0xd10] sm:$0xf]  ;;  %v12765_v2 = vor.u32 %v17424_v61, %v12764_v62  ;;  %7757 = vmatpush.bf16.msra.mxu0 %v12509_v6  ;;  %v7518_v61 = vpop.f32.mrf.mxu1 }
 0x435   :  { %v17488_v1 = vld [vmem:[#allocation5 + $0xd2c] sm:$0xf0] }
 0x436   :  { %v13276_v3 = vld [vmem:[#allocation5 + $0xf10] sm:$0xf]  ;;  %v13021_v8 = vor.u32 %v17488_v1, %v13020_v0  ;;  %7770 = vmatpush.bf16.msra.mxu1 %v12765_v2  ;;  %v7544_v33 = vpop.f32.mrf.mxu3 }
 0x437   :  { %v17552_v4 = vld [vmem:[#allocation5 + $0xf2c] sm:$0xf0] }
 0x438   :  { %v12476_v9 = vld [vmem:[#allocation5 + $0x8d0] sm:$0xf]  ;;  %v13277_v15 = vor.u32 %v17552_v4, %v13276_v3  ;;  %7783 = vmatpush.bf16.msra.mxu2 %v13021_v8 }
 0x439   :  { %v17352_v12 = vld [vmem:[#allocation5 + $0x8ec] sm:$0xf0] }
 0x43a   :  { %v12732_v11 = vld [vmem:[#allocation5 + $0xad0] sm:$0xf]  ;;  %v12477_v38 = vor.u32 %v17352_v12, %v12476_v9  ;;  %7796 = vmatpush.bf16.msra.mxu3 %v13277_v15 }
 0x43b   :  { %v17416_v16 = vld [vmem:[#allocation5 + $0xaec] sm:$0xf0] }
 0x43c   :  { %v12988_v17 = vld [vmem:[#allocation5 + $0xcd0] sm:$0xf]  ;;  %v12733_v40 = vor.u32 %v17416_v16, %v12732_v11  ;;  %7758 = vmatpush.bf16.msra.mxu0 %v12477_v38  ;;  %v7531_v16 = vpop.f32.mrf.mxu2 }
 0x43d   :  { %v17480_v18 = vld [vmem:[#allocation5 + $0xcec] sm:$0xf0] }
 0x43e   :  { %v13244_v22 = vld [vmem:[#allocation5 + $0xed0] sm:$0xf]  ;;  %v12989_v41 = vor.u32 %v17480_v18, %v12988_v17  ;;  %7771 = vmatpush.bf16.msra.mxu1 %v12733_v40 }
 0x43f   :  { %v17544_v35 = vld [vmem:[#allocation5 + $0xeec] sm:$0xf0] }
 0x440   :  { %v12444_v44 = vld [vmem:[#allocation5 + $0x890] sm:$0xf]  ;;  %v13245_v48 = vor.u32 %v17544_v35, %v13244_v22  ;;  %7784 = vmatpush.bf16.msra.mxu2 %v12989_v41 }
 0x441   :  { %v17344_v37 = vld [vmem:[#allocation5 + $0x8ac] sm:$0xf0] }
 0x442   :  { %v12700_v46 = vld [vmem:[#allocation5 + $0xa90] sm:$0xf]  ;;  %v12445_v57 = vor.u32 %v17344_v37, %v12444_v44  ;;  %7797 = vmatpush.bf16.msra.mxu3 %v13245_v48 }
 0x443   :  { %v17408_v49 = vld [vmem:[#allocation5 + $0xaac] sm:$0xf0] }
 0x444   :  { %v12956_v50 = vld [vmem:[#allocation5 + $0xc90] sm:$0xf]  ;;  %v12701_v59 = vor.u32 %v17408_v49, %v12700_v46  ;;  %7759 = vmatpush.bf16.msra.mxu0 %v12445_v57 }
 0x445   :  { %v17472_v51 = vld [vmem:[#allocation5 + $0xcac] sm:$0xf0] }
 0x446   :  { %v13212_v55 = vld [vmem:[#allocation5 + $0xe90] sm:$0xf]  ;;  %v12957_v60 = vor.u32 %v17472_v51, %v12956_v50  ;;  %7772 = vmatpush.bf16.msra.mxu1 %v12701_v59 }
 0x447   :  { %v17536_v56 = vld [vmem:[#allocation5 + $0xeac] sm:$0xf0] }
 0x448   :  { %v12412_v27 = vld [vmem:[#allocation5 + $0x850] sm:$0xf]  ;;  %v13213_v0 = vor.u32 %v17536_v56, %v13212_v55  ;;  %7785 = vmatpush.bf16.msra.mxu2 %v12957_v60 }
 0x449   :  { %v17336_v62 = vld [vmem:[#allocation5 + $0x86c] sm:$0xf0] }
 0x44a   :  { %v12668_v63 = vld [vmem:[#allocation5 + $0xa50] sm:$0xf]  ;;  %v12413_v2 = vor.u32 %v17336_v62, %v12412_v27  ;;  %7798 = vmatpush.bf16.msra.mxu3 %v13213_v0 }
 0x44b   :  { %v17400_v1 = vld [vmem:[#allocation5 + $0xa6c] sm:$0xf0] }
 0x44c   :  { %v12924_v3 = vld [vmem:[#allocation5 + $0xc50] sm:$0xf]  ;;  %v12669_v12 = vor.u32 %v17400_v1, %v12668_v63  ;;  %7760 = vmatpush.bf16.msra.mxu0 %v12413_v2 }
 0x44d   :  { %v17464_v4 = vld [vmem:[#allocation5 + $0xc6c] sm:$0xf0] }
 0x44e   :  { %v13180_v6 = vld [vmem:[#allocation5 + $0xe50] sm:$0xf]  ;;  %v12925_v11 = vor.u32 %v17464_v4, %v12924_v3  ;;  %7773 = vmatpush.bf16.msra.mxu1 %v12669_v12 }
 0x44f   :  { %v17528_v7 = vld [vmem:[#allocation5 + $0xe6c] sm:$0xf0] }
 0x450   :  { %v12380_v8 = vld [vmem:[#allocation5 + $0x810] sm:$0xf]  ;;  %v13181_v17 = vor.u32 %v17528_v7, %v13180_v6  ;;  %7786 = vmatpush.bf16.msra.mxu2 %v12925_v11 }
 0x451   :  { %v17328_v9 = vld [vmem:[#allocation5 + $0x82c] sm:$0xf0] }
 0x452   :  { %v12636_v13 = vld [vmem:[#allocation5 + $0xa10] sm:$0xf]  ;;  %v12381_v44 = vor.u32 %v17328_v9, %v12380_v8  ;;  %7799 = vmatpush.bf16.msra.mxu3 %v13181_v17 }
 0x453   :  { %v17392_v14 = vld [vmem:[#allocation5 + $0xa2c] sm:$0xf0] }
 0x454   :  { %v12892_v15 = vld [vmem:[#allocation5 + $0xc10] sm:$0xf]  ;;  %v12637_v48 = vor.u32 %v17392_v14, %v12636_v13  ;;  %7761 = vmatpush.bf16.msra.mxu0 %v12381_v44  ;;  %v7555_v44 = vpop.f32.mrf.mxu0 }
 0x455   :  { %v17456_v18 = vld [vmem:[#allocation5 + $0xc2c] sm:$0xf0] }
 0x456   :  { %v13148_v22 = vld [vmem:[#allocation5 + $0xe10] sm:$0xf]  ;;  %v12893_v49 = vor.u32 %v17456_v18, %v12892_v15  ;;  %7774 = vmatpush.bf16.msra.mxu1 %v12637_v48 }
 0x457   :  { %v17520_v35 = vld [vmem:[#allocation5 + $0xe2c] sm:$0xf0]  ;;  %7762 = vmatmul.bf16.vlgmr.msra.gmra.mxu0 %v18944_v42 }
 0x458   :  { %v13628_v38 = vld [vmem:[#allocation5 + $0x11d0] sm:$0xf]  ;;  %v13149_v52 = vor.u32 %v17520_v35, %v13148_v22  ;;  %7787 = vmatpush.bf16.msra.mxu2 %v12893_v49  ;;  %v7568_v49 = vpop.f32.mrf.mxu1 }
 0x459   :  { %v17640_v40 = vld [vmem:[#allocation5 + $0x11ec] sm:$0xf0]  ;;  %7775 = vmatmul.bf16.vlgmr.msra.gmra.mxu1 %v18948_v45 }
 0x45a   :  { %v13884_v41 = vld [vmem:[#allocation5 + $0x13d0] sm:$0xf]  ;;  %v13629_v53 = vor.u32 %v17640_v40, %v13628_v38  ;;  %7800 = vmatpush.bf16.msra.mxu3 %v13149_v52 }
 0x45b   :  { %v17704_v37 = vld [vmem:[#allocation5 + $0x13ec] sm:$0xf0]  ;;  %7788 = vmatmul.bf16.vlgmr.msra.gmra.mxu2 %v18942_v39 }
 0x45c   :  { %v14140_v46 = vld [vmem:[#allocation5 + $0x15d0] sm:$0xf]  ;;  %v13885_v55 = vor.u32 %v17704_v37, %v13884_v41  ;;  %7806 = vmatpush.bf16.msrb.mxu0 %v13629_v53 }
 0x45d   :  { %v17768_v47 = vld [vmem:[#allocation5 + $0x15ec] sm:$0xf0]  ;;  %7801 = vmatmul.bf16.vlgmr.msra.gmra.mxu3 %v18946_v43 }
 0x45e   :  { %v14396_v50 = vld [vmem:[#allocation5 + $0x17d0] sm:$0xf]  ;;  %v14141_v56 = vor.u32 %v17768_v47, %v14140_v46  ;;  %7819 = vmatpush.bf16.msrb.mxu1 %v13885_v55  ;;  %v7556_v47 = vadd.f32 %v7555_v44, %v19081_v58 }
 0x45f   :  { %v17832_v51 = vld [vmem:[#allocation5 + $0x17ec] sm:$0xf0] }
 0x460   :  { %v13596_v57 = vld [vmem:[#allocation5 + $0x1190] sm:$0xf]  ;;  %v14397_v60 = vor.u32 %v17832_v51, %v14396_v50  ;;  %7832 = vmatpush.bf16.msrb.mxu2 %v14141_v56 }
 0x461   :  { %v17632_v54 = vld [vmem:[#allocation5 + $0x11ac] sm:$0xf0] }
 0x462   :  { %v13852_v59 = vld [vmem:[#allocation5 + $0x1390] sm:$0xf]  ;;  %v13597_v1 = vor.u32 %v17632_v54, %v13596_v57  ;;  %7845 = vmatpush.bf16.msrb.mxu3 %v14397_v60  ;;  %v7569_v57 = vadd.f32 %v7568_v49, %v7556_v47 }
 0x463   :  { %v17696_v27 = vld [vmem:[#allocation5 + $0x13ac] sm:$0xf0] }
 0x464   :  { %v14108_v62 = vld [vmem:[#allocation5 + $0x1590] sm:$0xf]  ;;  %v13853_v3 = vor.u32 %v17696_v27, %v13852_v59  ;;  %7807 = vmatpush.bf16.msrb.mxu0 %v13597_v1 }
 0x465   :  { %v17760_v63 = vld [vmem:[#allocation5 + $0x15ac] sm:$0xf0] }
 0x466   :  { %v14364_v61 = vld [vmem:[#allocation5 + $0x1790] sm:$0xf]  ;;  %v14109_v4 = vor.u32 %v17760_v63, %v14108_v62  ;;  %7820 = vmatpush.bf16.msrb.mxu1 %v13853_v3 }
 0x467   :  { %v17824_v0 = vld [vmem:[#allocation5 + $0x17ac] sm:$0xf0] }
 0x468   :  { %v13564_v6 = vld [vmem:[#allocation5 + $0x1150] sm:$0xf]  ;;  %v14365_v8 = vor.u32 %v17824_v0, %v14364_v61  ;;  %7833 = vmatpush.bf16.msrb.mxu2 %v14109_v4 }
 0x469   :  { %v17624_v7 = vld [vmem:[#allocation5 + $0x116c] sm:$0xf0] }
 0x46a   :  { %v13820_v2 = vld [vmem:[#allocation5 + $0x1350] sm:$0xf]  ;;  %v13565_v15 = vor.u32 %v17624_v7, %v13564_v6  ;;  %7846 = vmatpush.bf16.msrb.mxu3 %v14365_v8  ;;  %v7581_v6 = vpop.f32.mrf.mxu2 }
 0x46b   :  { %v17688_v9 = vld [vmem:[#allocation5 + $0x136c] sm:$0xf0] }
 0x46c   :  { %v14076_v12 = vld [vmem:[#allocation5 + $0x1550] sm:$0xf]  ;;  %v13821_v16 = vor.u32 %v17688_v9, %v13820_v2  ;;  %7808 = vmatpush.bf16.msrb.mxu0 %v13565_v15  ;;  %v7582_v9 = vadd.f32 %v7581_v6, %v7569_v57 }
 0x46d   :  { %v17752_v11 = vld [vmem:[#allocation5 + $0x156c] sm:$0xf0] }
 0x46e   :  { %v14332_v13 = vld [vmem:[#allocation5 + $0x1750] sm:$0xf]  ;;  %v14077_v17 = vor.u32 %v17752_v11, %v14076_v12  ;;  %7821 = vmatpush.bf16.msrb.mxu1 %v13821_v16  ;;  %v7594_v12 = vpop.f32.mrf.mxu3  ;;  %v7570_v16 = vpop.f32.mrf.mxu1 }
 0x46f   :  { %v17816_v14 = vld [vmem:[#allocation5 + $0x176c] sm:$0xf0] }
 0x470   :  { %v13532_v18 = vld [vmem:[#allocation5 + $0x1110] sm:$0xf]  ;;  %v14333_v33 = vor.u32 %v17816_v14, %v14332_v13  ;;  %7834 = vmatpush.bf16.msrb.mxu2 %v14077_v17  ;;  %v7557_v14 = vpop.f32.mrf.mxu0  ;;  %v19088_v17 = vadd.f32 %v7594_v12, %v7582_v9 }
 0x471   :  { %v17616_v22 = vld [vmem:[#allocation5 + $0x112c] sm:$0xf0] }
 0x472   :  { %v13788_v35 = vld [vmem:[#allocation5 + $0x1310] sm:$0xf]  ;;  %v13533_v48 = vor.u32 %v17616_v22, %v13532_v18  ;;  %7847 = vmatpush.bf16.msrb.mxu3 %v14333_v33 }
 0x473   :  { %v17680_v38 = vld [vmem:[#allocation5 + $0x132c] sm:$0xf0] }
 0x474   :  { %v14044_v40 = vld [vmem:[#allocation5 + $0x1510] sm:$0xf]  ;;  %v13789_v50 = vor.u32 %v17680_v38, %v13788_v35  ;;  %7809 = vmatpush.bf16.msrb.mxu0 %v13533_v48 }
 0x475   :  { %v17744_v41 = vld [vmem:[#allocation5 + $0x152c] sm:$0xf0] }
 0x476   :  { %v14300_v37 = vld [vmem:[#allocation5 + $0x1710] sm:$0xf]  ;;  %v14045_v51 = vor.u32 %v17744_v41, %v14044_v40  ;;  %7822 = vmatpush.bf16.msrb.mxu1 %v13789_v50 }
 0x477   :  { %v17808_v46 = vld [vmem:[#allocation5 + $0x172c] sm:$0xf0] }
 0x478   :  { %v13500_v52 = vld [vmem:[#allocation5 + $0x10d0] sm:$0xf]  ;;  %v14301_v56 = vor.u32 %v17808_v46, %v14300_v37  ;;  %7835 = vmatpush.bf16.msrb.mxu2 %v14045_v51 }
 0x479   :  { %v17608_v53 = vld [vmem:[#allocation5 + $0x10ec] sm:$0xf0] }
 0x47a   :  { %v13756_v55 = vld [vmem:[#allocation5 + $0x12d0] sm:$0xf]  ;;  %v13501_v63 = vor.u32 %v17608_v53, %v13500_v52  ;;  %7848 = vmatpush.bf16.msrb.mxu3 %v14301_v56 }
 0x47b   :  { %v17672_v54 = vld [vmem:[#allocation5 + $0x12ec] sm:$0xf0] }
 0x47c   :  { %v14012_v59 = vld [vmem:[#allocation5 + $0x14d0] sm:$0xf]  ;;  %v13757_v58 = vor.u32 %v17672_v54, %v13756_v55  ;;  %7810 = vmatpush.bf16.msrb.mxu0 %v13501_v63 }
 0x47d   :  { %v17736_v60 = vld [vmem:[#allocation5 + $0x14ec] sm:$0xf0] }
 0x47e   :  { %v14268_v27 = vld [vmem:[#allocation5 + $0x16d0] sm:$0xf]  ;;  %v14013_v61 = vor.u32 %v17736_v60, %v14012_v59  ;;  %7823 = vmatpush.bf16.msrb.mxu1 %v13757_v58 }
 0x47f   :  { %v17800_v62 = vld [vmem:[#allocation5 + $0x16ec] sm:$0xf0] }
 0x480   :  { %v13468_v0 = vld [vmem:[#allocation5 + $0x1090] sm:$0xf]  ;;  %v14269_v4 = vor.u32 %v17800_v62, %v14268_v27  ;;  %7836 = vmatpush.bf16.msrb.mxu2 %v14013_v61  ;;  %v7583_v27 = vpop.f32.mrf.mxu2  ;;  %v7596_v61 = vpop.f32.mrf.mxu3 }
 0x481   :  { %v17600_v1 = vld [vmem:[#allocation5 + $0x10ac] sm:$0xf0] }
 0x482   :  { %v13724_v3 = vld [vmem:[#allocation5 + $0x1290] sm:$0xf]  ;;  %v13469_v15 = vor.u32 %v17600_v1, %v13468_v0  ;;  %7849 = vmatpush.bf16.msrb.mxu3 %v14269_v4 }
 0x483   :  { %v17664_v7 = vld [vmem:[#allocation5 + $0x12ac] sm:$0xf0] }
 0x484   :  { %v13980_v2 = vld [vmem:[#allocation5 + $0x1490] sm:$0xf]  ;;  %v13725_v18 = vor.u32 %v17664_v7, %v13724_v3  ;;  %7811 = vmatpush.bf16.msrb.mxu0 %v13469_v15 }
 0x485   :  { %v17728_v8 = vld [vmem:[#allocation5 + $0x14ac] sm:$0xf0] }
 0x486   :  { %v14236_v11 = vld [vmem:[#allocation5 + $0x1690] sm:$0xf]  ;;  %v13981_v22 = vor.u32 %v17728_v8, %v13980_v2  ;;  %7824 = vmatpush.bf16.msrb.mxu1 %v13725_v18 }
 0x487   :  { %v17792_v13 = vld [vmem:[#allocation5 + $0x16ac] sm:$0xf0] }
 0x488   :  { %v13436_v35 = vld [vmem:[#allocation5 + $0x1050] sm:$0xf]  ;;  %v14237_v40 = vor.u32 %v17792_v13, %v14236_v11  ;;  %7837 = vmatpush.bf16.msrb.mxu2 %v13981_v22 }
 0x489   :  { %v17592_v33 = vld [vmem:[#allocation5 + $0x106c] sm:$0xf0] }
 0x48a   :  { %v13692_v38 = vld [vmem:[#allocation5 + $0x1250] sm:$0xf]  ;;  %v13437_v48 = vor.u32 %v17592_v33, %v13436_v35  ;;  %7850 = vmatpush.bf16.msrb.mxu3 %v14237_v40 }
 0x48b   :  { %v17656_v41 = vld [vmem:[#allocation5 + $0x126c] sm:$0xf0] }
 0x48c   :  { %v13948_v44 = vld [vmem:[#allocation5 + $0x1450] sm:$0xf]  ;;  %v13693_v51 = vor.u32 %v17656_v41, %v13692_v38  ;;  %7812 = vmatpush.bf16.msrb.mxu0 %v13437_v48 }
 0x48d   :  { %v17720_v37 = vld [vmem:[#allocation5 + $0x146c] sm:$0xf0] }
 0x48e   :  { %v14204_v46 = vld [vmem:[#allocation5 + $0x1650] sm:$0xf]  ;;  %v13949_v52 = vor.u32 %v17720_v37, %v13948_v44  ;;  %7825 = vmatpush.bf16.msrb.mxu1 %v13693_v51 }
 0x48f   :  { %v17784_v47 = vld [vmem:[#allocation5 + $0x166c] sm:$0xf0] }
 0x490   :  { %v13404_v49 = vld [vmem:[#allocation5 + $0x1010] sm:$0xf]  ;;  %v14205_v57 = vor.u32 %v17784_v47, %v14204_v46  ;;  %7838 = vmatpush.bf16.msrb.mxu2 %v13949_v52 }
 0x491   :  { %v17584_v50 = vld [vmem:[#allocation5 + $0x102c] sm:$0xf0] }
 0x492   :  { %v13660_v53 = vld [vmem:[#allocation5 + $0x1210] sm:$0xf]  ;;  %v13405_v0 = vor.u32 %v17584_v50, %v13404_v49  ;;  %7851 = vmatpush.bf16.msrb.mxu3 %v14205_v57 }
 0x493   :  { %v17648_v55 = vld [vmem:[#allocation5 + $0x122c] sm:$0xf0] }
 0x494   :  { %v13916_v56 = vld [vmem:[#allocation5 + $0x1410] sm:$0xf]  ;;  %v13661_v6 = vor.u32 %v17648_v55, %v13660_v53  ;;  %7813 = vmatpush.bf16.msrb.mxu0 %v13405_v0  ;;  %v7607_v0 = vpop.f32.mrf.mxu0 }
 0x495   :  { %v17712_v54 = vld [vmem:[#allocation5 + $0x142c] sm:$0xf0] }
 0x496   :  { %v14172_v59 = vld [vmem:[#allocation5 + $0x1610] sm:$0xf]  ;;  %v13917_v7 = vor.u32 %v17712_v54, %v13916_v56  ;;  %7826 = vmatpush.bf16.msrb.mxu1 %v13661_v6 }
 0x497   :  { %v17776_v60 = vld [vmem:[#allocation5 + $0x162c] sm:$0xf0]  ;;  %7814 = vmatmul.bf16.vlgmr.msrb.gmra.mxu0 %v18954_v26 }
 0x498   :  { %v14652_v62 = vld [vmem:[#allocation5 + $0x19d0] sm:$0xf]  ;;  %v14173_v9 = vor.u32 %v17776_v60, %v14172_v59  ;;  %7839 = vmatpush.bf16.msrb.mxu2 %v13917_v7  ;;  %v7620_v7 = vpop.f32.mrf.mxu1 }
 0x499   :  { %v17896_v63 = vld [vmem:[#allocation5 + $0x19ec] sm:$0xf0]  ;;  %7827 = vmatmul.bf16.vlgmr.msrb.gmra.mxu1 %v18958_v31 }
 0x49a   :  { %v14908_v58 = vld [vmem:[#allocation5 + $0x1bd0] sm:$0xf]  ;;  %v14653_v12 = vor.u32 %v17896_v63, %v14652_v62  ;;  %7852 = vmatpush.bf16.msrb.mxu3 %v14173_v9 }
 0x49b   :  { %v17960_v1 = vld [vmem:[#allocation5 + $0x1bec] sm:$0xf0]  ;;  %7840 = vmatmul.bf16.vlgmr.msrb.gmra.mxu2 %v18956_v30 }
 0x49c   :  { %v15164_v3 = vld [vmem:[#allocation5 + $0x1dd0] sm:$0xf]  ;;  %v14909_v11 = vor.u32 %v17960_v1, %v14908_v58  ;;  %7858 = vmatpush.bf16.msra.mxu0 %v14653_v12 }
 0x49d   :  { %v18024_v4 = vld [vmem:[#allocation5 + $0x1dec] sm:$0xf0]  ;;  %7853 = vmatmul.bf16.vlgmr.msrb.gmra.mxu3 %v18960_v34 }
 0x49e   :  { %v15420_v2 = vld [vmem:[#allocation5 + $0x1fd0] sm:$0xf]  ;;  %v15165_v13 = vor.u32 %v18024_v4, %v15164_v3  ;;  %7871 = vmatpush.bf16.msra.mxu1 %v14909_v11  ;;  %v7608_v4 = vadd.f32 %v7607_v0, %v19088_v17 }
 0x49f   :  { %v18088_v8 = vld [vmem:[#allocation5 + $0x1fec] sm:$0xf0] }
 0x4a0   :  { %v14620_v14 = vld [vmem:[#allocation5 + $0x1990] sm:$0xf]  ;;  %v15421_v18 = vor.u32 %v18088_v8, %v15420_v2  ;;  %7884 = vmatpush.bf16.msra.mxu2 %v15165_v13 }
 0x4a1   :  { %v17888_v15 = vld [vmem:[#allocation5 + $0x19ac] sm:$0xf0] }
 0x4a2   :  { %v14876_v16 = vld [vmem:[#allocation5 + $0x1b90] sm:$0xf]  ;;  %v14621_v41 = vor.u32 %v17888_v15, %v14620_v14  ;;  %7897 = vmatpush.bf16.msra.mxu3 %v15421_v18  ;;  %v7621_v14 = vadd.f32 %v7620_v7, %v7608_v4 }
 0x4a3   :  { %v17952_v22 = vld [vmem:[#allocation5 + $0x1bac] sm:$0xf0] }
 0x4a4   :  { %v15132_v35 = vld [vmem:[#allocation5 + $0x1d90] sm:$0xf]  ;;  %v14877_v44 = vor.u32 %v17952_v22, %v14876_v16  ;;  %7859 = vmatpush.bf16.msra.mxu0 %v14621_v41 }
 0x4a5   :  { %v18016_v33 = vld [vmem:[#allocation5 + $0x1dac] sm:$0xf0] }
 0x4a6   :  { %v15388_v38 = vld [vmem:[#allocation5 + $0x1f90] sm:$0xf]  ;;  %v15133_v37 = vor.u32 %v18016_v33, %v15132_v35  ;;  %7872 = vmatpush.bf16.msra.mxu1 %v14877_v44 }
 0x4a7   :  { %v18080_v40 = vld [vmem:[#allocation5 + $0x1fac] sm:$0xf0] }
 0x4a8   :  { %v14588_v46 = vld [vmem:[#allocation5 + $0x1950] sm:$0xf]  ;;  %v15389_v49 = vor.u32 %v18080_v40, %v15388_v38  ;;  %7885 = vmatpush.bf16.msra.mxu2 %v15133_v37 }
 0x4a9   :  { %v17880_v47 = vld [vmem:[#allocation5 + $0x196c] sm:$0xf0] }
 0x4aa   :  { %v14844_v48 = vld [vmem:[#allocation5 + $0x1b50] sm:$0xf]  ;;  %v14589_v56 = vor.u32 %v17880_v47, %v14588_v46  ;;  %7898 = vmatpush.bf16.msra.mxu3 %v15389_v49  ;;  %v7633_v46 = vpop.f32.mrf.mxu2 }
 0x4ab   :  { %v17944_v50 = vld [vmem:[#allocation5 + $0x1b6c] sm:$0xf0] }
 0x4ac   :  { %v15100_v51 = vld [vmem:[#allocation5 + $0x1d50] sm:$0xf]  ;;  %v14845_v57 = vor.u32 %v17944_v50, %v14844_v48  ;;  %7860 = vmatpush.bf16.msra.mxu0 %v14589_v56  ;;  %v7634_v50 = vadd.f32 %v7633_v46, %v7621_v14 }
 0x4ad   :  { %v18008_v52 = vld [vmem:[#allocation5 + $0x1d6c] sm:$0xf0] }
 0x4ae   :  { %v15356_v53 = vld [vmem:[#allocation5 + $0x1f50] sm:$0xf]  ;;  %v15101_v54 = vor.u32 %v18008_v52, %v15100_v51  ;;  %7873 = vmatpush.bf16.msra.mxu1 %v14845_v57  ;;  %v7646_v51 = vpop.f32.mrf.mxu3  ;;  %v7622_v57 = vpop.f32.mrf.mxu1 }
 0x4af   :  { %v18072_v55 = vld [vmem:[#allocation5 + $0x1f6c] sm:$0xf0]  ;;  %v17116_v57 = vld [vmem:[#allocation5 + $0x194] sm:$0xf] }
 0x4b0   :  { %v14556_v59 = vld [vmem:[#allocation5 + $0x1910] sm:$0xf]  ;;  %v15357_v62 = vor.u32 %v18072_v55, %v15356_v53  ;;  %7886 = vmatpush.bf16.msra.mxu2 %v15101_v54  ;;  %v7609_v55 = vpop.f32.mrf.mxu0  ;;  %v19095_v54 = vadd.f32 %v7646_v51, %v7634_v50 }
 0x4b1   :  { %v17872_v60 = vld [vmem:[#allocation5 + $0x192c] sm:$0xf0] }
 0x4b2   :  { %v14812_v27 = vld [vmem:[#allocation5 + $0x1b10] sm:$0xf]  ;;  %v14557_v6 = vor.u32 %v17872_v60, %v14556_v59  ;;  %7899 = vmatpush.bf16.msra.mxu3 %v15357_v62 }
 0x4b3   :  { %v17936_v63 = vld [vmem:[#allocation5 + $0x1b2c] sm:$0xf0] }
 0x4b4   :  { %v15068_v58 = vld [vmem:[#allocation5 + $0x1d10] sm:$0xf]  ;;  %v14813_v2 = vor.u32 %v17936_v63, %v14812_v27  ;;  %7861 = vmatpush.bf16.msra.mxu0 %v14557_v6 }
 0x4b5   :  { %v18000_v61 = vld [vmem:[#allocation5 + $0x1d2c] sm:$0xf0] }
 0x4b6   :  { %v15324_v1 = vld [vmem:[#allocation5 + $0x1f10] sm:$0xf]  ;;  %v15069_v8 = vor.u32 %v18000_v61, %v15068_v58  ;;  %7874 = vmatpush.bf16.msra.mxu1 %v14813_v2 }
 0x4b7   :  { %v18064_v3 = vld [vmem:[#allocation5 + $0x1f2c] sm:$0xf0] }
 0x4b8   :  { %v14524_v9 = vld [vmem:[#allocation5 + $0x18d0] sm:$0xf]  ;;  %v15325_v13 = vor.u32 %v18064_v3, %v15324_v1  ;;  %7887 = vmatpush.bf16.msra.mxu2 %v15069_v8 }
 0x4b9   :  { %v17864_v12 = vld [vmem:[#allocation5 + $0x18ec] sm:$0xf0] }
 0x4ba   :  { %v14780_v11 = vld [vmem:[#allocation5 + $0x1ad0] sm:$0xf]  ;;  %v14525_v33 = vor.u32 %v17864_v12, %v14524_v9  ;;  %7900 = vmatpush.bf16.msra.mxu3 %v15325_v13 }
 0x4bb   :  { %v17928_v15 = vld [vmem:[#allocation5 + $0x1aec] sm:$0xf0] }
 0x4bc   :  { %v15036_v16 = vld [vmem:[#allocation5 + $0x1cd0] sm:$0xf]  ;;  %v14781_v17 = vor.u32 %v17928_v15, %v14780_v11  ;;  %7862 = vmatpush.bf16.msra.mxu0 %v14525_v33 }
 0x4bd   :  { %v17992_v18 = vld [vmem:[#allocation5 + $0x1cec] sm:$0xf0] }
 0x4be   :  { %v15292_v22 = vld [vmem:[#allocation5 + $0x1ed0] sm:$0xf]  ;;  %v15037_v38 = vor.u32 %v17992_v18, %v15036_v16  ;;  %7875 = vmatpush.bf16.msra.mxu1 %v14781_v17  ;;  %v17124_v17 = vld [vmem:[#allocation5 + $0x1d4] sm:$0xf] }
 0x4bf   :  { %v18056_v35 = vld [vmem:[#allocation5 + $0x1eec] sm:$0xf0] }
 0x4c0   :  { %v14492_v40 = vld [vmem:[#allocation5 + $0x1890] sm:$0xf]  ;;  %v15293_v37 = vor.u32 %v18056_v35, %v15292_v22  ;;  %7888 = vmatpush.bf16.msra.mxu2 %v15037_v38  ;;  %v7635_v22 = vpop.f32.mrf.mxu2  ;;  %v7648_v38 = vpop.f32.mrf.mxu3 }
 0x4c1   :  { %v17856_v41 = vld [vmem:[#allocation5 + $0x18ac] sm:$0xf0]  ;;  %v17100_v22 = vld [vmem:[#allocation5 + $0x114] sm:$0xf] }
 0x4c2   :  { %v14748_v44 = vld [vmem:[#allocation5 + $0x1a90] sm:$0xf]  ;;  %v14493_v56 = vor.u32 %v17856_v41, %v14492_v40  ;;  %7901 = vmatpush.bf16.msra.mxu3 %v15293_v37  ;;  %v11582_v41 = vld [vmem:[#allocation5 + $0x1f0] sm:$0xf0] }
 0x4c3   :  { %v17920_v47 = vld [vmem:[#allocation5 + $0x1aac] sm:$0xf0]  ;;  %v11838_v37 = vld [vmem:[#allocation5 + $0x3f0] sm:$0xf0] }
 0x4c4   :  { %v15004_v48 = vld [vmem:[#allocation5 + $0x1c90] sm:$0xf]  ;;  %v14749_v59 = vor.u32 %v17920_v47, %v14748_v44  ;;  %7863 = vmatpush.bf16.msra.mxu0 %v14493_v56  ;;  %v17188_v44 = vld [vmem:[#allocation5 + $0x3d4] sm:$0xf] }
 0x4c5   :  { %v17984_v49 = vld [vmem:[#allocation5 + $0x1cac] sm:$0xf0]  ;;  %v11742_v38 = vld [vmem:[#allocation5 + $0x330] sm:$0xf0] }
 0x4c6   :  { %v15260_v52 = vld [vmem:[#allocation5 + $0x1e90] sm:$0xf]  ;;  %v15005_v60 = vor.u32 %v17984_v49, %v15004_v48  ;;  %7876 = vmatpush.bf16.msra.mxu1 %v14749_v59  ;;  %v17252_v48 = vld [vmem:[#allocation5 + $0x5d4] sm:$0xf] }
 0x4c7   :  { %v18048_v53 = vld [vmem:[#allocation5 + $0x1eac] sm:$0xf0]  ;;  %v12094_v49 = vld [vmem:[#allocation5 + $0x5f0] sm:$0xf0] }
 0x4c8   :  { %v14460_v27 = vld [vmem:[#allocation5 + $0x1850] sm:$0xf]  ;;  %v15261_v58 = vor.u32 %v18048_v53, %v15260_v52  ;;  %7889 = vmatpush.bf16.msra.mxu2 %v15005_v60  ;;  %v11585_v52 = vor.u32 %v17124_v17, %v11582_v41  ;;  %v11841_v53 = vor.u32 %v17188_v44, %v11838_v37  ;;  %v12097_v59 = vor.u32 %v17252_v48, %v12094_v49  ;;  %v11550_v60 = vld [vmem:[#allocation5 + $0x1b0] sm:$0xf0] }
 0x4c9   :  { %v17848_v62 = vld [vmem:[#allocation5 + $0x186c] sm:$0xf0]  ;;  %v17164_v17 = vld [vmem:[#allocation5 + $0x314] sm:$0xf] }
 0x4ca   :  { %v14716_v63 = vld [vmem:[#allocation5 + $0x1a50] sm:$0xf]  ;;  %v14461_v6 = vor.u32 %v17848_v62, %v14460_v27  ;;  %7902 = vmatpush.bf16.msra.mxu3 %v15261_v58  ;;  %v17180_v27 = vld [vmem:[#allocation5 + $0x394] sm:$0xf]  ;;  %v11745_v49 = vor.u32 %v17164_v17, %v11742_v38 }
 0x4cb   :  { %v17912_v61 = vld [vmem:[#allocation5 + $0x1a6c] sm:$0xf0]  ;;  %v11806_v62 = vld [vmem:[#allocation5 + $0x3b0] sm:$0xf0] }
 0x4cc   :  { %v14972_v0 = vld [vmem:[#allocation5 + $0x1c50] sm:$0xf]  ;;  %v14717_v8 = vor.u32 %v17912_v61, %v14716_v63  ;;  %7864 = vmatpush.bf16.msra.mxu0 %v14461_v6  ;;  %v17244_v63 = vld [vmem:[#allocation5 + $0x594] sm:$0xf] }
 0x4cd   :  { %v17976_v1 = vld [vmem:[#allocation5 + $0x1c6c] sm:$0xf0]  ;;  %v12062_v58 = vld [vmem:[#allocation5 + $0x5b0] sm:$0xf0] }
 0x4ce   :  { %v15228_v3 = vld [vmem:[#allocation5 + $0x1e50] sm:$0xf]  ;;  %v14973_v9 = vor.u32 %v17976_v1, %v14972_v0  ;;  %7877 = vmatpush.bf16.msra.mxu1 %v14717_v8  ;;  %v11553_v0 = vor.u32 %v17116_v57, %v11550_v60  ;;  %v11809_v1 = vor.u32 %v17180_v27, %v11806_v62  ;;  %v17108_v6 = vld [vmem:[#allocation5 + $0x154] sm:$0xf] }
 0x4cf   :  { %v18040_v4 = vld [vmem:[#allocation5 + $0x1e6c] sm:$0xf0]  ;;  %v17172_v8 = vld [vmem:[#allocation5 + $0x354] sm:$0xf] }
 0x4d0   :  { %v14428_v7 = vld [vmem:[#allocation5 + $0x1810] sm:$0xf]  ;;  %v15229_v14 = vor.u32 %v18040_v4, %v15228_v3  ;;  %7890 = vmatpush.bf16.msra.mxu2 %v14973_v9  ;;  %v11774_v9 = vld [vmem:[#allocation5 + $0x370] sm:$0xf0] }
 0x4d1   :  { %v17840_v2 = vld [vmem:[#allocation5 + $0x182c] sm:$0xf0]  ;;  %v17228_v41 = vld [vmem:[#allocation5 + $0x514] sm:$0xf] }
 0x4d2   :  { %v14684_v12 = vld [vmem:[#allocation5 + $0x1a10] sm:$0xf]  ;;  %v14429_v40 = vor.u32 %v17840_v2, %v14428_v7  ;;  %7903 = vmatpush.bf16.msra.mxu3 %v15229_v14  ;;  %v12065_v7 = vor.u32 %v17244_v63, %v12062_v58  ;;  %v11518_v2 = vld [vmem:[#allocation5 + $0x170] sm:$0xf0] }
 0x4d3   :  { %v17904_v11 = vld [vmem:[#allocation5 + $0x1a2c] sm:$0xf0]  ;;  %v11521_v14 = vor.u32 %v17108_v6, %v11518_v2  ;;  %v11998_v44 = vld [vmem:[#allocation5 + $0x530] sm:$0xf0] }
 0x4d4   :  { %v14940_v13 = vld [vmem:[#allocation5 + $0x1c10] sm:$0xf]  ;;  %v14685_v46 = vor.u32 %v17904_v11, %v14684_v12  ;;  %7865 = vmatpush.bf16.msra.mxu0 %v14429_v40  ;;  %v17236_v12 = vld [vmem:[#allocation5 + $0x554] sm:$0xf]  ;;  %v7659_v40 = vpop.f32.mrf.mxu0 }
 0x4d5   :  { %v17968_v15 = vld [vmem:[#allocation5 + $0x1c2c] sm:$0xf0]  ;;  %v12030_v11 = vld [vmem:[#allocation5 + $0x570] sm:$0xf0]  ;;  %v7660_v37 = vadd.f32 %v7659_v40, %v19095_v54 }
 0x4d6   :  { %v15196_v16 = vld [vmem:[#allocation5 + $0x1e10] sm:$0xf]  ;;  %v14941_v47 = vor.u32 %v17968_v15, %v14940_v13  ;;  %7878 = vmatpush.bf16.msra.mxu1 %v14685_v46  ;;  %v11777_v15 = vor.u32 %v17172_v8, %v11774_v9  ;;  %v17156_v57 = vld [vmem:[#allocation5 + $0x2d4] sm:$0xf]  ;;  %v7698_v8 = vpop.f32.mrf.mxu3 }
 0x4d7   :  { %v18032_v18 = vld [vmem:[#allocation5 + $0x1e2c] sm:$0xf0]  ;;  %7866 = vmatmul.bf16.vlgmr.msra.gmra.mxu0 %v18966_v24  ;;  %v17220_v60 = vld [vmem:[#allocation5 + $0x4d4] sm:$0xf] }
 0x4d8   :  { %v15676_v35 = vld [vmem:[#allocation5 + $0x21d0] sm:$0xf]  ;;  %v15197_v50 = vor.u32 %v18032_v18, %v15196_v16  ;;  %7891 = vmatpush.bf16.msra.mxu2 %v14941_v47  ;;  %v7672_v47 = vpop.f32.mrf.mxu1  ;;  %v11966_v27 = vld [vmem:[#allocation5 + $0x4f0] sm:$0xf0] }
 0x4d9   :  { %v18152_v33 = vld [vmem:[#allocation5 + $0x21ec] sm:$0xf0]  ;;  %7879 = vmatmul.bf16.vlgmr.msra.gmra.mxu1 %v18970_v32  ;;  %v17148_v6 = vld [vmem:[#allocation5 + $0x294] sm:$0xf] }
 0x4da   :  { %v15677_v51 = vor.u32 %v18152_v33, %v15676_v35  ;;  %v15644_v55 = vld [vmem:[#allocation5 + $0x2190] sm:$0xf]  ;;  %7904 = vmatpush.bf16.msra.mxu3 %v15197_v50  ;;  %7923 = vmatpush.bf16.msrb.mxu1 %v11585_v52  ;;  %v12033_v35 = vor.u32 %v17236_v12, %v12030_v11  ;;  %v11486_v33 = vld [vmem:[#allocation5 + $0x130] sm:$0xf0] }
 0x4db   :  { %v18144_v56 = vld [vmem:[#allocation5 + $0x21ac] sm:$0xf0]  ;;  %7892 = vmatmul.bf16.vlgmr.msra.gmra.mxu2 %v18968_v29  ;;  %v11489_v48 = vor.u32 %v17100_v22, %v11486_v33  ;;  %v17092_v52 = vld [vmem:[#allocation5 + $0xd4] sm:$0xf] }
 0x4dc   :  { %7910 = vmatpush.bf16.msrb.mxu0 %v15677_v51  ;;  %v15645_v61 = vor.u32 %v18144_v56, %v15644_v55  ;;  %7936 = vmatpush.bf16.msrb.mxu2 %v11841_v53  ;;  %v15612_v3 = vld [vmem:[#allocation5 + $0x2150] sm:$0xf]  ;;  %v12001_v53 = vor.u32 %v17228_v41, %v11998_v44  ;;  %v7673_v55 = vadd.f32 %v7672_v47, %v7660_v37  ;;  %v11454_v56 = vld [vmem:[#allocation5 + $0xf0] sm:$0xf0]  ;;  %v7661_v11 = vpop.f32.mrf.mxu0 }
 0x4dd   :  { %v18136_v4 = vld [vmem:[#allocation5 + $0x216c] sm:$0xf0]  ;;  %7905 = vmatmul.bf16.vlgmr.msra.gmra.mxu3 %v18972_v36  ;;  %v11457_v54 = vor.u32 %v17092_v52, %v11454_v56  ;;  %v17212_v9 = vld [vmem:[#allocation5 + $0x494] sm:$0xf] }
 0x4de   :  { %7949 = vmatpush.bf16.msrb.mxu3 %v12097_v59  ;;  %v15613_v13 = vor.u32 %v18136_v4, %v15612_v3  ;;  %7924 = vmatpush.bf16.msrb.mxu1 %v11553_v0  ;;  %v15580_v16 = vld [vmem:[#allocation5 + $0x2110] sm:$0xf]  ;;  %v11710_v59 = vld [vmem:[#allocation5 + $0x2f0] sm:$0xf0]  ;;  %v7685_v3 = vpop.f32.mrf.mxu2 }
 0x4df   :  { %v18128_v18 = vld [vmem:[#allocation5 + $0x212c] sm:$0xf0]  ;;  %v11713_v63 = vor.u32 %v17156_v57, %v11710_v59  ;;  %v17084_v0 = vld [vmem:[#allocation5 + $0x94] sm:$0xf]  ;;  %v7686_v2 = vadd.f32 %v7685_v3, %v7673_v55 }
 0x4e0   :  { %7911 = vmatpush.bf16.msrb.mxu0 %v15645_v61  ;;  %7937 = vmatpush.bf16.msrb.mxu2 %v11809_v1  ;;  %v15581_v46 = vor.u32 %v18128_v18, %v15580_v16  ;;  %v15548_v50 = vld [vmem:[#allocation5 + $0x20d0] sm:$0xf]  ;;  %v11969_v1 = vor.u32 %v17220_v60, %v11966_v27  ;;  %v11422_v4 = vld [vmem:[#allocation5 + $0xb0] sm:$0xf0] }
 0x4e1   :  { %v18120_v51 = vld [vmem:[#allocation5 + $0x20ec] sm:$0xf0]  ;;  %v11934_v12 = vld [vmem:[#allocation5 + $0x4b0] sm:$0xf0]  ;;  %v11425_v16 = vor.u32 %v17084_v0, %v11422_v4 }
 0x4e2   :  { %7950 = vmatpush.bf16.msrb.mxu3 %v12065_v7  ;;  %7925 = vmatpush.bf16.msrb.mxu1 %v11521_v14  ;;  %v15549_v62 = vor.u32 %v18120_v51, %v15548_v50  ;;  %v15516_v58 = vld [vmem:[#allocation5 + $0x2090] sm:$0xf]  ;;  %v11678_v7 = vld [vmem:[#allocation5 + $0x2b0] sm:$0xf0]  ;;  %v7674_v14 = vpop.f32.mrf.mxu1  ;;  %v11937_v17 = vor.u32 %v17212_v9, %v11934_v12 }
 0x4e3   :  { %v18112_v61 = vld [vmem:[#allocation5 + $0x20ac] sm:$0xf0]  ;;  %v11681_v18 = vor.u32 %v17148_v6, %v11678_v7  ;;  %v17076_v33 = vld [vmem:[#allocation5 + $0x54] sm:$0xf] }
 0x4e4   :  { %7912 = vmatpush.bf16.msrb.mxu0 %v15613_v13  ;;  %7938 = vmatpush.bf16.msrb.mxu2 %v11777_v15  ;;  %v15517_v13 = vor.u32 %v18112_v61, %v15516_v58  ;;  %v19102_v15 = vadd.f32 %v7698_v8, %v7686_v2  ;;  %v15484_v22 = vld [vmem:[#allocation5 + $0x2050] sm:$0xf]  ;;  %v11390_v38 = vld [vmem:[#allocation5 + $0x70] sm:$0xf0] }
 0x4e5   :  { %v17140_v40 = vld [vmem:[#allocation5 + $0x254] sm:$0xf]  ;;  %v15452_v47 = vld [vmem:[#allocation5 + $0x2010] sm:$0xf] }
 0x4e6   :  { %7951 = vmatpush.bf16.msrb.mxu3 %v12033_v35  ;;  %7926 = vmatpush.bf16.msrb.mxu1 %v11489_v48  ;;  %v18104_v35 = vld [vmem:[#allocation5 + $0x206c] sm:$0xf0]  ;;  %v11646_v41 = vld [vmem:[#allocation5 + $0x270] sm:$0xf0]  ;;  %v7687_v60 = vpop.f32.mrf.mxu2 }
 0x4e7   :  { %v17204_v44 = vld [vmem:[#allocation5 + $0x454] sm:$0xf]  ;;  %v18096_v48 = vld [vmem:[#allocation5 + $0x202c] sm:$0xf0]  ;;  %v11649_v50 = vor.u32 %v17140_v40, %v11646_v41 }
 0x4e8   :  { %7913 = vmatpush.bf16.msrb.mxu0 %v15581_v46  ;;  %7939 = vmatpush.bf16.msrb.mxu2 %v11745_v49  ;;  %v11902_v37 = vld [vmem:[#allocation5 + $0x470] sm:$0xf0]  ;;  %v15485_v46 = vor.u32 %v18104_v35, %v15484_v22  ;;  %v11393_v49 = vor.u32 %v17076_v33, %v11390_v38  ;;  %v15453_v58 = vor.u32 %v18096_v48, %v15452_v47 }
 0x4e9   :  { %v17068_v51 = vld [vmem:[#allocation5 + $0x14] sm:$0xf]  ;;  %v11905_v55 = vor.u32 %v17204_v44, %v11902_v37 }
 0x4ea   :  { %7952 = vmatpush.bf16.msrb.mxu3 %v12001_v53  ;;  %7927 = vmatpush.bf16.msrb.mxu1 %v11457_v54  ;;  %v11358_v52 = vld [vmem:[#allocation5 + $0x30] sm:$0xf0] }
 0x4eb   :  { %v17132_v53 = vld [vmem:[#allocation5 + $0x214] sm:$0xf]  ;;  %v11361_v3 = vor.u32 %v17068_v51, %v11358_v52 }
 0x4ec   :  { %7914 = vmatpush.bf16.msrb.mxu0 %v15549_v62  ;;  %7940 = vmatpush.bf16.msrb.mxu2 %v11713_v63  ;;  %v11614_v56 = vld [vmem:[#allocation5 + $0x230] sm:$0xf0]  ;;  %v7700_v63 = vpop.f32.mrf.mxu3 }
 0x4ed   :  { %v17196_v57 = vld [vmem:[#allocation5 + $0x414] sm:$0xf]  ;;  %v11617_v4 = vor.u32 %v17132_v53, %v11614_v56 }
 0x4ee   :  { %7953 = vmatpush.bf16.msrb.mxu3 %v11969_v1  ;;  %7928 = vmatpush.bf16.msrb.mxu1 %v11425_v16  ;;  %v11870_v59 = vld [vmem:[#allocation5 + $0x430] sm:$0xf0] }
 0x4ef   :  { %v17316_v27 = vld [vmem:[#allocation5 + $0x7d4] sm:$0xf]  ;;  %v11873_v2 = vor.u32 %v17196_v57, %v11870_v59 }
 0x4f0   :  { %7915 = vmatpush.bf16.msrb.mxu0 %v15517_v13  ;;  %7941 = vmatpush.bf16.msrb.mxu2 %v11681_v18  ;;  %v12350_v62 = vld [vmem:[#allocation5 + $0x7f0] sm:$0xf0] }
 0x4f1   :  { %v17380_v54 = vld [vmem:[#allocation5 + $0x9d4] sm:$0xf]  ;;  %v12353_v8 = vor.u32 %v17316_v27, %v12350_v62  ;;  %v18524_v27 = vld [vmem:[#allocation7] sm:$0xff] }
 0x4f2   :  { %7954 = vmatpush.bf16.msrb.mxu3 %v11937_v17  ;;  %v12606_v61 = vld [vmem:[#allocation5 + $0x9f0] sm:$0xf0]  ;;  %7929 = vmatpush.bf16.msrb.mxu1 %v11393_v49  ;;  %v1306_v62 = vperm.slane %v18524_v27, 4 }
 0x4f3   :  { %v17444_v0 = vld [vmem:[#allocation5 + $0xbd4] sm:$0xf]  ;;  %v12609_v9 = vor.u32 %v17380_v54, %v12606_v61 }
 0x4f4   :  { %7916 = vmatpush.bf16.msrb.mxu0 %v15485_v46  ;;  %v12862_v1 = vld [vmem:[#allocation5 + $0xbf0] sm:$0xf0]  ;;  %7942 = vmatpush.bf16.msrb.mxu2 %v11649_v50 }
 0x4f5   :  { %v17508_v6 = vld [vmem:[#allocation5 + $0xdd4] sm:$0xf]  ;;  %v12865_v12 = vor.u32 %v17444_v0, %v12862_v1 }
 0x4f6   :  { %v13118_v7 = vld [vmem:[#allocation5 + $0xdf0] sm:$0xf0]  ;;  %7955 = vmatpush.bf16.msrb.mxu3 %v11905_v55  ;;  %7930 = vmatpush.bf16.msrb.mxu1 %v11361_v3 }
 0x4f7   :  { %v17308_v11 = vld [vmem:[#allocation5 + $0x794] sm:$0xf]  ;;  %v13121_v16 = vor.u32 %v17508_v6, %v13118_v7 }
 0x4f8   :  { %v12318_v13 = vld [vmem:[#allocation5 + $0x7b0] sm:$0xf0]  ;;  %7917 = vmatpush.bf16.msrb.mxu0 %v15453_v58  ;;  %7943 = vmatpush.bf16.msrb.mxu2 %v11617_v4  ;;  %v7711_v4 = vpop.f32.mrf.mxu0 }
 0x4f9   :  { %v17372_v14 = vld [vmem:[#allocation5 + $0x994] sm:$0xf]  ;;  %v12321_v38 = vor.u32 %v17308_v11, %v12318_v13  ;;  %7931 = vmatmul.bf16.vlgmr.msrb.gmra.mxu1 %v18932_v20  ;;  %v7724_v11 = vpop.f32.mrf.mxu1 }
 0x4fa   :  { %v12574_v18 = vld [vmem:[#allocation5 + $0x9b0] sm:$0xf0]  ;;  %7956 = vmatpush.bf16.msrb.mxu3 %v11873_v2  ;;  %7975 = vmatpush.bf16.msra.mxu1 %v12609_v9 }
 0x4fb   :  { %v17436_v22 = vld [vmem:[#allocation5 + $0xb94] sm:$0xf]  ;;  %v12577_v40 = vor.u32 %v17372_v14, %v12574_v18  ;;  %7918 = vmatmul.bf16.vlgmr.msrb.gmra.mxu0 %v18978_v28  ;;  %7944 = vmatmul.bf16.vlgmr.msrb.gmra.mxu2 %v18936_v23 }
 0x4fc   :  { %v12830_v35 = vld [vmem:[#allocation5 + $0xbb0] sm:$0xf0]  ;;  %7962 = vmatpush.bf16.msra.mxu0 %v12353_v8  ;;  %7988 = vmatpush.bf16.msra.mxu2 %v12865_v12  ;;  %v7712_v12 = vadd.f32 %v7711_v4, %v1306_v62 }
 0x4fd   :  { %v17500_v33 = vld [vmem:[#allocation5 + $0xd94] sm:$0xf]  ;;  %v12833_v41 = vor.u32 %v17436_v22, %v12830_v35  ;;  %7957 = vmatmul.bf16.vlgmr.msrb.gmra.mxu3 %v18930_v19 }
 0x4fe   :  { %v13086_v17 = vld [vmem:[#allocation5 + $0xdb0] sm:$0xf0]  ;;  %8001 = vmatpush.bf16.msra.mxu3 %v13121_v16  ;;  %7976 = vmatpush.bf16.msra.mxu1 %v12577_v40 }
 0x4ff   :  { %v17300_v44 = vld [vmem:[#allocation5 + $0x754] sm:$0xf]  ;;  %v13089_v47 = vor.u32 %v17500_v33, %v13086_v17  ;;  %v7725_v33 = vadd.f32 %v7724_v11, %v7712_v12 }
 0x500   :  { %v12286_v37 = vld [vmem:[#allocation5 + $0x770] sm:$0xf0]  ;;  %7963 = vmatpush.bf16.msra.mxu0 %v12321_v38  ;;  %7989 = vmatpush.bf16.msra.mxu2 %v12833_v41 }
 0x501   :  { %v17364_v46 = vld [vmem:[#allocation5 + $0x954] sm:$0xf]  ;;  %v12289_v53 = vor.u32 %v17300_v44, %v12286_v37 }
 0x502   :  { %v12542_v48 = vld [vmem:[#allocation5 + $0x970] sm:$0xf0]  ;;  %8002 = vmatpush.bf16.msra.mxu3 %v13089_v47 }
 0x503   :  { %v17428_v49 = vld [vmem:[#allocation5 + $0xb54] sm:$0xf]  ;;  %v12545_v56 = vor.u32 %v17364_v46, %v12542_v48  ;;  %v7737_v46 = vpop.f32.mrf.mxu2 }
 0x504   :  { %v12798_v50 = vld [vmem:[#allocation5 + $0xb70] sm:$0xf0]  ;;  %7964 = vmatpush.bf16.msra.mxu0 %v12289_v53 }
 0x505   :  { %v17492_v51 = vld [vmem:[#allocation5 + $0xd54] sm:$0xf]  ;;  %v12801_v57 = vor.u32 %v17428_v49, %v12798_v50  ;;  %7977 = vmatpush.bf16.msra.mxu1 %v12545_v56 }
 0x506   :  { %v13054_v52 = vld [vmem:[#allocation5 + $0xd70] sm:$0xf0] }
 0x507   :  { %v17292_v55 = vld [vmem:[#allocation5 + $0x714] sm:$0xf]  ;;  %v13057_v54 = vor.u32 %v17492_v51, %v13054_v52  ;;  %7990 = vmatpush.bf16.msra.mxu2 %v12801_v57  ;;  %v7738_v51 = vadd.f32 %v7737_v46, %v7725_v33  ;;  %v7750_v52 = vpop.f32.mrf.mxu3 }
 0x508   :  { %v12254_v59 = vld [vmem:[#allocation5 + $0x730] sm:$0xf0] }
 0x509   :  { %v17356_v60 = vld [vmem:[#allocation5 + $0x914] sm:$0xf]  ;;  %v12257_v3 = vor.u32 %v17292_v55, %v12254_v59  ;;  %8003 = vmatpush.bf16.msra.mxu3 %v13057_v54  ;;  %v19108_v57 = vadd.f32 %v7750_v52, %v7738_v51  ;;  %v7713_v59 = vpop.f32.mrf.mxu0 }
 0x50a   :  { %v12510_v63 = vld [vmem:[#allocation5 + $0x930] sm:$0xf0] }
 0x50b   :  { %v17420_v58 = vld [vmem:[#allocation5 + $0xb14] sm:$0xf]  ;;  %v12513_v6 = vor.u32 %v17356_v60, %v12510_v63  ;;  %7965 = vmatpush.bf16.msra.mxu0 %v12257_v3 }
 0x50c   :  { %v12766_v61 = vld [vmem:[#allocation5 + $0xb30] sm:$0xf0] }
 0x50d   :  { %v17484_v0 = vld [vmem:[#allocation5 + $0xd14] sm:$0xf]  ;;  %v12769_v7 = vor.u32 %v17420_v58, %v12766_v61  ;;  %7978 = vmatpush.bf16.msra.mxu1 %v12513_v6  ;;  %v7726_v58 = vpop.f32.mrf.mxu1 }
 0x50e   :  { %v13022_v1 = vld [vmem:[#allocation5 + $0xd30] sm:$0xf0] }
 0x50f   :  { %v17284_v2 = vld [vmem:[#allocation5 + $0x6d4] sm:$0xf]  ;;  %v13025_v13 = vor.u32 %v17484_v0, %v13022_v1  ;;  %7991 = vmatpush.bf16.msra.mxu2 %v12769_v7 }
 0x510   :  { %v12222_v8 = vld [vmem:[#allocation5 + $0x6f0] sm:$0xf0] }
 0x511   :  { %v17348_v9 = vld [vmem:[#allocation5 + $0x8d4] sm:$0xf]  ;;  %v12225_v17 = vor.u32 %v17284_v2, %v12222_v8  ;;  %8004 = vmatpush.bf16.msra.mxu3 %v13025_v13 }
 0x512   :  { %v12478_v14 = vld [vmem:[#allocation5 + $0x8f0] sm:$0xf0] }
 0x513   :  { %v17412_v16 = vld [vmem:[#allocation5 + $0xad4] sm:$0xf]  ;;  %v12481_v38 = vor.u32 %v17348_v9, %v12478_v14  ;;  %7966 = vmatpush.bf16.msra.mxu0 %v12225_v17  ;;  %v7752_v17 = vpop.f32.mrf.mxu3 }
 0x514   :  { %v12734_v18 = vld [vmem:[#allocation5 + $0xaf0] sm:$0xf0] }
 0x515   :  { %v17476_v22 = vld [vmem:[#allocation5 + $0xcd4] sm:$0xf]  ;;  %v12737_v40 = vor.u32 %v17412_v16, %v12734_v18  ;;  %7979 = vmatpush.bf16.msra.mxu1 %v12481_v38  ;;  %v7739_v16 = vpop.f32.mrf.mxu2 }
 0x516   :  { %v12990_v35 = vld [vmem:[#allocation5 + $0xcf0] sm:$0xf0] }
 0x517   :  { %v17276_v41 = vld [vmem:[#allocation5 + $0x694] sm:$0xf]  ;;  %v12993_v47 = vor.u32 %v17476_v22, %v12990_v35  ;;  %7992 = vmatpush.bf16.msra.mxu2 %v12737_v40 }
 0x518   :  { %v12190_v44 = vld [vmem:[#allocation5 + $0x6b0] sm:$0xf0] }
 0x519   :  { %v17340_v37 = vld [vmem:[#allocation5 + $0x894] sm:$0xf]  ;;  %v12193_v56 = vor.u32 %v17276_v41, %v12190_v44  ;;  %8005 = vmatpush.bf16.msra.mxu3 %v12993_v47 }
 0x51a   :  { %v12446_v48 = vld [vmem:[#allocation5 + $0x8b0] sm:$0xf0] }
 0x51b   :  { %v17404_v49 = vld [vmem:[#allocation5 + $0xa94] sm:$0xf]  ;;  %v12449_v60 = vor.u32 %v17340_v37, %v12446_v48  ;;  %7967 = vmatpush.bf16.msra.mxu0 %v12193_v56 }
 0x51c   :  { %v12702_v50 = vld [vmem:[#allocation5 + $0xab0] sm:$0xf0] }
 0x51d   :  { %v17468_v53 = vld [vmem:[#allocation5 + $0xc94] sm:$0xf]  ;;  %v12705_v27 = vor.u32 %v17404_v49, %v12702_v50  ;;  %7980 = vmatpush.bf16.msra.mxu1 %v12449_v60 }
 0x51e   :  { %v12958_v55 = vld [vmem:[#allocation5 + $0xcb0] sm:$0xf0] }
 0x51f   :  { %v17268_v62 = vld [vmem:[#allocation5 + $0x654] sm:$0xf]  ;;  %v12961_v61 = vor.u32 %v17468_v53, %v12958_v55  ;;  %7993 = vmatpush.bf16.msra.mxu2 %v12705_v27 }
 0x520   :  { %v12158_v54 = vld [vmem:[#allocation5 + $0x670] sm:$0xf0] }
 0x521   :  { %v17332_v63 = vld [vmem:[#allocation5 + $0x854] sm:$0xf]  ;;  %v12161_v7 = vor.u32 %v17268_v62, %v12158_v54  ;;  %8006 = vmatpush.bf16.msra.mxu3 %v12961_v61 }
 0x522   :  { %v12414_v0 = vld [vmem:[#allocation5 + $0x870] sm:$0xf0] }
 0x523   :  { %v17396_v1 = vld [vmem:[#allocation5 + $0xa54] sm:$0xf]  ;;  %v12417_v9 = vor.u32 %v17332_v63, %v12414_v0  ;;  %7968 = vmatpush.bf16.msra.mxu0 %v12161_v7 }
 0x524   :  { %v12670_v3 = vld [vmem:[#allocation5 + $0xa70] sm:$0xf0] }
 0x525   :  { %v17460_v4 = vld [vmem:[#allocation5 + $0xc54] sm:$0xf]  ;;  %v12673_v12 = vor.u32 %v17396_v1, %v12670_v3  ;;  %7981 = vmatpush.bf16.msra.mxu1 %v12417_v9 }
 0x526   :  { %v12926_v6 = vld [vmem:[#allocation5 + $0xc70] sm:$0xf0] }
 0x527   :  { %v17260_v2 = vld [vmem:[#allocation5 + $0x614] sm:$0xf]  ;;  %v12929_v18 = vor.u32 %v17460_v4, %v12926_v6  ;;  %7994 = vmatpush.bf16.msra.mxu2 %v12673_v12 }
 0x528   :  { %v12126_v8 = vld [vmem:[#allocation5 + $0x630] sm:$0xf0] }
 0x529   :  { %v17324_v11 = vld [vmem:[#allocation5 + $0x814] sm:$0xf]  ;;  %v12129_v44 = vor.u32 %v17260_v2, %v12126_v8  ;;  %8007 = vmatpush.bf16.msra.mxu3 %v12929_v18 }
 0x52a   :  { %v12382_v13 = vld [vmem:[#allocation5 + $0x830] sm:$0xf0] }
 0x52b   :  { %v17388_v14 = vld [vmem:[#allocation5 + $0xa14] sm:$0xf]  ;;  %v12385_v48 = vor.u32 %v17324_v11, %v12382_v13  ;;  %7969 = vmatpush.bf16.msra.mxu0 %v12129_v44 }
 0x52c   :  { %v12638_v22 = vld [vmem:[#allocation5 + $0xa30] sm:$0xf0] }
 0x52d   :  { %v17452_v35 = vld [vmem:[#allocation5 + $0xc14] sm:$0xf]  ;;  %v12641_v49 = vor.u32 %v17388_v14, %v12638_v22  ;;  %7982 = vmatpush.bf16.msra.mxu1 %v12385_v48  ;;  %v7763_v48 = vpop.f32.mrf.mxu0 }
 0x52e   :  { %v12894_v33 = vld [vmem:[#allocation5 + $0xc30] sm:$0xf0]  ;;  %7970 = vmatmul.bf16.vlgmr.msra.gmra.mxu0 %v18934_v21 }
 0x52f   :  { %v17572_v38 = vld [vmem:[#allocation5 + $0xfd4] sm:$0xf]  ;;  %v12897_v52 = vor.u32 %v17452_v35, %v12894_v33  ;;  %7995 = vmatpush.bf16.msra.mxu2 %v12641_v49 }
 0x530   :  { %v13374_v40 = vld [vmem:[#allocation5 + $0xff0] sm:$0xf0]  ;;  %7983 = vmatmul.bf16.vlgmr.msra.gmra.mxu1 %v18944_v42 }
 0x531   :  { %v17636_v41 = vld [vmem:[#allocation5 + $0x11d4] sm:$0xf]  ;;  %v13377_v53 = vor.u32 %v17572_v38, %v13374_v40  ;;  %8008 = vmatpush.bf16.msra.mxu3 %v12897_v52 }
 0x532   :  { %v13630_v37 = vld [vmem:[#allocation5 + $0x11f0] sm:$0xf0]  ;;  %7996 = vmatmul.bf16.vlgmr.msra.gmra.mxu2 %v18948_v45 }
 0x533   :  { %v17700_v46 = vld [vmem:[#allocation5 + $0x13d4] sm:$0xf]  ;;  %v13633_v55 = vor.u32 %v17636_v41, %v13630_v37  ;;  %8014 = vmatpush.bf16.msrb.mxu0 %v13377_v53 }
 0x534   :  { %v13886_v47 = vld [vmem:[#allocation5 + $0x13f0] sm:$0xf0]  ;;  %8009 = vmatmul.bf16.vlgmr.msra.gmra.mxu3 %v18942_v39 }
 0x535   :  { %v17764_v50 = vld [vmem:[#allocation5 + $0x15d4] sm:$0xf]  ;;  %v13889_v56 = vor.u32 %v17700_v46, %v13886_v47  ;;  %8027 = vmatpush.bf16.msrb.mxu1 %v13633_v55  ;;  %v7764_v55 = vadd.f32 %v7763_v48, %v19108_v57 }
 0x536   :  { %v14142_v51 = vld [vmem:[#allocation5 + $0x15f0] sm:$0xf0] }
 0x537   :  { %v17564_v59 = vld [vmem:[#allocation5 + $0xf94] sm:$0xf]  ;;  %v14145_v62 = vor.u32 %v17764_v50, %v14142_v51  ;;  %8040 = vmatpush.bf16.msrb.mxu2 %v13889_v56  ;;  %v7776_v56 = vpop.f32.mrf.mxu1 }
 0x538   :  { %v13342_v60 = vld [vmem:[#allocation5 + $0xfb0] sm:$0xf0] }
 0x539   :  { %v17628_v27 = vld [vmem:[#allocation5 + $0x1194] sm:$0xf]  ;;  %v13345_v1 = vor.u32 %v17564_v59, %v13342_v60  ;;  %8053 = vmatpush.bf16.msrb.mxu3 %v14145_v62 }
 0x53a   :  { %v13598_v54 = vld [vmem:[#allocation5 + $0x11b0] sm:$0xf0] }
 0x53b   :  { %v17692_v63 = vld [vmem:[#allocation5 + $0x1394] sm:$0xf]  ;;  %v13601_v3 = vor.u32 %v17628_v27, %v13598_v54  ;;  %8015 = vmatpush.bf16.msrb.mxu0 %v13345_v1 }
 0x53c   :  { %v13854_v58 = vld [vmem:[#allocation5 + $0x13b0] sm:$0xf0] }
 0x53d   :  { %v17756_v61 = vld [vmem:[#allocation5 + $0x1594] sm:$0xf]  ;;  %v13857_v4 = vor.u32 %v17692_v63, %v13854_v58  ;;  %8028 = vmatpush.bf16.msrb.mxu1 %v13601_v3  ;;  %v7777_v58 = vadd.f32 %v7776_v56, %v7764_v55 }
 0x53e   :  { %v14110_v0 = vld [vmem:[#allocation5 + $0x15b0] sm:$0xf0] }
 0x53f   :  { %v17556_v6 = vld [vmem:[#allocation5 + $0xf54] sm:$0xf]  ;;  %v14113_v8 = vor.u32 %v17756_v61, %v14110_v0  ;;  %8041 = vmatpush.bf16.msrb.mxu2 %v13857_v4 }
 0x540   :  { %v13310_v7 = vld [vmem:[#allocation5 + $0xf70] sm:$0xf0] }
 0x541   :  { %v17620_v2 = vld [vmem:[#allocation5 + $0x1154] sm:$0xf]  ;;  %v13313_v16 = vor.u32 %v17556_v6, %v13310_v7  ;;  %8054 = vmatpush.bf16.msrb.mxu3 %v14113_v8  ;;  %v7789_v7 = vpop.f32.mrf.mxu2 }
 0x542   :  { %v13566_v9 = vld [vmem:[#allocation5 + $0x1170] sm:$0xf0] }
 0x543   :  { %v17684_v12 = vld [vmem:[#allocation5 + $0x1354] sm:$0xf]  ;;  %v13569_v18 = vor.u32 %v17620_v2, %v13566_v9  ;;  %8016 = vmatpush.bf16.msrb.mxu0 %v13313_v16 }
 0x544   :  { %v13822_v11 = vld [vmem:[#allocation5 + $0x1370] sm:$0xf0] }
 0x545   :  { %v17748_v13 = vld [vmem:[#allocation5 + $0x1554] sm:$0xf]  ;;  %v13825_v22 = vor.u32 %v17684_v12, %v13822_v11  ;;  %8029 = vmatpush.bf16.msrb.mxu1 %v13569_v18  ;;  %v7790_v12 = vadd.f32 %v7789_v7, %v7777_v58  ;;  %v7802_v11 = vpop.f32.mrf.mxu3 }
 0x546   :  { %v14078_v14 = vld [vmem:[#allocation5 + $0x1570] sm:$0xf0] }
 0x547   :  { %v17548_v35 = vld [vmem:[#allocation5 + $0xf14] sm:$0xf]  ;;  %v14081_v38 = vor.u32 %v17748_v13, %v14078_v14  ;;  %8042 = vmatpush.bf16.msrb.mxu2 %v13825_v22  ;;  %v19115_v18 = vadd.f32 %v7802_v11, %v7790_v12  ;;  %v7765_v22 = vpop.f32.mrf.mxu0 }
 0x548   :  { %v13278_v33 = vld [vmem:[#allocation5 + $0xf30] sm:$0xf0] }
 0x549   :  { %v17612_v17 = vld [vmem:[#allocation5 + $0x1114] sm:$0xf]  ;;  %v13281_v47 = vor.u32 %v17548_v35, %v13278_v33  ;;  %8055 = vmatpush.bf16.msrb.mxu3 %v14081_v38 }
 0x54a   :  { %v13534_v40 = vld [vmem:[#allocation5 + $0x1130] sm:$0xf0] }
 0x54b   :  { %v17676_v41 = vld [vmem:[#allocation5 + $0x1314] sm:$0xf]  ;;  %v13537_v49 = vor.u32 %v17612_v17, %v13534_v40  ;;  %8017 = vmatpush.bf16.msrb.mxu0 %v13281_v47 }
 0x54c   :  { %v13790_v44 = vld [vmem:[#allocation5 + $0x1330] sm:$0xf0] }
 0x54d   :  { %v17740_v37 = vld [vmem:[#allocation5 + $0x1514] sm:$0xf]  ;;  %v13793_v50 = vor.u32 %v17676_v41, %v13790_v44  ;;  %8030 = vmatpush.bf16.msrb.mxu1 %v13537_v49  ;;  %v7778_v41 = vpop.f32.mrf.mxu1 }
 0x54e   :  { %v14046_v46 = vld [vmem:[#allocation5 + $0x1530] sm:$0xf0] }
 0x54f   :  { %v17540_v51 = vld [vmem:[#allocation5 + $0xed4] sm:$0xf]  ;;  %v14049_v59 = vor.u32 %v17740_v37, %v14046_v46  ;;  %8043 = vmatpush.bf16.msrb.mxu2 %v13793_v50 }
 0x550   :  { %v13246_v52 = vld [vmem:[#allocation5 + $0xef0] sm:$0xf0] }
 0x551   :  { %v17604_v53 = vld [vmem:[#allocation5 + $0x10d4] sm:$0xf]  ;;  %v13249_v61 = vor.u32 %v17540_v51, %v13246_v52  ;;  %8056 = vmatpush.bf16.msrb.mxu3 %v14049_v59 }
 0x552   :  { %v13502_v60 = vld [vmem:[#allocation5 + $0x10f0] sm:$0xf0] }
 0x553   :  { %v17668_v27 = vld [vmem:[#allocation5 + $0x12d4] sm:$0xf]  ;;  %v13505_v0 = vor.u32 %v17604_v53, %v13502_v60  ;;  %8018 = vmatpush.bf16.msrb.mxu0 %v13249_v61  ;;  %v7804_v61 = vpop.f32.mrf.mxu3 }
 0x554   :  { %v13758_v62 = vld [vmem:[#allocation5 + $0x12f0] sm:$0xf0] }
 0x555   :  { %v17732_v54 = vld [vmem:[#allocation5 + $0x14d4] sm:$0xf]  ;;  %v13761_v1 = vor.u32 %v17668_v27, %v13758_v62  ;;  %8031 = vmatpush.bf16.msrb.mxu1 %v13505_v0  ;;  %v7791_v27 = vpop.f32.mrf.mxu2 }
 0x556   :  { %v14014_v63 = vld [vmem:[#allocation5 + $0x14f0] sm:$0xf0] }
 0x557   :  { %v17532_v3 = vld [vmem:[#allocation5 + $0xe94] sm:$0xf]  ;;  %v14017_v57 = vor.u32 %v17732_v54, %v14014_v63  ;;  %8044 = vmatpush.bf16.msrb.mxu2 %v13761_v1 }
 0x558   :  { %v13214_v4 = vld [vmem:[#allocation5 + $0xeb0] sm:$0xf0] }
 0x559   :  { %v17596_v6 = vld [vmem:[#allocation5 + $0x1094] sm:$0xf]  ;;  %v13217_v16 = vor.u32 %v17532_v3, %v13214_v4  ;;  %8057 = vmatpush.bf16.msrb.mxu3 %v14017_v57 }
 0x55a   :  { %v13470_v2 = vld [vmem:[#allocation5 + $0x10b0] sm:$0xf0] }
 0x55b   :  { %v17660_v8 = vld [vmem:[#allocation5 + $0x1294] sm:$0xf]  ;;  %v13473_v35 = vor.u32 %v17596_v6, %v13470_v2  ;;  %8019 = vmatpush.bf16.msrb.mxu0 %v13217_v16 }
 0x55c   :  { %v13726_v9 = vld [vmem:[#allocation5 + $0x12b0] sm:$0xf0] }
 0x55d   :  { %v17724_v13 = vld [vmem:[#allocation5 + $0x1494] sm:$0xf]  ;;  %v13729_v33 = vor.u32 %v17660_v8, %v13726_v9  ;;  %8032 = vmatpush.bf16.msrb.mxu1 %v13473_v35 }
 0x55e   :  { %v13982_v14 = vld [vmem:[#allocation5 + $0x14b0] sm:$0xf0] }
 0x55f   :  { %v17524_v17 = vld [vmem:[#allocation5 + $0xe54] sm:$0xf]  ;;  %v13985_v44 = vor.u32 %v17724_v13, %v13982_v14  ;;  %8045 = vmatpush.bf16.msrb.mxu2 %v13729_v33 }
 0x560   :  { %v13182_v38 = vld [vmem:[#allocation5 + $0xe70] sm:$0xf0] }
 0x561   :  { %v17588_v40 = vld [vmem:[#allocation5 + $0x1054] sm:$0xf]  ;;  %v13185_v50 = vor.u32 %v17524_v17, %v13182_v38  ;;  %8058 = vmatpush.bf16.msrb.mxu3 %v13985_v44 }
 0x562   :  { %v13438_v37 = vld [vmem:[#allocation5 + $0x1070] sm:$0xf0] }
 0x563   :  { %v17652_v46 = vld [vmem:[#allocation5 + $0x1254] sm:$0xf]  ;;  %v13441_v53 = vor.u32 %v17588_v40, %v13438_v37  ;;  %8020 = vmatpush.bf16.msrb.mxu0 %v13185_v50 }
 0x564   :  { %v13694_v47 = vld [vmem:[#allocation5 + $0x1270] sm:$0xf0] }
 0x565   :  { %v17716_v48 = vld [vmem:[#allocation5 + $0x1454] sm:$0xf]  ;;  %v13697_v55 = vor.u32 %v17652_v46, %v13694_v47  ;;  %8033 = vmatpush.bf16.msrb.mxu1 %v13441_v53 }
 0x566   :  { %v13950_v49 = vld [vmem:[#allocation5 + $0x1470] sm:$0xf0] }
 0x567   :  { %v17516_v51 = vld [vmem:[#allocation5 + $0xe14] sm:$0xf]  ;;  %v13953_v62 = vor.u32 %v17716_v48, %v13950_v49  ;;  %8046 = vmatpush.bf16.msrb.mxu2 %v13697_v55 }
 0x568   :  { %v13150_v52 = vld [vmem:[#allocation5 + $0xe30] sm:$0xf0] }
 0x569   :  { %v17580_v56 = vld [vmem:[#allocation5 + $0x1014] sm:$0xf]  ;;  %v13153_v4 = vor.u32 %v17516_v51, %v13150_v52  ;;  %8059 = vmatpush.bf16.msrb.mxu3 %v13953_v62 }
 0x56a   :  { %v13406_v59 = vld [vmem:[#allocation5 + $0x1030] sm:$0xf0] }
 0x56b   :  { %v17644_v60 = vld [vmem:[#allocation5 + $0x1214] sm:$0xf]  ;;  %v13409_v2 = vor.u32 %v17580_v56, %v13406_v59  ;;  %8021 = vmatpush.bf16.msrb.mxu0 %v13153_v4 }
 0x56c   :  { %v13662_v54 = vld [vmem:[#allocation5 + $0x1230] sm:$0xf0] }
 0x56d   :  { %v17708_v63 = vld [vmem:[#allocation5 + $0x1414] sm:$0xf]  ;;  %v13665_v8 = vor.u32 %v17644_v60, %v13662_v54  ;;  %8034 = vmatpush.bf16.msrb.mxu1 %v13409_v2 }
 0x56e   :  { %v13918_v58 = vld [vmem:[#allocation5 + $0x1430] sm:$0xf0]  ;;  %8022 = vmatmul.bf16.vlgmr.msrb.gmra.mxu0 %v18946_v43 }
 0x56f   :  { %v17828_v0 = vld [vmem:[#allocation5 + $0x17d4] sm:$0xf]  ;;  %v13921_v11 = vor.u32 %v17708_v63, %v13918_v58  ;;  %8047 = vmatpush.bf16.msrb.mxu2 %v13665_v8 }
 0x570   :  { %v14398_v1 = vld [vmem:[#allocation5 + $0x17f0] sm:$0xf0]  ;;  %8035 = vmatmul.bf16.vlgmr.msrb.gmra.mxu1 %v18954_v26 }
 0x571   :  { %v17892_v3 = vld [vmem:[#allocation5 + $0x19d4] sm:$0xf]  ;;  %v14401_v13 = vor.u32 %v17828_v0, %v14398_v1  ;;  %8060 = vmatpush.bf16.msrb.mxu3 %v13921_v11 }
 0x572   :  { %v14654_v6 = vld [vmem:[#allocation5 + $0x19f0] sm:$0xf0]  ;;  %8048 = vmatmul.bf16.vlgmr.msrb.gmra.mxu2 %v18958_v31 }
 0x573   :  { %v17956_v7 = vld [vmem:[#allocation5 + $0x1bd4] sm:$0xf]  ;;  %v14657_v14 = vor.u32 %v17892_v3, %v14654_v6  ;;  %8066 = vmatpush.bf16.msra.mxu0 %v14401_v13  ;;  %v7815_v6 = vpop.f32.mrf.mxu0 }
 0x574   :  { %v14910_v57 = vld [vmem:[#allocation5 + $0x1bf0] sm:$0xf0]  ;;  %8061 = vmatmul.bf16.vlgmr.msrb.gmra.mxu3 %v18956_v30  ;;  %v7816_v2 = vadd.f32 %v7815_v6, %v19115_v18 }
 0x575   :  { %v18020_v9 = vld [vmem:[#allocation5 + $0x1dd4] sm:$0xf]  ;;  %v14913_v16 = vor.u32 %v17956_v7, %v14910_v57  ;;  %8079 = vmatpush.bf16.msra.mxu1 %v14657_v14 }
 0x576   :  { %v15166_v12 = vld [vmem:[#allocation5 + $0x1df0] sm:$0xf0] }
 0x577   :  { %v17820_v22 = vld [vmem:[#allocation5 + $0x1794] sm:$0xf]  ;;  %v15169_v17 = vor.u32 %v18020_v9, %v15166_v12  ;;  %8092 = vmatpush.bf16.msra.mxu2 %v14913_v16  ;;  %v7828_v9 = vpop.f32.mrf.mxu1 }
 0x578   :  { %v14366_v35 = vld [vmem:[#allocation5 + $0x17b0] sm:$0xf0] }
 0x579   :  { %v17884_v33 = vld [vmem:[#allocation5 + $0x1994] sm:$0xf]  ;;  %v14369_v46 = vor.u32 %v17820_v22, %v14366_v35  ;;  %8105 = vmatpush.bf16.msra.mxu3 %v15169_v17  ;;  %v7829_v35 = vadd.f32 %v7828_v9, %v7816_v2 }
 0x57a   :  { %v14622_v38 = vld [vmem:[#allocation5 + $0x19b0] sm:$0xf0] }
 0x57b   :  { %v17948_v40 = vld [vmem:[#allocation5 + $0x1b94] sm:$0xf]  ;;  %v14625_v47 = vor.u32 %v17884_v33, %v14622_v38  ;;  %8067 = vmatpush.bf16.msra.mxu0 %v14369_v46 }
 0x57c   :  { %v14878_v41 = vld [vmem:[#allocation5 + $0x1bb0] sm:$0xf0] }
 0x57d   :  { %v18012_v44 = vld [vmem:[#allocation5 + $0x1d94] sm:$0xf]  ;;  %v14881_v48 = vor.u32 %v17948_v40, %v14878_v41  ;;  %8080 = vmatpush.bf16.msra.mxu1 %v14625_v47 }
 0x57e   :  { %v15134_v37 = vld [vmem:[#allocation5 + $0x1db0] sm:$0xf0] }
 0x57f   :  { %v17812_v49 = vld [vmem:[#allocation5 + $0x1754] sm:$0xf]  ;;  %v15137_v52 = vor.u32 %v18012_v44, %v15134_v37  ;;  %8093 = vmatpush.bf16.msra.mxu2 %v14881_v48 }
 0x580   :  { %v14334_v50 = vld [vmem:[#allocation5 + $0x1770] sm:$0xf0] }
 0x581   :  { %v17876_v51 = vld [vmem:[#allocation5 + $0x1954] sm:$0xf]  ;;  %v14337_v27 = vor.u32 %v17812_v49, %v14334_v50  ;;  %8106 = vmatpush.bf16.msra.mxu3 %v15137_v52  ;;  %v7841_v50 = vpop.f32.mrf.mxu2 }
 0x582   :  { %v14590_v53 = vld [vmem:[#allocation5 + $0x1970] sm:$0xf0] }
 0x583   :  { %v17940_v55 = vld [vmem:[#allocation5 + $0x1b54] sm:$0xf]  ;;  %v14593_v62 = vor.u32 %v17876_v51, %v14590_v53  ;;  %8068 = vmatpush.bf16.msra.mxu0 %v14337_v27  ;;  %v7817_v27 = vpop.f32.mrf.mxu0 }
 0x584   :  { %v14846_v56 = vld [vmem:[#allocation5 + $0x1b70] sm:$0xf0] }
 0x585   :  { %v18004_v59 = vld [vmem:[#allocation5 + $0x1d54] sm:$0xf]  ;;  %v14849_v54 = vor.u32 %v17940_v55, %v14846_v56  ;;  %8081 = vmatpush.bf16.msra.mxu1 %v14593_v62  ;;  %v7842_v55 = vadd.f32 %v7841_v50, %v7829_v35  ;;  %v7854_v56 = vpop.f32.mrf.mxu3  ;;  %v17129_v50 = vld [vmem:[#allocation5 + $0x1f4] sm:$0xf0] }
 0x586   :  { %v15102_v60 = vld [vmem:[#allocation5 + $0x1d70] sm:$0xf0] }
 0x587   :  { %v17804_v63 = vld [vmem:[#allocation5 + $0x1714] sm:$0xf]  ;;  %v15105_v0 = vor.u32 %v18004_v59, %v15102_v60  ;;  %8094 = vmatpush.bf16.msra.mxu2 %v14849_v54  ;;  %v7830_v54 = vpop.f32.mrf.mxu1 }
 0x588   :  { %v14302_v58 = vld [vmem:[#allocation5 + $0x1730] sm:$0xf0] }
 0x589   :  { %v17868_v61 = vld [vmem:[#allocation5 + $0x1914] sm:$0xf]  ;;  %v14305_v8 = vor.u32 %v17804_v63, %v14302_v58  ;;  %8107 = vmatpush.bf16.msra.mxu3 %v15105_v0  ;;  %v19122_v63 = vadd.f32 %v7854_v56, %v7842_v55  ;;  %v17193_v55 = vld [vmem:[#allocation5 + $0x3f4] sm:$0xf0] }
 0x58a   :  { %v14558_v1 = vld [vmem:[#allocation5 + $0x1930] sm:$0xf0] }
 0x58b   :  { %v17932_v3 = vld [vmem:[#allocation5 + $0x1b14] sm:$0xf]  ;;  %v14561_v12 = vor.u32 %v17868_v61, %v14558_v1  ;;  %8069 = vmatpush.bf16.msra.mxu0 %v14305_v8 }
 0x58c   :  { %v14814_v4 = vld [vmem:[#allocation5 + $0x1b30] sm:$0xf0] }
 0x58d   :  { %v17996_v7 = vld [vmem:[#allocation5 + $0x1d14] sm:$0xf]  ;;  %v14817_v11 = vor.u32 %v17932_v3, %v14814_v4  ;;  %8082 = vmatpush.bf16.msra.mxu1 %v14561_v12 }
 0x58e   :  { %v15070_v57 = vld [vmem:[#allocation5 + $0x1d30] sm:$0xf0] }
 0x58f   :  { %v17796_v13 = vld [vmem:[#allocation5 + $0x16d4] sm:$0xf]  ;;  %v15073_v22 = vor.u32 %v17996_v7, %v15070_v57  ;;  %8095 = vmatpush.bf16.msra.mxu2 %v14817_v11 }
 0x590   :  { %v14270_v14 = vld [vmem:[#allocation5 + $0x16f0] sm:$0xf0] }
 0x591   :  { %v17860_v16 = vld [vmem:[#allocation5 + $0x18d4] sm:$0xf]  ;;  %v14273_v44 = vor.u32 %v17796_v13, %v14270_v14  ;;  %8108 = vmatpush.bf16.msra.mxu3 %v15073_v22 }
 0x592   :  { %v14526_v33 = vld [vmem:[#allocation5 + $0x18f0] sm:$0xf0] }
 0x593   :  { %v17924_v17 = vld [vmem:[#allocation5 + $0x1ad4] sm:$0xf]  ;;  %v14529_v18 = vor.u32 %v17860_v16, %v14526_v33  ;;  %8070 = vmatpush.bf16.msra.mxu0 %v14273_v44 }
 0x594   :  { %v14782_v38 = vld [vmem:[#allocation5 + $0x1af0] sm:$0xf0] }
 0x595   :  { %v17988_v40 = vld [vmem:[#allocation5 + $0x1cd4] sm:$0xf]  ;;  %v14785_v37 = vor.u32 %v17924_v17, %v14782_v38  ;;  %8083 = vmatpush.bf16.msra.mxu1 %v14529_v18 }
 0x596   :  { %v15038_v41 = vld [vmem:[#allocation5 + $0x1cf0] sm:$0xf0] }
 0x597   :  { %v17788_v46 = vld [vmem:[#allocation5 + $0x1694] sm:$0xf]  ;;  %v15041_v49 = vor.u32 %v17988_v40, %v15038_v41  ;;  %8096 = vmatpush.bf16.msra.mxu2 %v14785_v37  ;;  %v7843_v41 = vpop.f32.mrf.mxu2 }
 0x598   :  { %v14238_v47 = vld [vmem:[#allocation5 + $0x16b0] sm:$0xf0] }
 0x599   :  { %v17852_v48 = vld [vmem:[#allocation5 + $0x1894] sm:$0xf]  ;;  %v14241_v62 = vor.u32 %v17788_v46, %v14238_v47  ;;  %8109 = vmatpush.bf16.msra.mxu3 %v15041_v49  ;;  %v7856_v46 = vpop.f32.mrf.mxu3  ;;  %v11588_v49 = vld [vmem:[#allocation5 + $0x1d8] sm:$0xf] }
 0x59a   :  { %v14494_v51 = vld [vmem:[#allocation5 + $0x18b0] sm:$0xf0]  ;;  %v11589_v27 = vor.u32 %v17129_v50, %v11588_v49  ;;  %v11492_v46 = vld [vmem:[#allocation5 + $0x118] sm:$0xf] }
 0x59b   :  { %v17916_v52 = vld [vmem:[#allocation5 + $0x1a94] sm:$0xf]  ;;  %v14497_v58 = vor.u32 %v17852_v48, %v14494_v51  ;;  %8071 = vmatpush.bf16.msra.mxu0 %v14241_v62  ;;  %v11748_v49 = vld [vmem:[#allocation5 + $0x318] sm:$0xf] }
 0x59c   :  { %v14750_v53 = vld [vmem:[#allocation5 + $0x1ab0] sm:$0xf0]  ;;  %v17169_v50 = vld [vmem:[#allocation5 + $0x334] sm:$0xf0] }
 0x59d   :  { %v17980_v59 = vld [vmem:[#allocation5 + $0x1c94] sm:$0xf]  ;;  %v14753_v61 = vor.u32 %v17916_v52, %v14750_v53  ;;  %8084 = vmatpush.bf16.msra.mxu1 %v14497_v58  ;;  %v11844_v53 = vld [vmem:[#allocation5 + $0x3d8] sm:$0xf] }
 0x59e   :  { %v15006_v60 = vld [vmem:[#allocation5 + $0x1cb0] sm:$0xf0] }
 0x59f   :  { %v17780_v0 = vld [vmem:[#allocation5 + $0x1654] sm:$0xf]  ;;  %v15009_v4 = vor.u32 %v17980_v59, %v15006_v60  ;;  %8097 = vmatpush.bf16.msra.mxu2 %v14753_v61  ;;  %v11845_v61 = vor.u32 %v17193_v55, %v11844_v53  ;;  %v7880_v53 = vpop.f32.mrf.mxu1 }
 0x5a0   :  { %v14206_v1 = vld [vmem:[#allocation5 + $0x1670] sm:$0xf0] }
 0x5a1   :  { %v17844_v3 = vld [vmem:[#allocation5 + $0x1854] sm:$0xf]  ;;  %v14209_v9 = vor.u32 %v17780_v0, %v14206_v1  ;;  %8110 = vmatpush.bf16.msra.mxu3 %v15009_v4  ;;  %v11556_v1 = vld [vmem:[#allocation5 + $0x198] sm:$0xf] }
 0x5a2   :  { %v14462_v6 = vld [vmem:[#allocation5 + $0x1870] sm:$0xf0]  ;;  %v11812_v4 = vld [vmem:[#allocation5 + $0x398] sm:$0xf] }
 0x5a3   :  { %v17908_v7 = vld [vmem:[#allocation5 + $0x1a54] sm:$0xf]  ;;  %v14465_v13 = vor.u32 %v17844_v3, %v14462_v6  ;;  %8072 = vmatpush.bf16.msra.mxu0 %v14209_v9  ;;  %v17121_v3 = vld [vmem:[#allocation5 + $0x1b4] sm:$0xf0] }
 0x5a4   :  { %v14718_v57 = vld [vmem:[#allocation5 + $0x1a70] sm:$0xf0]  ;;  %v17185_v6 = vld [vmem:[#allocation5 + $0x3b4] sm:$0xf0] }
 0x5a5   :  { %v17972_v2 = vld [vmem:[#allocation5 + $0x1c54] sm:$0xf]  ;;  %v14721_v14 = vor.u32 %v17908_v7, %v14718_v57  ;;  %8085 = vmatpush.bf16.msra.mxu1 %v14465_v13 }
 0x5a6   :  { %v14974_v8 = vld [vmem:[#allocation5 + $0x1c70] sm:$0xf0] }
 0x5a7   :  { %v17772_v12 = vld [vmem:[#allocation5 + $0x1614] sm:$0xf]  ;;  %v14977_v33 = vor.u32 %v17972_v2, %v14974_v8  ;;  %8098 = vmatpush.bf16.msra.mxu2 %v14721_v14  ;;  %v11557_v2 = vor.u32 %v17121_v3, %v11556_v1  ;;  %v11524_v14 = vld [vmem:[#allocation5 + $0x158] sm:$0xf] }
 0x5a8   :  { %v14174_v11 = vld [vmem:[#allocation5 + $0x1630] sm:$0xf0]  ;;  %v11716_v1 = vld [vmem:[#allocation5 + $0x2d8] sm:$0xf] }
 0x5a9   :  { %v17836_v16 = vld [vmem:[#allocation5 + $0x1814] sm:$0xf]  ;;  %v14177_v47 = vor.u32 %v17772_v12, %v14174_v11  ;;  %8111 = vmatpush.bf16.msra.mxu3 %v14977_v33  ;;  %v11813_v11 = vor.u32 %v17185_v6, %v11812_v4  ;;  %v17161_v3 = vld [vmem:[#allocation5 + $0x2f4] sm:$0xf0] }
 0x5aa   :  { %v14430_v22 = vld [vmem:[#allocation5 + $0x1830] sm:$0xf0] }
 0x5ab   :  { %v17900_v35 = vld [vmem:[#allocation5 + $0x1a14] sm:$0xf]  ;;  %v14433_v51 = vor.u32 %v17836_v16, %v14430_v22  ;;  %8073 = vmatpush.bf16.msra.mxu0 %v14177_v47  ;;  %v17113_v16 = vld [vmem:[#allocation5 + $0x174] sm:$0xf0] }
 0x5ac   :  { %v14686_v17 = vld [vmem:[#allocation5 + $0x1a30] sm:$0xf0]  ;;  %v11780_v22 = vld [vmem:[#allocation5 + $0x358] sm:$0xf] }
 0x5ad   :  { %v17964_v38 = vld [vmem:[#allocation5 + $0x1c14] sm:$0xf]  ;;  %v14689_v52 = vor.u32 %v17900_v35, %v14686_v17  ;;  %8086 = vmatpush.bf16.msra.mxu1 %v14433_v51  ;;  %v17177_v35 = vld [vmem:[#allocation5 + $0x374] sm:$0xf0] }
 0x5ae   :  { %v14942_v40 = vld [vmem:[#allocation5 + $0x1c30] sm:$0xf0]  ;;  %8074 = vmatmul.bf16.vlgmr.msra.gmra.mxu0 %v18960_v34  ;;  %v17105_v47 = vld [vmem:[#allocation5 + $0x134] sm:$0xf0] }
 0x5af   :  { %v18084_v44 = vld [vmem:[#allocation5 + $0x1fd4] sm:$0xf]  ;;  %v14945_v56 = vor.u32 %v17964_v38, %v14942_v40  ;;  %8099 = vmatpush.bf16.msra.mxu2 %v14689_v52  ;;  %v11525_v38 = vor.u32 %v17113_v16, %v11524_v14  ;;  %v7906_v16 = vpop.f32.mrf.mxu3 }
 0x5b0   :  { %v15422_v18 = vld [vmem:[#allocation5 + $0x1ff0] sm:$0xf0]  ;;  %8087 = vmatmul.bf16.vlgmr.msra.gmra.mxu1 %v18966_v24 }
 0x5b1   :  { %v18148_v37 = vld [vmem:[#allocation5 + $0x21d4] sm:$0xf]  ;;  %v15425_v59 = vor.u32 %v18084_v44, %v15422_v18  ;;  %8112 = vmatpush.bf16.msra.mxu3 %v14945_v56  ;;  %v11781_v18 = vor.u32 %v17177_v35, %v11780_v22  ;;  %v11493_v56 = vor.u32 %v17105_v47, %v11492_v46  ;;  %v11684_v22 = vld [vmem:[#allocation5 + $0x298] sm:$0xf] }
 0x5b2   :  { %v15678_v48 = vld [vmem:[#allocation5 + $0x21f0] sm:$0xf0]  ;;  %8100 = vmatmul.bf16.vlgmr.msra.gmra.mxu2 %v18970_v32  ;;  %v17153_v35 = vld [vmem:[#allocation5 + $0x2b4] sm:$0xf0] }
 0x5b3   :  { %v15681_v60 = vor.u32 %v18148_v37, %v15678_v48  ;;  %v18076_v62 = vld [vmem:[#allocation5 + $0x1f94] sm:$0xf]  ;;  %8118 = vmatpush.bf16.msrb.mxu0 %v15425_v59  ;;  %8144 = vmatpush.bf16.msrb.mxu2 %v11589_v27  ;;  %v7867_v48 = vpop.f32.mrf.mxu0  ;;  %v11685_v47 = vor.u32 %v17153_v35, %v11684_v22 }
 0x5b4   :  { %v15390_v54 = vld [vmem:[#allocation5 + $0x1fb0] sm:$0xf0]  ;;  %8113 = vmatmul.bf16.vlgmr.msra.gmra.mxu3 %v18968_v29  ;;  %v7868_v51 = vadd.f32 %v7867_v48, %v19122_v63 }
 0x5b5   :  { %v18140_v58 = vld [vmem:[#allocation5 + $0x2194] sm:$0xf]  ;;  %v15393_v7 = vor.u32 %v18076_v62, %v15390_v54  ;;  %8131 = vmatpush.bf16.msrb.mxu1 %v15681_v60  ;;  %8157 = vmatpush.bf16.msrb.mxu3 %v11845_v61  ;;  %v11749_v62 = vor.u32 %v17169_v50, %v11748_v49  ;;  %v11460_v61 = vld [vmem:[#allocation5 + $0xd8] sm:$0xf] }
 0x5b6   :  { %v15646_v0 = vld [vmem:[#allocation5 + $0x21b0] sm:$0xf0]  ;;  %v7881_v54 = vadd.f32 %v7880_v53, %v7868_v51  ;;  %v11396_v49 = vld [vmem:[#allocation5 + $0x58] sm:$0xf] }
 0x5b7   :  { %v15649_v57 = vor.u32 %v18140_v58, %v15646_v0  ;;  %v18068_v8 = vld [vmem:[#allocation5 + $0x1f54] sm:$0xf]  ;;  %8119 = vmatpush.bf16.msrb.mxu0 %v15393_v7  ;;  %8145 = vmatpush.bf16.msrb.mxu2 %v11557_v2  ;;  %v17097_v0 = vld [vmem:[#allocation5 + $0xf4] sm:$0xf0] }
 0x5b8   :  { %v15358_v9 = vld [vmem:[#allocation5 + $0x1f70] sm:$0xf0]  ;;  %v11461_v6 = vor.u32 %v17097_v0, %v11460_v61  ;;  %v17081_v50 = vld [vmem:[#allocation5 + $0x74] sm:$0xf0] }
 0x5b9   :  { %v18132_v12 = vld [vmem:[#allocation5 + $0x2154] sm:$0xf]  ;;  %v15361_v33 = vor.u32 %v18068_v8, %v15358_v9  ;;  %8132 = vmatpush.bf16.msrb.mxu1 %v15649_v57  ;;  %8158 = vmatpush.bf16.msrb.mxu3 %v11813_v11  ;;  %v11717_v8 = vor.u32 %v17161_v3, %v11716_v1  ;;  %v7893_v9 = vpop.f32.mrf.mxu2  ;;  %v11428_v11 = vld [vmem:[#allocation5 + $0x98] sm:$0xf] }
 0x5ba   :  { %v15614_v13 = vld [vmem:[#allocation5 + $0x2170] sm:$0xf0]  ;;  %v7894_v14 = vadd.f32 %v7893_v9, %v7881_v54  ;;  %v11652_v51 = vld [vmem:[#allocation5 + $0x258] sm:$0xf] }
 0x5bb   :  { %v15617_v17 = vor.u32 %v18132_v12, %v15614_v13  ;;  %v18060_v40 = vld [vmem:[#allocation5 + $0x1f14] sm:$0xf]  ;;  %8120 = vmatpush.bf16.msrb.mxu0 %v15361_v33  ;;  %8146 = vmatpush.bf16.msrb.mxu2 %v11525_v38  ;;  %v17089_v13 = vld [vmem:[#allocation5 + $0xb4] sm:$0xf0]  ;;  %v7869_v33 = vpop.f32.mrf.mxu0  ;;  %v7882_v38 = vpop.f32.mrf.mxu1 }
 0x5bc   :  { %v15326_v41 = vld [vmem:[#allocation5 + $0x1f30] sm:$0xf0]  ;;  %v11364_v54 = vld [vmem:[#allocation5 + $0x18] sm:$0xf] }
 0x5bd   :  { %v18124_v44 = vld [vmem:[#allocation5 + $0x2114] sm:$0xf]  ;;  %v15329_v52 = vor.u32 %v18060_v40, %v15326_v41  ;;  %8133 = vmatpush.bf16.msrb.mxu1 %v15617_v17  ;;  %8159 = vmatpush.bf16.msrb.mxu3 %v11781_v18  ;;  %v19129_v40 = vadd.f32 %v7906_v16, %v7894_v14  ;;  %v17073_v61 = vld [vmem:[#allocation5 + $0x34] sm:$0xf0] }
 0x5be   :  { %v15582_v37 = vld [vmem:[#allocation5 + $0x2130] sm:$0xf0]  ;;  %v11620_v0 = vld [vmem:[#allocation5 + $0x218] sm:$0xf] }
 0x5bf   :  { %v15585_v55 = vor.u32 %v18124_v44, %v15582_v37  ;;  %v18052_v59 = vld [vmem:[#allocation5 + $0x1ed4] sm:$0xf]  ;;  %8121 = vmatpush.bf16.msrb.mxu0 %v15329_v52  ;;  %8147 = vmatpush.bf16.msrb.mxu2 %v11493_v56  ;;  %v11429_v44 = vor.u32 %v17089_v13, %v11428_v11  ;;  %v17145_v52 = vld [vmem:[#allocation5 + $0x274] sm:$0xf0]  ;;  %v11365_v11 = vor.u32 %v17073_v61, %v11364_v54 }
 0x5c0   :  { %v15294_v60 = vld [vmem:[#allocation5 + $0x1ef0] sm:$0xf0]  ;;  %v17137_v1 = vld [vmem:[#allocation5 + $0x234] sm:$0xf0] }
 0x5c1   :  { %v18116_v27 = vld [vmem:[#allocation5 + $0x20d4] sm:$0xf]  ;;  %v15297_v4 = vor.u32 %v18052_v59, %v15294_v60  ;;  %8134 = vmatpush.bf16.msrb.mxu1 %v15585_v55  ;;  %8160 = vmatpush.bf16.msrb.mxu3 %v11749_v62  ;;  %v11397_v60 = vor.u32 %v17081_v50, %v11396_v49  ;;  %v7895_v3 = vpop.f32.mrf.mxu2  ;;  %v17385_v9 = vld [vmem:[#allocation5 + $0x9f4] sm:$0xf0]  ;;  %v11621_v16 = vor.u32 %v17137_v1, %v11620_v0 }
 0x5c2   :  { %v15550_v58 = vld [vmem:[#allocation5 + $0x20f0] sm:$0xf0]  ;;  %v12868_v13 = vld [vmem:[#allocation5 + $0xbd8] sm:$0xf] }
 0x5c3   :  { %v15553_v63 = vor.u32 %v18116_v27, %v15550_v58  ;;  %v18044_v7 = vld [vmem:[#allocation5 + $0x1e94] sm:$0xf]  ;;  %8122 = vmatpush.bf16.msrb.mxu0 %v15297_v4  ;;  %8148 = vmatpush.bf16.msrb.mxu2 %v11461_v6  ;;  %v11653_v58 = vor.u32 %v17145_v52, %v11652_v51  ;;  %v12100_v4 = vld [vmem:[#allocation5 + $0x5d8] sm:$0xf] }
 0x5c4   :  { %v15262_v57 = vld [vmem:[#allocation5 + $0x1eb0] sm:$0xf0]  ;;  %v12356_v6 = vld [vmem:[#allocation5 + $0x7d8] sm:$0xf] }
 0x5c5   :  { %v18108_v2 = vld [vmem:[#allocation5 + $0x2094] sm:$0xf]  ;;  %v15265_v17 = vor.u32 %v18044_v7, %v15262_v57  ;;  %8135 = vmatpush.bf16.msrb.mxu1 %v15553_v63  ;;  %8161 = vmatpush.bf16.msrb.mxu3 %v11717_v8  ;;  %v17257_v63 = vld [vmem:[#allocation5 + $0x5f4] sm:$0xf0]  ;;  %v7908_v7 = vpop.f32.mrf.mxu3 }
 0x5c6   :  { %v15518_v12 = vld [vmem:[#allocation5 + $0x20b0] sm:$0xf0]  ;;  %v12612_v8 = vld [vmem:[#allocation5 + $0x9d8] sm:$0xf]  ;;  %v12101_v22 = vor.u32 %v17257_v63, %v12100_v4 }
 0x5c7   :  { %v15521_v41 = vor.u32 %v18108_v2, %v15518_v12  ;;  %v18036_v18 = vld [vmem:[#allocation5 + $0x1e54] sm:$0xf]  ;;  %8123 = vmatpush.bf16.msrb.mxu0 %v15265_v17  ;;  %8149 = vmatpush.bf16.msrb.mxu2 %v11429_v44  ;;  %v17321_v2 = vld [vmem:[#allocation5 + $0x7f4] sm:$0xf0]  ;;  %v12613_v33 = vor.u32 %v17385_v9, %v12612_v8 }
 0x5c8   :  { %v15230_v37 = vld [vmem:[#allocation5 + $0x1e70] sm:$0xf0]  ;;  %v17449_v14 = vld [vmem:[#allocation5 + $0xbf4] sm:$0xf0]  ;;  %v12357_v35 = vor.u32 %v17321_v2, %v12356_v6  ;;  %v7919_v2 = vpop.f32.mrf.mxu0 }
 0x5c9   :  { %v18100_v46 = vld [vmem:[#allocation5 + $0x2054] sm:$0xf]  ;;  %v15233_v53 = vor.u32 %v18036_v18, %v15230_v37  ;;  %8136 = vmatpush.bf16.msrb.mxu1 %v15521_v41  ;;  %8162 = vmatpush.bf16.msrb.mxu3 %v11685_v47  ;;  %v12068_v17 = vld [vmem:[#allocation5 + $0x598] sm:$0xf]  ;;  %v12869_v44 = vor.u32 %v17449_v14, %v12868_v13  ;;  %v19136_v13 = vadd.f32 %v7919_v2, %v19129_v40 }
 0x5ca   :  { %v15486_v48 = vld [vmem:[#allocation5 + $0x2070] sm:$0xf0]  ;;  %v17249_v38 = vld [vmem:[#allocation5 + $0x5b4] sm:$0xf0] }
 0x5cb   :  { %v18028_v55 = vld [vmem:[#allocation5 + $0x1e14] sm:$0xf]  ;;  %v15489_v59 = vor.u32 %v18100_v46, %v15486_v48  ;;  %8124 = vmatpush.bf16.msrb.mxu0 %v15233_v53  ;;  %8150 = vmatpush.bf16.msrb.mxu2 %v11397_v60  ;;  %v12324_v41 = vld [vmem:[#allocation5 + $0x798] sm:$0xf]  ;;  %v12069_v49 = vor.u32 %v17249_v38, %v12068_v17  ;;  %v7932_v38 = vpop.f32.mrf.mxu1 }
 0x5cc   :  { %v15198_v56 = vld [vmem:[#allocation5 + $0x1e30] sm:$0xf0]  ;;  %v17313_v18 = vld [vmem:[#allocation5 + $0x7b4] sm:$0xf0] }
 0x5cd   :  { %v18092_v27 = vld [vmem:[#allocation5 + $0x2014] sm:$0xf]  ;;  %v15201_v57 = vor.u32 %v18028_v55, %v15198_v56  ;;  %8137 = vmatpush.bf16.msrb.mxu1 %v15489_v59  ;;  %8163 = vmatpush.bf16.msrb.mxu3 %v11653_v58  ;;  %v12580_v37 = vld [vmem:[#allocation5 + $0x998] sm:$0xf]  ;;  %v12325_v50 = vor.u32 %v17313_v18, %v12324_v41 }
 0x5ce   :  { %v15454_v62 = vld [vmem:[#allocation5 + $0x2030] sm:$0xf0]  ;;  %v17377_v46 = vld [vmem:[#allocation5 + $0x9b4] sm:$0xf0] }
 0x5cf   :  { %v15457_v12 = vor.u32 %v18092_v27, %v15454_v62  ;;  %8125 = vmatpush.bf16.msrb.mxu0 %v15201_v57  ;;  %8151 = vmatpush.bf16.msrb.mxu2 %v11365_v11  ;;  %v12836_v47 = vld [vmem:[#allocation5 + $0xb98] sm:$0xf]  ;;  %v12581_v51 = vor.u32 %v17377_v46, %v12580_v37 }
 0x5d0   :  { %v17441_v48 = vld [vmem:[#allocation5 + $0xbb4] sm:$0xf0] }
 0x5d1   :  { %8138 = vmatpush.bf16.msrb.mxu1 %v15457_v12  ;;  %8164 = vmatpush.bf16.msrb.mxu3 %v11621_v16  ;;  %v12036_v52 = vld [vmem:[#allocation5 + $0x558] sm:$0xf]  ;;  %v12837_v56 = vor.u32 %v17441_v48, %v12836_v47  ;;  %v18525_v12 = vld [vmem:[#allocation7] sm:$0xff] }
 0x5d2   :  { %v17241_v53 = vld [vmem:[#allocation5 + $0x574] sm:$0xf0]  ;;  %8126 = vmatmul.bf16.vlgmr.msrb.gmra.mxu0 %v18972_v36  ;;  %8152 = vmatmul.bf16.vlgmr.msrb.gmra.mxu2 %v18932_v20  ;;  %v1307_v11 = vperm.slane %v18525_v12, 5 }
 0x5d3   :  { %8170 = vmatpush.bf16.msra.mxu0 %v12101_v22  ;;  %8196 = vmatpush.bf16.msra.mxu2 %v12613_v33  ;;  %v12292_v55 = vld [vmem:[#allocation5 + $0x758] sm:$0xf]  ;;  %v12037_v58 = vor.u32 %v17241_v53, %v12036_v52  ;;  %v7934_v2 = vpop.f32.mrf.mxu1 }
 0x5d4   :  { %v17305_v59 = vld [vmem:[#allocation5 + $0x774] sm:$0xf0]  ;;  %8139 = vmatmul.bf16.vlgmr.msrb.gmra.mxu1 %v18978_v28  ;;  %8165 = vmatmul.bf16.vlgmr.msrb.gmra.mxu3 %v18936_v23  ;;  %v7933_v48 = vadd.f32 %v7932_v38, %v1307_v11 }
 0x5d5   :  { %8183 = vmatpush.bf16.msra.mxu1 %v12357_v35  ;;  %8209 = vmatpush.bf16.msra.mxu3 %v12869_v44  ;;  %v12548_v60 = vld [vmem:[#allocation5 + $0x958] sm:$0xf]  ;;  %v12293_v61 = vor.u32 %v17305_v59, %v12292_v55 }
 0x5d6   :  { %v17369_v27 = vld [vmem:[#allocation5 + $0x974] sm:$0xf0] }
 0x5d7   :  { %v12804_v62 = vld [vmem:[#allocation5 + $0xb58] sm:$0xf]  ;;  %8171 = vmatpush.bf16.msra.mxu0 %v12069_v49  ;;  %8197 = vmatpush.bf16.msra.mxu2 %v12581_v51  ;;  %v12549_v0 = vor.u32 %v17369_v27, %v12548_v60  ;;  %v7945_v27 = vpop.f32.mrf.mxu2 }
 0x5d8   :  { %v17433_v54 = vld [vmem:[#allocation5 + $0xb74] sm:$0xf0] }
 0x5d9   :  { %8184 = vmatpush.bf16.msra.mxu1 %v12325_v50  ;;  %v12004_v1 = vld [vmem:[#allocation5 + $0x518] sm:$0xf]  ;;  %8210 = vmatpush.bf16.msra.mxu3 %v12837_v56  ;;  %v12805_v63 = vor.u32 %v17433_v54, %v12804_v62  ;;  %v7958_v62 = vpop.f32.mrf.mxu3 }
 0x5da   :  { %v17233_v3 = vld [vmem:[#allocation5 + $0x534] sm:$0xf0] }
 0x5db   :  { %v12260_v4 = vld [vmem:[#allocation5 + $0x718] sm:$0xf]  ;;  %8172 = vmatpush.bf16.msra.mxu0 %v12037_v58  ;;  %v12005_v14 = vor.u32 %v17233_v3, %v12004_v1  ;;  %8198 = vmatpush.bf16.msra.mxu2 %v12549_v0  ;;  %v7921_v0 = vpop.f32.mrf.mxu0 }
 0x5dc   :  { %v17297_v6 = vld [vmem:[#allocation5 + $0x734] sm:$0xf0] }
 0x5dd   :  { %v12516_v7 = vld [vmem:[#allocation5 + $0x918] sm:$0xf]  ;;  %8185 = vmatpush.bf16.msra.mxu1 %v12293_v61  ;;  %v12261_v16 = vor.u32 %v17297_v6, %v12260_v4  ;;  %8211 = vmatpush.bf16.msra.mxu3 %v12805_v63  ;;  %v7946_v61 = vadd.f32 %v7945_v27, %v7933_v48 }
 0x5de   :  { %v17361_v57 = vld [vmem:[#allocation5 + $0x934] sm:$0xf0] }
 0x5df   :  { %v12772_v8 = vld [vmem:[#allocation5 + $0xb18] sm:$0xf]  ;;  %v12517_v22 = vor.u32 %v17361_v57, %v12516_v7  ;;  %8173 = vmatpush.bf16.msra.mxu0 %v12005_v14  ;;  %v19138_v57 = vadd.f32 %v7958_v62, %v7946_v61 }
 0x5e0   :  { %v17425_v9 = vld [vmem:[#allocation5 + $0xb34] sm:$0xf0] }
 0x5e1   :  { %v11972_v35 = vld [vmem:[#allocation5 + $0x4d8] sm:$0xf]  ;;  %v12773_v41 = vor.u32 %v17425_v9, %v12772_v8  ;;  %8186 = vmatpush.bf16.msra.mxu1 %v12261_v16  ;;  %8199 = vmatpush.bf16.msra.mxu2 %v12517_v22 }
 0x5e2   :  { %v17225_v33 = vld [vmem:[#allocation5 + $0x4f4] sm:$0xf0] }
 0x5e3   :  { %v12228_v17 = vld [vmem:[#allocation5 + $0x6d8] sm:$0xf]  ;;  %v11973_v40 = vor.u32 %v17225_v33, %v11972_v35  ;;  %8212 = vmatpush.bf16.msra.mxu3 %v12773_v41 }
 0x5e4   :  { %v17289_v44 = vld [vmem:[#allocation5 + $0x6f4] sm:$0xf0] }
 0x5e5   :  { %v12484_v18 = vld [vmem:[#allocation5 + $0x8d8] sm:$0xf]  ;;  %v12229_v49 = vor.u32 %v17289_v44, %v12228_v17  ;;  %8174 = vmatpush.bf16.msra.mxu0 %v11973_v40  ;;  %v7947_v40 = vpop.f32.mrf.mxu2 }
 0x5e6   :  { %v17353_v37 = vld [vmem:[#allocation5 + $0x8f4] sm:$0xf0] }
 0x5e7   :  { %v12740_v46 = vld [vmem:[#allocation5 + $0xad8] sm:$0xf]  ;;  %v12485_v50 = vor.u32 %v17353_v37, %v12484_v18  ;;  %8187 = vmatpush.bf16.msra.mxu1 %v12229_v49  ;;  %v7960_v49 = vpop.f32.mrf.mxu3 }
 0x5e8   :  { %v17417_v47 = vld [vmem:[#allocation5 + $0xaf4] sm:$0xf0] }
 0x5e9   :  { %v11940_v51 = vld [vmem:[#allocation5 + $0x498] sm:$0xf]  ;;  %v12741_v55 = vor.u32 %v17417_v47, %v12740_v46  ;;  %8200 = vmatpush.bf16.msra.mxu2 %v12485_v50 }
 0x5ea   :  { %v17217_v52 = vld [vmem:[#allocation5 + $0x4b4] sm:$0xf0] }
 0x5eb   :  { %v12196_v53 = vld [vmem:[#allocation5 + $0x698] sm:$0xf]  ;;  %v11941_v1 = vor.u32 %v17217_v52, %v11940_v51  ;;  %8213 = vmatpush.bf16.msra.mxu3 %v12741_v55 }
 0x5ec   :  { %v17281_v56 = vld [vmem:[#allocation5 + $0x6b4] sm:$0xf0] }
 0x5ed   :  { %v12452_v59 = vld [vmem:[#allocation5 + $0x898] sm:$0xf]  ;;  %v12197_v3 = vor.u32 %v17281_v56, %v12196_v53  ;;  %8175 = vmatpush.bf16.msra.mxu0 %v11941_v1 }
 0x5ee   :  { %v17345_v60 = vld [vmem:[#allocation5 + $0x8b4] sm:$0xf0] }
 0x5ef   :  { %v12708_v54 = vld [vmem:[#allocation5 + $0xa98] sm:$0xf]  ;;  %v12453_v4 = vor.u32 %v17345_v60, %v12452_v59  ;;  %8188 = vmatpush.bf16.msra.mxu1 %v12197_v3 }
 0x5f0   :  { %v17409_v58 = vld [vmem:[#allocation5 + $0xab4] sm:$0xf0] }
 0x5f1   :  { %v11908_v63 = vld [vmem:[#allocation5 + $0x458] sm:$0xf]  ;;  %v12709_v8 = vor.u32 %v17409_v58, %v12708_v54  ;;  %8201 = vmatpush.bf16.msra.mxu2 %v12453_v4 }
 0x5f2   :  { %v17209_v6 = vld [vmem:[#allocation5 + $0x474] sm:$0xf0] }
 0x5f3   :  { %v12164_v7 = vld [vmem:[#allocation5 + $0x658] sm:$0xf]  ;;  %v11909_v22 = vor.u32 %v17209_v6, %v11908_v63  ;;  %8214 = vmatpush.bf16.msra.mxu3 %v12709_v8 }
 0x5f4   :  { %v17273_v9 = vld [vmem:[#allocation5 + $0x674] sm:$0xf0] }
 0x5f5   :  { %v12420_v12 = vld [vmem:[#allocation5 + $0x858] sm:$0xf]  ;;  %v12165_v17 = vor.u32 %v17273_v9, %v12164_v7  ;;  %8176 = vmatpush.bf16.msra.mxu0 %v11909_v22 }
 0x5f6   :  { %v17337_v11 = vld [vmem:[#allocation5 + $0x874] sm:$0xf0] }
 0x5f7   :  { %v12676_v14 = vld [vmem:[#allocation5 + $0xa58] sm:$0xf]  ;;  %v12421_v38 = vor.u32 %v17337_v11, %v12420_v12  ;;  %8189 = vmatpush.bf16.msra.mxu1 %v12165_v17 }
 0x5f8   :  { %v17401_v16 = vld [vmem:[#allocation5 + $0xa74] sm:$0xf0] }
 0x5f9   :  { %v11876_v35 = vld [vmem:[#allocation5 + $0x418] sm:$0xf]  ;;  %v12677_v37 = vor.u32 %v17401_v16, %v12676_v14  ;;  %8202 = vmatpush.bf16.msra.mxu2 %v12421_v38 }
 0x5fa   :  { %v17201_v33 = vld [vmem:[#allocation5 + $0x434] sm:$0xf0] }
 0x5fb   :  { %v12132_v41 = vld [vmem:[#allocation5 + $0x618] sm:$0xf]  ;;  %v11877_v53 = vor.u32 %v17201_v33, %v11876_v35  ;;  %8215 = vmatpush.bf16.msra.mxu3 %v12677_v37 }
 0x5fc   :  { %v17265_v44 = vld [vmem:[#allocation5 + $0x634] sm:$0xf0] }
 0x5fd   :  { %v12388_v18 = vld [vmem:[#allocation5 + $0x818] sm:$0xf]  ;;  %v12133_v60 = vor.u32 %v17265_v44, %v12132_v41  ;;  %8177 = vmatpush.bf16.msra.mxu0 %v11877_v53 }
 0x5fe   :  { %v17329_v46 = vld [vmem:[#allocation5 + $0x834] sm:$0xf0] }
 0x5ff   :  { %v12644_v47 = vld [vmem:[#allocation5 + $0xa18] sm:$0xf]  ;;  %v12389_v27 = vor.u32 %v17329_v46, %v12388_v18  ;;  %8190 = vmatpush.bf16.msra.mxu1 %v12133_v60 }
 0x600   :  { %v17393_v48 = vld [vmem:[#allocation5 + $0xa34] sm:$0xf0]  ;;  %8178 = vmatmul.bf16.vlgmr.msra.gmra.mxu0 %v18930_v19 }
 0x601   :  { %v13124_v50 = vld [vmem:[#allocation5 + $0xdd8] sm:$0xf]  ;;  %v12645_v58 = vor.u32 %v17393_v48, %v12644_v47  ;;  %8203 = vmatpush.bf16.msra.mxu2 %v12389_v27  ;;  %v7971_v27 = vpop.f32.mrf.mxu0 }
 0x602   :  { %v17513_v51 = vld [vmem:[#allocation5 + $0xdf4] sm:$0xf0]  ;;  %8191 = vmatmul.bf16.vlgmr.msra.gmra.mxu1 %v18934_v21 }
 0x603   :  { %v13380_v52 = vld [vmem:[#allocation5 + $0xfd8] sm:$0xf]  ;;  %v13125_v61 = vor.u32 %v17513_v51, %v13124_v50  ;;  %8216 = vmatpush.bf16.msra.mxu3 %v12645_v58 }
 0x604   :  { %v17577_v55 = vld [vmem:[#allocation5 + $0xff4] sm:$0xf0]  ;;  %8204 = vmatmul.bf16.vlgmr.msra.gmra.mxu2 %v18944_v42 }
 0x605   :  { %v13636_v56 = vld [vmem:[#allocation5 + $0x11d8] sm:$0xf]  ;;  %v13381_v0 = vor.u32 %v17577_v55, %v13380_v52  ;;  %8222 = vmatpush.bf16.msrb.mxu0 %v13125_v61 }
 0x606   :  { %v17641_v59 = vld [vmem:[#allocation5 + $0x11f4] sm:$0xf0]  ;;  %8217 = vmatmul.bf16.vlgmr.msra.gmra.mxu3 %v18948_v45 }
 0x607   :  { %v13892_v62 = vld [vmem:[#allocation5 + $0x13d8] sm:$0xf]  ;;  %v13637_v1 = vor.u32 %v17641_v59, %v13636_v56  ;;  %8235 = vmatpush.bf16.msrb.mxu1 %v13381_v0 }
 0x608   :  { %v17705_v54 = vld [vmem:[#allocation5 + $0x13f4] sm:$0xf0] }
 0x609   :  { %v13092_v3 = vld [vmem:[#allocation5 + $0xd98] sm:$0xf]  ;;  %v13893_v6 = vor.u32 %v17705_v54, %v13892_v62  ;;  %8248 = vmatpush.bf16.msrb.mxu2 %v13637_v1  ;;  %v7972_v1 = vadd.f32 %v7971_v27, %v19138_v57 }
 0x60a   :  { %v17505_v4 = vld [vmem:[#allocation5 + $0xdb4] sm:$0xf0] }
 0x60b   :  { %v13348_v63 = vld [vmem:[#allocation5 + $0xf98] sm:$0xf]  ;;  %v13093_v11 = vor.u32 %v17505_v4, %v13092_v3  ;;  %8261 = vmatpush.bf16.msrb.mxu3 %v13893_v6  ;;  %v7984_v3 = vpop.f32.mrf.mxu1 }
 0x60c   :  { %v17569_v7 = vld [vmem:[#allocation5 + $0xfb4] sm:$0xf0] }
 0x60d   :  { %v13604_v2 = vld [vmem:[#allocation5 + $0x1198] sm:$0xf]  ;;  %v13349_v14 = vor.u32 %v17569_v7, %v13348_v63  ;;  %8223 = vmatpush.bf16.msrb.mxu0 %v13093_v11 }
 0x60e   :  { %v17633_v8 = vld [vmem:[#allocation5 + $0x11b4] sm:$0xf0] }
 0x60f   :  { %v13860_v9 = vld [vmem:[#allocation5 + $0x1398] sm:$0xf]  ;;  %v13605_v16 = vor.u32 %v17633_v8, %v13604_v2  ;;  %8236 = vmatpush.bf16.msrb.mxu1 %v13349_v14 }
 0x610   :  { %v17697_v12 = vld [vmem:[#allocation5 + $0x13b4] sm:$0xf0] }
 0x611   :  { %v13060_v22 = vld [vmem:[#allocation5 + $0xd58] sm:$0xf]  ;;  %v13861_v17 = vor.u32 %v17697_v12, %v13860_v9  ;;  %8249 = vmatpush.bf16.msrb.mxu2 %v13605_v16  ;;  %v7985_v9 = vadd.f32 %v7984_v3, %v7972_v1 }
 0x612   :  { %v17497_v35 = vld [vmem:[#allocation5 + $0xd74] sm:$0xf0] }
 0x613   :  { %v13316_v33 = vld [vmem:[#allocation5 + $0xf58] sm:$0xf]  ;;  %v13061_v46 = vor.u32 %v17497_v35, %v13060_v22  ;;  %8262 = vmatpush.bf16.msrb.mxu3 %v13861_v17 }
 0x614   :  { %v17561_v38 = vld [vmem:[#allocation5 + $0xf74] sm:$0xf0] }
 0x615   :  { %v13572_v41 = vld [vmem:[#allocation5 + $0x1158] sm:$0xf]  ;;  %v13317_v47 = vor.u32 %v17561_v38, %v13316_v33  ;;  %8224 = vmatpush.bf16.msrb.mxu0 %v13061_v46  ;;  %v7997_v33 = vpop.f32.mrf.mxu2 }
 0x616   :  { %v17625_v44 = vld [vmem:[#allocation5 + $0x1174] sm:$0xf0] }
 0x617   :  { %v13828_v18 = vld [vmem:[#allocation5 + $0x1358] sm:$0xf]  ;;  %v13573_v48 = vor.u32 %v17625_v44, %v13572_v41  ;;  %8237 = vmatpush.bf16.msrb.mxu1 %v13317_v47  ;;  %v7998_v44 = vadd.f32 %v7997_v33, %v7985_v9 }
 0x618   :  { %v17689_v37 = vld [vmem:[#allocation5 + $0x1374] sm:$0xf0] }
 0x619   :  { %v13028_v40 = vld [vmem:[#allocation5 + $0xd18] sm:$0xf]  ;;  %v13829_v51 = vor.u32 %v17689_v37, %v13828_v18  ;;  %8250 = vmatpush.bf16.msrb.mxu2 %v13573_v48  ;;  %v8010_v18 = vpop.f32.mrf.mxu3 }
 0x61a   :  { %v17489_v49 = vld [vmem:[#allocation5 + $0xd34] sm:$0xf0]  ;;  %v19145_v48 = vadd.f32 %v8010_v18, %v7998_v44 }
 0x61b   :  { %v13284_v50 = vld [vmem:[#allocation5 + $0xf18] sm:$0xf]  ;;  %v13029_v60 = vor.u32 %v17489_v49, %v13028_v40  ;;  %8263 = vmatpush.bf16.msrb.mxu3 %v13829_v51  ;;  %v7973_v40 = vpop.f32.mrf.mxu0 }
 0x61c   :  { %v17553_v52 = vld [vmem:[#allocation5 + $0xf34] sm:$0xf0] }
 0x61d   :  { %v13540_v53 = vld [vmem:[#allocation5 + $0x1118] sm:$0xf]  ;;  %v13285_v62 = vor.u32 %v17553_v52, %v13284_v50  ;;  %8225 = vmatpush.bf16.msrb.mxu0 %v13029_v60 }
 0x61e   :  { %v17617_v55 = vld [vmem:[#allocation5 + $0x1134] sm:$0xf0] }
 0x61f   :  { %v13796_v56 = vld [vmem:[#allocation5 + $0x1318] sm:$0xf]  ;;  %v13541_v54 = vor.u32 %v17617_v55, %v13540_v53  ;;  %8238 = vmatpush.bf16.msrb.mxu1 %v13285_v62  ;;  %v7986_v55 = vpop.f32.mrf.mxu1 }
 0x620   :  { %v17681_v59 = vld [vmem:[#allocation5 + $0x1334] sm:$0xf0] }
 0x621   :  { %v12996_v58 = vld [vmem:[#allocation5 + $0xcd8] sm:$0xf]  ;;  %v13797_v4 = vor.u32 %v17681_v59, %v13796_v56  ;;  %8251 = vmatpush.bf16.msrb.mxu2 %v13541_v54 }
 0x622   :  { %v17481_v61 = vld [vmem:[#allocation5 + $0xcf4] sm:$0xf0] }
 0x623   :  { %v13252_v0 = vld [vmem:[#allocation5 + $0xed8] sm:$0xf]  ;;  %v12997_v12 = vor.u32 %v17481_v61, %v12996_v58  ;;  %8264 = vmatpush.bf16.msrb.mxu3 %v13797_v4 }
 0x624   :  { %v17545_v63 = vld [vmem:[#allocation5 + $0xef4] sm:$0xf0] }
 0x625   :  { %v13508_v6 = vld [vmem:[#allocation5 + $0x10d8] sm:$0xf]  ;;  %v13253_v11 = vor.u32 %v17545_v63, %v13252_v0  ;;  %8226 = vmatpush.bf16.msrb.mxu0 %v12997_v12 }
 0x626   :  { %v17609_v7 = vld [vmem:[#allocation5 + $0x10f4] sm:$0xf0] }
 0x627   :  { %v13764_v2 = vld [vmem:[#allocation5 + $0x12d8] sm:$0xf]  ;;  %v13509_v14 = vor.u32 %v17609_v7, %v13508_v6  ;;  %8239 = vmatpush.bf16.msrb.mxu1 %v13253_v11  ;;  %v7999_v7 = vpop.f32.mrf.mxu2  ;;  %v8012_v11 = vpop.f32.mrf.mxu3 }
 0x628   :  { %v17673_v8 = vld [vmem:[#allocation5 + $0x12f4] sm:$0xf0] }
 0x629   :  { %v12964_v16 = vld [vmem:[#allocation5 + $0xc98] sm:$0xf]  ;;  %v13765_v57 = vor.u32 %v17673_v8, %v13764_v2  ;;  %8252 = vmatpush.bf16.msrb.mxu2 %v13509_v14 }
 0x62a   :  { %v17473_v22 = vld [vmem:[#allocation5 + $0xcb4] sm:$0xf0] }
 0x62b   :  { %v13220_v35 = vld [vmem:[#allocation5 + $0xe98] sm:$0xf]  ;;  %v12965_v47 = vor.u32 %v17473_v22, %v12964_v16  ;;  %8265 = vmatpush.bf16.msrb.mxu3 %v13765_v57 }
 0x62c   :  { %v17537_v17 = vld [vmem:[#allocation5 + $0xeb4] sm:$0xf0] }
 0x62d   :  { %v13476_v38 = vld [vmem:[#allocation5 + $0x1098] sm:$0xf]  ;;  %v13221_v49 = vor.u32 %v17537_v17, %v13220_v35  ;;  %8227 = vmatpush.bf16.msrb.mxu0 %v12965_v47 }
 0x62e   :  { %v17601_v41 = vld [vmem:[#allocation5 + $0x10b4] sm:$0xf0] }
 0x62f   :  { %v13732_v37 = vld [vmem:[#allocation5 + $0x1298] sm:$0xf]  ;;  %v13477_v50 = vor.u32 %v17601_v41, %v13476_v38  ;;  %8240 = vmatpush.bf16.msrb.mxu1 %v13221_v49 }
 0x630   :  { %v17665_v46 = vld [vmem:[#allocation5 + $0x12b4] sm:$0xf0] }
 0x631   :  { %v12932_v51 = vld [vmem:[#allocation5 + $0xc58] sm:$0xf]  ;;  %v13733_v56 = vor.u32 %v17665_v46, %v13732_v37  ;;  %8253 = vmatpush.bf16.msrb.mxu2 %v13477_v50 }
 0x632   :  { %v17465_v52 = vld [vmem:[#allocation5 + $0xc74] sm:$0xf0] }
 0x633   :  { %v13188_v53 = vld [vmem:[#allocation5 + $0xe58] sm:$0xf]  ;;  %v12933_v58 = vor.u32 %v17465_v52, %v12932_v51  ;;  %8266 = vmatpush.bf16.msrb.mxu3 %v13733_v56 }
 0x634   :  { %v17529_v59 = vld [vmem:[#allocation5 + $0xe74] sm:$0xf0] }
 0x635   :  { %v13444_v60 = vld [vmem:[#allocation5 + $0x1058] sm:$0xf]  ;;  %v13189_v1 = vor.u32 %v17529_v59, %v13188_v53  ;;  %8228 = vmatpush.bf16.msrb.mxu0 %v12933_v58 }
 0x636   :  { %v17593_v27 = vld [vmem:[#allocation5 + $0x1074] sm:$0xf0] }
 0x637   :  { %v13700_v62 = vld [vmem:[#allocation5 + $0x1258] sm:$0xf]  ;;  %v13445_v3 = vor.u32 %v17593_v27, %v13444_v60  ;;  %8241 = vmatpush.bf16.msrb.mxu1 %v13189_v1 }
 0x638   :  { %v17657_v54 = vld [vmem:[#allocation5 + $0x1274] sm:$0xf0] }
 0x639   :  { %v12900_v61 = vld [vmem:[#allocation5 + $0xc18] sm:$0xf]  ;;  %v13701_v2 = vor.u32 %v17657_v54, %v13700_v62  ;;  %8254 = vmatpush.bf16.msrb.mxu2 %v13445_v3 }
 0x63a   :  { %v17457_v0 = vld [vmem:[#allocation5 + $0xc34] sm:$0xf0] }
 0x63b   :  { %v13156_v4 = vld [vmem:[#allocation5 + $0xe18] sm:$0xf]  ;;  %v12901_v35 = vor.u32 %v17457_v0, %v12900_v61  ;;  %8267 = vmatpush.bf16.msrb.mxu3 %v13701_v2 }
 0x63c   :  { %v17521_v63 = vld [vmem:[#allocation5 + $0xe34] sm:$0xf0] }
 0x63d   :  { %v13412_v6 = vld [vmem:[#allocation5 + $0x1018] sm:$0xf]  ;;  %v13157_v38 = vor.u32 %v17521_v63, %v13156_v4  ;;  %8229 = vmatpush.bf16.msrb.mxu0 %v12901_v35 }
 0x63e   :  { %v17585_v8 = vld [vmem:[#allocation5 + $0x1034] sm:$0xf0] }
 0x63f   :  { %v13668_v9 = vld [vmem:[#allocation5 + $0x1218] sm:$0xf]  ;;  %v13413_v41 = vor.u32 %v17585_v8, %v13412_v6  ;;  %8242 = vmatpush.bf16.msrb.mxu1 %v13157_v38 }
 0x640   :  { %v17649_v12 = vld [vmem:[#allocation5 + $0x1234] sm:$0xf0]  ;;  %8230 = vmatmul.bf16.vlgmr.msrb.gmra.mxu0 %v18942_v39 }
 0x641   :  { %v14148_v14 = vld [vmem:[#allocation5 + $0x15d8] sm:$0xf]  ;;  %v13669_v37 = vor.u32 %v17649_v12, %v13668_v9  ;;  %8255 = vmatpush.bf16.msrb.mxu2 %v13413_v41 }
 0x642   :  { %v17769_v16 = vld [vmem:[#allocation5 + $0x15f4] sm:$0xf0]  ;;  %8243 = vmatmul.bf16.vlgmr.msrb.gmra.mxu1 %v18946_v43 }
 0x643   :  { %v14404_v22 = vld [vmem:[#allocation5 + $0x17d8] sm:$0xf]  ;;  %v14149_v46 = vor.u32 %v17769_v16, %v14148_v14  ;;  %8268 = vmatpush.bf16.msrb.mxu3 %v13669_v37 }
 0x644   :  { %v17833_v33 = vld [vmem:[#allocation5 + $0x17f4] sm:$0xf0]  ;;  %8256 = vmatmul.bf16.vlgmr.msrb.gmra.mxu2 %v18954_v26 }
 0x645   :  { %v14660_v57 = vld [vmem:[#allocation5 + $0x19d8] sm:$0xf]  ;;  %v14405_v47 = vor.u32 %v17833_v33, %v14404_v22  ;;  %8274 = vmatpush.bf16.msra.mxu0 %v14149_v46 }
 0x646   :  { %v17897_v17 = vld [vmem:[#allocation5 + $0x19f4] sm:$0xf0]  ;;  %8269 = vmatmul.bf16.vlgmr.msrb.gmra.mxu3 %v18958_v31 }
 0x647   :  { %v14916_v44 = vld [vmem:[#allocation5 + $0x1bd8] sm:$0xf]  ;;  %v14661_v40 = vor.u32 %v17897_v17, %v14660_v57  ;;  %8287 = vmatpush.bf16.msra.mxu1 %v14405_v47  ;;  %v8023_v57 = vpop.f32.mrf.mxu0 }
 0x648   :  { %v17961_v18 = vld [vmem:[#allocation5 + $0x1bf4] sm:$0xf0]  ;;  %v8024_v41 = vadd.f32 %v8023_v57, %v19145_v48 }
 0x649   :  { %v14116_v49 = vld [vmem:[#allocation5 + $0x1598] sm:$0xf]  ;;  %v14917_v52 = vor.u32 %v17961_v18, %v14916_v44  ;;  %8300 = vmatpush.bf16.msra.mxu2 %v14661_v40  ;;  %v8036_v18 = vpop.f32.mrf.mxu1 }
 0x64a   :  { %v17761_v50 = vld [vmem:[#allocation5 + $0x15b4] sm:$0xf0] }
 0x64b   :  { %v14372_v51 = vld [vmem:[#allocation5 + $0x1798] sm:$0xf]  ;;  %v14117_v27 = vor.u32 %v17761_v50, %v14116_v49  ;;  %8313 = vmatpush.bf16.msra.mxu3 %v14917_v52 }
 0x64c   :  { %v17825_v53 = vld [vmem:[#allocation5 + $0x17b4] sm:$0xf0] }
 0x64d   :  { %v14628_v55 = vld [vmem:[#allocation5 + $0x1998] sm:$0xf]  ;;  %v14373_v62 = vor.u32 %v17825_v53, %v14372_v51  ;;  %8275 = vmatpush.bf16.msra.mxu0 %v14117_v27  ;;  %v8037_v51 = vadd.f32 %v8036_v18, %v8024_v41 }
 0x64e   :  { %v17889_v56 = vld [vmem:[#allocation5 + $0x19b4] sm:$0xf0] }
 0x64f   :  { %v14884_v59 = vld [vmem:[#allocation5 + $0x1b98] sm:$0xf]  ;;  %v14629_v54 = vor.u32 %v17889_v56, %v14628_v55  ;;  %8288 = vmatpush.bf16.msra.mxu1 %v14373_v62 }
 0x650   :  { %v17953_v60 = vld [vmem:[#allocation5 + $0x1bb4] sm:$0xf0] }
 0x651   :  { %v14084_v58 = vld [vmem:[#allocation5 + $0x1558] sm:$0xf]  ;;  %v14885_v1 = vor.u32 %v17953_v60, %v14884_v59  ;;  %8301 = vmatpush.bf16.msra.mxu2 %v14629_v54 }
 0x652   :  { %v17753_v61 = vld [vmem:[#allocation5 + $0x1574] sm:$0xf0] }
 0x653   :  { %v14340_v0 = vld [vmem:[#allocation5 + $0x1758] sm:$0xf]  ;;  %v14085_v2 = vor.u32 %v17753_v61, %v14084_v58  ;;  %8314 = vmatpush.bf16.msra.mxu3 %v14885_v1 }
 0x654   :  { %v17817_v3 = vld [vmem:[#allocation5 + $0x1774] sm:$0xf0] }
 0x655   :  { %v14596_v4 = vld [vmem:[#allocation5 + $0x1958] sm:$0xf]  ;;  %v14341_v8 = vor.u32 %v17817_v3, %v14340_v0  ;;  %8276 = vmatpush.bf16.msra.mxu0 %v14085_v2  ;;  %v8049_v0 = vpop.f32.mrf.mxu2 }
 0x656   :  { %v17881_v63 = vld [vmem:[#allocation5 + $0x1974] sm:$0xf0] }
 0x657   :  { %v14852_v6 = vld [vmem:[#allocation5 + $0x1b58] sm:$0xf]  ;;  %v14597_v9 = vor.u32 %v17881_v63, %v14596_v4  ;;  %8289 = vmatpush.bf16.msra.mxu1 %v14341_v8  ;;  %v8050_v63 = vadd.f32 %v8049_v0, %v8037_v51  ;;  %v8025_v8 = vpop.f32.mrf.mxu0 }
 0x658   :  { %v17945_v7 = vld [vmem:[#allocation5 + $0x1b74] sm:$0xf0] }
 0x659   :  { %v14052_v12 = vld [vmem:[#allocation5 + $0x1518] sm:$0xf]  ;;  %v14853_v16 = vor.u32 %v17945_v7, %v14852_v6  ;;  %8302 = vmatpush.bf16.msra.mxu2 %v14597_v9  ;;  %v8062_v6 = vpop.f32.mrf.mxu3 }
 0x65a   :  { %v17745_v11 = vld [vmem:[#allocation5 + $0x1534] sm:$0xf0] }
 0x65b   :  { %v14308_v14 = vld [vmem:[#allocation5 + $0x1718] sm:$0xf]  ;;  %v14053_v44 = vor.u32 %v17745_v11, %v14052_v12  ;;  %8315 = vmatpush.bf16.msra.mxu3 %v14853_v16  ;;  %v8038_v12 = vpop.f32.mrf.mxu1  ;;  %v19152_v11 = vadd.f32 %v8062_v6, %v8050_v63  ;;  %v17125_v63 = vld [vmem:[#allocation5 + $0x1dc] sm:$0xf] }
 0x65c   :  { %v17809_v22 = vld [vmem:[#allocation5 + $0x1734] sm:$0xf0]  ;;  %v11590_v6 = vld [vmem:[#allocation5 + $0x1f8] sm:$0xf0] }
 0x65d   :  { %v14564_v35 = vld [vmem:[#allocation5 + $0x1918] sm:$0xf]  ;;  %v14309_v37 = vor.u32 %v17809_v22, %v14308_v14  ;;  %8277 = vmatpush.bf16.msra.mxu0 %v14053_v44 }
 0x65e   :  { %v17873_v33 = vld [vmem:[#allocation5 + $0x1934] sm:$0xf0] }
 0x65f   :  { %v14820_v17 = vld [vmem:[#allocation5 + $0x1b18] sm:$0xf]  ;;  %v14565_v46 = vor.u32 %v17873_v33, %v14564_v35  ;;  %8290 = vmatpush.bf16.msra.mxu1 %v14309_v37 }
 0x660   :  { %v17937_v38 = vld [vmem:[#allocation5 + $0x1b34] sm:$0xf0] }
 0x661   :  { %v14020_v47 = vld [vmem:[#allocation5 + $0x14d8] sm:$0xf]  ;;  %v14821_v50 = vor.u32 %v17937_v38, %v14820_v17  ;;  %8303 = vmatpush.bf16.msra.mxu2 %v14565_v46 }
 0x662   :  { %v17737_v40 = vld [vmem:[#allocation5 + $0x14f4] sm:$0xf0] }
 0x663   :  { %v14276_v49 = vld [vmem:[#allocation5 + $0x16d8] sm:$0xf]  ;;  %v14021_v60 = vor.u32 %v17737_v40, %v14020_v47  ;;  %8316 = vmatpush.bf16.msra.mxu3 %v14821_v50 }
 0x664   :  { %v17801_v52 = vld [vmem:[#allocation5 + $0x16f4] sm:$0xf0] }
 0x665   :  { %v14532_v53 = vld [vmem:[#allocation5 + $0x18d8] sm:$0xf]  ;;  %v14277_v48 = vor.u32 %v17801_v52, %v14276_v49  ;;  %8278 = vmatpush.bf16.msra.mxu0 %v14021_v60  ;;  %v8051_v60 = vpop.f32.mrf.mxu2 }
 0x666   :  { %v17865_v55 = vld [vmem:[#allocation5 + $0x18f4] sm:$0xf0] }
 0x667   :  { %v14788_v56 = vld [vmem:[#allocation5 + $0x1ad8] sm:$0xf]  ;;  %v14533_v27 = vor.u32 %v17865_v55, %v14532_v53  ;;  %8291 = vmatpush.bf16.msra.mxu1 %v14277_v48 }
 0x668   :  { %v17929_v59 = vld [vmem:[#allocation5 + $0x1af4] sm:$0xf0] }
 0x669   :  { %v13988_v62 = vld [vmem:[#allocation5 + $0x1498] sm:$0xf]  ;;  %v14789_v61 = vor.u32 %v17929_v59, %v14788_v56  ;;  %8304 = vmatpush.bf16.msra.mxu2 %v14533_v27 }
 0x66a   :  { %v17729_v54 = vld [vmem:[#allocation5 + $0x14b4] sm:$0xf0] }
 0x66b   :  { %v14244_v58 = vld [vmem:[#allocation5 + $0x1698] sm:$0xf]  ;;  %v13989_v9 = vor.u32 %v17729_v54, %v13988_v62  ;;  %8317 = vmatpush.bf16.msra.mxu3 %v14789_v61  ;;  %v8064_v54 = vpop.f32.mrf.mxu3 }
 0x66c   :  { %v17793_v1 = vld [vmem:[#allocation5 + $0x16b4] sm:$0xf0] }
 0x66d   :  { %v14500_v3 = vld [vmem:[#allocation5 + $0x1898] sm:$0xf]  ;;  %v14245_v14 = vor.u32 %v17793_v1, %v14244_v58  ;;  %8279 = vmatpush.bf16.msra.mxu0 %v13989_v9 }
 0x66e   :  { %v17857_v4 = vld [vmem:[#allocation5 + $0x18b4] sm:$0xf0] }
 0x66f   :  { %v14756_v7 = vld [vmem:[#allocation5 + $0x1a98] sm:$0xf]  ;;  %v14501_v16 = vor.u32 %v17857_v4, %v14500_v3  ;;  %8292 = vmatpush.bf16.msra.mxu1 %v14245_v14 }
 0x670   :  { %v17921_v2 = vld [vmem:[#allocation5 + $0x1ab4] sm:$0xf0] }
 0x671   :  { %v13956_v22 = vld [vmem:[#allocation5 + $0x1458] sm:$0xf]  ;;  %v14757_v57 = vor.u32 %v17921_v2, %v14756_v7  ;;  %8305 = vmatpush.bf16.msra.mxu2 %v14501_v16 }
 0x672   :  { %v17721_v35 = vld [vmem:[#allocation5 + $0x1474] sm:$0xf0] }
 0x673   :  { %v14212_v33 = vld [vmem:[#allocation5 + $0x1658] sm:$0xf]  ;;  %v13957_v37 = vor.u32 %v17721_v35, %v13956_v22  ;;  %8318 = vmatpush.bf16.msra.mxu3 %v14757_v57  ;;  %v11593_v22 = vor.u32 %v17125_v63, %v11590_v6  ;;  %v8088_v6 = vpop.f32.mrf.mxu1 }
 0x674   :  { %v17785_v17 = vld [vmem:[#allocation5 + $0x1674] sm:$0xf0] }
 0x675   :  { %v14468_v38 = vld [vmem:[#allocation5 + $0x1858] sm:$0xf]  ;;  %v14213_v40 = vor.u32 %v17785_v17, %v14212_v33  ;;  %8280 = vmatpush.bf16.msra.mxu0 %v13957_v37  ;;  %v17117_v17 = vld [vmem:[#allocation5 + $0x19c] sm:$0xf] }
 0x676   :  { %v17849_v41 = vld [vmem:[#allocation5 + $0x1874] sm:$0xf0] }
 0x677   :  { %v14724_v44 = vld [vmem:[#allocation5 + $0x1a58] sm:$0xf]  ;;  %v14469_v49 = vor.u32 %v17849_v41, %v14468_v38  ;;  %8293 = vmatpush.bf16.msra.mxu1 %v14213_v40  ;;  %v11558_v38 = vld [vmem:[#allocation5 + $0x1b8] sm:$0xf0] }
 0x678   :  { %v17913_v18 = vld [vmem:[#allocation5 + $0x1a74] sm:$0xf0]  ;;  %v11561_v40 = vor.u32 %v17117_v17, %v11558_v38  ;;  %v11462_v17 = vld [vmem:[#allocation5 + $0xf8] sm:$0xf0] }
 0x679   :  { %v13924_v46 = vld [vmem:[#allocation5 + $0x1418] sm:$0xf]  ;;  %v14725_v53 = vor.u32 %v17913_v18, %v14724_v44  ;;  %8306 = vmatpush.bf16.msra.mxu2 %v14469_v49 }
 0x67a   :  { %v17713_v47 = vld [vmem:[#allocation5 + $0x1434] sm:$0xf0] }
 0x67b   :  { %v14180_v50 = vld [vmem:[#allocation5 + $0x1618] sm:$0xf]  ;;  %v13925_v58 = vor.u32 %v17713_v47, %v13924_v46  ;;  %8319 = vmatpush.bf16.msra.mxu3 %v14725_v53  ;;  %v11526_v53 = vld [vmem:[#allocation5 + $0x178] sm:$0xf0] }
 0x67c   :  { %v17777_v51 = vld [vmem:[#allocation5 + $0x1634] sm:$0xf0] }
 0x67d   :  { %v14436_v52 = vld [vmem:[#allocation5 + $0x1818] sm:$0xf]  ;;  %v14181_v3 = vor.u32 %v17777_v51, %v14180_v50  ;;  %8281 = vmatpush.bf16.msra.mxu0 %v13925_v58 }
 0x67e   :  { %v17841_v55 = vld [vmem:[#allocation5 + $0x1834] sm:$0xf0] }
 0x67f   :  { %v14692_v56 = vld [vmem:[#allocation5 + $0x1a18] sm:$0xf]  ;;  %v14437_v4 = vor.u32 %v17841_v55, %v14436_v52  ;;  %8294 = vmatpush.bf16.msra.mxu1 %v14181_v3  ;;  %v17109_v52 = vld [vmem:[#allocation5 + $0x15c] sm:$0xf] }
 0x680   :  { %v17905_v59 = vld [vmem:[#allocation5 + $0x1a34] sm:$0xf0]  ;;  %8282 = vmatmul.bf16.vlgmr.msra.gmra.mxu0 %v18956_v30  ;;  %v11494_v3 = vld [vmem:[#allocation5 + $0x138] sm:$0xf0] }
 0x681   :  { %v15172_v48 = vld [vmem:[#allocation5 + $0x1dd8] sm:$0xf]  ;;  %v14693_v7 = vor.u32 %v17905_v59, %v14692_v56  ;;  %8307 = vmatpush.bf16.msra.mxu2 %v14437_v4 }
 0x682   :  { %v18025_v27 = vld [vmem:[#allocation5 + $0x1df4] sm:$0xf0]  ;;  %8295 = vmatmul.bf16.vlgmr.msra.gmra.mxu1 %v18960_v34 }
 0x683   :  { %v15428_v62 = vld [vmem:[#allocation5 + $0x1fd8] sm:$0xf]  ;;  %v15173_v2 = vor.u32 %v18025_v27, %v15172_v48  ;;  %8320 = vmatpush.bf16.msra.mxu3 %v14693_v7 }
 0x684   :  { %v18089_v61 = vld [vmem:[#allocation5 + $0x1ff4] sm:$0xf0]  ;;  %8308 = vmatmul.bf16.vlgmr.msra.gmra.mxu2 %v18966_v24 }
 0x685   :  { %v15684_v0 = vld [vmem:[#allocation5 + $0x21d8] sm:$0xf]  ;;  %v15429_v8 = vor.u32 %v18089_v61, %v15428_v62  ;;  %8326 = vmatpush.bf16.msrb.mxu0 %v15173_v2  ;;  %v11529_v62 = vor.u32 %v17109_v52, %v11526_v53  ;;  %v8114_v52 = vpop.f32.mrf.mxu3  ;;  %v17085_v53 = vld [vmem:[#allocation5 + $0x9c] sm:$0xf] }
 0x686   :  { %v18153_v1 = vld [vmem:[#allocation5 + $0x21f4] sm:$0xf0]  ;;  %8321 = vmatmul.bf16.vlgmr.msra.gmra.mxu3 %v18970_v32 }
 0x687   :  { %v15685_v9 = vor.u32 %v18153_v1, %v15684_v0  ;;  %v15140_v12 = vld [vmem:[#allocation5 + $0x1d98] sm:$0xf]  ;;  %8339 = vmatpush.bf16.msrb.mxu1 %v15429_v8  ;;  %8365 = vmatpush.bf16.msrb.mxu3 %v11593_v22  ;;  %v8075_v0 = vpop.f32.mrf.mxu0  ;;  %v17101_v1 = vld [vmem:[#allocation5 + $0x11c] sm:$0xf] }
 0x688   :  { %v18017_v14 = vld [vmem:[#allocation5 + $0x1db4] sm:$0xf0]  ;;  %v8076_v4 = vadd.f32 %v8075_v0, %v19152_v11 }
 0x689   :  { %v15396_v16 = vld [vmem:[#allocation5 + $0x1f98] sm:$0xf]  ;;  %v15141_v41 = vor.u32 %v18017_v14, %v15140_v12  ;;  %8352 = vmatpush.bf16.msrb.mxu2 %v15685_v9  ;;  %v11497_v14 = vor.u32 %v17101_v1, %v11494_v3 }
 0x68a   :  { %v18081_v35 = vld [vmem:[#allocation5 + $0x1fb4] sm:$0xf0] }
 0x68b   :  { %v15652_v33 = vld [vmem:[#allocation5 + $0x2198] sm:$0xf]  ;;  %v15397_v44 = vor.u32 %v18081_v35, %v15396_v16  ;;  %8327 = vmatpush.bf16.msrb.mxu0 %v15141_v41  ;;  %8366 = vmatpush.bf16.msrb.mxu3 %v11561_v40  ;;  %v8089_v16 = vadd.f32 %v8088_v6, %v8076_v4  ;;  %v11398_v6 = vld [vmem:[#allocation5 + $0x78] sm:$0xf0] }
 0x68c   :  { %v18145_v57 = vld [vmem:[#allocation5 + $0x21b4] sm:$0xf0] }
 0x68d   :  { %v15653_v18 = vor.u32 %v18145_v57, %v15652_v33  ;;  %v15108_v37 = vld [vmem:[#allocation5 + $0x1d58] sm:$0xf]  ;;  %8340 = vmatpush.bf16.msrb.mxu1 %v15397_v44  ;;  %v17093_v57 = vld [vmem:[#allocation5 + $0xdc] sm:$0xf] }
 0x68e   :  { %v18009_v46 = vld [vmem:[#allocation5 + $0x1d74] sm:$0xf0] }
 0x68f   :  { %v15364_v47 = vld [vmem:[#allocation5 + $0x1f58] sm:$0xf]  ;;  %v15109_v55 = vor.u32 %v18009_v46, %v15108_v37  ;;  %8353 = vmatpush.bf16.msrb.mxu2 %v15653_v18  ;;  %8367 = vmatpush.bf16.msrb.mxu3 %v11529_v62  ;;  %v11465_v46 = vor.u32 %v17093_v57, %v11462_v17  ;;  %v17069_v57 = vld [vmem:[#allocation5 + $0x1c] sm:$0xf] }
 0x690   :  { %v18073_v49 = vld [vmem:[#allocation5 + $0x1f74] sm:$0xf0]  ;;  %v11366_v17 = vld [vmem:[#allocation5 + $0x38] sm:$0xf0] }
 0x691   :  { %v15620_v50 = vld [vmem:[#allocation5 + $0x2158] sm:$0xf]  ;;  %v15365_v56 = vor.u32 %v18073_v49, %v15364_v47  ;;  %8328 = vmatpush.bf16.msrb.mxu0 %v15109_v55  ;;  %v8101_v47 = vpop.f32.mrf.mxu2  ;;  %v11430_v55 = vld [vmem:[#allocation5 + $0xb8] sm:$0xf0] }
 0x692   :  { %v18137_v51 = vld [vmem:[#allocation5 + $0x2174] sm:$0xf0]  ;;  %v11433_v0 = vor.u32 %v17085_v53, %v11430_v55  ;;  %v11369_v53 = vor.u32 %v17069_v57, %v11366_v17 }
 0x693   :  { %v15621_v59 = vor.u32 %v18137_v51, %v15620_v50  ;;  %v15076_v60 = vld [vmem:[#allocation5 + $0x1d18] sm:$0xf]  ;;  %8341 = vmatpush.bf16.msrb.mxu1 %v15365_v56  ;;  %8368 = vmatpush.bf16.msrb.mxu3 %v11497_v14  ;;  %v8102_v51 = vadd.f32 %v8101_v47, %v8089_v16  ;;  %v8077_v56 = vpop.f32.mrf.mxu0  ;;  %v17317_v47 = vld [vmem:[#allocation5 + $0x7dc] sm:$0xf] }
 0x694   :  { %v18001_v48 = vld [vmem:[#allocation5 + $0x1d34] sm:$0xf0] }
 0x695   :  { %v15332_v27 = vld [vmem:[#allocation5 + $0x1f18] sm:$0xf]  ;;  %v15077_v63 = vor.u32 %v18001_v48, %v15076_v60  ;;  %8354 = vmatpush.bf16.msrb.mxu2 %v15621_v59  ;;  %v8090_v60 = vpop.f32.mrf.mxu1  ;;  %v19159_v48 = vadd.f32 %v8114_v52, %v8102_v51  ;;  %v17381_v51 = vld [vmem:[#allocation5 + $0x9dc] sm:$0xf] }
 0x696   :  { %v18065_v54 = vld [vmem:[#allocation5 + $0x1f34] sm:$0xf0]  ;;  %v12614_v52 = vld [vmem:[#allocation5 + $0x9f8] sm:$0xf0] }
 0x697   :  { %v15588_v58 = vld [vmem:[#allocation5 + $0x2118] sm:$0xf]  ;;  %v15333_v7 = vor.u32 %v18065_v54, %v15332_v27  ;;  %8329 = vmatpush.bf16.msrb.mxu0 %v15077_v63  ;;  %8369 = vmatpush.bf16.msrb.mxu3 %v11465_v46  ;;  %v17077_v63 = vld [vmem:[#allocation5 + $0x5c] sm:$0xf] }
 0x698   :  { %v18129_v61 = vld [vmem:[#allocation5 + $0x2134] sm:$0xf0]  ;;  %v12102_v46 = vld [vmem:[#allocation5 + $0x5f8] sm:$0xf0] }
 0x699   :  { %v15589_v2 = vor.u32 %v18129_v61, %v15588_v58  ;;  %v15044_v8 = vld [vmem:[#allocation5 + $0x1cd8] sm:$0xf]  ;;  %8342 = vmatpush.bf16.msrb.mxu1 %v15333_v7  ;;  %v17181_v60 = vld [vmem:[#allocation5 + $0x39c] sm:$0xf] }
 0x69a   :  { %v17993_v9 = vld [vmem:[#allocation5 + $0x1cf4] sm:$0xf0] }
 0x69b   :  { %v15300_v12 = vld [vmem:[#allocation5 + $0x1ed8] sm:$0xf]  ;;  %v15045_v38 = vor.u32 %v17993_v9, %v15044_v8  ;;  %8355 = vmatpush.bf16.msrb.mxu2 %v15589_v2  ;;  %8370 = vmatpush.bf16.msrb.mxu3 %v11433_v0  ;;  %v12326_v0 = vld [vmem:[#allocation5 + $0x7b8] sm:$0xf0] }
 0x69c   :  { %v18057_v22 = vld [vmem:[#allocation5 + $0x1ef4] sm:$0xf0] }
 0x69d   :  { %v15556_v35 = vld [vmem:[#allocation5 + $0x20d8] sm:$0xf]  ;;  %v15301_v11 = vor.u32 %v18057_v22, %v15300_v12  ;;  %8330 = vmatpush.bf16.msrb.mxu0 %v15045_v38  ;;  %v8103_v38 = vpop.f32.mrf.mxu2 }
 0x69e   :  { %v18121_v33 = vld [vmem:[#allocation5 + $0x20f4] sm:$0xf0]  ;;  %v17165_v38 = vld [vmem:[#allocation5 + $0x31c] sm:$0xf] }
 0x69f   :  { %v15557_v41 = vor.u32 %v18121_v33, %v15556_v35  ;;  %v15012_v44 = vld [vmem:[#allocation5 + $0x1c98] sm:$0xf]  ;;  %8343 = vmatpush.bf16.msrb.mxu1 %v15301_v11  ;;  %v11401_v35 = vor.u32 %v17077_v63, %v11398_v6  ;;  %v17189_v11 = vld [vmem:[#allocation5 + $0x3dc] sm:$0xf] }
 0x6a0   :  { %v17985_v18 = vld [vmem:[#allocation5 + $0x1cb4] sm:$0xf0] }
 0x6a1   :  { %v15268_v37 = vld [vmem:[#allocation5 + $0x1e98] sm:$0xf]  ;;  %v15013_v59 = vor.u32 %v17985_v18, %v15012_v44  ;;  %8356 = vmatpush.bf16.msrb.mxu2 %v15557_v41  ;;  %v11846_v41 = vld [vmem:[#allocation5 + $0x3f8] sm:$0xf0]  ;;  %v8116_v18 = vpop.f32.mrf.mxu3  ;;  %8371 = vmatpush.bf16.msrb.mxu3 %v11401_v35 }
 0x6a2   :  { %v18049_v40 = vld [vmem:[#allocation5 + $0x1eb4] sm:$0xf0]  ;;  %v17253_v44 = vld [vmem:[#allocation5 + $0x5dc] sm:$0xf]  ;;  %v11849_v55 = vor.u32 %v17189_v11, %v11846_v41 }
 0x6a3   :  { %v15524_v49 = vld [vmem:[#allocation5 + $0x2098] sm:$0xf]  ;;  %v15269_v27 = vor.u32 %v18049_v40, %v15268_v37  ;;  %8331 = vmatpush.bf16.msrb.mxu0 %v15013_v59  ;;  %v12358_v40 = vld [vmem:[#allocation5 + $0x7f8] sm:$0xf0]  ;;  %v12105_v56 = vor.u32 %v17253_v44, %v12102_v46 }
 0x6a4   :  { %v18113_v50 = vld [vmem:[#allocation5 + $0x20b4] sm:$0xf0]  ;;  %v12361_v59 = vor.u32 %v17317_v47, %v12358_v40  ;;  %v12550_v35 = vld [vmem:[#allocation5 + $0x978] sm:$0xf0]  ;;  %v8127_v47 = vpop.f32.mrf.mxu0 }
 0x6a5   :  { %v15525_v62 = vor.u32 %v18113_v50, %v15524_v49  ;;  %v14980_v54 = vld [vmem:[#allocation5 + $0x1c58] sm:$0xf]  ;;  %8344 = vmatpush.bf16.msrb.mxu1 %v15269_v27  ;;  %v11814_v27 = vld [vmem:[#allocation5 + $0x3b8] sm:$0xf0]  ;;  %8372 = vmatpush.bf16.msrb.mxu3 %v11369_v53 }
 0x6a6   :  { %v17977_v58 = vld [vmem:[#allocation5 + $0x1c74] sm:$0xf0]  ;;  %v11750_v11 = vld [vmem:[#allocation5 + $0x338] sm:$0xf0] }
 0x6a7   :  { %v15236_v61 = vld [vmem:[#allocation5 + $0x1e58] sm:$0xf]  ;;  %v14981_v7 = vor.u32 %v17977_v58, %v14980_v54  ;;  %8357 = vmatpush.bf16.msrb.mxu2 %v15525_v62  ;;  %v17245_v62 = vld [vmem:[#allocation5 + $0x59c] sm:$0xf]  ;;  %v12617_v54 = vor.u32 %v17381_v51, %v12614_v52  ;;  %v11753_v51 = vor.u32 %v17165_v38, %v11750_v11 }
 0x6a8   :  { %v18041_v1 = vld [vmem:[#allocation5 + $0x1e74] sm:$0xf0]  ;;  %v12070_v58 = vld [vmem:[#allocation5 + $0x5b8] sm:$0xf0]  ;;  %8373 = vmatmul.bf16.vlgmr.msrb.gmra.mxu3 %v18932_v20  ;;  %v8140_v20 = vpop.f32.mrf.mxu1 }
 0x6a9   :  { %v15492_v3 = vld [vmem:[#allocation5 + $0x2058] sm:$0xf]  ;;  %v15237_v9 = vor.u32 %v18041_v1, %v15236_v61  ;;  %8332 = vmatpush.bf16.msrb.mxu0 %v14981_v7  ;;  %v17309_v61 = vld [vmem:[#allocation5 + $0x79c] sm:$0xf]  ;;  %v12073_v63 = vor.u32 %v17245_v62, %v12070_v58  ;;  %8417 = vmatpush.bf16.msra.mxu3 %v12617_v54 }
 0x6aa   :  { %v18105_v4 = vld [vmem:[#allocation5 + $0x2074] sm:$0xf0]  ;;  %v17373_v1 = vld [vmem:[#allocation5 + $0x99c] sm:$0xf]  ;;  %v12329_v6 = vor.u32 %v17309_v61, %v12326_v0 }
 0x6ab   :  { %v14948_v2 = vld [vmem:[#allocation5 + $0x1c18] sm:$0xf]  ;;  %v15493_v12 = vor.u32 %v18105_v4, %v15492_v3  ;;  %8345 = vmatpush.bf16.msrb.mxu1 %v15237_v9  ;;  %v12582_v3 = vld [vmem:[#allocation5 + $0x9b8] sm:$0xf0]  ;;  %v11817_v4 = vor.u32 %v17181_v60, %v11814_v27 }
 0x6ac   :  { %v17969_v8 = vld [vmem:[#allocation5 + $0x1c34] sm:$0xf0]  ;;  %v17173_v7 = vld [vmem:[#allocation5 + $0x35c] sm:$0xf]  ;;  %v12585_v9 = vor.u32 %v17373_v1, %v12582_v3  ;;  %v18526_v1 = vld [vmem:[#allocation7] sm:$0xff] }
 0x6ad   :  { %v15204_v14 = vld [vmem:[#allocation5 + $0x1e18] sm:$0xf]  ;;  %v14949_v37 = vor.u32 %v17969_v8, %v14948_v2  ;;  %8358 = vmatpush.bf16.msrb.mxu2 %v15493_v12  ;;  %v11782_v2 = vld [vmem:[#allocation5 + $0x378] sm:$0xf0] }
 0x6ae   :  { %v18033_v16 = vld [vmem:[#allocation5 + $0x1e34] sm:$0xf0]  ;;  %v17237_v8 = vld [vmem:[#allocation5 + $0x55c] sm:$0xf]  ;;  %8418 = vmatpush.bf16.msra.mxu3 %v12585_v9 }
 0x6af   :  { %v15460_v22 = vld [vmem:[#allocation5 + $0x2018] sm:$0xf]  ;;  %v15205_v49 = vor.u32 %v18033_v16, %v15204_v14  ;;  %8333 = vmatpush.bf16.msrb.mxu0 %v14949_v37  ;;  %v12038_v12 = vld [vmem:[#allocation5 + $0x578] sm:$0xf0] }
 0x6b0   :  { %v18097_v33 = vld [vmem:[#allocation5 + $0x2034] sm:$0xf0]  ;;  %v17301_v14 = vld [vmem:[#allocation5 + $0x75c] sm:$0xf]  ;;  %v12041_v57 = vor.u32 %v17237_v8, %v12038_v12  ;;  %v8142_v11 = vpop.f32.mrf.mxu1 }
 0x6b1   :  { %v15461_v50 = vor.u32 %v18097_v33, %v15460_v22  ;;  %8346 = vmatpush.bf16.msrb.mxu1 %v15205_v49  ;;  %v12294_v16 = vld [vmem:[#allocation5 + $0x778] sm:$0xf0]  ;;  %v11785_v33 = vor.u32 %v17173_v7, %v11782_v2 }
 0x6b2   :  { %8334 = vmatmul.bf16.vlgmr.msrb.gmra.mxu0 %v18968_v29  ;;  %v17365_v22 = vld [vmem:[#allocation5 + $0x95c] sm:$0xf]  ;;  %v12297_v17 = vor.u32 %v17301_v14, %v12294_v16  ;;  %v8153_v16 = vpop.f32.mrf.mxu2 }
 0x6b3   :  { %8359 = vmatpush.bf16.msrb.mxu2 %v15461_v50  ;;  %8378 = vmatpush.bf16.msra.mxu0 %v11849_v55  ;;  %v17229_v41 = vld [vmem:[#allocation5 + $0x51c] sm:$0xf]  ;;  %v12553_v44 = vor.u32 %v17365_v22, %v12550_v35  ;;  %v8128_v50 = vadd.f32 %v8127_v47, %v19159_v48  ;;  %v1308_v48 = vperm.slane %v18526_v1, 6 }
 0x6b4   :  { %8347 = vmatmul.bf16.vlgmr.msrb.gmra.mxu1 %v18972_v36  ;;  %v12006_v18 = vld [vmem:[#allocation5 + $0x538] sm:$0xf0] }
 0x6b5   :  { %8391 = vmatpush.bf16.msra.mxu1 %v12105_v56  ;;  %v17293_v37 = vld [vmem:[#allocation5 + $0x71c] sm:$0xf]  ;;  %v12009_v52 = vor.u32 %v17229_v41, %v12006_v18  ;;  %8419 = vmatpush.bf16.msra.mxu3 %v12553_v44  ;;  %v19166_v27 = vadd.f32 %v8140_v20, %v8128_v50 }
 0x6b6   :  { %8360 = vmatmul.bf16.vlgmr.msrb.gmra.mxu2 %v18978_v28  ;;  %v12262_v46 = vld [vmem:[#allocation5 + $0x738] sm:$0xf0] }
 0x6b7   :  { %8404 = vmatpush.bf16.msra.mxu2 %v12361_v59  ;;  %8379 = vmatpush.bf16.msra.mxu0 %v11817_v4  ;;  %v17357_v40 = vld [vmem:[#allocation5 + $0x91c] sm:$0xf]  ;;  %v12265_v53 = vor.u32 %v17293_v37, %v12262_v46 }
 0x6b8   :  { %v12518_v49 = vld [vmem:[#allocation5 + $0x938] sm:$0xf0] }
 0x6b9   :  { %8392 = vmatpush.bf16.msra.mxu1 %v12073_v63  ;;  %v17157_v55 = vld [vmem:[#allocation5 + $0x2dc] sm:$0xf]  ;;  %v12521_v60 = vor.u32 %v17357_v40, %v12518_v49 }
 0x6ba   :  { %v11718_v56 = vld [vmem:[#allocation5 + $0x2f8] sm:$0xf0] }
 0x6bb   :  { %8405 = vmatpush.bf16.msra.mxu2 %v12329_v6  ;;  %8380 = vmatpush.bf16.msra.mxu0 %v11785_v33  ;;  %v17221_v59 = vld [vmem:[#allocation5 + $0x4dc] sm:$0xf]  ;;  %v11721_v3 = vor.u32 %v17157_v55, %v11718_v56  ;;  %v8154_v33 = vadd.f32 %v8153_v16, %v1308_v48 }
 0x6bc   :  { %v11974_v62 = vld [vmem:[#allocation5 + $0x4f8] sm:$0xf0]  ;;  %8420 = vmatpush.bf16.msra.mxu3 %v12521_v60 }
 0x6bd   :  { %8393 = vmatpush.bf16.msra.mxu1 %v12041_v57  ;;  %v17285_v54 = vld [vmem:[#allocation5 + $0x6dc] sm:$0xf]  ;;  %v11977_v4 = vor.u32 %v17221_v59, %v11974_v62  ;;  %v8166_v57 = vpop.f32.mrf.mxu3 }
 0x6be   :  { %v12230_v58 = vld [vmem:[#allocation5 + $0x6f8] sm:$0xf0]  ;;  %v19168_v47 = vadd.f32 %v8166_v57, %v8154_v33 }
 0x6bf   :  { %8406 = vmatpush.bf16.msra.mxu2 %v12297_v17  ;;  %v17349_v61 = vld [vmem:[#allocation5 + $0x8dc] sm:$0xf]  ;;  %8381 = vmatpush.bf16.msra.mxu0 %v11753_v51  ;;  %v12233_v63 = vor.u32 %v17285_v54, %v12230_v58  ;;  %v8129_v17 = vpop.f32.mrf.mxu0 }
 0x6c0   :  { %v12486_v0 = vld [vmem:[#allocation5 + $0x8f8] sm:$0xf0] }
 0x6c1   :  { %8394 = vmatpush.bf16.msra.mxu1 %v12009_v52  ;;  %v17149_v6 = vld [vmem:[#allocation5 + $0x29c] sm:$0xf]  ;;  %v12489_v8 = vor.u32 %v17349_v61, %v12486_v0 }
 0x6c2   :  { %v11686_v7 = vld [vmem:[#allocation5 + $0x2b8] sm:$0xf0] }
 0x6c3   :  { %8407 = vmatpush.bf16.msra.mxu2 %v12265_v53  ;;  %v17213_v2 = vld [vmem:[#allocation5 + $0x49c] sm:$0xf]  ;;  %8382 = vmatpush.bf16.msra.mxu0 %v11721_v3  ;;  %v11689_v38 = vor.u32 %v17149_v6, %v11686_v7  ;;  %v8155_v3 = vpop.f32.mrf.mxu2 }
 0x6c4   :  { %v11942_v9 = vld [vmem:[#allocation5 + $0x4b8] sm:$0xf0]  ;;  %8421 = vmatpush.bf16.msra.mxu3 %v12489_v8 }
 0x6c5   :  { %v17277_v12 = vld [vmem:[#allocation5 + $0x69c] sm:$0xf]  ;;  %8395 = vmatpush.bf16.msra.mxu1 %v11977_v4  ;;  %v11945_v41 = vor.u32 %v17213_v2, %v11942_v9  ;;  %v8168_v7 = vpop.f32.mrf.mxu3 }
 0x6c6   :  { %v12198_v14 = vld [vmem:[#allocation5 + $0x6b8] sm:$0xf0] }
 0x6c7   :  { %v17341_v22 = vld [vmem:[#allocation5 + $0x89c] sm:$0xf]  ;;  %8408 = vmatpush.bf16.msra.mxu2 %v12233_v63  ;;  %v12201_v44 = vor.u32 %v17277_v12, %v12198_v14  ;;  %8383 = vmatpush.bf16.msra.mxu0 %v11689_v38 }
 0x6c8   :  { %v12454_v35 = vld [vmem:[#allocation5 + $0x8b8] sm:$0xf0] }
 0x6c9   :  { %v17141_v18 = vld [vmem:[#allocation5 + $0x25c] sm:$0xf]  ;;  %v12457_v40 = vor.u32 %v17341_v22, %v12454_v35  ;;  %8396 = vmatpush.bf16.msra.mxu1 %v11945_v41 }
 0x6ca   :  { %v11654_v37 = vld [vmem:[#allocation5 + $0x278] sm:$0xf0] }
 0x6cb   :  { %v17205_v46 = vld [vmem:[#allocation5 + $0x45c] sm:$0xf]  ;;  %v11657_v53 = vor.u32 %v17141_v18, %v11654_v37  ;;  %8409 = vmatpush.bf16.msra.mxu2 %v12201_v44  ;;  %8422 = vmatpush.bf16.msra.mxu3 %v12457_v40 }
 0x6cc   :  { %v11910_v49 = vld [vmem:[#allocation5 + $0x478] sm:$0xf0] }
 0x6cd   :  { %v17269_v50 = vld [vmem:[#allocation5 + $0x65c] sm:$0xf]  ;;  %v11913_v59 = vor.u32 %v17205_v46, %v11910_v49  ;;  %8384 = vmatpush.bf16.msra.mxu0 %v11657_v53 }
 0x6ce   :  { %v12166_v51 = vld [vmem:[#allocation5 + $0x678] sm:$0xf0] }
 0x6cf   :  { %v17333_v20 = vld [vmem:[#allocation5 + $0x85c] sm:$0xf]  ;;  %v12169_v60 = vor.u32 %v17269_v50, %v12166_v51  ;;  %8397 = vmatpush.bf16.msra.mxu1 %v11913_v59 }
 0x6d0   :  { %v12422_v52 = vld [vmem:[#allocation5 + $0x878] sm:$0xf0] }
 0x6d1   :  { %v17133_v55 = vld [vmem:[#allocation5 + $0x21c] sm:$0xf]  ;;  %v12425_v61 = vor.u32 %v17333_v20, %v12422_v52  ;;  %8410 = vmatpush.bf16.msra.mxu2 %v12169_v60 }
 0x6d2   :  { %v11622_v56 = vld [vmem:[#allocation5 + $0x238] sm:$0xf0] }
 0x6d3   :  { %v17197_v62 = vld [vmem:[#allocation5 + $0x41c] sm:$0xf]  ;;  %v11625_v2 = vor.u32 %v17133_v55, %v11622_v56  ;;  %8423 = vmatpush.bf16.msra.mxu3 %v12425_v61 }
 0x6d4   :  { %v11878_v54 = vld [vmem:[#allocation5 + $0x438] sm:$0xf0] }
 0x6d5   :  { %v17261_v58 = vld [vmem:[#allocation5 + $0x61c] sm:$0xf]  ;;  %v11881_v14 = vor.u32 %v17197_v62, %v11878_v54  ;;  %8385 = vmatpush.bf16.msra.mxu0 %v11625_v2 }
 0x6d6   :  { %v12134_v0 = vld [vmem:[#allocation5 + $0x638] sm:$0xf0] }
 0x6d7   :  { %v17325_v1 = vld [vmem:[#allocation5 + $0x81c] sm:$0xf]  ;;  %v12137_v16 = vor.u32 %v17261_v58, %v12134_v0  ;;  %8398 = vmatpush.bf16.msra.mxu1 %v11881_v14 }
 0x6d8   :  { %v12390_v48 = vld [vmem:[#allocation5 + $0x838] sm:$0xf0]  ;;  %8386 = vmatmul.bf16.vlgmr.msra.gmra.mxu0 %v18936_v23 }
 0x6d9   :  { %v17445_v4 = vld [vmem:[#allocation5 + $0xbdc] sm:$0xf]  ;;  %v12393_v33 = vor.u32 %v17325_v1, %v12390_v48  ;;  %8411 = vmatpush.bf16.msra.mxu2 %v12137_v16 }
 0x6da   :  { %v12870_v63 = vld [vmem:[#allocation5 + $0xbf8] sm:$0xf0]  ;;  %8399 = vmatmul.bf16.vlgmr.msra.gmra.mxu1 %v18930_v19 }
 0x6db   :  { %v17509_v6 = vld [vmem:[#allocation5 + $0xddc] sm:$0xf]  ;;  %v12873_v57 = vor.u32 %v17445_v4, %v12870_v63  ;;  %8424 = vmatpush.bf16.msra.mxu3 %v12393_v33  ;;  %v8192_v33 = vpop.f32.mrf.mxu1 }
 0x6dc   :  { %v13126_v8 = vld [vmem:[#allocation5 + $0xdf8] sm:$0xf0]  ;;  %8412 = vmatmul.bf16.vlgmr.msra.gmra.mxu2 %v18934_v21 }
 0x6dd   :  { %v17573_v9 = vld [vmem:[#allocation5 + $0xfdc] sm:$0xf]  ;;  %v13129_v17 = vor.u32 %v17509_v6, %v13126_v8  ;;  %8430 = vmatpush.bf16.msrb.mxu0 %v12873_v57 }
 0x6de   :  { %v13382_v12 = vld [vmem:[#allocation5 + $0xff8] sm:$0xf0]  ;;  %8425 = vmatmul.bf16.vlgmr.msra.gmra.mxu3 %v18944_v42 }
 0x6df   :  { %v17637_v22 = vld [vmem:[#allocation5 + $0x11dc] sm:$0xf]  ;;  %v13385_v38 = vor.u32 %v17573_v9, %v13382_v12  ;;  %8443 = vmatpush.bf16.msrb.mxu1 %v13129_v17  ;;  %v8179_v9 = vpop.f32.mrf.mxu0 }
 0x6e0   :  { %v13638_v35 = vld [vmem:[#allocation5 + $0x11f8] sm:$0xf0] }
 0x6e1   :  { %v17437_v11 = vld [vmem:[#allocation5 + $0xb9c] sm:$0xf]  ;;  %v13641_v18 = vor.u32 %v17637_v22, %v13638_v35  ;;  %8456 = vmatpush.bf16.msrb.mxu2 %v13385_v38  ;;  %v8180_v35 = vadd.f32 %v8179_v9, %v19168_v47 }
 0x6e2   :  { %v12838_v41 = vld [vmem:[#allocation5 + $0xbb8] sm:$0xf0] }
 0x6e3   :  { %v17501_v44 = vld [vmem:[#allocation5 + $0xd9c] sm:$0xf]  ;;  %v12841_v51 = vor.u32 %v17437_v11, %v12838_v41  ;;  %8469 = vmatpush.bf16.msrb.mxu3 %v13641_v18  ;;  %v8193_v18 = vadd.f32 %v8192_v33, %v8180_v35 }
 0x6e4   :  { %v13094_v37 = vld [vmem:[#allocation5 + $0xdb8] sm:$0xf0] }
 0x6e5   :  { %v17565_v46 = vld [vmem:[#allocation5 + $0xf9c] sm:$0xf]  ;;  %v13097_v20 = vor.u32 %v17501_v44, %v13094_v37  ;;  %8431 = vmatpush.bf16.msrb.mxu0 %v12841_v51 }
 0x6e6   :  { %v13350_v40 = vld [vmem:[#allocation5 + $0xfb8] sm:$0xf0] }
 0x6e7   :  { %v17629_v49 = vld [vmem:[#allocation5 + $0x119c] sm:$0xf]  ;;  %v13353_v52 = vor.u32 %v17565_v46, %v13350_v40  ;;  %8444 = vmatpush.bf16.msrb.mxu1 %v13097_v20  ;;  %v8205_v20 = vpop.f32.mrf.mxu2 }
 0x6e8   :  { %v13606_v50 = vld [vmem:[#allocation5 + $0x11b8] sm:$0xf0] }
 0x6e9   :  { %v17429_v53 = vld [vmem:[#allocation5 + $0xb5c] sm:$0xf]  ;;  %v13609_v59 = vor.u32 %v17629_v49, %v13606_v50  ;;  %8457 = vmatpush.bf16.msrb.mxu2 %v13353_v52 }
 0x6ea   :  { %v12806_v55 = vld [vmem:[#allocation5 + $0xb78] sm:$0xf0] }
 0x6eb   :  { %v17493_v56 = vld [vmem:[#allocation5 + $0xd5c] sm:$0xf]  ;;  %v12809_v0 = vor.u32 %v17429_v53, %v12806_v55  ;;  %8470 = vmatpush.bf16.msrb.mxu3 %v13609_v59  ;;  %v8218_v59 = vpop.f32.mrf.mxu3 }
 0x6ec   :  { %v13062_v60 = vld [vmem:[#allocation5 + $0xd78] sm:$0xf0] }
 0x6ed   :  { %v17557_v62 = vld [vmem:[#allocation5 + $0xf5c] sm:$0xf]  ;;  %v13065_v1 = vor.u32 %v17493_v56, %v13062_v60  ;;  %8432 = vmatpush.bf16.msrb.mxu0 %v12809_v0  ;;  %v8206_v56 = vadd.f32 %v8205_v20, %v8193_v18 }
 0x6ee   :  { %v13318_v54 = vld [vmem:[#allocation5 + $0xf78] sm:$0xf0] }
 0x6ef   :  { %v17621_v58 = vld [vmem:[#allocation5 + $0x115c] sm:$0xf]  ;;  %v13321_v48 = vor.u32 %v17557_v62, %v13318_v54  ;;  %8445 = vmatpush.bf16.msrb.mxu1 %v13065_v1  ;;  %v8207_v33 = vpop.f32.mrf.mxu2 }
 0x6f0   :  { %v13574_v61 = vld [vmem:[#allocation5 + $0x1178] sm:$0xf0] }
 0x6f1   :  { %v17421_v3 = vld [vmem:[#allocation5 + $0xb1c] sm:$0xf]  ;;  %v13577_v63 = vor.u32 %v17621_v58, %v13574_v61  ;;  %8458 = vmatpush.bf16.msrb.mxu2 %v13321_v48  ;;  %v19175_v58 = vadd.f32 %v8218_v59, %v8206_v56  ;;  %v8181_v61 = vpop.f32.mrf.mxu0 }
 0x6f2   :  { %v12774_v4 = vld [vmem:[#allocation5 + $0xb38] sm:$0xf0] }
 0x6f3   :  { %v17485_v21 = vld [vmem:[#allocation5 + $0xd1c] sm:$0xf]  ;;  %v12777_v42 = vor.u32 %v17421_v3, %v12774_v4  ;;  %8471 = vmatpush.bf16.msrb.mxu3 %v13577_v63 }
 0x6f4   :  { %v13030_v6 = vld [vmem:[#allocation5 + $0xd38] sm:$0xf0] }
 0x6f5   :  { %v17549_v7 = vld [vmem:[#allocation5 + $0xf1c] sm:$0xf]  ;;  %v13033_v19 = vor.u32 %v17485_v21, %v13030_v6  ;;  %8433 = vmatpush.bf16.msrb.mxu0 %v12777_v42  ;;  %v8194_v21 = vpop.f32.mrf.mxu1 }
 0x6f6   :  { %v13286_v2 = vld [vmem:[#allocation5 + $0xf38] sm:$0xf0] }
 0x6f7   :  { %v17613_v8 = vld [vmem:[#allocation5 + $0x111c] sm:$0xf]  ;;  %v13289_v12 = vor.u32 %v17549_v7, %v13286_v2  ;;  %8446 = vmatpush.bf16.msrb.mxu1 %v13033_v19 }
 0x6f8   :  { %v13542_v23 = vld [vmem:[#allocation5 + $0x1138] sm:$0xf0] }
 0x6f9   :  { %v17413_v14 = vld [vmem:[#allocation5 + $0xadc] sm:$0xf]  ;;  %v13545_v57 = vor.u32 %v17613_v8, %v13542_v23  ;;  %8459 = vmatpush.bf16.msrb.mxu2 %v13289_v12 }
 0x6fa   :  { %v12742_v16 = vld [vmem:[#allocation5 + $0xaf8] sm:$0xf0] }
 0x6fb   :  { %v17477_v22 = vld [vmem:[#allocation5 + $0xcdc] sm:$0xf]  ;;  %v12745_v37 = vor.u32 %v17413_v14, %v12742_v16  ;;  %8472 = vmatpush.bf16.msrb.mxu3 %v13545_v57 }
 0x6fc   :  { %v12998_v17 = vld [vmem:[#allocation5 + $0xcf8] sm:$0xf0] }
 0x6fd   :  { %v17541_v38 = vld [vmem:[#allocation5 + $0xedc] sm:$0xf]  ;;  %v13001_v46 = vor.u32 %v17477_v22, %v12998_v17  ;;  %8434 = vmatpush.bf16.msrb.mxu0 %v12745_v37 }
 0x6fe   :  { %v13254_v11 = vld [vmem:[#allocation5 + $0xef8] sm:$0xf0] }
 0x6ff   :  { %v17605_v41 = vld [vmem:[#allocation5 + $0x10dc] sm:$0xf]  ;;  %v13257_v40 = vor.u32 %v17541_v38, %v13254_v11  ;;  %8447 = vmatpush.bf16.msrb.mxu1 %v13001_v46 }
 0x700   :  { %v13510_v44 = vld [vmem:[#allocation5 + $0x10f8] sm:$0xf0] }
 0x701   :  { %v17405_v49 = vld [vmem:[#allocation5 + $0xa9c] sm:$0xf]  ;;  %v13513_v47 = vor.u32 %v17605_v41, %v13510_v44  ;;  %8460 = vmatpush.bf16.msrb.mxu2 %v13257_v40  ;;  %v8220_v41 = vpop.f32.mrf.mxu3 }
 0x702   :  { %v12710_v50 = vld [vmem:[#allocation5 + $0xab8] sm:$0xf0]  ;;  %v8231_v41 = vpop.f32.mrf.mxu0 }
 0x703   :  { %v17469_v51 = vld [vmem:[#allocation5 + $0xc9c] sm:$0xf]  ;;  %v12713_v54 = vor.u32 %v17405_v49, %v12710_v50  ;;  %8473 = vmatpush.bf16.msrb.mxu3 %v13513_v47 }
 0x704   :  { %v12966_v52 = vld [vmem:[#allocation5 + $0xcb8] sm:$0xf0] }
 0x705   :  { %v17533_v53 = vld [vmem:[#allocation5 + $0xe9c] sm:$0xf]  ;;  %v12969_v0 = vor.u32 %v17469_v51, %v12966_v52  ;;  %8435 = vmatpush.bf16.msrb.mxu0 %v12713_v54 }
 0x706   :  { %v13222_v55 = vld [vmem:[#allocation5 + $0xeb8] sm:$0xf0] }
 0x707   :  { %v17597_v60 = vld [vmem:[#allocation5 + $0x109c] sm:$0xf]  ;;  %v13225_v1 = vor.u32 %v17533_v53, %v13222_v55  ;;  %8448 = vmatpush.bf16.msrb.mxu1 %v12969_v0 }
 0x708   :  { %v13478_v62 = vld [vmem:[#allocation5 + $0x10b8] sm:$0xf0] }
 0x709   :  { %v17397_v48 = vld [vmem:[#allocation5 + $0xa5c] sm:$0xf]  ;;  %v13481_v63 = vor.u32 %v17597_v60, %v13478_v62  ;;  %8461 = vmatpush.bf16.msrb.mxu2 %v13225_v1 }
 0x70a   :  { %v12678_v3 = vld [vmem:[#allocation5 + $0xa78] sm:$0xf0] }
 0x70b   :  { %v17461_v4 = vld [vmem:[#allocation5 + $0xc5c] sm:$0xf]  ;;  %v12681_v42 = vor.u32 %v17397_v48, %v12678_v3  ;;  %8474 = vmatpush.bf16.msrb.mxu3 %v13481_v63 }
 0x70c   :  { %v12934_v6 = vld [vmem:[#allocation5 + $0xc78] sm:$0xf0] }
 0x70d   :  { %v17525_v7 = vld [vmem:[#allocation5 + $0xe5c] sm:$0xf]  ;;  %v12937_v12 = vor.u32 %v17461_v4, %v12934_v6  ;;  %8436 = vmatpush.bf16.msrb.mxu0 %v12681_v42 }
 0x70e   :  { %v13190_v2 = vld [vmem:[#allocation5 + $0xe78] sm:$0xf0] }
 0x70f   :  { %v17589_v8 = vld [vmem:[#allocation5 + $0x105c] sm:$0xf]  ;;  %v13193_v14 = vor.u32 %v17525_v7, %v13190_v2  ;;  %8449 = vmatpush.bf16.msrb.mxu1 %v12937_v12 }
 0x710   :  { %v13446_v23 = vld [vmem:[#allocation5 + $0x1078] sm:$0xf0] }
 0x711   :  { %v17389_v9 = vld [vmem:[#allocation5 + $0xa1c] sm:$0xf]  ;;  %v13449_v57 = vor.u32 %v17589_v8, %v13446_v23  ;;  %8462 = vmatpush.bf16.msrb.mxu2 %v13193_v14 }
 0x712   :  { %v12646_v19 = vld [vmem:[#allocation5 + $0xa38] sm:$0xf0] }
 0x713   :  { %v17453_v16 = vld [vmem:[#allocation5 + $0xc1c] sm:$0xf]  ;;  %v12649_v46 = vor.u32 %v17389_v9, %v12646_v19  ;;  %8475 = vmatpush.bf16.msrb.mxu3 %v13449_v57 }
 0x714   :  { %v12902_v22 = vld [vmem:[#allocation5 + $0xc38] sm:$0xf0] }
 0x715   :  { %v17517_v35 = vld [vmem:[#allocation5 + $0xe1c] sm:$0xf]  ;;  %v12905_v51 = vor.u32 %v17453_v16, %v12902_v22  ;;  %8437 = vmatpush.bf16.msrb.mxu0 %v12649_v46 }
 0x716   :  { %v13158_v17 = vld [vmem:[#allocation5 + $0xe38] sm:$0xf0] }
 0x717   :  { %v17581_v38 = vld [vmem:[#allocation5 + $0x101c] sm:$0xf]  ;;  %v13161_v20 = vor.u32 %v17517_v35, %v13158_v17  ;;  %8450 = vmatpush.bf16.msrb.mxu1 %v12905_v51 }
 0x718   :  { %v13414_v11 = vld [vmem:[#allocation5 + $0x1038] sm:$0xf0]  ;;  %8438 = vmatmul.bf16.vlgmr.msrb.gmra.mxu0 %v18948_v45 }
 0x719   :  { %v17701_v44 = vld [vmem:[#allocation5 + $0x13dc] sm:$0xf]  ;;  %v13417_v53 = vor.u32 %v17581_v38, %v13414_v11  ;;  %8463 = vmatpush.bf16.msrb.mxu2 %v13161_v20 }
 0x71a   :  { %v13894_v18 = vld [vmem:[#allocation5 + $0x13f8] sm:$0xf0]  ;;  %8451 = vmatmul.bf16.vlgmr.msrb.gmra.mxu1 %v18942_v39 }
 0x71b   :  { %v17765_v37 = vld [vmem:[#allocation5 + $0x15dc] sm:$0xf]  ;;  %v13897_v55 = vor.u32 %v17701_v44, %v13894_v18  ;;  %8476 = vmatpush.bf16.msrb.mxu3 %v13417_v53 }
 0x71c   :  { %v14150_v40 = vld [vmem:[#allocation5 + $0x15f8] sm:$0xf0]  ;;  %8464 = vmatmul.bf16.vlgmr.msrb.gmra.mxu2 %v18946_v43 }
 0x71d   :  { %v17829_v49 = vld [vmem:[#allocation5 + $0x17dc] sm:$0xf]  ;;  %v14153_v56 = vor.u32 %v17765_v37, %v14150_v40  ;;  %8482 = vmatpush.bf16.msra.mxu0 %v13897_v55  ;;  %v8244_v37 = vpop.f32.mrf.mxu1 }
 0x71e   :  { %v14406_v50 = vld [vmem:[#allocation5 + $0x17f8] sm:$0xf0]  ;;  %8477 = vmatmul.bf16.vlgmr.msrb.gmra.mxu3 %v18954_v26  ;;  %v8232_v26 = vadd.f32 %v8231_v41, %v19175_v58 }
 0x71f   :  { %v17893_v47 = vld [vmem:[#allocation5 + $0x19dc] sm:$0xf]  ;;  %v14409_v59 = vor.u32 %v17829_v49, %v14406_v50  ;;  %8495 = vmatpush.bf16.msra.mxu1 %v14153_v56 }
 0x720   :  { %v14662_v52 = vld [vmem:[#allocation5 + $0x19f8] sm:$0xf0] }
 0x721   :  { %v17693_v60 = vld [vmem:[#allocation5 + $0x139c] sm:$0xf]  ;;  %v14665_v61 = vor.u32 %v17893_v47, %v14662_v52  ;;  %8508 = vmatpush.bf16.msra.mxu2 %v14409_v59  ;;  %v8245_v47 = vadd.f32 %v8244_v37, %v8232_v26 }
 0x722   :  { %v13862_v62 = vld [vmem:[#allocation5 + $0x13b8] sm:$0xf0] }
 0x723   :  { %v17757_v54 = vld [vmem:[#allocation5 + $0x159c] sm:$0xf]  ;;  %v13865_v21 = vor.u32 %v17693_v60, %v13862_v62  ;;  %8521 = vmatpush.bf16.msra.mxu3 %v14665_v61 }
 0x724   :  { %v14118_v0 = vld [vmem:[#allocation5 + $0x15b8] sm:$0xf0] }
 0x725   :  { %v17821_v1 = vld [vmem:[#allocation5 + $0x179c] sm:$0xf]  ;;  %v14121_v63 = vor.u32 %v17757_v54, %v14118_v0  ;;  %8483 = vmatpush.bf16.msra.mxu0 %v13865_v21 }
 0x726   :  { %v14374_v48 = vld [vmem:[#allocation5 + $0x17b8] sm:$0xf0] }
 0x727   :  { %v17885_v3 = vld [vmem:[#allocation5 + $0x199c] sm:$0xf]  ;;  %v14377_v6 = vor.u32 %v17821_v1, %v14374_v48  ;;  %8496 = vmatpush.bf16.msra.mxu1 %v14121_v63  ;;  %v8257_v48 = vpop.f32.mrf.mxu2 }
 0x728   :  { %v14630_v4 = vld [vmem:[#allocation5 + $0x19b8] sm:$0xf0]  ;;  %v8258_v63 = vadd.f32 %v8257_v48, %v8245_v47 }
 0x729   :  { %v17685_v7 = vld [vmem:[#allocation5 + $0x135c] sm:$0xf]  ;;  %v14633_v23 = vor.u32 %v17885_v3, %v14630_v4  ;;  %8509 = vmatpush.bf16.msra.mxu2 %v14377_v6  ;;  %v8270_v6 = vpop.f32.mrf.mxu3 }
 0x72a   :  { %v13830_v2 = vld [vmem:[#allocation5 + $0x1378] sm:$0xf0] }
 0x72b   :  { %v17749_v8 = vld [vmem:[#allocation5 + $0x155c] sm:$0xf]  ;;  %v13833_v16 = vor.u32 %v17685_v7, %v13830_v2  ;;  %8522 = vmatpush.bf16.msra.mxu3 %v14633_v23 }
 0x72c   :  { %v14086_v42 = vld [vmem:[#allocation5 + $0x1578] sm:$0xf0] }
 0x72d   :  { %v17813_v9 = vld [vmem:[#allocation5 + $0x175c] sm:$0xf]  ;;  %v14089_v22 = vor.u32 %v17749_v8, %v14086_v42  ;;  %8484 = vmatpush.bf16.msra.mxu0 %v13833_v16  ;;  %v8233_v8 = vpop.f32.mrf.mxu0  ;;  %v8246_v42 = vpop.f32.mrf.mxu1 }
 0x72e   :  { %v14342_v19 = vld [vmem:[#allocation5 + $0x1778] sm:$0xf0] }
 0x72f   :  { %v17877_v12 = vld [vmem:[#allocation5 + $0x195c] sm:$0xf]  ;;  %v14345_v35 = vor.u32 %v17813_v9, %v14342_v19  ;;  %8497 = vmatpush.bf16.msra.mxu1 %v14089_v22  ;;  %v19182_v9 = vadd.f32 %v8270_v6, %v8258_v63 }
 0x730   :  { %v14598_v14 = vld [vmem:[#allocation5 + $0x1978] sm:$0xf0] }
 0x731   :  { %v17677_v33 = vld [vmem:[#allocation5 + $0x131c] sm:$0xf]  ;;  %v14601_v17 = vor.u32 %v17877_v12, %v14598_v14  ;;  %8510 = vmatpush.bf16.msra.mxu2 %v14345_v35 }
 0x732   :  { %v13798_v45 = vld [vmem:[#allocation5 + $0x1338] sm:$0xf0] }
 0x733   :  { %v17741_v57 = vld [vmem:[#allocation5 + $0x151c] sm:$0xf]  ;;  %v13801_v18 = vor.u32 %v17677_v33, %v13798_v45  ;;  %8523 = vmatpush.bf16.msra.mxu3 %v14601_v17 }
 0x734   :  { %v14054_v38 = vld [vmem:[#allocation5 + $0x1538] sm:$0xf0] }
 0x735   :  { %v17805_v11 = vld [vmem:[#allocation5 + $0x171c] sm:$0xf]  ;;  %v14057_v46 = vor.u32 %v17741_v57, %v14054_v38  ;;  %8485 = vmatpush.bf16.msra.mxu0 %v13801_v18 }
 0x736   :  { %v14310_v43 = vld [vmem:[#allocation5 + $0x1738] sm:$0xf0] }
 0x737   :  { %v17869_v39 = vld [vmem:[#allocation5 + $0x191c] sm:$0xf]  ;;  %v14313_v40 = vor.u32 %v17805_v11, %v14310_v43  ;;  %8498 = vmatpush.bf16.msra.mxu1 %v14057_v46 }
 0x738   :  { %v14566_v44 = vld [vmem:[#allocation5 + $0x1938] sm:$0xf0] }
 0x739   :  { %v17669_v49 = vld [vmem:[#allocation5 + $0x12dc] sm:$0xf]  ;;  %v14569_v20 = vor.u32 %v17869_v39, %v14566_v44  ;;  %8511 = vmatpush.bf16.msra.mxu2 %v14313_v40 }
 0x73a   :  { %v13766_v50 = vld [vmem:[#allocation5 + $0x12f8] sm:$0xf0] }
 0x73b   :  { %v17733_v51 = vld [vmem:[#allocation5 + $0x14dc] sm:$0xf]  ;;  %v13769_v60 = vor.u32 %v17669_v49, %v13766_v50  ;;  %8524 = vmatpush.bf16.msra.mxu3 %v14569_v20 }
 0x73c   :  { %v14022_v52 = vld [vmem:[#allocation5 + $0x14f8] sm:$0xf0] }
 0x73d   :  { %v17797_v53 = vld [vmem:[#allocation5 + $0x16dc] sm:$0xf]  ;;  %v14025_v58 = vor.u32 %v17733_v51, %v14022_v52  ;;  %8486 = vmatpush.bf16.msra.mxu0 %v13769_v60  ;;  %v8259_v51 = vpop.f32.mrf.mxu2 }
 0x73e   :  { %v14278_v55 = vld [vmem:[#allocation5 + $0x16f8] sm:$0xf0]  ;;  %v8296_v51 = vpop.f32.mrf.mxu1 }
 0x73f   :  { %v17861_v56 = vld [vmem:[#allocation5 + $0x18dc] sm:$0xf]  ;;  %v14281_v62 = vor.u32 %v17797_v53, %v14278_v55  ;;  %8499 = vmatpush.bf16.msra.mxu1 %v14025_v58  ;;  %v8272_v53 = vpop.f32.mrf.mxu3 }
 0x740   :  { %v14534_v59 = vld [vmem:[#allocation5 + $0x18f8] sm:$0xf0] }
 0x741   :  { %v17661_v54 = vld [vmem:[#allocation5 + $0x129c] sm:$0xf]  ;;  %v14537_v1 = vor.u32 %v17861_v56, %v14534_v59  ;;  %8512 = vmatpush.bf16.msra.mxu2 %v14281_v62 }
 0x742   :  { %v13734_v61 = vld [vmem:[#allocation5 + $0x12b8] sm:$0xf0] }
 0x743   :  { %v17725_v0 = vld [vmem:[#allocation5 + $0x149c] sm:$0xf]  ;;  %v13737_v23 = vor.u32 %v17661_v54, %v13734_v61  ;;  %8525 = vmatpush.bf16.msra.mxu3 %v14537_v1 }
 0x744   :  { %v13990_v3 = vld [vmem:[#allocation5 + $0x14b8] sm:$0xf0] }
 0x745   :  { %v17789_v4 = vld [vmem:[#allocation5 + $0x169c] sm:$0xf]  ;;  %v13993_v19 = vor.u32 %v17725_v0, %v13990_v3  ;;  %8487 = vmatpush.bf16.msra.mxu0 %v13737_v23 }
 0x746   :  { %v14246_v21 = vld [vmem:[#allocation5 + $0x16b8] sm:$0xf0] }
 0x747   :  { %v17853_v7 = vld [vmem:[#allocation5 + $0x189c] sm:$0xf]  ;;  %v14249_v12 = vor.u32 %v17789_v4, %v14246_v21  ;;  %8500 = vmatpush.bf16.msra.mxu1 %v13993_v19 }
 0x748   :  { %v14502_v2 = vld [vmem:[#allocation5 + $0x18b8] sm:$0xf0] }
 0x749   :  { %v17653_v14 = vld [vmem:[#allocation5 + $0x125c] sm:$0xf]  ;;  %v14505_v35 = vor.u32 %v17853_v7, %v14502_v2  ;;  %8513 = vmatpush.bf16.msra.mxu2 %v14249_v12 }
 0x74a   :  { %v13702_v16 = vld [vmem:[#allocation5 + $0x1278] sm:$0xf0] }
 0x74b   :  { %v17717_v22 = vld [vmem:[#allocation5 + $0x145c] sm:$0xf]  ;;  %v13705_v11 = vor.u32 %v17653_v14, %v13702_v16  ;;  %8526 = vmatpush.bf16.msra.mxu3 %v14505_v35 }
 0x74c   :  { %v13958_v33 = vld [vmem:[#allocation5 + $0x1478] sm:$0xf0] }
 0x74d   :  { %v17781_v45 = vld [vmem:[#allocation5 + $0x165c] sm:$0xf]  ;;  %v13961_v39 = vor.u32 %v17717_v22, %v13958_v33  ;;  %8488 = vmatpush.bf16.msra.mxu0 %v13705_v11 }
 0x74e   :  { %v14214_v57 = vld [vmem:[#allocation5 + $0x1678] sm:$0xf0] }
 0x74f   :  { %v17845_v17 = vld [vmem:[#allocation5 + $0x185c] sm:$0xf]  ;;  %v14217_v44 = vor.u32 %v17781_v45, %v14214_v57  ;;  %8501 = vmatpush.bf16.msra.mxu1 %v13961_v39 }
 0x750   :  { %v14470_v38 = vld [vmem:[#allocation5 + $0x1878] sm:$0xf0] }
 0x751   :  { %v17645_v43 = vld [vmem:[#allocation5 + $0x121c] sm:$0xf]  ;;  %v14473_v46 = vor.u32 %v17845_v17, %v14470_v38  ;;  %8514 = vmatpush.bf16.msra.mxu2 %v14217_v44 }
 0x752   :  { %v13670_v41 = vld [vmem:[#allocation5 + $0x1238] sm:$0xf0] }
 0x753   :  { %v17709_v26 = vld [vmem:[#allocation5 + $0x141c] sm:$0xf]  ;;  %v13673_v55 = vor.u32 %v17645_v43, %v13670_v41  ;;  %8527 = vmatpush.bf16.msra.mxu3 %v14473_v46 }
 0x754   :  { %v13926_v18 = vld [vmem:[#allocation5 + $0x1438] sm:$0xf0] }
 0x755   :  { %v17773_v37 = vld [vmem:[#allocation5 + $0x161c] sm:$0xf]  ;;  %v13929_v58 = vor.u32 %v17709_v26, %v13926_v18  ;;  %8489 = vmatpush.bf16.msra.mxu0 %v13673_v55 }
 0x756   :  { %v14182_v40 = vld [vmem:[#allocation5 + $0x1638] sm:$0xf0] }
 0x757   :  { %v17837_v49 = vld [vmem:[#allocation5 + $0x181c] sm:$0xf]  ;;  %v14185_v62 = vor.u32 %v17773_v37, %v14182_v40  ;;  %8502 = vmatpush.bf16.msra.mxu1 %v13929_v58  ;;  %v8283_v40 = vpop.f32.mrf.mxu0 }
 0x758   :  { %v14438_v50 = vld [vmem:[#allocation5 + $0x1838] sm:$0xf0]  ;;  %8490 = vmatmul.bf16.vlgmr.msra.gmra.mxu0 %v18958_v31 }
 0x759   :  { %v17957_v20 = vld [vmem:[#allocation5 + $0x1bdc] sm:$0xf]  ;;  %v14441_v0 = vor.u32 %v17837_v49, %v14438_v50  ;;  %8515 = vmatpush.bf16.msra.mxu2 %v14185_v62 }
 0x75a   :  { %v14918_v47 = vld [vmem:[#allocation5 + $0x1bf8] sm:$0xf0]  ;;  %8503 = vmatmul.bf16.vlgmr.msra.gmra.mxu1 %v18956_v30 }
 0x75b   :  { %v18021_v52 = vld [vmem:[#allocation5 + $0x1ddc] sm:$0xf]  ;;  %v14921_v1 = vor.u32 %v17957_v20, %v14918_v47  ;;  %8528 = vmatpush.bf16.msra.mxu3 %v14441_v0 }
 0x75c   :  { %v15174_v56 = vld [vmem:[#allocation5 + $0x1df8] sm:$0xf0]  ;;  %8516 = vmatmul.bf16.vlgmr.msra.gmra.mxu2 %v18960_v34 }
 0x75d   :  { %v18085_v59 = vld [vmem:[#allocation5 + $0x1fdc] sm:$0xf]  ;;  %v15177_v48 = vor.u32 %v18021_v52, %v15174_v56  ;;  %8534 = vmatpush.bf16.msrb.mxu0 %v14921_v1 }
 0x75e   :  { %v15430_v60 = vld [vmem:[#allocation5 + $0x1ff8] sm:$0xf0]  ;;  %8529 = vmatmul.bf16.vlgmr.msra.gmra.mxu3 %v18966_v24  ;;  %v8284_v24 = vadd.f32 %v8283_v40, %v19182_v9 }
 0x75f   :  { %v18149_v54 = vld [vmem:[#allocation5 + $0x21dc] sm:$0xf]  ;;  %v15433_v3 = vor.u32 %v18085_v59, %v15430_v60  ;;  %8547 = vmatpush.bf16.msrb.mxu1 %v15177_v48 }
 0x760   :  { %v15686_v61 = vld [vmem:[#allocation5 + $0x21f8] sm:$0xf0]  ;;  %v8297_v59 = vadd.f32 %v8296_v51, %v8284_v24 }
 0x761   :  { %v17949_v4 = vld [vmem:[#allocation5 + $0x1b9c] sm:$0xf]  ;;  %v15689_v6 = vor.u32 %v18149_v54, %v15686_v61  ;;  %8560 = vmatpush.bf16.msrb.mxu2 %v15433_v3 }
 0x762   :  { %v14886_v21 = vld [vmem:[#allocation5 + $0x1bb8] sm:$0xf0] }
 0x763   :  { %v18013_v63 = vld [vmem:[#allocation5 + $0x1d9c] sm:$0xf]  ;;  %v14889_v19 = vor.u32 %v17949_v4, %v14886_v21  ;;  %8573 = vmatpush.bf16.msrb.mxu3 %v15689_v6 }
 0x764   :  { %v15142_v7 = vld [vmem:[#allocation5 + $0x1db8] sm:$0xf0] }
 0x765   :  { %v18077_v2 = vld [vmem:[#allocation5 + $0x1f9c] sm:$0xf]  ;;  %v15145_v12 = vor.u32 %v18013_v63, %v15142_v7  ;;  %8535 = vmatpush.bf16.msrb.mxu0 %v14889_v19  ;;  %v8309_v63 = vpop.f32.mrf.mxu2 }
 0x766   :  { %v15398_v8 = vld [vmem:[#allocation5 + $0x1fb8] sm:$0xf0] }
 0x767   :  { %v18141_v23 = vld [vmem:[#allocation5 + $0x219c] sm:$0xf]  ;;  %v15401_v14 = vor.u32 %v18077_v2, %v15398_v8  ;;  %8548 = vmatpush.bf16.msrb.mxu1 %v15145_v12  ;;  %v8310_v8 = vadd.f32 %v8309_v63, %v8297_v59  ;;  %v8285_v12 = vpop.f32.mrf.mxu0  ;;  %v18216_v59 = vld [vmem:[#allocation8 + $0x1ec] sm:$0xf0]  ;;  %v15916_v63 = vld [vmem:[#allocation8 + $0x1c0] sm:$0xf] }
 0x768   :  { %v15654_v42 = vld [vmem:[#allocation5 + $0x21b8] sm:$0xf0] }
 0x769   :  { %v17941_v16 = vld [vmem:[#allocation5 + $0x1b5c] sm:$0xf]  ;;  %v15657_v33 = vor.u32 %v18141_v23, %v15654_v42  ;;  %8561 = vmatpush.bf16.msrb.mxu2 %v15401_v14  ;;  %v8322_v23 = vpop.f32.mrf.mxu3 }
 0x76a   :  { %v14854_v22 = vld [vmem:[#allocation5 + $0x1b78] sm:$0xf0] }
 0x76b   :  { %v18005_v35 = vld [vmem:[#allocation5 + $0x1d5c] sm:$0xf]  ;;  %v14857_v43 = vor.u32 %v17941_v16, %v14854_v22  ;;  %8574 = vmatpush.bf16.msrb.mxu3 %v15657_v33  ;;  %v8298_v16 = vpop.f32.mrf.mxu1  ;;  %v19189_v22 = vadd.f32 %v8322_v23, %v8310_v8  ;;  %v18244_v8 = vld [vmem:[#allocation8 + $0x2cc] sm:$0xf0]  ;;  %v16172_v23 = vld [vmem:[#allocation8 + $0x3c0] sm:$0xf] }
 0x76c   :  { %v15110_v45 = vld [vmem:[#allocation5 + $0x1d78] sm:$0xf0]  ;;  %v15772_v16 = vld [vmem:[#allocation8 + $0xa0] sm:$0xf] }
 0x76d   :  { %v18069_v57 = vld [vmem:[#allocation5 + $0x1f5c] sm:$0xf]  ;;  %v15113_v41 = vor.u32 %v18005_v35, %v15110_v45  ;;  %8536 = vmatpush.bf16.msrb.mxu0 %v14857_v43 }
 0x76e   :  { %v15366_v17 = vld [vmem:[#allocation5 + $0x1f78] sm:$0xf0] }
 0x76f   :  { %v18133_v38 = vld [vmem:[#allocation5 + $0x215c] sm:$0xf]  ;;  %v15369_v39 = vor.u32 %v18069_v57, %v15366_v17  ;;  %8549 = vmatpush.bf16.msrb.mxu1 %v15113_v41 }
 0x770   :  { %v15622_v11 = vld [vmem:[#allocation5 + $0x2178] sm:$0xf0] }
 0x771   :  { %v17933_v44 = vld [vmem:[#allocation5 + $0x1b1c] sm:$0xf]  ;;  %v15625_v18 = vor.u32 %v18133_v38, %v15622_v11  ;;  %8562 = vmatpush.bf16.msrb.mxu2 %v15369_v39 }
 0x772   :  { %v14822_v31 = vld [vmem:[#allocation5 + $0x1b38] sm:$0xf0] }
 0x773   :  { %v17997_v26 = vld [vmem:[#allocation5 + $0x1d1c] sm:$0xf]  ;;  %v14825_v50 = vor.u32 %v17933_v44, %v14822_v31  ;;  %8575 = vmatpush.bf16.msrb.mxu3 %v15625_v18 }
 0x774   :  { %v15078_v37 = vld [vmem:[#allocation5 + $0x1d38] sm:$0xf0] }
 0x775   :  { %v18061_v46 = vld [vmem:[#allocation5 + $0x1f1c] sm:$0xf]  ;;  %v15081_v20 = vor.u32 %v17997_v26, %v15078_v37  ;;  %8537 = vmatpush.bf16.msrb.mxu0 %v14825_v50 }
 0x776   :  { %v15334_v34 = vld [vmem:[#allocation5 + $0x1f38] sm:$0xf0] }
 0x777   :  { %v18125_v30 = vld [vmem:[#allocation5 + $0x211c] sm:$0xf]  ;;  %v15337_v47 = vor.u32 %v18061_v46, %v15334_v34  ;;  %8550 = vmatpush.bf16.msrb.mxu1 %v15081_v20  ;;  %v8311_v20 = vpop.f32.mrf.mxu2 }
 0x778   :  { %v15590_v49 = vld [vmem:[#allocation5 + $0x2138] sm:$0xf0]  ;;  %v15868_v20 = vld [vmem:[#allocation8 + $0x160] sm:$0xf] }
 0x779   :  { %v17925_v52 = vld [vmem:[#allocation5 + $0x1adc] sm:$0xf]  ;;  %v15593_v56 = vor.u32 %v18125_v30, %v15590_v49  ;;  %8563 = vmatpush.bf16.msrb.mxu2 %v15337_v47  ;;  %v15804_v47 = vld [vmem:[#allocation8 + $0xe0] sm:$0xf] }
 0x77a   :  { %v14790_v53 = vld [vmem:[#allocation5 + $0x1af8] sm:$0xf0] }
 0x77b   :  { %v17989_v55 = vld [vmem:[#allocation5 + $0x1cdc] sm:$0xf]  ;;  %v14793_v0 = vor.u32 %v17925_v52, %v14790_v53  ;;  %8576 = vmatpush.bf16.msrb.mxu3 %v15593_v56  ;;  %v18184_v52 = vld [vmem:[#allocation8 + $0xec] sm:$0xf0]  ;;  %v15932_v53 = vld [vmem:[#allocation8 + $0x1e0] sm:$0xf] }
 0x77c   :  { %v15046_v60 = vld [vmem:[#allocation5 + $0x1cf8] sm:$0xf0] }
 0x77d   :  { %v18053_v58 = vld [vmem:[#allocation5 + $0x1edc] sm:$0xf]  ;;  %v15049_v9 = vor.u32 %v17989_v55, %v15046_v60  ;;  %8538 = vmatpush.bf16.msrb.mxu0 %v14793_v0  ;;  %v8324_v55 = vpop.f32.mrf.mxu3  ;;  %v16060_v60 = vld [vmem:[#allocation8 + $0x2e0] sm:$0xf]  ;;  %v18280_v0 = vld [vmem:[#allocation8 + $0x3ec] sm:$0xf0] }
 0x77e   :  { %v15302_v62 = vld [vmem:[#allocation5 + $0x1ef8] sm:$0xf0]  ;;  %v18232_v55 = vld [vmem:[#allocation8 + $0x26c] sm:$0xf0] }
 0x77f   :  { %v18117_v54 = vld [vmem:[#allocation5 + $0x20dc] sm:$0xf]  ;;  %v15305_v1 = vor.u32 %v18053_v58, %v15302_v62  ;;  %8551 = vmatpush.bf16.msrb.mxu1 %v15049_v9  ;;  %v18248_v58 = vld [vmem:[#allocation8 + $0x2ec] sm:$0xf0] }
 0x780   :  { %v15558_v61 = vld [vmem:[#allocation5 + $0x20f8] sm:$0xf0] }
 0x781   :  { %v17917_v48 = vld [vmem:[#allocation5 + $0x1a9c] sm:$0xf]  ;;  %v15561_v21 = vor.u32 %v18117_v54, %v15558_v61  ;;  %8564 = vmatpush.bf16.msrb.mxu2 %v15305_v1  ;;  %v16188_v61 = vld [vmem:[#allocation8 + $0x3e0] sm:$0xf]  ;;  %v15805_v1 = vor.u32 %v18184_v52, %v15804_v47  ;;  %v18200_v52 = vld [vmem:[#allocation8 + $0x16c] sm:$0xf0] }
 0x782   :  { %v14758_v3 = vld [vmem:[#allocation5 + $0x1ab8] sm:$0xf0] }
 0x783   :  { %v17981_v4 = vld [vmem:[#allocation5 + $0x1c9c] sm:$0xf]  ;;  %v14761_v14 = vor.u32 %v17917_v48, %v14758_v3  ;;  %8577 = vmatpush.bf16.msrb.mxu3 %v15561_v21  ;;  %v15933_v48 = vor.u32 %v18216_v59, %v15932_v53  ;;  %v16061_v3 = vor.u32 %v18248_v58, %v16060_v60  ;;  %v18180_v21 = vld [vmem:[#allocation8 + $0xcc] sm:$0xf0]  ;;  %v15996_v53 = vld [vmem:[#allocation8 + $0x260] sm:$0xf]  ;;  %v15869_v58 = vor.u32 %v18200_v52, %v15868_v20 }
 0x784   :  { %v15014_v6 = vld [vmem:[#allocation5 + $0x1cb8] sm:$0xf0]  ;;  %v18264_v59 = vld [vmem:[#allocation8 + $0x36c] sm:$0xf0]  ;;  %v8587_v52 = vmax.f32 %v19042_v5, 0.0 }
 0x785   :  { %v18045_v7 = vld [vmem:[#allocation5 + $0x1e9c] sm:$0xf]  ;;  %v15017_v35 = vor.u32 %v17981_v4, %v15014_v6  ;;  %8539 = vmatpush.bf16.msrb.mxu0 %v14761_v14  ;;  %v15788_v4 = vld [vmem:[#allocation8 + $0xc0] sm:$0xf]  ;;  %v16189_v6 = vor.u32 %v18280_v0, %v16188_v61  ;;  %v18164_v61 = vld [vmem:[#allocation8 + $0x4c] sm:$0xf0] }
 0x786   :  { %v15270_v2 = vld [vmem:[#allocation5 + $0x1eb8] sm:$0xf0]  ;;  %v15852_v0 = vld [vmem:[#allocation8 + $0x140] sm:$0xf]  ;;  %v18376_v20 = vld [vmem:[#allocation8 + $0x6ec] sm:$0xf0] }
 0x787   :  { %v18109_v42 = vld [vmem:[#allocation5 + $0x209c] sm:$0xf]  ;;  %v15273_v33 = vor.u32 %v18045_v7, %v15270_v2  ;;  %8552 = vmatpush.bf16.msrb.mxu1 %v15017_v35  ;;  %v18212_v7 = vld [vmem:[#allocation8 + $0x1cc] sm:$0xf0]  ;;  %v16044_v2 = vld [vmem:[#allocation8 + $0x2c0] sm:$0xf] }
 0x788   :  { %v15526_v19 = vld [vmem:[#allocation5 + $0x20b8] sm:$0xf0]  ;;  %v15917_v12 = vor.u32 %v18212_v7, %v15916_v63  ;;  %v16045_v14 = vor.u32 %v18244_v8, %v16044_v2  ;;  %v18176_v35 = vld [vmem:[#allocation8 + $0xac] sm:$0xf0] }
 0x789   :  { %v17909_v45 = vld [vmem:[#allocation5 + $0x1a5c] sm:$0xf]  ;;  %v15529_v38 = vor.u32 %v18109_v42, %v15526_v19  ;;  %8565 = vmatpush.bf16.msrb.mxu2 %v15273_v33  ;;  %v18276_v42 = vld [vmem:[#allocation8 + $0x3cc] sm:$0xf0]  ;;  %v15789_v19 = vor.u32 %v18180_v21, %v15788_v4  ;;  %v15900_v33 = vld [vmem:[#allocation8 + $0x1a0] sm:$0xf] }
 0x78a   :  { %v14726_v57 = vld [vmem:[#allocation5 + $0x1a78] sm:$0xf0]  ;;  %v18228_v4 = vld [vmem:[#allocation8 + $0x24c] sm:$0xf0]  ;;  %v16108_v21 = vld [vmem:[#allocation8 + $0x340] sm:$0xf] }
 0x78b   :  { %v17973_v17 = vld [vmem:[#allocation5 + $0x1c5c] sm:$0xf]  ;;  %v14729_v31 = vor.u32 %v17909_v45, %v14726_v57  ;;  %8578 = vmatpush.bf16.msrb.mxu3 %v15529_v38  ;;  %v16173_v45 = vor.u32 %v18276_v42, %v16172_v23  ;;  %v18208_v57 = vld [vmem:[#allocation8 + $0x1ac] sm:$0xf0] }
 0x78c   :  { %v14982_v11 = vld [vmem:[#allocation5 + $0x1c78] sm:$0xf0]  ;;  %v18240_v38 = vld [vmem:[#allocation8 + $0x2ac] sm:$0xf0] }
 0x78d   :  { %v18037_v43 = vld [vmem:[#allocation5 + $0x1e5c] sm:$0xf]  ;;  %v14985_v37 = vor.u32 %v17973_v17, %v14982_v11  ;;  %8540 = vmatpush.bf16.msrb.mxu0 %v14729_v31  ;;  %v16028_v17 = vld [vmem:[#allocation8 + $0x2a0] sm:$0xf]  ;;  %v18260_v63 = vld [vmem:[#allocation8 + $0x34c] sm:$0xf0] }
 0x78e   :  { %v15238_v41 = vld [vmem:[#allocation5 + $0x1e78] sm:$0xf0]  ;;  %v16156_v11 = vld [vmem:[#allocation8 + $0x3a0] sm:$0xf]  ;;  %v18372_v5 = vld [vmem:[#allocation8 + $0x6cc] sm:$0xf0] }
 0x78f   :  { %v18101_v39 = vld [vmem:[#allocation5 + $0x205c] sm:$0xf]  ;;  %v15241_v46 = vor.u32 %v18037_v43, %v15238_v41  ;;  %8553 = vmatpush.bf16.msrb.mxu1 %v14985_v37  ;;  %v18272_v43 = vld [vmem:[#allocation8 + $0x3ac] sm:$0xf0]  ;;  %v15773_v41 = vor.u32 %v18176_v35, %v15772_v16  ;;  %v15756_v31 = vld [vmem:[#allocation8 + $0x80] sm:$0xf]  ;;  %v16109_v16 = vor.u32 %v18260_v63, %v16108_v21 }
 0x790   :  { %v15494_v44 = vld [vmem:[#allocation5 + $0x2078] sm:$0xf0]  ;;  %v18204_v37 = vld [vmem:[#allocation8 + $0x18c] sm:$0xf0]  ;;  %v16284_v21 = vld [vmem:[#allocation8 + $0x4a0] sm:$0xf] }
 0x791   :  { %v17901_v26 = vld [vmem:[#allocation5 + $0x1a1c] sm:$0xf]  ;;  %v15497_v49 = vor.u32 %v18101_v39, %v15494_v44  ;;  %8566 = vmatpush.bf16.msrb.mxu2 %v15241_v46  ;;  %v15901_v39 = vor.u32 %v18208_v57, %v15900_v33  ;;  %v16029_v44 = vor.u32 %v18240_v38, %v16028_v17  ;;  %v16012_v46 = vld [vmem:[#allocation8 + $0x280] sm:$0xf]  ;;  %v18192_v35 = vld [vmem:[#allocation8 + $0x12c] sm:$0xf0] }
 0x792   :  { %v14694_v18 = vld [vmem:[#allocation5 + $0x1a38] sm:$0xf0]  ;;  %v15964_v33 = vld [vmem:[#allocation8 + $0x220] sm:$0xf]  ;;  %v18256_v17 = vld [vmem:[#allocation8 + $0x32c] sm:$0xf0] }
 0x793   :  { %v17965_v34 = vld [vmem:[#allocation5 + $0x1c1c] sm:$0xf]  ;;  %v14697_v56 = vor.u32 %v17901_v26, %v14694_v18  ;;  %8579 = vmatpush.bf16.msrb.mxu3 %v15497_v49  ;;  %v15884_v26 = vld [vmem:[#allocation8 + $0x180] sm:$0xf]  ;;  %v16157_v18 = vor.u32 %v18272_v43, %v16156_v11  ;;  %v18156_v43 = vld [vmem:[#allocation8 + $0xc] sm:$0xf0] }
 0x794   :  { %v14950_v40 = vld [vmem:[#allocation5 + $0x1c38] sm:$0xf0]  ;;  %v15885_v49 = vor.u32 %v18204_v37, %v15884_v26  ;;  %v16092_v57 = vld [vmem:[#allocation8 + $0x320] sm:$0xf] }
 0x795   :  { %v18029_v30 = vld [vmem:[#allocation5 + $0x1e1c] sm:$0xf]  ;;  %v14953_v62 = vor.u32 %v17965_v34, %v14950_v40  ;;  %8541 = vmatpush.bf16.msrb.mxu0 %v14697_v56  ;;  %v19195_v34 = vpop.f32.mrf.mxu0  ;;  %v18268_v40 = vld [vmem:[#allocation8 + $0x38c] sm:$0xf0]  ;;  %v16124_v56 = vld [vmem:[#allocation8 + $0x360] sm:$0xf]  ;;  %v16093_v26 = vor.u32 %v18256_v17, %v16092_v57 }
 0x796   :  { %v15206_v24 = vld [vmem:[#allocation5 + $0x1e38] sm:$0xf0]  ;;  %v15692_v11 = vld [vmem:[#allocation8] sm:$0xf] }
 0x797   :  { %v18093_v50 = vld [vmem:[#allocation5 + $0x201c] sm:$0xf]  ;;  %v15209_v54 = vor.u32 %v18029_v30, %v15206_v24  ;;  %8554 = vmatpush.bf16.msrb.mxu1 %v14953_v62  ;;  %v19197_v30 = vpop.f32.mrf.mxu1  ;;  %v15997_v62 = vor.u32 %v18232_v55, %v15996_v53  ;;  %v16076_v37 = vld [vmem:[#allocation8 + $0x300] sm:$0xf] }
 0x798   :  { %v15462_v51 = vld [vmem:[#allocation5 + $0x2038] sm:$0xf0]  ;;  %8542 = vmatmul.bf16.vlgmr.msrb.gmra.mxu0 %v18970_v32  ;;  %v18172_v32 = vld [vmem:[#allocation8 + $0x8c] sm:$0xf0]  ;;  %v16268_v17 = vld [vmem:[#allocation8 + $0x480] sm:$0xf] }
 0x799   :  { %v15465_v9 = vor.u32 %v18093_v50, %v15462_v51  ;;  %8567 = vmatpush.bf16.msrb.mxu2 %v15209_v54  ;;  %10148 = vmatpush.bf16.msra.mxu0 %v15805_v1  ;;  %v15740_v50 = vld [vmem:[#allocation8 + $0x60] sm:$0xf]  ;;  %v18168_v51 = vld [vmem:[#allocation8 + $0x6c] sm:$0xf0]  ;;  %v19199_v1 = vpop.f32.mrf.mxu2 }
 0x79a   :  { %8555 = vmatmul.bf16.vlgmr.msrb.gmra.mxu1 %v18968_v29  ;;  %v18236_v29 = vld [vmem:[#allocation8 + $0x28c] sm:$0xf0]  ;;  %v15741_v60 = vor.u32 %v18168_v51, %v15740_v50  ;;  %v15724_v54 = vld [vmem:[#allocation8 + $0x40] sm:$0xf] }
 0x79b   :  { %8580 = vmatpush.bf16.msrb.mxu3 %v15465_v9  ;;  %10161 = vmatpush.bf16.msra.mxu1 %v15933_v48  ;;  %v16013_v24 = vor.u32 %v18236_v29, %v16012_v46  ;;  %v16125_v9 = vor.u32 %v18264_v59, %v16124_v56  ;;  %v18196_v48 = vld [vmem:[#allocation8 + $0x14c] sm:$0xf0]  ;;  %v15725_v2 = vor.u32 %v18164_v61, %v15724_v54  ;;  %v16572_v51 = vld [vmem:[#allocation8 + $0x6e0] sm:$0xf]  ;;  %v8588_v56 = vmax.f32 %v19072_v10, 0.0 }
 0x79c   :  { %8568 = vmatmul.bf16.vlgmr.msrb.gmra.mxu2 %v18972_v36  ;;  %v16140_v36 = vld [vmem:[#allocation8 + $0x380] sm:$0xf]  ;;  %v15853_v23 = vor.u32 %v18196_v48, %v15852_v0  ;;  %v18252_v46 = vld [vmem:[#allocation8 + $0x30c] sm:$0xf0]  ;;  %v8589_v59 = vmax.f32 %v19102_v15, 0.0  ;;  %v16573_v54 = vor.u32 %v18376_v20, %v16572_v51 }
 0x79d   :  { %10174 = vmatpush.bf16.msra.mxu2 %v16061_v3  ;;  %10149 = vmatpush.bf16.msra.mxu0 %v15789_v19  ;;  %v16141_v47 = vor.u32 %v18268_v40, %v16140_v36  ;;  %v15980_v3 = vld [vmem:[#allocation8 + $0x240] sm:$0xf]  ;;  %v8337_v7 = vpop.f32.mrf.mxu0  ;;  %v18312_v40 = vld [vmem:[#allocation8 + $0x4ec] sm:$0xf0]  ;;  %v19211_v10 = vpack.c.bf16 %v8588_v56, %v8588_v56 }
 0x79e   :  { %8581 = vmatmul.bf16.vlgmr.msrb.gmra.mxu3 %v18978_v28  ;;  %v15757_v28 = vor.u32 %v18172_v32, %v15756_v31  ;;  %v15981_v42 = vor.u32 %v18228_v4, %v15980_v3  ;;  %v15708_v19 = vld [vmem:[#allocation8 + $0x20] sm:$0xf]  ;;  %v18188_v31 = vld [vmem:[#allocation8 + $0x10c] sm:$0xf0]  ;;  %v19209_v4 = vpack.c.bf16 %v8587_v52, %v8587_v52  ;;  %v19213_v63 = vpack.c.bf16 %v8589_v59, %v8589_v59 }
 0x79f   :  { %10187 = vmatpush.bf16.msra.mxu3 %v16189_v6  ;;  %10162 = vmatpush.bf16.msra.mxu1 %v15917_v12  ;;  %v19201_v6 = vpop.f32.mrf.mxu3  ;;  %v8350_v8 = vpop.f32.mrf.mxu1  ;;  %v18160_v12 = vld [vmem:[#allocation8 + $0x2c] sm:$0xf0]  ;;  %v15948_v32 = vld [vmem:[#allocation8 + $0x200] sm:$0xf] }
 0x7a0   :  { %v15709_v38 = vor.u32 %v18160_v12, %v15708_v19  ;;  %v16316_v36 = vld [vmem:[#allocation8 + $0x4e0] sm:$0xf]  ;;  %v18344_v50 = vld [vmem:[#allocation8 + $0x5ec] sm:$0xf0] }
 0x7a1   :  { %10175 = vmatpush.bf16.msra.mxu2 %v16045_v14  ;;  %10150 = vmatpush.bf16.msra.mxu0 %v15773_v41  ;;  %v15836_v14 = vld [vmem:[#allocation8 + $0x120] sm:$0xf]  ;;  %v8363_v29 = vpop.f32.mrf.mxu2  ;;  %v18308_v0 = vld [vmem:[#allocation8 + $0x4cc] sm:$0xf0] }
 0x7a2   :  { %v15837_v41 = vor.u32 %v18192_v35, %v15836_v14  ;;  %v16300_v61 = vld [vmem:[#allocation8 + $0x4c0] sm:$0xf]  ;;  %v18304_v8 = vld [vmem:[#allocation8 + $0x4ac] sm:$0xf0] }
 0x7a3   :  { %10188 = vmatpush.bf16.msra.mxu3 %v16173_v45  ;;  %10163 = vmatpush.bf16.msra.mxu1 %v15901_v39  ;;  %v18224_v45 = vld [vmem:[#allocation8 + $0x22c] sm:$0xf0]  ;;  %v16556_v48 = vld [vmem:[#allocation8 + $0x6c0] sm:$0xf]  ;;  %v16301_v15 = vor.u32 %v18308_v0, %v16300_v61  ;;  %v16285_v35 = vor.u32 %v18304_v8, %v16284_v21 }
 0x7a4   :  { %v15965_v39 = vor.u32 %v18224_v45, %v15964_v33  ;;  %v18336_v12 = vld [vmem:[#allocation8 + $0x5ac] sm:$0xf0]  ;;  %v16540_v14 = vld [vmem:[#allocation8 + $0x6a0] sm:$0xf] }
 0x7a5   :  { %10176 = vmatpush.bf16.msra.mxu2 %v16029_v44  ;;  %10151 = vmatpush.bf16.msra.mxu0 %v15757_v28  ;;  %v15820_v44 = vld [vmem:[#allocation8 + $0x100] sm:$0xf]  ;;  %v18356_v59 = vld [vmem:[#allocation8 + $0x64c] sm:$0xf0] }
 0x7a6   :  { %v16444_v28 = vld [vmem:[#allocation8 + $0x5e0] sm:$0xf]  ;;  %v15821_v53 = vor.u32 %v18188_v31, %v15820_v44  ;;  %v8387_v31 = vpop.f32.mrf.mxu0  ;;  %v18352_v8 = vld [vmem:[#allocation8 + $0x62c] sm:$0xf0] }
 0x7a7   :  { %10189 = vmatpush.bf16.msra.mxu3 %v16157_v18  ;;  %10164 = vmatpush.bf16.msra.mxu1 %v15885_v49  ;;  %v18220_v18 = vld [vmem:[#allocation8 + $0x20c] sm:$0xf0]  ;;  %v8376_v49 = vpop.f32.mrf.mxu3  ;;  %v16236_v20 = vld [vmem:[#allocation8 + $0x440] sm:$0xf] }
 0x7a8   :  { %v15949_v55 = vor.u32 %v18220_v18, %v15948_v32  ;;  %v16252_v18 = vld [vmem:[#allocation8 + $0x460] sm:$0xf] }
 0x7a9   :  { %10177 = vmatpush.bf16.msra.mxu2 %v16013_v24  ;;  %10152 = vmatpush.bf16.msra.mxu0 %v15741_v60  ;;  %v15693_v24 = vor.u32 %v18156_v43, %v15692_v11  ;;  %v16077_v60 = vor.u32 %v18252_v46, %v16076_v37  ;;  %v16396_v11 = vld [vmem:[#allocation8 + $0x580] sm:$0xf]  ;;  %v18332_v43 = vld [vmem:[#allocation8 + $0x58c] sm:$0xf0] }
 0x7aa   :  { %v16397_v32 = vor.u32 %v18332_v43, %v16396_v11  ;;  %v18296_v37 = vld [vmem:[#allocation8 + $0x46c] sm:$0xf0]  ;;  %v16380_v46 = vld [vmem:[#allocation8 + $0x560] sm:$0xf] }
 0x7ab   :  { %10190 = vmatpush.bf16.msra.mxu3 %v16141_v47  ;;  %10165 = vmatpush.bf16.msra.mxu1 %v15869_v58  ;;  %v8586_v47 = vmax.f32 %v19012_v25, 0.0  ;;  %v16317_v58 = vor.u32 %v18312_v40, %v16316_v36  ;;  %v18340_v25 = vld [vmem:[#allocation8 + $0x5cc] sm:$0xf0]  ;;  %v8400_v36 = vpop.f32.mrf.mxu1  ;;  %v16364_v52 = vld [vmem:[#allocation8 + $0x540] sm:$0xf] }
 0x7ac   :  { %v18328_v40 = vld [vmem:[#allocation8 + $0x56c] sm:$0xf0]  ;;  %v16492_v56 = vld [vmem:[#allocation8 + $0x640] sm:$0xf] }
 0x7ad   :  { %10178 = vmatpush.bf16.msra.mxu2 %v15997_v62  ;;  %10153 = vmatpush.bf16.msra.mxu0 %v15725_v2  ;;  %v16445_v62 = vor.u32 %v18344_v50, %v16444_v28  ;;  %v19207_v3 = vpack.c.bf16 %v8586_v47, %v8586_v47  ;;  %v16557_v2 = vor.u32 %v18372_v5, %v16556_v48  ;;  %v18360_v28 = vld [vmem:[#allocation8 + $0x66c] sm:$0xf0]  ;;  %v16220_v48 = vld [vmem:[#allocation8 + $0x420] sm:$0xf] }
 0x7ae   :  { %v16381_v50 = vor.u32 %v18328_v40, %v16380_v46  ;;  %v18292_v47 = vld [vmem:[#allocation8 + $0x44c] sm:$0xf0]  ;;  %v8389_v0 = vpop.f32.mrf.mxu0  ;;  %v16700_v11 = vld [vmem:[#allocation8 + $0x7e0] sm:$0xf] }
 0x7af   :  { %10191 = vmatpush.bf16.msra.mxu3 %v16125_v9  ;;  %10166 = vmatpush.bf16.msra.mxu1 %v15853_v23  ;;  %v16428_v9 = vld [vmem:[#allocation8 + $0x5c0] sm:$0xf]  ;;  %v18288_v5 = vld [vmem:[#allocation8 + $0x42c] sm:$0xf0]  ;;  %v15902_v0 = vld [vmem:[#allocation8 + $0x1b0] sm:$0xf0] }
 0x7b0   :  { %v16429_v7 = vor.u32 %v18340_v25, %v16428_v9  ;;  %v16412_v23 = vld [vmem:[#allocation8 + $0x5a0] sm:$0xf]  ;;  %v16493_v25 = vor.u32 %v18356_v59, %v16492_v56  ;;  %v18408_v43 = vld [vmem:[#allocation8 + $0x7ec] sm:$0xf0] }
 0x7b1   :  { %10179 = vmatpush.bf16.msra.mxu2 %v15981_v42  ;;  %10154 = vmatpush.bf16.msra.mxu0 %v15709_v38  ;;  %v18527_v42 = vld [vmem:[#allocation7] sm:$0xff]  ;;  %v16413_v33 = vor.u32 %v18336_v12, %v16412_v23  ;;  %v18300_v38 = vld [vmem:[#allocation8 + $0x48c] sm:$0xf0] }
 0x7b2   :  { %v1309_v19 = vperm.slane %v18527_v42, 7  ;;  %v16269_v44 = vor.u32 %v18300_v38, %v16268_v17  ;;  %v18284_v42 = vld [vmem:[#allocation8 + $0x40c] sm:$0xf0]  ;;  %v18182_v17 = vld [vmem:[#allocation8 + $0xe4] sm:$0xf] }
 0x7b3   :  { %10192 = vmatpush.bf16.msra.mxu3 %v16109_v16  ;;  %10167 = vmatpush.bf16.msra.mxu1 %v15837_v41  ;;  %v18368_v16 = vld [vmem:[#allocation8 + $0x6ac] sm:$0xf0]  ;;  %v16524_v41 = vld [vmem:[#allocation8 + $0x680] sm:$0xf]  ;;  %v8402_v21 = vpop.f32.mrf.mxu1 }
 0x7b4   :  { %v16541_v45 = vor.u32 %v18368_v16, %v16540_v14  ;;  %v8375_v57 = vadd.f32 %v19201_v6, %v1309_v19  ;;  %v16508_v6 = vld [vmem:[#allocation8 + $0x660] sm:$0xf] }
 0x7b5   :  { %10180 = vmatpush.bf16.msra.mxu2 %v15965_v39  ;;  %10155 = vmatpush.bf16.msra.mxu0 %v15693_v24  ;;  %v18364_v39 = vld [vmem:[#allocation8 + $0x68c] sm:$0xf0]  ;;  %v16253_v24 = vor.u32 %v18296_v37, %v16252_v18  ;;  %v16509_v51 = vor.u32 %v18360_v28, %v16508_v6  ;;  %v16332_v19 = vld [vmem:[#allocation8 + $0x500] sm:$0xf]  ;;  %v8591_v18 = vmax.f32 %v19166_v27, 0.0 }
 0x7b6   :  { %v8388_v29 = vadd.f32 %v8387_v31, %v8375_v57  ;;  %v8590_v31 = vmax.f32 %v19136_v13, 0.0  ;;  %v18178_v6 = vld [vmem:[#allocation8 + $0xc4] sm:$0xf]  ;;  %v15790_v28 = vld [vmem:[#allocation8 + $0xd0] sm:$0xf0] }
 0x7b7   :  { %10193 = vmatpush.bf16.msra.mxu3 %v16093_v26  ;;  %10168 = vmatpush.bf16.msra.mxu1 %v15821_v53  ;;  %v16525_v26 = vor.u32 %v18364_v39, %v16524_v41  ;;  %v8413_v53 = vpop.f32.mrf.mxu2  ;;  %v18214_v41 = vld [vmem:[#allocation8 + $0x1e4] sm:$0xf]  ;;  %v15934_v39 = vld [vmem:[#allocation8 + $0x1f0] sm:$0xf0]  ;;  %v16684_v13 = vld [vmem:[#allocation8 + $0x7c0] sm:$0xf]  ;;  %v19230_v27 = vpack.c.bf16 %v8591_v18, %v8591_v18  ;;  %v15793_v56 = vor.u32 %v18178_v6, %v15790_v28 }
 0x7b8   :  { %10156 = vmatmul.bf16.vlgmr.msra.gmra.mxu0 %v19207_v3  ;;  %v8401_v49 = vadd.f32 %v8400_v36, %v8388_v29  ;;  %v15937_v40 = vor.u32 %v18214_v41, %v15934_v39  ;;  %v18198_v41 = vld [vmem:[#allocation8 + $0x164] sm:$0xf]  ;;  %v15870_v39 = vld [vmem:[#allocation8 + $0x170] sm:$0xf0] }
 0x7b9   :  { %10181 = vmatpush.bf16.msra.mxu2 %v15949_v55  ;;  %10200 = vmatpush.bf16.msrb.mxu0 %v16317_v58  ;;  %v18324_v55 = vld [vmem:[#allocation8 + $0x54c] sm:$0xf0]  ;;  %v8426_v58 = vpop.f32.mrf.mxu3  ;;  %v18162_v18 = vld [vmem:[#allocation8 + $0x44] sm:$0xf]  ;;  %v15854_v6 = vld [vmem:[#allocation8 + $0x150] sm:$0xf0] }
 0x7ba   :  { %10169 = vmatmul.bf16.vlgmr.msra.gmra.mxu1 %v19209_v4  ;;  %v16365_v9 = vor.u32 %v18324_v55, %v16364_v52  ;;  %v19228_v52 = vpack.c.bf16 %v8590_v31, %v8590_v31  ;;  %v15998_v31 = vld [vmem:[#allocation8 + $0x270] sm:$0xf0] }
 0x7bb   :  { %10194 = vmatpush.bf16.msra.mxu3 %v16077_v60  ;;  %10213 = vmatpush.bf16.msrb.mxu1 %v16445_v62  ;;  %v8414_v60 = vadd.f32 %v8413_v53, %v8401_v49  ;;  %v8336_v62 = vadd.f32 %v19195_v34, %v19189_v22  ;;  %v16221_v22 = vor.u32 %v18288_v5, %v16220_v48  ;;  %v16204_v34 = vld [vmem:[#allocation8 + $0x400] sm:$0xf]  ;;  %v18210_v49 = vld [vmem:[#allocation8 + $0x1c4] sm:$0xf]  ;;  %v16030_v5 = vld [vmem:[#allocation8 + $0x2b0] sm:$0xf0] }
 0x7bc   :  { %10182 = vmatmul.bf16.vlgmr.msra.gmra.mxu2 %v19211_v10  ;;  %v18238_v48 = vld [vmem:[#allocation8 + $0x2a4] sm:$0xf] }
 0x7bd   :  { %10226 = vmatpush.bf16.msrb.mxu2 %v16573_v54  ;;  %10201 = vmatpush.bf16.msrb.mxu0 %v16301_v15  ;;  %v16237_v54 = vor.u32 %v18292_v47, %v16236_v20  ;;  %v19222_v61 = vadd.f32 %v8426_v58, %v8414_v60  ;;  %v16348_v15 = vld [vmem:[#allocation8 + $0x520] sm:$0xf]  ;;  %v8349_v23 = vadd.f32 %v19197_v30, %v8336_v62  ;;  %v15806_v30 = vld [vmem:[#allocation8 + $0xf0] sm:$0xf0]  ;;  %v18242_v20 = vld [vmem:[#allocation8 + $0x2c4] sm:$0xf] }
 0x7be   :  { %10195 = vmatmul.bf16.vlgmr.msra.gmra.mxu3 %v19213_v63  ;;  %v15809_v36 = vor.u32 %v18182_v17, %v15806_v30  ;;  %v16046_v47 = vld [vmem:[#allocation8 + $0x2d0] sm:$0xf0]  ;;  %v18174_v60 = vld [vmem:[#allocation8 + $0xa4] sm:$0xf] }
 0x7bf   :  { %10214 = vmatpush.bf16.msrb.mxu1 %v16429_v7  ;;  %v18320_v7 = vld [vmem:[#allocation8 + $0x52c] sm:$0xf0]  ;;  %v8362_v12 = vadd.f32 %v19199_v1, %v8349_v23  ;;  %v8415_v57 = vpop.f32.mrf.mxu2  ;;  %v16205_v1 = vor.u32 %v18284_v42, %v16204_v34  ;;  %v15774_v58 = vld [vmem:[#allocation8 + $0xb0] sm:$0xf0]  ;;  %v18206_v62 = vld [vmem:[#allocation8 + $0x1a4] sm:$0xf] }
 0x7c0   :  { %v16349_v14 = vor.u32 %v18320_v7, %v16348_v15  ;;  %v15777_v21 = vor.u32 %v18174_v60, %v15774_v58  ;;  %v15905_v7 = vor.u32 %v18206_v62, %v15902_v0  ;;  %v18396_v23 = vld [vmem:[#allocation8 + $0x78c] sm:$0xf0]  ;;  %v15758_v34 = vld [vmem:[#allocation8 + $0x90] sm:$0xf0]  ;;  %v18202_v42 = vld [vmem:[#allocation8 + $0x184] sm:$0xf]  ;;  %v19239_v57 = vpop.f32.mrf.mxu1 }
 0x7c1   :  { %10227 = vmatpush.bf16.msrb.mxu2 %v16557_v2  ;;  %10202 = vmatpush.bf16.msrb.mxu0 %v16285_v35  ;;  %v16476_v2 = vld [vmem:[#allocation8 + $0x620] sm:$0xf]  ;;  %v18316_v35 = vld [vmem:[#allocation8 + $0x50c] sm:$0xf0]  ;;  %v8428_v38 = vpop.f32.mrf.mxu3  ;;  %v8592_v37 = vmax.f32 %v8362_v12, 0.0 }
 0x7c2   :  { %v16477_v16 = vor.u32 %v18352_v8, %v16476_v2  ;;  %v16333_v46 = vor.u32 %v18316_v35, %v16332_v19  ;;  %v18170_v2 = vld [vmem:[#allocation8 + $0x84] sm:$0xf]  ;;  %v16652_v8 = vld [vmem:[#allocation8 + $0x780] sm:$0xf]  ;;  %v15886_v19 = vld [vmem:[#allocation8 + $0x190] sm:$0xf0] }
 0x7c3   :  { %10215 = vmatpush.bf16.msrb.mxu1 %v16413_v33  ;;  %v16460_v33 = vld [vmem:[#allocation8 + $0x600] sm:$0xf]  ;;  %v19232_v55 = vpack.c.bf16 %v8592_v37, %v8592_v37  ;;  %v18234_v12 = vld [vmem:[#allocation8 + $0x284] sm:$0xf]  ;;  %v16653_v35 = vor.u32 %v18396_v23, %v16652_v8  ;;  %v15742_v30 = vld [vmem:[#allocation8 + $0x70] sm:$0xf0] }
 0x7c4   :  { %v18166_v17 = vld [vmem:[#allocation8 + $0x64] sm:$0xf]  ;;  %v16636_v38 = vld [vmem:[#allocation8 + $0x760] sm:$0xf]  ;;  %v15838_v62 = vld [vmem:[#allocation8 + $0x130] sm:$0xf0] }
 0x7c5   :  { %10228 = vmatpush.bf16.msrb.mxu2 %v16541_v45  ;;  %10203 = vmatpush.bf16.msrb.mxu0 %v16269_v44  ;;  %v18348_v45 = vld [vmem:[#allocation8 + $0x60c] sm:$0xf0]  ;;  %v16701_v44 = vor.u32 %v18408_v43, %v16700_v11  ;;  %v16620_v37 = vld [vmem:[#allocation8 + $0x740] sm:$0xf] }
 0x7c6   :  { %v16461_v29 = vor.u32 %v18348_v45, %v16460_v33  ;;  %v15761_v33 = vor.u32 %v18170_v2, %v15758_v34  ;;  %v15889_v45 = vor.u32 %v18202_v42, %v15886_v19  ;;  %v18392_v11 = vld [vmem:[#allocation8 + $0x76c] sm:$0xf0]  ;;  %v18186_v2 = vld [vmem:[#allocation8 + $0x104] sm:$0xf]  ;;  %v16588_v8 = vld [vmem:[#allocation8 + $0x700] sm:$0xf] }
 0x7c7   :  { %10216 = vmatpush.bf16.msrb.mxu1 %v16397_v32  ;;  %v18246_v32 = vld [vmem:[#allocation8 + $0x2e4] sm:$0xf]  ;;  %10239 = vmatpush.bf16.msrb.mxu3 %v16701_v44  ;;  %v19241_v28 = vpop.f32.mrf.mxu2  ;;  %v18384_v0 = vld [vmem:[#allocation8 + $0x72c] sm:$0xf0]  ;;  %v15822_v34 = vld [vmem:[#allocation8 + $0x110] sm:$0xf0] }
 0x7c8   :  { %v18230_v44 = vld [vmem:[#allocation8 + $0x264] sm:$0xf]  ;;  %v8454_v60 = vpop.f32.mrf.mxu1  ;;  %v18380_v23 = vld [vmem:[#allocation8 + $0x70c] sm:$0xf0]  ;;  %v15950_v19 = vld [vmem:[#allocation8 + $0x210] sm:$0xf0] }
 0x7c9   :  { %10229 = vmatpush.bf16.msrb.mxu2 %v16525_v26  ;;  %10204 = vmatpush.bf16.msrb.mxu0 %v16253_v24  ;;  %v16062_v26 = vld [vmem:[#allocation8 + $0x2f0] sm:$0xf0]  ;;  %v18218_v42 = vld [vmem:[#allocation8 + $0x204] sm:$0xf] }
 0x7ca   :  { %v16065_v24 = vor.u32 %v18246_v32, %v16062_v26  ;;  %v15745_v32 = vor.u32 %v18166_v17, %v15742_v30  ;;  %v15873_v26 = vor.u32 %v18198_v41, %v15870_v39  ;;  %v18374_v17 = vld [vmem:[#allocation8 + $0x6e4] sm:$0xf]  ;;  %v15825_v41 = vor.u32 %v18186_v2, %v15822_v34 }
 0x7cb   :  { %10217 = vmatpush.bf16.msrb.mxu1 %v16381_v50  ;;  %v15918_v50 = vld [vmem:[#allocation8 + $0x1d0] sm:$0xf0]  ;;  %v15953_v39 = vor.u32 %v18218_v42, %v15950_v19  ;;  %v18366_v60 = vld [vmem:[#allocation8 + $0x6a4] sm:$0xf] }
 0x7cc   :  { %v15921_v59 = vor.u32 %v18210_v49, %v15918_v50  ;;  %v18226_v49 = vld [vmem:[#allocation8 + $0x244] sm:$0xf]  ;;  %v19243_v50 = vpop.f32.mrf.mxu3  ;;  %v16142_v19 = vld [vmem:[#allocation8 + $0x390] sm:$0xf0] }
 0x7cd   :  { %10230 = vmatpush.bf16.msrb.mxu2 %v16509_v51  ;;  %10205 = vmatpush.bf16.msrb.mxu0 %v16237_v54  ;;  %v18404_v51 = vld [vmem:[#allocation8 + $0x7cc] sm:$0xf0]  ;;  %v16049_v54 = vor.u32 %v18242_v20, %v16046_v47  ;;  %v18362_v2 = vld [vmem:[#allocation8 + $0x684] sm:$0xf] }
 0x7ce   :  { %v16685_v53 = vor.u32 %v18404_v51, %v16684_v13  ;;  %v18266_v42 = vld [vmem:[#allocation8 + $0x384] sm:$0xf] }
 0x7cf   :  { %10218 = vmatpush.bf16.msrb.mxu1 %v16365_v9  ;;  %v16668_v9 = vld [vmem:[#allocation8 + $0x7a0] sm:$0xf] }
 0x7d0   :  { %10240 = vmatpush.bf16.msrb.mxu3 %v16685_v53  ;;  %v18158_v53 = vld [vmem:[#allocation8 + $0x24] sm:$0xf] }
 0x7d1   :  { %10231 = vmatpush.bf16.msrb.mxu2 %v16493_v25  ;;  %10206 = vmatpush.bf16.msrb.mxu0 %v16221_v22  ;;  %v18400_v25 = vld [vmem:[#allocation8 + $0x7ac] sm:$0xf0]  ;;  %v16033_v22 = vor.u32 %v18238_v48, %v16030_v5  ;;  %v18154_v48 = vld [vmem:[#allocation8 + $0x4] sm:$0xf]  ;;  %v15694_v5 = vld [vmem:[#allocation8 + $0x10] sm:$0xf0] }
 0x7d2   :  { %v16669_v15 = vor.u32 %v18400_v25, %v16668_v9  ;;  %v18222_v9 = vld [vmem:[#allocation8 + $0x224] sm:$0xf]  ;;  %v15966_v25 = vld [vmem:[#allocation8 + $0x230] sm:$0xf0]  ;;  %v15697_v30 = vor.u32 %v18154_v48, %v15694_v5 }
 0x7d3   :  { %10219 = vmatpush.bf16.msrb.mxu1 %v16349_v14  ;;  %v16014_v14 = vld [vmem:[#allocation8 + $0x290] sm:$0xf0]  ;;  %v18298_v5 = vld [vmem:[#allocation8 + $0x484] sm:$0xf] }
 0x7d4   :  { %10241 = vmatpush.bf16.msrb.mxu3 %v16669_v15  ;;  %v16017_v43 = vor.u32 %v18234_v12, %v16014_v14  ;;  %v18310_v12 = vld [vmem:[#allocation8 + $0x4e4] sm:$0xf]  ;;  %v16318_v14 = vld [vmem:[#allocation8 + $0x4f0] sm:$0xf0] }
 0x7d5   :  { %10232 = vmatpush.bf16.msrb.mxu2 %v16477_v16  ;;  %10207 = vmatpush.bf16.msrb.mxu0 %v16205_v1  ;;  %v19237_v16 = vpop.f32.mrf.mxu0  ;;  %v16637_v1 = vor.u32 %v18392_v11, %v16636_v38  ;;  %v16574_v38 = vld [vmem:[#allocation8 + $0x6f0] sm:$0xf0]  ;;  %v8480_v11 = vpop.f32.mrf.mxu3 }
 0x7d6   :  { %v18358_v11 = vld [vmem:[#allocation8 + $0x664] sm:$0xf] }
 0x7d7   :  { %10220 = vmatpush.bf16.msrb.mxu1 %v16333_v46  ;;  %v18388_v46 = vld [vmem:[#allocation8 + $0x74c] sm:$0xf0] }
 0x7d8   :  { %10208 = vmatmul.bf16.vlgmr.msrb.gmra.mxu0 %v19228_v52  ;;  %10242 = vmatpush.bf16.msrb.mxu3 %v16653_v35  ;;  %v16621_v51 = vor.u32 %v18388_v46, %v16620_v37  ;;  %v18342_v35 = vld [vmem:[#allocation8 + $0x5e4] sm:$0xf]  ;;  %v16302_v37 = vld [vmem:[#allocation8 + $0x4d0] sm:$0xf0] }
 0x7d9   :  { %10233 = vmatpush.bf16.msrb.mxu2 %v16461_v29  ;;  %10252 = vmatpush.bf16.msra.mxu0 %v15809_v36  ;;  %v16001_v29 = vor.u32 %v18230_v44, %v15998_v31  ;;  %v15726_v36 = vld [vmem:[#allocation8 + $0x50] sm:$0xf0]  ;;  %v16321_v44 = vor.u32 %v18310_v12, %v16318_v14  ;;  %v18278_v31 = vld [vmem:[#allocation8 + $0x3e4] sm:$0xf] }
 0x7da   :  { %10221 = vmatmul.bf16.vlgmr.msrb.gmra.mxu1 %v19230_v27  ;;  %v15729_v20 = vor.u32 %v18162_v18, %v15726_v36  ;;  %v18306_v18 = vld [vmem:[#allocation8 + $0x4c4] sm:$0xf] }
 0x7db   :  { %10265 = vmatpush.bf16.msra.mxu1 %v15937_v40  ;;  %v18194_v40 = vld [vmem:[#allocation8 + $0x144] sm:$0xf] }
 0x7dc   :  { %10234 = vmatmul.bf16.vlgmr.msrb.gmra.mxu2 %v19232_v55  ;;  %10243 = vmatpush.bf16.msrb.mxu3 %v16637_v1  ;;  %v15857_v47 = vor.u32 %v18194_v40, %v15854_v6  ;;  %v16190_v1 = vld [vmem:[#allocation8 + $0x3f0] sm:$0xf0]  ;;  %v18338_v46 = vld [vmem:[#allocation8 + $0x5c4] sm:$0xf] }
 0x7dd   :  { %10278 = vmatpush.bf16.msra.mxu2 %v16065_v24  ;;  %10253 = vmatpush.bf16.msra.mxu0 %v15793_v56  ;;  %v15982_v24 = vld [vmem:[#allocation8 + $0x250] sm:$0xf0]  ;;  %v8441_v13 = vpop.f32.mrf.mxu0  ;;  %v18370_v36 = vld [vmem:[#allocation8 + $0x6c4] sm:$0xf]  ;;  %v16193_v6 = vor.u32 %v18278_v31, %v16190_v1 }
 0x7de   :  { %v15710_v56 = vld [vmem:[#allocation8 + $0x30] sm:$0xf0]  ;;  %v15985_v58 = vor.u32 %v18226_v49, %v15982_v24  ;;  %v16305_v49 = vor.u32 %v18306_v18, %v16302_v37  ;;  %v18274_v24 = vld [vmem:[#allocation8 + $0x3c4] sm:$0xf] }
 0x7df   :  { %10266 = vmatpush.bf16.msra.mxu1 %v15921_v59  ;;  %v18190_v59 = vld [vmem:[#allocation8 + $0x124] sm:$0xf]  ;;  %v16558_v40 = vld [vmem:[#allocation8 + $0x6d0] sm:$0xf0] }
 0x7e0   :  { %10244 = vmatpush.bf16.msrb.mxu3 %v16621_v51  ;;  %v16174_v13 = vld [vmem:[#allocation8 + $0x3d0] sm:$0xf0]  ;;  %v18322_v18 = vld [vmem:[#allocation8 + $0x544] sm:$0xf] }
 0x7e1   :  { %10279 = vmatpush.bf16.msra.mxu2 %v16049_v54  ;;  %10254 = vmatpush.bf16.msra.mxu0 %v15777_v21  ;;  %v16604_v54 = vld [vmem:[#allocation8 + $0x720] sm:$0xf]  ;;  %v15713_v21 = vor.u32 %v18158_v53, %v15710_v56  ;;  %v16286_v53 = vld [vmem:[#allocation8 + $0x4b0] sm:$0xf0]  ;;  %v18334_v56 = vld [vmem:[#allocation8 + $0x5a4] sm:$0xf] }
 0x7e2   :  { %v16605_v15 = vor.u32 %v18384_v0, %v16604_v54  ;;  %v18270_v0 = vld [vmem:[#allocation8 + $0x3a4] sm:$0xf]  ;;  %v16366_v37 = vld [vmem:[#allocation8 + $0x550] sm:$0xf0] }
 0x7e3   :  { %10267 = vmatpush.bf16.msra.mxu1 %v15905_v7  ;;  %v15841_v7 = vor.u32 %v18190_v59, %v15838_v62  ;;  %v16414_v59 = vld [vmem:[#allocation8 + $0x5b0] sm:$0xf0]  ;;  %v16177_v62 = vor.u32 %v18274_v24, %v16174_v13 }
 0x7e4   :  { %10245 = vmatpush.bf16.msrb.mxu3 %v16605_v15  ;;  %v16270_v15 = vld [vmem:[#allocation8 + $0x490] sm:$0xf0] }
 0x7e5   :  { %10280 = vmatpush.bf16.msra.mxu2 %v16033_v22  ;;  %10255 = vmatpush.bf16.msra.mxu0 %v15761_v33  ;;  %v15969_v22 = vor.u32 %v18222_v9, %v15966_v25  ;;  %v8467_v33 = vpop.f32.mrf.mxu2  ;;  %v16158_v9 = vld [vmem:[#allocation8 + $0x3b0] sm:$0xf0]  ;;  %v16417_v25 = vor.u32 %v18334_v56, %v16414_v59  ;;  %v16273_v34 = vor.u32 %v18298_v5, %v16270_v15  ;;  %v18286_v56 = vld [vmem:[#allocation8 + $0x424] sm:$0xf] }
 0x7e6   :  { %v18294_v33 = vld [vmem:[#allocation8 + $0x464] sm:$0xf]  ;;  %v16222_v59 = vld [vmem:[#allocation8 + $0x430] sm:$0xf0] }
 0x7e7   :  { %10268 = vmatpush.bf16.msra.mxu1 %v15889_v45  ;;  %v16446_v45 = vld [vmem:[#allocation8 + $0x5f0] sm:$0xf0] }
 0x7e8   :  { %v16094_v5 = vld [vmem:[#allocation8 + $0x330] sm:$0xf0] }
 0x7e9   :  { %10281 = vmatpush.bf16.msra.mxu2 %v16017_v43  ;;  %10256 = vmatpush.bf16.msra.mxu0 %v15745_v32  ;;  %v16589_v43 = vor.u32 %v18380_v23, %v16588_v8  ;;  %v16449_v32 = vor.u32 %v18342_v35, %v16446_v45  ;;  %v16526_v8 = vld [vmem:[#allocation8 + $0x690] sm:$0xf0]  ;;  %v16161_v23 = vor.u32 %v18270_v0, %v16158_v9  ;;  %v19250_v35 = vpop.f32.mrf.mxu1 }
 0x7ea   :  { %v16529_v14 = vor.u32 %v18362_v2, %v16526_v8  ;;  %v16254_v45 = vld [vmem:[#allocation8 + $0x470] sm:$0xf0]  ;;  %v16225_v9 = vor.u32 %v18286_v56, %v16222_v59  ;;  %v18314_v2 = vld [vmem:[#allocation8 + $0x504] sm:$0xf]  ;;  %v18209_v56 = vld [vmem:[#allocation8 + $0x1b4] sm:$0xf0] }
 0x7eb   :  { %10269 = vmatpush.bf16.msra.mxu1 %v15873_v26  ;;  %v16577_v26 = vor.u32 %v18374_v17, %v16574_v38  ;;  %10246 = vmatpush.bf16.msrb.mxu3 %v16589_v43  ;;  %v18326_v17 = vld [vmem:[#allocation8 + $0x564] sm:$0xf]  ;;  %v16382_v38 = vld [vmem:[#allocation8 + $0x570] sm:$0xf0]  ;;  %v16036_v59 = vld [vmem:[#allocation8 + $0x2a8] sm:$0xf] }
 0x7ec   :  { %v16510_v43 = vld [vmem:[#allocation8 + $0x670] sm:$0xf0]  ;;  %v16385_v31 = vor.u32 %v18326_v17, %v16382_v38  ;;  %v16068_v38 = vld [vmem:[#allocation8 + $0x2e8] sm:$0xf] }
 0x7ed   :  { %10282 = vmatpush.bf16.msra.mxu2 %v16001_v29  ;;  %10257 = vmatpush.bf16.msra.mxu0 %v15729_v20  ;;  %v16430_v29 = vld [vmem:[#allocation8 + $0x5d0] sm:$0xf0]  ;;  %v16561_v20 = vor.u32 %v18370_v36, %v16558_v40  ;;  %v16513_v1 = vor.u32 %v18358_v11, %v16510_v43  ;;  %v19252_v36 = vpop.f32.mrf.mxu2  ;;  %v18249_v11 = vld [vmem:[#allocation8 + $0x2f4] sm:$0xf0] }
 0x7ee   :  { %v16433_v51 = vor.u32 %v18338_v46, %v16430_v29  ;;  %v18354_v46 = vld [vmem:[#allocation8 + $0x644] sm:$0xf]  ;;  %v16494_v29 = vld [vmem:[#allocation8 + $0x650] sm:$0xf0] }
 0x7ef   :  { %10270 = vmatpush.bf16.msra.mxu1 %v15857_v47  ;;  %v18302_v47 = vld [vmem:[#allocation8 + $0x4a4] sm:$0xf]  ;;  %10291 = vmatpush.bf16.msra.mxu3 %v16193_v6  ;;  %v8440_v6 = vadd.f32 %v19237_v16, %v19222_v61  ;;  %v16478_v0 = vld [vmem:[#allocation8 + $0x630] sm:$0xf0] }
 0x7f0   :  { %v16289_v54 = vor.u32 %v18302_v47, %v16286_v53  ;;  %v16369_v47 = vor.u32 %v18322_v18, %v16366_v37  ;;  %v16497_v53 = vor.u32 %v18354_v46, %v16494_v29  ;;  %v16334_v8 = vld [vmem:[#allocation8 + $0x510] sm:$0xf0]  ;;  %v18181_v18 = vld [vmem:[#allocation8 + $0xd4] sm:$0xf0]  ;;  %v15924_v37 = vld [vmem:[#allocation8 + $0x1c8] sm:$0xf] }
 0x7f1   :  { %10283 = vmatpush.bf16.msra.mxu2 %v15985_v58  ;;  %10258 = vmatpush.bf16.msra.mxu0 %v15713_v21  ;;  %v16542_v58 = vld [vmem:[#allocation8 + $0x6b0] sm:$0xf0]  ;;  %v18330_v21 = vld [vmem:[#allocation8 + $0x584] sm:$0xf]  ;;  %v8453_v16 = vadd.f32 %v19239_v57, %v8440_v6  ;;  %v18217_v57 = vld [vmem:[#allocation8 + $0x1f4] sm:$0xf0] }
 0x7f2   :  { %v16545_v48 = vor.u32 %v18366_v60, %v16542_v58  ;;  %v18318_v60 = vld [vmem:[#allocation8 + $0x524] sm:$0xf]  ;;  %v8506_v58 = vpop.f32.mrf.mxu1  ;;  %v18213_v46 = vld [vmem:[#allocation8 + $0x1d4] sm:$0xf0] }
 0x7f3   :  { %10271 = vmatpush.bf16.msra.mxu1 %v15841_v7  ;;  %v16398_v7 = vld [vmem:[#allocation8 + $0x590] sm:$0xf0]  ;;  %10292 = vmatpush.bf16.msra.mxu3 %v16177_v62  ;;  %v18245_v6 = vld [vmem:[#allocation8 + $0x2d4] sm:$0xf0] }
 0x7f4   :  { %v16401_v12 = vor.u32 %v18330_v21, %v16398_v7  ;;  %v16350_v62 = vld [vmem:[#allocation8 + $0x530] sm:$0xf0] }
 0x7f5   :  { %10284 = vmatpush.bf16.msra.mxu2 %v15969_v22  ;;  %10259 = vmatpush.bf16.msra.mxu0 %v15697_v30  ;;  %v19248_v22 = vpop.f32.mrf.mxu0  ;;  %v16145_v30 = vor.u32 %v18266_v42, %v16142_v19  ;;  %v16353_v15 = vor.u32 %v18318_v60, %v16350_v62  ;;  %v16206_v7 = vld [vmem:[#allocation8 + $0x410] sm:$0xf0]  ;;  %v15812_v19 = vld [vmem:[#allocation8 + $0xe8] sm:$0xf]  ;;  %v18241_v60 = vld [vmem:[#allocation8 + $0x2b4] sm:$0xf0] }
 0x7f6   :  { %v16462_v42 = vld [vmem:[#allocation8 + $0x610] sm:$0xf0] }
 0x7f7   :  { %10272 = vmatpush.bf16.msra.mxu1 %v15825_v41  ;;  %10293 = vmatpush.bf16.msra.mxu3 %v16161_v23  ;;  %v16257_v41 = vor.u32 %v18294_v33, %v16254_v45  ;;  %v8466_v23 = vadd.f32 %v19241_v28, %v8453_v16  ;;  %v8519_v33 = vpop.f32.mrf.mxu2  ;;  %v18173_v16 = vld [vmem:[#allocation8 + $0x94] sm:$0xf0] }
 0x7f8   :  { %10260 = vmatmul.bf16.vlgmr.msra.gmra.mxu0 %v19207_v3 }
 0x7f9   :  { %10285 = vmatpush.bf16.msra.mxu2 %v15953_v39  ;;  %10304 = vmatpush.bf16.msrb.mxu0 %v16321_v44  ;;  %v18262_v39 = vld [vmem:[#allocation8 + $0x364] sm:$0xf]  ;;  %v16126_v44 = vld [vmem:[#allocation8 + $0x370] sm:$0xf0]  ;;  %v8479_v28 = vadd.f32 %v19243_v50, %v8466_v23  ;;  %v18169_v23 = vld [vmem:[#allocation8 + $0x74] sm:$0xf0] }
 0x7fa   :  { %10273 = vmatmul.bf16.vlgmr.msra.gmra.mxu1 %v19209_v4  ;;  %v16129_v40 = vor.u32 %v18262_v39, %v16126_v44 }
 0x7fb   :  { %10317 = vmatpush.bf16.msrb.mxu1 %v16449_v32  ;;  %v18290_v32 = vld [vmem:[#allocation8 + $0x444] sm:$0xf]  ;;  %10294 = vmatpush.bf16.msra.mxu3 %v16145_v30  ;;  %v16337_v30 = vor.u32 %v18314_v2, %v16334_v8  ;;  %v8492_v29 = vadd.f32 %v19248_v22, %v8479_v28 }
 0x7fc   :  { %10286 = vmatmul.bf16.vlgmr.msra.gmra.mxu2 %v19211_v10 }
 0x7fd   :  { %10330 = vmatpush.bf16.msrb.mxu2 %v16577_v26  ;;  %10305 = vmatpush.bf16.msrb.mxu0 %v16305_v49  ;;  %v16238_v26 = vld [vmem:[#allocation8 + $0x450] sm:$0xf0]  ;;  %v19256_v49 = vpop.f32.mrf.mxu3  ;;  %v8493_v13 = vpop.f32.mrf.mxu0  ;;  %v8505_v22 = vadd.f32 %v19250_v35, %v8492_v29  ;;  %v16020_v35 = vld [vmem:[#allocation8 + $0x288] sm:$0xf] }
 0x7fe   :  { %v16241_v24 = vor.u32 %v18290_v32, %v16238_v26  ;;  %v16078_v32 = vld [vmem:[#allocation8 + $0x310] sm:$0xf0]  ;;  %v16069_v26 = vor.u32 %v18249_v11, %v16068_v38  ;;  %v15925_v13 = vor.u32 %v18213_v46, %v15924_v37  ;;  %v15860_v38 = vld [vmem:[#allocation8 + $0x148] sm:$0xf]  ;;  %v18197_v11 = vld [vmem:[#allocation8 + $0x154] sm:$0xf0] }
 0x7ff   :  { %10318 = vmatpush.bf16.msrb.mxu1 %v16433_v51  ;;  %v18258_v51 = vld [vmem:[#allocation8 + $0x344] sm:$0xf]  ;;  %10295 = vmatpush.bf16.msra.mxu3 %v16129_v40  ;;  %v16052_v40 = vld [vmem:[#allocation8 + $0x2c8] sm:$0xf]  ;;  %v8518_v58 = vadd.f32 %v19252_v36, %v8505_v22  ;;  %v18161_v46 = vld [vmem:[#allocation8 + $0x34] sm:$0xf0] }
 0x800   :  { %v15748_v36 = vld [vmem:[#allocation8 + $0x68] sm:$0xf]  ;;  %v18157_v22 = vld [vmem:[#allocation8 + $0x14] sm:$0xf0] }
 0x801   :  { %10331 = vmatpush.bf16.msrb.mxu2 %v16561_v20  ;;  %10306 = vmatpush.bf16.msrb.mxu0 %v16289_v54  ;;  %v16110_v20 = vld [vmem:[#allocation8 + $0x350] sm:$0xf0]  ;;  %v18350_v54 = vld [vmem:[#allocation8 + $0x624] sm:$0xf]  ;;  %v15844_v29 = vld [vmem:[#allocation8 + $0x128] sm:$0xf] }
 0x802   :  { %v16113_v61 = vor.u32 %v18258_v51, %v16110_v20  ;;  %v16481_v21 = vor.u32 %v18350_v54, %v16478_v0  ;;  %v15780_v51 = vld [vmem:[#allocation8 + $0xa8] sm:$0xf]  ;;  %v16053_v20 = vor.u32 %v18245_v6, %v16052_v40  ;;  %v18193_v40 = vld [vmem:[#allocation8 + $0x134] sm:$0xf0] }
 0x803   :  { %10319 = vmatpush.bf16.msrb.mxu1 %v16417_v25  ;;  %v18282_v25 = vld [vmem:[#allocation8 + $0x404] sm:$0xf]  ;;  %v15764_v0 = vld [vmem:[#allocation8 + $0x88] sm:$0xf] }
 0x804   :  { %10296 = vmatpush.bf16.msra.mxu3 %v16113_v61  ;;  %v16209_v17 = vor.u32 %v18282_v25, %v16206_v7  ;;  %v16037_v61 = vor.u32 %v18241_v60, %v16036_v59  ;;  %v18205_v25 = vld [vmem:[#allocation8 + $0x194] sm:$0xf0]  ;;  %v15828_v59 = vld [vmem:[#allocation8 + $0x108] sm:$0xf] }
 0x805   :  { %10332 = vmatpush.bf16.msrb.mxu2 %v16545_v48  ;;  %10307 = vmatpush.bf16.msrb.mxu0 %v16273_v34  ;;  %v18254_v48 = vld [vmem:[#allocation8 + $0x324] sm:$0xf]  ;;  %v8532_v43 = vpop.f32.mrf.mxu3 }
 0x806   :  { %v18346_v34 = vld [vmem:[#allocation8 + $0x604] sm:$0xf]  ;;  %v16097_v45 = vor.u32 %v18254_v48, %v16094_v5  ;;  %v18237_v48 = vld [vmem:[#allocation8 + $0x294] sm:$0xf0]  ;;  %v8531_v5 = vadd.f32 %v19256_v49, %v8518_v58  ;;  %v15732_v49 = vld [vmem:[#allocation8 + $0x48] sm:$0xf] }
 0x807   :  { %10320 = vmatpush.bf16.msrb.mxu1 %v16401_v12  ;;  %v18185_v12 = vld [vmem:[#allocation8 + $0xf4] sm:$0xf0]  ;;  %v16021_v8 = vor.u32 %v18237_v48, %v16020_v35 }
 0x808   :  { %v15813_v39 = vor.u32 %v18185_v12, %v15812_v19  ;;  %10297 = vmatpush.bf16.msra.mxu3 %v16097_v45  ;;  %v16004_v12 = vld [vmem:[#allocation8 + $0x268] sm:$0xf]  ;;  %v18189_v58 = vld [vmem:[#allocation8 + $0x114] sm:$0xf0] }
 0x809   :  { %10333 = vmatpush.bf16.msrb.mxu2 %v16529_v14  ;;  %10308 = vmatpush.bf16.msrb.mxu0 %v16257_v41  ;;  %v15940_v14 = vld [vmem:[#allocation8 + $0x1e8] sm:$0xf]  ;;  %v16465_v41 = vor.u32 %v18346_v34, %v16462_v42  ;;  %v18201_v42 = vld [vmem:[#allocation8 + $0x174] sm:$0xf0] }
 0x80a   :  { %v15941_v44 = vor.u32 %v18217_v57, %v15940_v14  ;;  %v15876_v34 = vld [vmem:[#allocation8 + $0x168] sm:$0xf]  ;;  %v18233_v14 = vld [vmem:[#allocation8 + $0x274] sm:$0xf0]  ;;  %v15749_v57 = vor.u32 %v18169_v23, %v15748_v36  ;;  %v15829_v36 = vor.u32 %v18189_v58, %v15828_v59  ;;  %v16638_v59 = vld [vmem:[#allocation8 + $0x770] sm:$0xf0] }
 0x80b   :  { %10321 = vmatpush.bf16.msrb.mxu1 %v16385_v31  ;;  %v15796_v31 = vld [vmem:[#allocation8 + $0xc8] sm:$0xf]  ;;  %v15877_v33 = vor.u32 %v18201_v42, %v15876_v34  ;;  %v16005_v45 = vor.u32 %v18233_v14, %v16004_v12  ;;  %v18345_v48 = vld [vmem:[#allocation8 + $0x5f4] sm:$0xf0] }
 0x80c   :  { %v15797_v50 = vor.u32 %v18181_v18, %v15796_v31  ;;  %v16308_v12 = vld [vmem:[#allocation8 + $0x4c8] sm:$0xf]  ;;  %v18309_v14 = vld [vmem:[#allocation8 + $0x4d4] sm:$0xf0] }
 0x80d   :  { %10334 = vmatpush.bf16.msrb.mxu2 %v16513_v1  ;;  %10309 = vmatpush.bf16.msrb.mxu0 %v16241_v24  ;;  %v18250_v1 = vld [vmem:[#allocation8 + $0x304] sm:$0xf] }
 0x80e   :  { %v16081_v24 = vor.u32 %v18250_v1, %v16078_v32  ;;  %v15861_v32 = vor.u32 %v18197_v11, %v15860_v38  ;;  %v18398_v38 = vld [vmem:[#allocation8 + $0x7a4] sm:$0xf]  ;;  %v16670_v11 = vld [vmem:[#allocation8 + $0x7b0] sm:$0xf0] }
 0x80f   :  { %10322 = vmatpush.bf16.msrb.mxu1 %v16369_v47  ;;  %v18177_v47 = vld [vmem:[#allocation8 + $0xb4] sm:$0xf0] }
 0x810   :  { %10298 = vmatpush.bf16.msra.mxu3 %v16081_v24  ;;  %v15781_v62 = vor.u32 %v18177_v47, %v15780_v51  ;;  %v15972_v24 = vld [vmem:[#allocation8 + $0x228] sm:$0xf]  ;;  %v16702_v51 = vld [vmem:[#allocation8 + $0x7f0] sm:$0xf0] }
 0x811   :  { %10335 = vmatpush.bf16.msrb.mxu2 %v16497_v53  ;;  %10310 = vmatpush.bf16.msrb.mxu0 %v16225_v9  ;;  %v15908_v53 = vld [vmem:[#allocation8 + $0x1a8] sm:$0xf] }
 0x812   :  { %v15909_v54 = vor.u32 %v18209_v56, %v15908_v53  ;;  %v15892_v9 = vld [vmem:[#allocation8 + $0x188] sm:$0xf]  ;;  %v15845_v56 = vor.u32 %v18193_v40, %v15844_v29 }
 0x813   :  { %10323 = vmatpush.bf16.msrb.mxu1 %v16353_v15  ;;  %v15893_v7 = vor.u32 %v18205_v25, %v15892_v9  ;;  %v18313_v9 = vld [vmem:[#allocation8 + $0x4f4] sm:$0xf0]  ;;  %v16452_v25 = vld [vmem:[#allocation8 + $0x5e8] sm:$0xf] }
 0x814   :  { %v16453_v42 = vor.u32 %v18345_v48, %v16452_v25  ;;  %v16276_v40 = vld [vmem:[#allocation8 + $0x488] sm:$0xf] }
 0x815   :  { %10336 = vmatpush.bf16.msrb.mxu2 %v16481_v21  ;;  %10311 = vmatpush.bf16.msrb.mxu0 %v16209_v17  ;;  %v8543_v15 = vpop.f32.mrf.mxu0  ;;  %v15765_v21 = vor.u32 %v18173_v16, %v15764_v0  ;;  %v18165_v17 = vld [vmem:[#allocation8 + $0x54] sm:$0xf0]  ;;  %v16324_v16 = vld [vmem:[#allocation8 + $0x4e8] sm:$0xf] }
 0x816   :  { %v8544_v19 = vadd.f32 %v8543_v15, %v8531_v5  ;;  %v15733_v1 = vor.u32 %v18165_v17, %v15732_v49  ;;  %v16580_v5 = vld [vmem:[#allocation8 + $0x6e8] sm:$0xf]  ;;  %v18377_v15 = vld [vmem:[#allocation8 + $0x6f4] sm:$0xf0]  ;;  %v16325_v34 = vor.u32 %v18313_v9, %v16324_v16 }
 0x817   :  { %10324 = vmatpush.bf16.msrb.mxu1 %v16337_v30  ;;  %v8556_v2 = vpop.f32.mrf.mxu1  ;;  %v15988_v30 = vld [vmem:[#allocation8 + $0x248] sm:$0xf]  ;;  %v18341_v49 = vld [vmem:[#allocation8 + $0x5d4] sm:$0xf0] }
 0x818   :  { %10312 = vmatmul.bf16.vlgmr.msrb.gmra.mxu0 %v19228_v52  ;;  %v8557_v43 = vadd.f32 %v8556_v2, %v8544_v19  ;;  %v18402_v2 = vld [vmem:[#allocation8 + $0x7c4] sm:$0xf]  ;;  %v16581_v19 = vor.u32 %v18377_v15, %v16580_v5  ;;  %v18373_v17 = vld [vmem:[#allocation8 + $0x6d4] sm:$0xf0]  ;;  %v16260_v16 = vld [vmem:[#allocation8 + $0x468] sm:$0xf] }
 0x819   :  { %10337 = vmatpush.bf16.msrb.mxu2 %v16465_v41  ;;  %10356 = vmatpush.bf16.msra.mxu0 %v15813_v39  ;;  %v18229_v41 = vld [vmem:[#allocation8 + $0x254] sm:$0xf0]  ;;  %v16388_v25 = vld [vmem:[#allocation8 + $0x568] sm:$0xf] }
 0x81a   :  { %10325 = vmatmul.bf16.vlgmr.msrb.gmra.mxu1 %v19230_v27  ;;  %v15989_v37 = vor.u32 %v18229_v41, %v15988_v30  ;;  %v16292_v30 = vld [vmem:[#allocation8 + $0x4a8] sm:$0xf]  ;;  %v18297_v9 = vld [vmem:[#allocation8 + $0x474] sm:$0xf0] }
 0x81b   :  { %10369 = vmatpush.bf16.msra.mxu1 %v15941_v44  ;;  %v18329_v5 = vld [vmem:[#allocation8 + $0x574] sm:$0xf0]  ;;  %v16516_v15 = vld [vmem:[#allocation8 + $0x668] sm:$0xf] }
 0x81c   :  { %10338 = vmatmul.bf16.vlgmr.msrb.gmra.mxu2 %v19232_v55 }
 0x81d   :  { %10382 = vmatpush.bf16.msra.mxu2 %v16069_v26  ;;  %10357 = vmatpush.bf16.msra.mxu0 %v15797_v50  ;;  %v8545_v31 = vpop.f32.mrf.mxu0  ;;  %v15716_v26 = vld [vmem:[#allocation8 + $0x28] sm:$0xf]  ;;  %v18225_v50 = vld [vmem:[#allocation8 + $0x234] sm:$0xf0] }
 0x81e   :  { %v15717_v53 = vor.u32 %v18161_v46, %v15716_v26  ;;  %v15973_v60 = vor.u32 %v18225_v50, %v15972_v24  ;;  %v18337_v31 = vld [vmem:[#allocation8 + $0x5b4] sm:$0xf0]  ;;  %v16654_v46 = vld [vmem:[#allocation8 + $0x790] sm:$0xf0] }
 0x81f   :  { %10370 = vmatpush.bf16.msra.mxu1 %v15925_v13  ;;  %v8569_v28 = vpop.f32.mrf.mxu2  ;;  %v8558_v18 = vpop.f32.mrf.mxu1  ;;  %v18406_v13 = vld [vmem:[#allocation8 + $0x7e4] sm:$0xf]  ;;  %v18369_v26 = vld [vmem:[#allocation8 + $0x6b4] sm:$0xf0] }
 0x820   :  { %v8570_v39 = vadd.f32 %v8569_v28, %v8557_v43  ;;  %v16309_v43 = vor.u32 %v18309_v14, %v16308_v12  ;;  %v19272_v18 = vld [vmem:[#allocation10] sm:$0xf]  ;;  %v16372_v12 = vld [vmem:[#allocation8 + $0x548] sm:$0xf] }
 0x821   :  { %10383 = vmatpush.bf16.msra.mxu2 %v16053_v20  ;;  %10358 = vmatpush.bf16.msra.mxu0 %v15781_v62  ;;  %v8582_v44 = vpop.f32.mrf.mxu3  ;;  %v15700_v20 = vld [vmem:[#allocation8 + $0x8] sm:$0xf]  ;;  %v8860_v50 = vperm.slane %v19272_v18, 0 }
 0x822   :  { %v8583_v6 = vadd.f32 %v8582_v44, %v8570_v39  ;;  %v15956_v62 = vld [vmem:[#allocation8 + $0x208] sm:$0xf]  ;;  %v18305_v39 = vld [vmem:[#allocation8 + $0x4b4] sm:$0xf0] }
 0x823   :  { %10371 = vmatpush.bf16.msra.mxu1 %v15909_v54  ;;  %v18221_v54 = vld [vmem:[#allocation8 + $0x214] sm:$0xf0]  ;;  %v16420_v44 = vld [vmem:[#allocation8 + $0x5a8] sm:$0xf]  ;;  %v16293_v29 = vor.u32 %v18305_v39, %v16292_v30 }
 0x824   :  { %v8593_v47 = vmax.f32 %v8583_v6, 0.0  ;;  %v15957_v23 = vor.u32 %v18221_v54, %v15956_v62  ;;  %v16421_v6 = vor.u32 %v18337_v31, %v16420_v44  ;;  %v16228_v31 = vld [vmem:[#allocation8 + $0x428] sm:$0xf] }
 0x825   :  { %10384 = vmatpush.bf16.msra.mxu2 %v16037_v61  ;;  %10359 = vmatpush.bf16.msra.mxu0 %v15765_v21  ;;  %v16705_v61 = vor.u32 %v18406_v13, %v16702_v51  ;;  %v18301_v13 = vld [vmem:[#allocation8 + $0x494] sm:$0xf0]  ;;  %v16404_v51 = vld [vmem:[#allocation8 + $0x588] sm:$0xf] }
 0x826   :  { %v19268_v0 = vpack.c.bf16 %v8593_v47, %v8593_v47  ;;  %v18333_v47 = vld [vmem:[#allocation8 + $0x594] sm:$0xf0] }
 0x827   :  { %10372 = vmatpush.bf16.msra.mxu1 %v15893_v7  ;;  %v8571_v35 = vpop.f32.mrf.mxu2  ;;  %v15701_v7 = vor.u32 %v18157_v22, %v15700_v20  ;;  %v18390_v22 = vld [vmem:[#allocation8 + $0x764] sm:$0xf]  ;;  %v16405_v54 = vor.u32 %v18333_v47, %v16404_v51  ;;  %v18281_v51 = vld [vmem:[#allocation8 + $0x3f4] sm:$0xf0] }
 0x828   :  { %10247 = vmatmul.bf16.vlgmr.msrb.gmra.mxu3 %v19268_v0  ;;  %v16641_v48 = vor.u32 %v18390_v22, %v16638_v59  ;;  %v16340_v22 = vld [vmem:[#allocation8 + $0x508] sm:$0xf] }
 0x829   :  { %10385 = vmatpush.bf16.msra.mxu2 %v16021_v8  ;;  %10360 = vmatpush.bf16.msra.mxu0 %v15749_v57  ;;  %v8584_v21 = vpop.f32.mrf.mxu3  ;;  %v16686_v8 = vld [vmem:[#allocation8 + $0x7d0] sm:$0xf0]  ;;  %v16436_v57 = vld [vmem:[#allocation8 + $0x5c8] sm:$0xf] }
 0x82a   :  { %10343 = vmatpush.bf16.msrb.mxu3 %v16705_v61  ;;  %v16437_v41 = vor.u32 %v18341_v49, %v16436_v57  ;;  %v18361_v21 = vld [vmem:[#allocation8 + $0x674] sm:$0xf0] }
 0x82b   :  { %10373 = vmatpush.bf16.msra.mxu1 %v15877_v33  ;;  %v16689_v33 = vor.u32 %v18402_v2, %v16686_v8  ;;  %v16261_v8 = vor.u32 %v18297_v9, %v16260_v16  ;;  %v18325_v57 = vld [vmem:[#allocation8 + $0x554] sm:$0xf0]  ;;  %v15814_v16 = vld [vmem:[#allocation8 + $0xf8] sm:$0xf0]  ;;  %v18215_v9 = vld [vmem:[#allocation8 + $0x1ec] sm:$0xf] }
 0x82c   :  { %v18357_v49 = vld [vmem:[#allocation8 + $0x654] sm:$0xf0]  ;;  %v16373_v39 = vor.u32 %v18325_v57, %v16372_v12  ;;  %v15798_v12 = vld [vmem:[#allocation8 + $0xd8] sm:$0xf0] }
 0x82d   :  { %10386 = vmatpush.bf16.msra.mxu2 %v16005_v45  ;;  %10361 = vmatpush.bf16.msra.mxu0 %v15733_v1  ;;  %v16564_v45 = vld [vmem:[#allocation8 + $0x6c8] sm:$0xf]  ;;  %v16673_v1 = vor.u32 %v18398_v38, %v16670_v11 }
 0x82e   :  { %v16565_v28 = vor.u32 %v18373_v17, %v16564_v45  ;;  %10344 = vmatpush.bf16.msrb.mxu3 %v16689_v33  ;;  %v16500_v33 = vld [vmem:[#allocation8 + $0x648] sm:$0xf]  ;;  %v18382_v45 = vld [vmem:[#allocation8 + $0x724] sm:$0xf]  ;;  %v16606_v17 = vld [vmem:[#allocation8 + $0x730] sm:$0xf0] }
 0x82f   :  { %10374 = vmatpush.bf16.msra.mxu1 %v15861_v32  ;;  %v16548_v32 = vld [vmem:[#allocation8 + $0x6a8] sm:$0xf]  ;;  %v16501_v44 = vor.u32 %v18357_v49, %v16500_v33  ;;  %v15926_v33 = vld [vmem:[#allocation8 + $0x1d8] sm:$0xf0]  ;;  %v18243_v49 = vld [vmem:[#allocation8 + $0x2cc] sm:$0xf] }
 0x830   :  { %v16549_v24 = vor.u32 %v18369_v26, %v16548_v32  ;;  %v16356_v32 = vld [vmem:[#allocation8 + $0x528] sm:$0xf]  ;;  %v16609_v26 = vor.u32 %v18382_v45, %v16606_v17  ;;  %v16054_v45 = vld [vmem:[#allocation8 + $0x2d8] sm:$0xf0] }
 0x831   :  { %10387 = vmatpush.bf16.msra.mxu2 %v15989_v37  ;;  %10362 = vmatpush.bf16.msra.mxu0 %v15717_v53  ;;  %v18394_v37 = vld [vmem:[#allocation8 + $0x784] sm:$0xf]  ;;  %v16532_v53 = vld [vmem:[#allocation8 + $0x688] sm:$0xf] }
 0x832   :  { %10345 = vmatpush.bf16.msrb.mxu3 %v16673_v1  ;;  %v16657_v20 = vor.u32 %v18394_v37, %v16654_v46  ;;  %v18289_v1 = vld [vmem:[#allocation8 + $0x434] sm:$0xf0]  ;;  %v16484_v46 = vld [vmem:[#allocation8 + $0x628] sm:$0xf] }
 0x833   :  { %10375 = vmatpush.bf16.msra.mxu1 %v15845_v56  ;;  %v18365_v56 = vld [vmem:[#allocation8 + $0x694] sm:$0xf0]  ;;  %v16164_v17 = vld [vmem:[#allocation8 + $0x3a8] sm:$0xf] }
 0x834   :  { %v16533_v61 = vor.u32 %v18365_v56, %v16532_v53  ;;  %v18321_v37 = vld [vmem:[#allocation8 + $0x534] sm:$0xf0]  ;;  %v16212_v53 = vld [vmem:[#allocation8 + $0x408] sm:$0xf] }
 0x835   :  { %10388 = vmatpush.bf16.msra.mxu2 %v15973_v60  ;;  %10363 = vmatpush.bf16.msra.mxu0 %v15701_v7  ;;  %v16277_v60 = vor.u32 %v18301_v13, %v16276_v40  ;;  %v10157_v58 = vpop.f32.mrf.mxu0  ;;  %v18386_v7 = vld [vmem:[#allocation8 + $0x744] sm:$0xf]  ;;  %v16196_v13 = vld [vmem:[#allocation8 + $0x3e8] sm:$0xf]  ;;  %v18285_v56 = vld [vmem:[#allocation8 + $0x414] sm:$0xf0] }
 0x836   :  { %10346 = vmatpush.bf16.msrb.mxu3 %v16657_v20  ;;  %v10158_v35 = vadd.f32 %v10157_v58, %v8860_v50  ;;  %v16229_v50 = vor.u32 %v18289_v1, %v16228_v31  ;;  %v16357_v20 = vor.u32 %v18321_v37, %v16356_v32  ;;  %v16468_v58 = vld [vmem:[#allocation8 + $0x608] sm:$0xf]  ;;  %v15910_v31 = vld [vmem:[#allocation8 + $0x1b8] sm:$0xf0]  ;;  %v18239_v1 = vld [vmem:[#allocation8 + $0x2ac] sm:$0xf] }
 0x837   :  { %10376 = vmatpush.bf16.msra.mxu1 %v15829_v36  ;;  %v10170_v62 = vpop.f32.mrf.mxu1  ;;  %v16622_v36 = vld [vmem:[#allocation8 + $0x750] sm:$0xf0]  ;;  %v16038_v32 = vld [vmem:[#allocation8 + $0x2b8] sm:$0xf0]  ;;  %v18269_v37 = vld [vmem:[#allocation8 + $0x394] sm:$0xf0] }
 0x838   :  { %10364 = vmatmul.bf16.vlgmr.msra.gmra.mxu0 %v19207_v3  ;;  %v10171_v2 = vadd.f32 %v10170_v62, %v10158_v35  ;;  %10299 = vmatmul.bf16.vlgmr.msra.gmra.mxu3 %v19213_v63  ;;  %v16625_v14 = vor.u32 %v18386_v7, %v16622_v36  ;;  %v18349_v62 = vld [vmem:[#allocation8 + $0x614] sm:$0xf0] }
 0x839   :  { %10389 = vmatpush.bf16.msra.mxu2 %v15957_v23  ;;  %10408 = vmatpush.bf16.msrb.mxu0 %v16325_v34  ;;  %v16389_v23 = vor.u32 %v18329_v5, %v16388_v25  ;;  %v16517_v34 = vor.u32 %v18361_v21, %v16516_v15  ;;  %v15942_v5 = vld [vmem:[#allocation8 + $0x1f8] sm:$0xf0]  ;;  %v18247_v15 = vld [vmem:[#allocation8 + $0x2ec] sm:$0xf]  ;;  %v16469_v36 = vor.u32 %v18349_v62, %v16468_v58 }
 0x83a   :  { %10377 = vmatmul.bf16.vlgmr.msra.gmra.mxu1 %v19209_v4  ;;  %10347 = vmatpush.bf16.msrb.mxu3 %v16641_v48  ;;  %v16213_v48 = vor.u32 %v18285_v56, %v16212_v53  ;;  %v16070_v21 = vld [vmem:[#allocation8 + $0x2f8] sm:$0xf0]  ;;  %v16132_v56 = vld [vmem:[#allocation8 + $0x368] sm:$0xf] }
 0x83b   :  { %10421 = vmatpush.bf16.msrb.mxu1 %v16453_v42  ;;  %v16244_v42 = vld [vmem:[#allocation8 + $0x448] sm:$0xf]  ;;  %v16022_v53 = vld [vmem:[#allocation8 + $0x298] sm:$0xf0] }
 0x83c   :  { %10390 = vmatmul.bf16.vlgmr.msra.gmra.mxu2 %v19211_v10 }
 0x83d   :  { %10434 = vmatpush.bf16.msrb.mxu2 %v16581_v19  ;;  %10409 = vmatpush.bf16.msrb.mxu0 %v16309_v43  ;;  %v18293_v19 = vld [vmem:[#allocation8 + $0x454] sm:$0xf0] }
 0x83e   :  { %v16245_v43 = vor.u32 %v18293_v19, %v16244_v42  ;;  %10348 = vmatpush.bf16.msrb.mxu3 %v16625_v14  ;;  %v16073_v42 = vor.u32 %v18247_v15, %v16070_v21  ;;  %v18179_v19 = vld [vmem:[#allocation8 + $0xcc] sm:$0xf]  ;;  %v16006_v15 = vld [vmem:[#allocation8 + $0x278] sm:$0xf0] }
 0x83f   :  { %10422 = vmatpush.bf16.msrb.mxu1 %v16437_v41  ;;  %v10183_v38 = vpop.f32.mrf.mxu2  ;;  %v10159_v41 = vpop.f32.mrf.mxu0  ;;  %v18211_v14 = vld [vmem:[#allocation8 + $0x1cc] sm:$0xf] }
 0x840   :  { %v10184_v30 = vadd.f32 %v10183_v38, %v10171_v2  ;;  %v16180_v2 = vld [vmem:[#allocation8 + $0x3c8] sm:$0xf]  ;;  %v18273_v38 = vld [vmem:[#allocation8 + $0x3b4] sm:$0xf0]  ;;  %v18175_v41 = vld [vmem:[#allocation8 + $0xac] sm:$0xf] }
 0x841   :  { %10435 = vmatpush.bf16.msrb.mxu2 %v16565_v28  ;;  %10410 = vmatpush.bf16.msrb.mxu0 %v16293_v29  ;;  %v10196_v11 = vpop.f32.mrf.mxu3  ;;  %v10172_v28 = vpop.f32.mrf.mxu1  ;;  %v18353_v29 = vld [vmem:[#allocation8 + $0x634] sm:$0xf0] }
 0x842   :  { %v19278_v40 = vadd.f32 %v10196_v11, %v10184_v30  ;;  %v16485_v47 = vor.u32 %v18353_v29, %v16484_v46  ;;  %10349 = vmatpush.bf16.msrb.mxu3 %v16609_v26  ;;  %v15801_v11 = vor.u32 %v18179_v19, %v15798_v12  ;;  %v16057_v30 = vor.u32 %v18243_v49, %v16054_v45  ;;  %v15782_v28 = vld [vmem:[#allocation8 + $0xb8] sm:$0xf0]  ;;  %v16148_v26 = vld [vmem:[#allocation8 + $0x388] sm:$0xf]  ;;  %v18257_v45 = vld [vmem:[#allocation8 + $0x334] sm:$0xf0] }
 0x843   :  { %10423 = vmatpush.bf16.msrb.mxu1 %v16421_v6  ;;  %v18378_v6 = vld [vmem:[#allocation8 + $0x704] sm:$0xf]  ;;  %v15785_v46 = vor.u32 %v18175_v41, %v15782_v28  ;;  %v15862_v12 = vld [vmem:[#allocation8 + $0x158] sm:$0xf0]  ;;  %v16100_v49 = vld [vmem:[#allocation8 + $0x328] sm:$0xf] }
 0x844   :  { %v18159_v28 = vld [vmem:[#allocation8 + $0x2c] sm:$0xf] }
 0x845   :  { %10436 = vmatpush.bf16.msrb.mxu2 %v16549_v24  ;;  %10411 = vmatpush.bf16.msrb.mxu0 %v16277_v60  ;;  %v16590_v24 = vld [vmem:[#allocation8 + $0x710] sm:$0xf0]  ;;  %v18317_v60 = vld [vmem:[#allocation8 + $0x514] sm:$0xf0] }
 0x846   :  { %v16593_v59 = vor.u32 %v18378_v6, %v16590_v24  ;;  %v16341_v7 = vor.u32 %v18317_v60, %v16340_v22  ;;  %v16041_v6 = vor.u32 %v18239_v1, %v16038_v32  ;;  %v18171_v24 = vld [vmem:[#allocation8 + $0x8c] sm:$0xf]  ;;  %v18265_v22 = vld [vmem:[#allocation8 + $0x374] sm:$0xf0]  ;;  %v15846_v1 = vld [vmem:[#allocation8 + $0x138] sm:$0xf0] }
 0x847   :  { %10424 = vmatpush.bf16.msrb.mxu1 %v16405_v54  ;;  %v16197_v54 = vor.u32 %v18281_v51, %v16196_v13  ;;  %v10185_v25 = vpop.f32.mrf.mxu2  ;;  %v18203_v13 = vld [vmem:[#allocation8 + $0x18c] sm:$0xf]  ;;  %v16149_v51 = vor.u32 %v18269_v37, %v16148_v26  ;;  %v15974_v26 = vld [vmem:[#allocation8 + $0x238] sm:$0xf0]  ;;  %v16084_v37 = vld [vmem:[#allocation8 + $0x308] sm:$0xf] }
 0x848   :  { %10350 = vmatpush.bf16.msrb.mxu3 %v16593_v59  ;;  %v18199_v25 = vld [vmem:[#allocation8 + $0x16c] sm:$0xf] }
 0x849   :  { %10437 = vmatpush.bf16.msrb.mxu2 %v16533_v61  ;;  %10412 = vmatpush.bf16.msrb.mxu0 %v16261_v8  ;;  %v18183_v61 = vld [vmem:[#allocation8 + $0xec] sm:$0xf]  ;;  %v10198_v35 = vpop.f32.mrf.mxu3  ;;  %v18277_v8 = vld [vmem:[#allocation8 + $0x3d4] sm:$0xf0] }
 0x84a   :  { %v16181_v57 = vor.u32 %v18277_v8, %v16180_v2  ;;  %v16133_v35 = vor.u32 %v18265_v22, %v16132_v56  ;;  %v18223_v32 = vld [vmem:[#allocation8 + $0x22c] sm:$0xf]  ;;  %v15830_v56 = vld [vmem:[#allocation8 + $0x118] sm:$0xf0] }
 0x84b   :  { %10425 = vmatpush.bf16.msrb.mxu1 %v16389_v23  ;;  %v15817_v23 = vor.u32 %v18183_v61, %v15814_v16  ;;  %10351 = vmatmul.bf16.vlgmr.msrb.gmra.mxu3 %v19268_v0  ;;  %v18167_v16 = vld [vmem:[#allocation8 + $0x6c] sm:$0xf] }
 0x84c   :  { %10395 = vmatpush.bf16.msra.mxu3 %v16197_v54  ;;  %v18219_v22 = vld [vmem:[#allocation8 + $0x20c] sm:$0xf] }
 0x84d   :  { %10438 = vmatpush.bf16.msrb.mxu2 %v16517_v34  ;;  %10413 = vmatpush.bf16.msrb.mxu0 %v16245_v43  ;;  %v15945_v34 = vor.u32 %v18215_v9, %v15942_v5  ;;  %v15929_v43 = vor.u32 %v18211_v14, %v15926_v33  ;;  %v15750_v9 = vld [vmem:[#allocation8 + $0x78] sm:$0xf0]  ;;  %v18231_v5 = vld [vmem:[#allocation8 + $0x26c] sm:$0xf] }
 0x84e   :  { %v15753_v2 = vor.u32 %v18167_v16, %v15750_v9  ;;  %v18227_v14 = vld [vmem:[#allocation8 + $0x24c] sm:$0xf]  ;;  %v16454_v9 = vld [vmem:[#allocation8 + $0x5f8] sm:$0xf0] }
 0x84f   :  { %10426 = vmatpush.bf16.msrb.mxu1 %v16373_v39  ;;  %v18207_v39 = vld [vmem:[#allocation8 + $0x1ac] sm:$0xf] }
 0x850   :  { %10396 = vmatpush.bf16.msra.mxu3 %v16181_v57  ;;  %v15913_v29 = vor.u32 %v18207_v39, %v15910_v31  ;;  %v15990_v57 = vld [vmem:[#allocation8 + $0x258] sm:$0xf0]  ;;  %v16101_v31 = vor.u32 %v18257_v45, %v16100_v49 }
 0x851   :  { %10439 = vmatpush.bf16.msrb.mxu2 %v16501_v44  ;;  %10414 = vmatpush.bf16.msrb.mxu0 %v16229_v50  ;;  %v16165_v44 = vor.u32 %v18273_v38, %v16164_v17  ;;  %v15766_v50 = vld [vmem:[#allocation8 + $0x98] sm:$0xf0]  ;;  %v15993_v41 = vor.u32 %v18227_v14, %v15990_v57  ;;  %v16676_v14 = vld [vmem:[#allocation8 + $0x7a8] sm:$0xf]  ;;  %v18401_v57 = vld [vmem:[#allocation8 + $0x7b4] sm:$0xf0] }
 0x852   :  { %v15769_v60 = vor.u32 %v18171_v24, %v15766_v50  ;;  %v15718_v39 = vld [vmem:[#allocation8 + $0x38] sm:$0xf0]  ;;  %v18409_v24 = vld [vmem:[#allocation8 + $0x7f4] sm:$0xf0] }
 0x853   :  { %10427 = vmatpush.bf16.msrb.mxu1 %v16357_v20  ;;  %v15894_v20 = vld [vmem:[#allocation8 + $0x198] sm:$0xf0] }
 0x854   :  { %10397 = vmatpush.bf16.msra.mxu3 %v16165_v44  ;;  %v15897_v54 = vor.u32 %v18203_v13, %v15894_v20  ;;  %v18191_v44 = vld [vmem:[#allocation8 + $0x12c] sm:$0xf]  ;;  %v15977_v13 = vor.u32 %v18223_v32, %v15974_v26  ;;  %v15702_v20 = vld [vmem:[#allocation8 + $0x18] sm:$0xf0]  ;;  %v8861_v32 = vperm.slane %v19272_v18, 1 }
 0x855   :  { %10440 = vmatpush.bf16.msrb.mxu2 %v16485_v47  ;;  %10415 = vmatpush.bf16.msrb.mxu0 %v16213_v48  ;;  %v18235_v47 = vld [vmem:[#allocation8 + $0x28c] sm:$0xf]  ;;  %v10209_v59 = vpop.f32.mrf.mxu0  ;;  %v15878_v48 = vld [vmem:[#allocation8 + $0x178] sm:$0xf0]  ;;  %v15849_v50 = vor.u32 %v18191_v44, %v15846_v1  ;;  %v16660_v44 = vld [vmem:[#allocation8 + $0x788] sm:$0xf] }
 0x856   :  { %v10210_v58 = vadd.f32 %v10209_v59, %v19278_v40  ;;  %v16025_v61 = vor.u32 %v18235_v47, %v16022_v53  ;;  %v15881_v8 = vor.u32 %v18199_v25, %v15878_v48  ;;  %v16009_v40 = vor.u32 %v18231_v5, %v16006_v15  ;;  %v18187_v47 = vld [vmem:[#allocation8 + $0x10c] sm:$0xf]  ;;  %v15958_v59 = vld [vmem:[#allocation8 + $0x218] sm:$0xf0]  ;;  %v16692_v5 = vld [vmem:[#allocation8 + $0x7c8] sm:$0xf] }
 0x857   :  { %10428 = vmatpush.bf16.msrb.mxu1 %v16341_v7  ;;  %v10222_v62 = vpop.f32.mrf.mxu1  ;;  %v16116_v7 = vld [vmem:[#allocation8 + $0x348] sm:$0xf]  ;;  %v18375_v25 = vld [vmem:[#allocation8 + $0x6ec] sm:$0xf]  ;;  %v15833_v48 = vor.u32 %v18187_v47, %v15830_v56  ;;  %v18405_v15 = vld [vmem:[#allocation8 + $0x7d4] sm:$0xf0] }
 0x858   :  { %10416 = vmatmul.bf16.vlgmr.msrb.gmra.mxu0 %v19228_v52  ;;  %10398 = vmatpush.bf16.msra.mxu3 %v16149_v51  ;;  %v10223_v21 = vadd.f32 %v10222_v62, %v10210_v58  ;;  %v18155_v51 = vld [vmem:[#allocation8 + $0xc] sm:$0xf] }
 0x859   :  { %10441 = vmatpush.bf16.msrb.mxu2 %v16469_v36  ;;  %10460 = vmatpush.bf16.msra.mxu0 %v15817_v23  ;;  %v18261_v36 = vld [vmem:[#allocation8 + $0x354] sm:$0xf0]  ;;  %v18163_v23 = vld [vmem:[#allocation8 + $0x4c] sm:$0xf]  ;;  %v15705_v16 = vor.u32 %v18155_v51, %v15702_v20 }
 0x85a   :  { %10429 = vmatmul.bf16.vlgmr.msrb.gmra.mxu1 %v19230_v27  ;;  %v16117_v19 = vor.u32 %v18261_v36, %v16116_v7  ;;  %v18311_v62 = vld [vmem:[#allocation8 + $0x4ec] sm:$0xf] }
 0x85b   :  { %10473 = vmatpush.bf16.msra.mxu1 %v15945_v34  ;;  %v15734_v34 = vld [vmem:[#allocation8 + $0x58] sm:$0xf0] }
 0x85c   :  { %10442 = vmatmul.bf16.vlgmr.msrb.gmra.mxu2 %v19232_v55  ;;  %10399 = vmatpush.bf16.msra.mxu3 %v16133_v35  ;;  %v16582_v35 = vld [vmem:[#allocation8 + $0x6f8] sm:$0xf0] }
 0x85d   :  { %10486 = vmatpush.bf16.msra.mxu2 %v16073_v42  ;;  %10461 = vmatpush.bf16.msra.mxu0 %v15801_v11  ;;  %v18195_v42 = vld [vmem:[#allocation8 + $0x14c] sm:$0xf]  ;;  %v10211_v38 = vpop.f32.mrf.mxu0  ;;  %v15737_v11 = vor.u32 %v18163_v23, %v15734_v34  ;;  %v16693_v34 = vor.u32 %v18405_v15, %v16692_v5 }
 0x85e   :  { %v18339_v23 = vld [vmem:[#allocation8 + $0x5cc] sm:$0xf] }
 0x85f   :  { %10474 = vmatpush.bf16.msra.mxu1 %v15929_v43  ;;  %v10235_v33 = vpop.f32.mrf.mxu2  ;;  %v10224_v43 = vpop.f32.mrf.mxu1  ;;  %v18303_v38 = vld [vmem:[#allocation8 + $0x4ac] sm:$0xf] }
 0x860   :  { %v19285_v17 = vadd.f32 %v10235_v33, %v10223_v21  ;;  %10400 = vmatpush.bf16.msra.mxu3 %v16117_v19  ;;  %v15961_v21 = vor.u32 %v18219_v22, %v15958_v59  ;;  %v18371_v19 = vld [vmem:[#allocation8 + $0x6cc] sm:$0xf]  ;;  %v16262_v59 = vld [vmem:[#allocation8 + $0x478] sm:$0xf0] }
 0x861   :  { %10487 = vmatpush.bf16.msra.mxu2 %v16057_v30  ;;  %10462 = vmatpush.bf16.msra.mxu0 %v15785_v46  ;;  %v15865_v30 = vor.u32 %v18195_v42, %v15862_v12  ;;  %v18253_v46 = vld [vmem:[#allocation8 + $0x314] sm:$0xf0]  ;;  %v16438_v42 = vld [vmem:[#allocation8 + $0x5d8] sm:$0xf0]  ;;  %v18335_v43 = vld [vmem:[#allocation8 + $0x5ac] sm:$0xf] }
 0x862   :  { %v16085_v53 = vor.u32 %v18253_v46, %v16084_v37  ;;  %v16566_v12 = vld [vmem:[#allocation8 + $0x6d8] sm:$0xf0]  ;;  %v16441_v49 = vor.u32 %v18339_v23, %v16438_v42  ;;  %v18299_v46 = vld [vmem:[#allocation8 + $0x48c] sm:$0xf]  ;;  %v18385_v42 = vld [vmem:[#allocation8 + $0x734] sm:$0xf0] }
 0x863   :  { %10475 = vmatpush.bf16.msra.mxu1 %v15913_v29  ;;  %v15721_v29 = vor.u32 %v18159_v28, %v15718_v39  ;;  %v16569_v45 = vor.u32 %v18371_v19, %v16566_v12  ;;  %v18367_v28 = vld [vmem:[#allocation8 + $0x6ac] sm:$0xf]  ;;  %v16550_v39 = vld [vmem:[#allocation8 + $0x6b8] sm:$0xf0] }
 0x864   :  { %10401 = vmatpush.bf16.msra.mxu3 %v16101_v31  ;;  %v18397_v31 = vld [vmem:[#allocation8 + $0x794] sm:$0xf0]  ;;  %v16553_v37 = vor.u32 %v18367_v28, %v16550_v39  ;;  %v18295_v22 = vld [vmem:[#allocation8 + $0x46c] sm:$0xf]  ;;  %v16486_v28 = vld [vmem:[#allocation8 + $0x638] sm:$0xf0] }
 0x865   :  { %10488 = vmatpush.bf16.msra.mxu2 %v16041_v6  ;;  %10463 = vmatpush.bf16.msra.mxu0 %v15769_v60  ;;  %v16708_v6 = vld [vmem:[#allocation8 + $0x7e8] sm:$0xf]  ;;  %v18291_v15 = vld [vmem:[#allocation8 + $0x44c] sm:$0xf] }
 0x866   :  { %v16709_v58 = vor.u32 %v18409_v24, %v16708_v6  ;;  %v16661_v6 = vor.u32 %v18397_v31, %v16660_v44  ;;  %v16406_v24 = vld [vmem:[#allocation8 + $0x598] sm:$0xf0]  ;;  %v16596_v39 = vld [vmem:[#allocation8 + $0x708] sm:$0xf]  ;;  %v18381_v44 = vld [vmem:[#allocation8 + $0x714] sm:$0xf0] }
 0x867   :  { %10476 = vmatpush.bf16.msra.mxu1 %v15897_v54  ;;  %v10237_v60 = vpop.f32.mrf.mxu2  ;;  %v16326_v54 = vld [vmem:[#allocation8 + $0x4f8] sm:$0xf0] }
 0x868   :  { %10402 = vmatpush.bf16.msra.mxu3 %v16085_v53  ;;  %v16329_v7 = vor.u32 %v18311_v62, %v16326_v54  ;;  %v18327_v60 = vld [vmem:[#allocation8 + $0x56c] sm:$0xf]  ;;  %v16390_v62 = vld [vmem:[#allocation8 + $0x578] sm:$0xf0] }
 0x869   :  { %10489 = vmatpush.bf16.msra.mxu2 %v16025_v61  ;;  %10464 = vmatpush.bf16.msra.mxu0 %v15753_v2  ;;  %v18343_v61 = vld [vmem:[#allocation8 + $0x5ec] sm:$0xf]  ;;  %v16585_v2 = vor.u32 %v18375_v25, %v16582_v35  ;;  %v18389_v25 = vld [vmem:[#allocation8 + $0x754] sm:$0xf0]  ;;  %v16265_v35 = vor.u32 %v18295_v22, %v16262_v59 }
 0x86a   :  { %v16457_v36 = vor.u32 %v18343_v61, %v16454_v9  ;;  %v18359_v54 = vld [vmem:[#allocation8 + $0x66c] sm:$0xf]  ;;  %v16518_v61 = vld [vmem:[#allocation8 + $0x678] sm:$0xf0]  ;;  %v16628_v9 = vld [vmem:[#allocation8 + $0x748] sm:$0xf] }
 0x86b   :  { %10477 = vmatpush.bf16.msra.mxu1 %v15881_v8  ;;  %v18307_v8 = vld [vmem:[#allocation8 + $0x4cc] sm:$0xf]  ;;  %10403 = vmatmul.bf16.vlgmr.msra.gmra.mxu3 %v19213_v63  ;;  %v16521_v5 = vor.u32 %v18359_v54, %v16518_v61  ;;  %v16166_v61 = vld [vmem:[#allocation8 + $0x3b8] sm:$0xf0] }
 0x86c   :  { %10447 = vmatpush.bf16.msrb.mxu3 %v16709_v58  ;;  %v18271_v54 = vld [vmem:[#allocation8 + $0x3ac] sm:$0xf] }
 0x86d   :  { %10490 = vmatpush.bf16.msra.mxu2 %v16009_v40  ;;  %10465 = vmatpush.bf16.msra.mxu0 %v15737_v11  ;;  %v16310_v40 = vld [vmem:[#allocation8 + $0x4d8] sm:$0xf0] }
 0x86e   :  { %v16313_v33 = vor.u32 %v18307_v8, %v16310_v40  ;;  %v16294_v11 = vld [vmem:[#allocation8 + $0x4b8] sm:$0xf0]  ;;  %v18355_v8 = vld [vmem:[#allocation8 + $0x64c] sm:$0xf] }
 0x86f   :  { %10478 = vmatpush.bf16.msra.mxu1 %v15865_v30  ;;  %v16677_v30 = vor.u32 %v18401_v57, %v16676_v14  ;;  %v16297_v1 = vor.u32 %v18303_v38, %v16294_v11  ;;  %v16502_v40 = vld [vmem:[#allocation8 + $0x658] sm:$0xf0]  ;;  %v18319_v11 = vld [vmem:[#allocation8 + $0x52c] sm:$0xf] }
 0x870   :  { %10448 = vmatpush.bf16.msrb.mxu3 %v16693_v34  ;;  %v16612_v34 = vld [vmem:[#allocation8 + $0x728] sm:$0xf]  ;;  %v16230_v38 = vld [vmem:[#allocation8 + $0x438] sm:$0xf0] }
 0x871   :  { %10491 = vmatpush.bf16.msra.mxu2 %v15993_v41  ;;  %10466 = vmatpush.bf16.msra.mxu0 %v15721_v29  ;;  %v16422_v41 = vld [vmem:[#allocation8 + $0x5b8] sm:$0xf0]  ;;  %v18331_v29 = vld [vmem:[#allocation8 + $0x58c] sm:$0xf] }
 0x872   :  { %v16425_v26 = vor.u32 %v18335_v43, %v16422_v41  ;;  %v16409_v53 = vor.u32 %v18331_v29, %v16406_v24  ;;  %v16613_v43 = vor.u32 %v18385_v42, %v16612_v34  ;;  %v18351_v41 = vld [vmem:[#allocation8 + $0x62c] sm:$0xf]  ;;  %v16597_v29 = vor.u32 %v18381_v44, %v16596_v39  ;;  %v16342_v24 = vld [vmem:[#allocation8 + $0x518] sm:$0xf0]  ;;  %v16828_v34 = vld [vmem:[#allocation11 + $0xe0] sm:$0xf] }
 0x873   :  { %10479 = vmatpush.bf16.msra.mxu1 %v15849_v50  ;;  %v18363_v50 = vld [vmem:[#allocation8 + $0x68c] sm:$0xf]  ;;  %v16732_v44 = vld [vmem:[#allocation11 + $0x20] sm:$0xf] }
 0x874   :  { %10449 = vmatpush.bf16.msrb.mxu3 %v16677_v30  ;;  %v16358_v30 = vld [vmem:[#allocation8 + $0x538] sm:$0xf0]  ;;  %v18439_v42 = vld [vmem:[#allocation11 + $0xe4] sm:$0xf0] }
 0x875   :  { %10492 = vmatpush.bf16.msra.mxu2 %v15977_v13  ;;  %10467 = vmatpush.bf16.msra.mxu0 %v15705_v16  ;;  %v16644_v13 = vld [vmem:[#allocation8 + $0x768] sm:$0xf]  ;;  %v10261_v51 = vpop.f32.mrf.mxu0  ;;  %v18255_v39 = vld [vmem:[#allocation8 + $0x32c] sm:$0xf] }
 0x876   :  { %v10262_v18 = vadd.f32 %v10261_v51, %v8861_v32  ;;  %v16198_v32 = vld [vmem:[#allocation8 + $0x3f8] sm:$0xf0]  ;;  %v16772_v51 = vld [vmem:[#allocation11 + $0x70] sm:$0xf] }
 0x877   :  { %10480 = vmatpush.bf16.msra.mxu1 %v15833_v48  ;;  %v10274_v20 = vpop.f32.mrf.mxu1  ;;  %v16393_v48 = vor.u32 %v18327_v60, %v16390_v62  ;;  %v18423_v62 = vld [vmem:[#allocation11 + $0x64] sm:$0xf0] }
 0x878   :  { %10468 = vmatmul.bf16.vlgmr.msra.gmra.mxu0 %v19207_v3  ;;  %v16278_v3 = vld [vmem:[#allocation8 + $0x498] sm:$0xf0]  ;;  %10450 = vmatpush.bf16.msrb.mxu3 %v16661_v6  ;;  %v10275_v16 = vadd.f32 %v10274_v20, %v10262_v18  ;;  %v18315_v6 = vld [vmem:[#allocation8 + $0x50c] sm:$0xf] }
 0x879   :  { %10493 = vmatpush.bf16.msra.mxu2 %v15961_v21  ;;  %10512 = vmatpush.bf16.msrb.mxu0 %v16329_v7  ;;  %v16281_v47 = vor.u32 %v18299_v46, %v16278_v3  ;;  %v16246_v21 = vld [vmem:[#allocation8 + $0x458] sm:$0xf0]  ;;  %v18323_v7 = vld [vmem:[#allocation8 + $0x54c] sm:$0xf] }
 0x87a   :  { %10481 = vmatmul.bf16.vlgmr.msra.gmra.mxu1 %v19209_v4  ;;  %v16534_v4 = vld [vmem:[#allocation8 + $0x698] sm:$0xf0]  ;;  %v16249_v57 = vor.u32 %v18291_v15, %v16246_v21  ;;  %v18283_v46 = vld [vmem:[#allocation8 + $0x40c] sm:$0xf]  ;;  %v16836_v15 = vld [vmem:[#allocation11 + $0xf0] sm:$0xf] }
 0x87b   :  { %10525 = vmatpush.bf16.msrb.mxu1 %v16457_v36  ;;  %v16537_v56 = vor.u32 %v18363_v50, %v16534_v4  ;;  %v16629_v36 = vor.u32 %v18389_v25, %v16628_v9  ;;  %v16214_v3 = vld [vmem:[#allocation8 + $0x418] sm:$0xf0]  ;;  %v18347_v50 = vld [vmem:[#allocation8 + $0x60c] sm:$0xf]  ;;  %v16169_v9 = vor.u32 %v18271_v54, %v16166_v61  ;;  %v16774_v61 = vld [vmem:[#allocation11 + $0x78] sm:$0xf0] }
 0x87c   :  { %10494 = vmatmul.bf16.vlgmr.msra.gmra.mxu2 %v19211_v10  ;;  %v18393_v10 = vld [vmem:[#allocation8 + $0x774] sm:$0xf0]  ;;  %v18425_v20 = vld [vmem:[#allocation11 + $0x74] sm:$0xf0]  ;;  %v18275_v18 = vld [vmem:[#allocation8 + $0x3cc] sm:$0xf] }
 0x87d   :  { %10538 = vmatpush.bf16.msrb.mxu2 %v16585_v2  ;;  %10513 = vmatpush.bf16.msrb.mxu0 %v16313_v33  ;;  %v16645_v58 = vor.u32 %v18393_v10, %v16644_v13  ;;  %v16374_v2 = vld [vmem:[#allocation8 + $0x558] sm:$0xf0]  ;;  %v10263_v12 = vpop.f32.mrf.mxu0  ;;  %v16773_v59 = vor.u32 %v18425_v20, %v16772_v51  ;;  %v18267_v25 = vld [vmem:[#allocation8 + $0x38c] sm:$0xf]  ;;  %v16804_v51 = vld [vmem:[#allocation11 + $0xb0] sm:$0xf] }
 0x87e   :  { %v16377_v33 = vor.u32 %v18323_v7, %v16374_v2  ;;  %v16470_v10 = vld [vmem:[#allocation8 + $0x618] sm:$0xf0] }
 0x87f   :  { %10526 = vmatpush.bf16.msrb.mxu1 %v16441_v49  ;;  %10451 = vmatpush.bf16.msrb.mxu3 %v16645_v58  ;;  %v10287_v23 = vpop.f32.mrf.mxu2  ;;  %v10276_v14 = vpop.f32.mrf.mxu1  ;;  %v16505_v49 = vor.u32 %v18355_v8, %v16502_v40  ;;  %v16473_v22 = vor.u32 %v18347_v50, %v16470_v10  ;;  %v16764_v58 = vld [vmem:[#allocation11 + $0x60] sm:$0xf]  ;;  %v18441_v21 = vld [vmem:[#allocation11 + $0xf4] sm:$0xf0]  ;;  %v18263_v8 = vld [vmem:[#allocation8 + $0x36c] sm:$0xf] }
 0x880   :  { %v19292_v19 = vadd.f32 %v10287_v23, %v10275_v16  ;;  %v16765_v16 = vor.u32 %v18423_v62, %v16764_v58  ;;  %v16837_v7 = vor.u32 %v18441_v21, %v16836_v15  ;;  %v16748_v40 = vld [vmem:[#allocation11 + $0x40] sm:$0xf]  ;;  %v18419_v23 = vld [vmem:[#allocation11 + $0x44] sm:$0xf0]  ;;  %v16086_v10 = vld [vmem:[#allocation8 + $0x318] sm:$0xf0] }
 0x881   :  { %10539 = vmatpush.bf16.msrb.mxu2 %v16569_v45  ;;  %10514 = vmatpush.bf16.msrb.mxu0 %v16297_v1  ;;  %v18287_v45 = vld [vmem:[#allocation8 + $0x42c] sm:$0xf]  ;;  %v18433_v20 = vld [vmem:[#allocation11 + $0xb4] sm:$0xf0]  ;;  %v18424_v58 = vld [vmem:[#allocation11 + $0x74] sm:$0xf] }
 0x882   :  { %v16233_v31 = vor.u32 %v18287_v45, %v16230_v38  ;;  %v18279_v1 = vld [vmem:[#allocation8 + $0x3ec] sm:$0xf]  ;;  %v18417_v45 = vld [vmem:[#allocation11 + $0x34] sm:$0xf0]  ;;  %v16777_v15 = vor.u32 %v18424_v58, %v16774_v61  ;;  %v18422_v21 = vld [vmem:[#allocation11 + $0x64] sm:$0xf] }
 0x883   :  { %10527 = vmatpush.bf16.msrb.mxu1 %v16425_v26  ;;  %10452 = vmatpush.bf16.msrb.mxu3 %v16629_v36  ;;  %v16361_v26 = vor.u32 %v18319_v11, %v16358_v30  ;;  %v16201_v13 = vor.u32 %v18279_v1, %v16198_v32  ;;  %v16118_v38 = vld [vmem:[#allocation8 + $0x358] sm:$0xf0]  ;;  %v16820_v11 = vld [vmem:[#allocation11 + $0xd0] sm:$0xf]  ;;  %v18251_v50 = vld [vmem:[#allocation8 + $0x30c] sm:$0xf] }
 0x884   :  { %v16102_v32 = vld [vmem:[#allocation8 + $0x338] sm:$0xf0]  ;;  %v18383_v61 = vld [vmem:[#allocation8 + $0x72c] sm:$0xf] }
 0x885   :  { %10540 = vmatpush.bf16.msrb.mxu2 %v16553_v37  ;;  %10515 = vmatpush.bf16.msrb.mxu0 %v16281_v47  ;;  %v16489_v37 = vor.u32 %v18351_v41, %v16486_v28  ;;  %v16217_v47 = vor.u32 %v18283_v46, %v16214_v3 }
 0x887   :  { %10528 = vmatpush.bf16.msrb.mxu1 %v16409_v53  ;;  %10453 = vmatpush.bf16.msrb.mxu3 %v16613_v43  ;;  %v10289_v4 = vpop.f32.mrf.mxu2  ;;  %v16182_v53 = vld [vmem:[#allocation8 + $0x3d8] sm:$0xf0] }
 0x888   :  { %v16185_v60 = vor.u32 %v18275_v18, %v16182_v53  ;;  %v18437_v43 = vld [vmem:[#allocation11 + $0xd4] sm:$0xf0]  ;;  %v16724_v4 = vld [vmem:[#allocation11 + $0x10] sm:$0xf]  ;;  %v16805_v53 = vor.u32 %v18433_v20, %v16804_v51  ;;  %v18387_v51 = vld [vmem:[#allocation8 + $0x74c] sm:$0xf] }
 0x889   :  { %10541 = vmatpush.bf16.msrb.mxu2 %v16537_v56  ;;  %10516 = vmatpush.bf16.msrb.mxu0 %v16265_v35  ;;  %v16345_v56 = vor.u32 %v18315_v6, %v16342_v24  ;;  %v16756_v35 = vld [vmem:[#allocation11 + $0x50] sm:$0xf]  ;;  %v16821_v30 = vor.u32 %v18437_v43, %v16820_v11  ;;  %v16105_v24 = vor.u32 %v18255_v39, %v16102_v32  ;;  %v16710_v18 = vld [vmem:[#allocation8 + $0x7f8] sm:$0xf0]  ;;  %v18395_v43 = vld [vmem:[#allocation8 + $0x78c] sm:$0xf] }
 0x88a   :  { %v16750_v32 = vld [vmem:[#allocation11 + $0x48] sm:$0xf0]  ;;  %v18416_v20 = vld [vmem:[#allocation11 + $0x34] sm:$0xf] }
 0x88b   :  { %10529 = vmatpush.bf16.msrb.mxu1 %v16393_v48  ;;  %10454 = vmatpush.bf16.msrb.mxu3 %v16597_v29  ;;  %v18421_v48 = vld [vmem:[#allocation11 + $0x54] sm:$0xf0] }
 0x88c   :  { %v16757_v36 = vor.u32 %v18421_v48, %v16756_v35  ;;  %v16694_v35 = vld [vmem:[#allocation8 + $0x7d8] sm:$0xf0] }
 0x88d   :  { %10542 = vmatpush.bf16.msrb.mxu2 %v16521_v5  ;;  %10517 = vmatpush.bf16.msrb.mxu0 %v16249_v57  ;;  %v16150_v5 = vld [vmem:[#allocation8 + $0x398] sm:$0xf0]  ;;  %v16749_v57 = vor.u32 %v18419_v23, %v16748_v40  ;;  %v16780_v23 = vld [vmem:[#allocation11 + $0x80] sm:$0xf] }
 0x88e   :  { %10455 = vmatmul.bf16.vlgmr.msrb.gmra.mxu3 %v19268_v0  ;;  %v16153_v2 = vor.u32 %v18267_v25, %v16150_v5  ;;  %v18403_v25 = vld [vmem:[#allocation8 + $0x7cc] sm:$0xf] }
 0x88f   :  { %10530 = vmatpush.bf16.msrb.mxu1 %v16377_v33  ;;  %10499 = vmatpush.bf16.msra.mxu3 %v16201_v13  ;;  %v18259_v33 = vld [vmem:[#allocation8 + $0x34c] sm:$0xf]  ;;  %v18413_v13 = vld [vmem:[#allocation11 + $0x14] sm:$0xf0] }
 0x890   :  { %v16121_v28 = vor.u32 %v18259_v33, %v16118_v38  ;;  %v16838_v33 = vld [vmem:[#allocation11 + $0xf8] sm:$0xf0] }
 0x891   :  { %10543 = vmatpush.bf16.msrb.mxu2 %v16505_v49  ;;  %10518 = vmatpush.bf16.msrb.mxu0 %v16233_v31  ;;  %v16740_v49 = vld [vmem:[#allocation11 + $0x30] sm:$0xf]  ;;  %v18415_v31 = vld [vmem:[#allocation11 + $0x24] sm:$0xf0]  ;;  %v16758_v38 = vld [vmem:[#allocation11 + $0x58] sm:$0xf0] }
 0x892   :  { %v16741_v41 = vor.u32 %v18417_v45, %v16740_v49  ;;  %v16733_v6 = vor.u32 %v18415_v31, %v16732_v44  ;;  %v18420_v45 = vld [vmem:[#allocation11 + $0x54] sm:$0xf]  ;;  %v18391_v44 = vld [vmem:[#allocation8 + $0x76c] sm:$0xf]  ;;  %v18418_v31 = vld [vmem:[#allocation11 + $0x44] sm:$0xf] }
 0x893   :  { %10531 = vmatpush.bf16.msrb.mxu1 %v16361_v26  ;;  %10500 = vmatpush.bf16.msra.mxu3 %v16185_v60  ;;  %v16812_v26 = vld [vmem:[#allocation11 + $0xc0] sm:$0xf]  ;;  %v18411_v60 = vld [vmem:[#allocation11 + $0x4] sm:$0xf0] }
 0x895   :  { %10544 = vmatpush.bf16.msrb.mxu2 %v16489_v37  ;;  %10519 = vmatpush.bf16.msrb.mxu0 %v16217_v47  ;;  %v19298_v12 = vpop.f32.mrf.mxu0  ;;  %v18435_v37 = vld [vmem:[#allocation11 + $0xc4] sm:$0xf0] }
 0x896   :  { %v16813_v3 = vor.u32 %v18435_v37, %v16812_v26  ;;  %v18407_v47 = vld [vmem:[#allocation8 + $0x7ec] sm:$0xf]  ;;  %v16646_v26 = vld [vmem:[#allocation8 + $0x778] sm:$0xf0]  ;;  %v18438_v37 = vld [vmem:[#allocation11 + $0xe4] sm:$0xf] }
 0x897   :  { %10532 = vmatpush.bf16.msrb.mxu1 %v16345_v56  ;;  %10501 = vmatpush.bf16.msra.mxu3 %v16169_v9  ;;  %v19300_v14 = vpop.f32.mrf.mxu1  ;;  %v16725_v56 = vor.u32 %v18413_v13, %v16724_v4  ;;  %v16713_v54 = vor.u32 %v18407_v47, %v16710_v18  ;;  %v18431_v9 = vld [vmem:[#allocation11 + $0xa4] sm:$0xf0]  ;;  %v16742_v47 = vld [vmem:[#allocation11 + $0x38] sm:$0xf0]  ;;  %v16630_v18 = vld [vmem:[#allocation8 + $0x758] sm:$0xf0] }
 0x898   :  { %10520 = vmatmul.bf16.vlgmr.msrb.gmra.mxu0 %v19228_v52  ;;  %v16134_v52 = vld [vmem:[#allocation8 + $0x378] sm:$0xf0]  ;;  %v16745_v58 = vor.u32 %v18416_v20, %v16742_v47  ;;  %v16884_v47 = vld [vmem:[#allocation11 + $0x150] sm:$0xf] }
 0x899   :  { %10545 = vmatpush.bf16.msrb.mxu2 %v16473_v22  ;;  %10962 = vmatpush.bf16.msra.mxu0 %v16773_v59  ;;  %v16089_v22 = vor.u32 %v18251_v50, %v16086_v10  ;;  %v16716_v59 = vld [vmem:[#allocation11] sm:$0xf]  ;;  %v16649_v10 = vor.u32 %v18391_v44, %v16646_v26 }
 0x89a   :  { %10533 = vmatmul.bf16.vlgmr.msrb.gmra.mxu1 %v19230_v27  ;;  %v16829_v27 = vor.u32 %v18439_v42, %v16828_v34  ;;  %v16717_v5 = vor.u32 %v18411_v60, %v16716_v59  ;;  %v18399_v34 = vld [vmem:[#allocation8 + $0x7ac] sm:$0xf]  ;;  %v16678_v42 = vld [vmem:[#allocation8 + $0x7b8] sm:$0xf0] }
 0x89b   :  { %10975 = vmatpush.bf16.msra.mxu1 %v16837_v7  ;;  %10502 = vmatpush.bf16.msra.mxu3 %v16153_v2  ;;  %v16788_v7 = vld [vmem:[#allocation11 + $0x90] sm:$0xf]  ;;  %v16697_v2 = vor.u32 %v18403_v25, %v16694_v35  ;;  %v16681_v49 = vor.u32 %v18399_v34, %v16678_v42  ;;  %v18434_v25 = vld [vmem:[#allocation11 + $0xc4] sm:$0xf]  ;;  %v16814_v35 = vld [vmem:[#allocation11 + $0xc8] sm:$0xf0] }
 0x89c   :  { %10546 = vmatmul.bf16.vlgmr.msrb.gmra.mxu2 %v19232_v55  ;;  %v16137_v55 = vor.u32 %v18263_v8, %v16134_v52  ;;  %v16766_v8 = vld [vmem:[#allocation11 + $0x68] sm:$0xf0]  ;;  %v18427_v52 = vld [vmem:[#allocation11 + $0x84] sm:$0xf0]  ;;  %v16598_v34 = vld [vmem:[#allocation8 + $0x718] sm:$0xf0] }
 0x89d   :  { %10963 = vmatpush.bf16.msra.mxu0 %v16765_v16  ;;  %v10315_v46 = vpop.f32.mrf.mxu0  ;;  %v16796_v16 = vld [vmem:[#allocation11 + $0xa0] sm:$0xf]  ;;  %v18432_v42 = vld [vmem:[#allocation11 + $0xb4] sm:$0xf] }
 0x89e   :  { %v16797_v48 = vor.u32 %v18431_v9, %v16796_v16  ;;  %v16830_v46 = vld [vmem:[#allocation11 + $0xe8] sm:$0xf0]  ;;  %v18414_v16 = vld [vmem:[#allocation11 + $0x24] sm:$0xf] }
 0x89f   :  { %10976 = vmatpush.bf16.msra.mxu1 %v16829_v27  ;;  %10503 = vmatpush.bf16.msra.mxu3 %v16137_v55  ;;  %v19302_v1 = vpop.f32.mrf.mxu2  ;;  %v10328_v29 = vpop.f32.mrf.mxu1  ;;  %v16769_v27 = vor.u32 %v18422_v21, %v16766_v8  ;;  %v18440_v55 = vld [vmem:[#allocation11 + $0xf4] sm:$0xf]  ;;  %v16734_v9 = vld [vmem:[#allocation11 + $0x28] sm:$0xf0] }
 0x8a0   :  { %v16841_v11 = vor.u32 %v18440_v55, %v16838_v33  ;;  %v18410_v33 = vld [vmem:[#allocation11 + $0x4] sm:$0xf] }
 0x8a1   :  { %10964 = vmatpush.bf16.msra.mxu0 %v16757_v36  ;;  %v18429_v36 = vld [vmem:[#allocation11 + $0x94] sm:$0xf0] }
 0x8a2   :  { %v16789_v40 = vor.u32 %v18429_v36, %v16788_v7  ;;  %v16737_v36 = vor.u32 %v18414_v16, %v16734_v9 }
 0x8a3   :  { %10977 = vmatpush.bf16.msra.mxu1 %v16821_v30  ;;  %10504 = vmatpush.bf16.msra.mxu3 %v16121_v28  ;;  %v16662_v30 = vld [vmem:[#allocation8 + $0x798] sm:$0xf0] }
 0x8a4   :  { %v16665_v39 = vor.u32 %v18395_v43, %v16662_v30  ;;  %v18428_v43 = vld [vmem:[#allocation11 + $0x94] sm:$0xf] }
 0x8a5   :  { %10965 = vmatpush.bf16.msra.mxu0 %v16749_v57  ;;  %v16781_v57 = vor.u32 %v18427_v52, %v16780_v23  ;;  %v18412_v23 = vld [vmem:[#allocation11 + $0x14] sm:$0xf]  ;;  %v16726_v52 = vld [vmem:[#allocation11 + $0x18] sm:$0xf0] }
 0x8a6   :  { %v16729_v55 = vor.u32 %v18412_v23, %v16726_v52  ;;  %v16902_v23 = vld [vmem:[#allocation11 + $0x178] sm:$0xf0] }
 0x8a7   :  { %10978 = vmatpush.bf16.msra.mxu1 %v16813_v3  ;;  %10505 = vmatpush.bf16.msra.mxu3 %v16105_v24  ;;  %v10341_v62 = vpop.f32.mrf.mxu2  ;;  %v16833_v3 = vor.u32 %v18438_v37, %v16830_v46  ;;  %v16753_v24 = vor.u32 %v18418_v31, %v16750_v32  ;;  %v18426_v46 = vld [vmem:[#allocation11 + $0x84] sm:$0xf] }
 0x8a9   :  { %10966 = vmatpush.bf16.msra.mxu0 %v16741_v41  ;;  %v19305_v41 = vld [vmem:[#allocation10] sm:$0xf] }
 0x8aa   :  { %v8862_v28 = vperm.slane %v19305_v41, 2 }
 0x8ab   :  { %10979 = vmatpush.bf16.msra.mxu1 %v16805_v53  ;;  %10506 = vmatpush.bf16.msra.mxu3 %v16089_v22  ;;  %v18436_v53 = vld [vmem:[#allocation11 + $0xd4] sm:$0xf] }
 0x8ad   :  { %10967 = vmatpush.bf16.msra.mxu0 %v16733_v6  ;;  %v10248_v6 = vpop.f32.mrf.mxu3 }
 0x8ae   :  { %10507 = vmatmul.bf16.vlgmr.msra.gmra.mxu3 %v19213_v63  ;;  %v16761_v63 = vor.u32 %v18420_v45, %v16758_v38  ;;  %v10249_v13 = vadd.f32 %v10248_v6, %v19285_v17  ;;  %v16614_v17 = vld [vmem:[#allocation8 + $0x738] sm:$0xf0]  ;;  %v18430_v38 = vld [vmem:[#allocation11 + $0xa4] sm:$0xf] }
 0x8af   :  { %10980 = vmatpush.bf16.msra.mxu1 %v16797_v48  ;;  %10551 = vmatpush.bf16.msrb.mxu3 %v16713_v54  ;;  %v16633_v54 = vor.u32 %v18387_v51, %v16630_v18  ;;  %v16617_v8 = vor.u32 %v18383_v61, %v16614_v17  ;;  %v18449_v61 = vld [vmem:[#allocation11 + $0x134] sm:$0xf0] }
 0x8b0   :  { %v10564_v59 = vmax.f32 %v10249_v13, 0.0  ;;  %v18455_v13 = vld [vmem:[#allocation11 + $0x164] sm:$0xf0] }
 0x8b1   :  { %10968 = vmatpush.bf16.msra.mxu0 %v16725_v56  ;;  %v16822_v56 = vld [vmem:[#allocation11 + $0xd8] sm:$0xf0] }
 0x8b2   :  { %v16825_v60 = vor.u32 %v18436_v53, %v16822_v56  ;;  %v10568_v62 = vpack.c.bf16 %v10564_v59, %v10564_v59 }
 0x8b3   :  { %10981 = vmatpush.bf16.msra.mxu1 %v16789_v40  ;;  %10552 = vmatpush.bf16.msrb.mxu3 %v16697_v2  ;;  %v18379_v40 = vld [vmem:[#allocation8 + $0x70c] sm:$0xf] }
 0x8b4   :  { %v16601_v45 = vor.u32 %v18379_v40, %v16598_v34  ;;  %v18456_v40 = vld [vmem:[#allocation11 + $0x174] sm:$0xf] }
 0x8b5   :  { %10969 = vmatpush.bf16.msra.mxu0 %v16717_v5  ;;  %v10365_v29 = vpop.f32.mrf.mxu0  ;;  %v16817_v5 = vor.u32 %v18434_v25, %v16814_v35  ;;  %v10250_v7 = vpop.f32.mrf.mxu3  ;;  %v18447_v35 = vld [vmem:[#allocation11 + $0x124] sm:$0xf0]  ;;  %v16905_v34 = vor.u32 %v18456_v40, %v16902_v23 }
 0x8b6   :  { %v10366_v50 = vadd.f32 %v10365_v29, %v8862_v28  ;;  %v16790_v28 = vld [vmem:[#allocation11 + $0x98] sm:$0xf0] }
 0x8b7   :  { %10982 = vmatpush.bf16.msra.mxu1 %v16781_v57  ;;  %10553 = vmatpush.bf16.msrb.mxu3 %v16681_v49  ;;  %v10378_v4 = vpop.f32.mrf.mxu1  ;;  %v16718_v49 = vld [vmem:[#allocation11 + $0x8] sm:$0xf0]  ;;  %v16793_v37 = vor.u32 %v18428_v43, %v16790_v28 }
 0x8b8   :  { %v10379_v22 = vadd.f32 %v10378_v4, %v10366_v50  ;;  %10970 = vmatmul.bf16.vlgmr.msra.gmra.mxu0 %v10568_v62  ;;  %v16721_v26 = vor.u32 %v18410_v33, %v16718_v49  ;;  %v16892_v4 = vld [vmem:[#allocation11 + $0x160] sm:$0xf]  ;;  %v18452_v33 = vld [vmem:[#allocation11 + $0x154] sm:$0xf]  ;;  %v16886_v49 = vld [vmem:[#allocation11 + $0x158] sm:$0xf0] }
 0x8b9   :  { %11014 = vmatpush.bf16.msrb.mxu0 %v16777_v15 }
 0x8bb   :  { %11027 = vmatpush.bf16.msrb.mxu1 %v16841_v11  ;;  %10554 = vmatpush.bf16.msrb.mxu3 %v16665_v39  ;;  %v16798_v11 = vld [vmem:[#allocation11 + $0xa8] sm:$0xf0]  ;;  %v18457_v39 = vld [vmem:[#allocation11 + $0x174] sm:$0xf0] }
 0x8bc   :  { %v16801_v30 = vor.u32 %v18430_v38, %v16798_v11  ;;  %v16889_v38 = vor.u32 %v18452_v33, %v16886_v49  ;;  %v16908_v33 = vld [vmem:[#allocation11 + $0x180] sm:$0xf]  ;;  %v18459_v49 = vld [vmem:[#allocation11 + $0x184] sm:$0xf0] }
 0x8bd   :  { %11015 = vmatpush.bf16.msrb.mxu0 %v16769_v27  ;;  %v10367_v21 = vpop.f32.mrf.mxu0  ;;  %v16806_v27 = vld [vmem:[#allocation11 + $0xb8] sm:$0xf0]  ;;  %v10300_v32 = vpop.f32.mrf.mxu3 }
 0x8be   :  { %v16809_v57 = vor.u32 %v18432_v42, %v16806_v27  ;;  %v10301_v29 = vadd.f32 %v10300_v32, %v19292_v19  ;;  %v18445_v21 = vld [vmem:[#allocation11 + $0x114] sm:$0xf0]  ;;  %v18454_v42 = vld [vmem:[#allocation11 + $0x164] sm:$0xf]  ;;  %v16894_v27 = vld [vmem:[#allocation11 + $0x168] sm:$0xf0] }
 0x8bf   :  { %11028 = vmatpush.bf16.msrb.mxu1 %v16833_v3  ;;  %10555 = vmatpush.bf16.msrb.mxu3 %v16649_v10  ;;  %v10391_v48 = vpop.f32.mrf.mxu2  ;;  %v10380_v2 = vpop.f32.mrf.mxu1  ;;  %v16782_v3 = vld [vmem:[#allocation11 + $0x88] sm:$0xf0]  ;;  %v16893_v10 = vor.u32 %v18455_v13, %v16892_v4  ;;  %v18448_v32 = vld [vmem:[#allocation11 + $0x134] sm:$0xf]  ;;  %v16854_v13 = vld [vmem:[#allocation11 + $0x118] sm:$0xf0] }
 0x8c0   :  { %v19309_v15 = vadd.f32 %v10391_v48, %v10379_v22  ;;  %v16785_v6 = vor.u32 %v18426_v46, %v16782_v3  ;;  %v10314_v50 = vadd.f32 %v19298_v12, %v10301_v29  ;;  %v16876_v22 = vld [vmem:[#allocation11 + $0x140] sm:$0xf]  ;;  %v18451_v12 = vld [vmem:[#allocation11 + $0x144] sm:$0xf0]  ;;  %v18444_v4 = vld [vmem:[#allocation11 + $0x114] sm:$0xf] }
 0x8c1   :  { %11016 = vmatpush.bf16.msrb.mxu0 %v16761_v63  ;;  %v16900_v63 = vld [vmem:[#allocation11 + $0x170] sm:$0xf]  ;;  %v16844_v2 = vld [vmem:[#allocation11 + $0x100] sm:$0xf] }
 0x8c2   :  { %v16901_v31 = vor.u32 %v18457_v39, %v16900_v63  ;;  %v10327_v51 = vadd.f32 %v19300_v14, %v10314_v50  ;;  %v18450_v63 = vld [vmem:[#allocation11 + $0x144] sm:$0xf]  ;;  %v16878_v39 = vld [vmem:[#allocation11 + $0x148] sm:$0xf0] }
 0x8c3   :  { %11029 = vmatpush.bf16.msrb.mxu1 %v16825_v60  ;;  %10556 = vmatpush.bf16.msrb.mxu3 %v16633_v54  ;;  %v16877_v60 = vor.u32 %v18451_v12, %v16876_v22  ;;  %v16868_v54 = vld [vmem:[#allocation11 + $0x130] sm:$0xf] }
 0x8c4   :  { %10988 = vmatpush.bf16.msra.mxu2 %v16901_v31  ;;  %v10340_v53 = vadd.f32 %v19302_v1, %v10327_v51  ;;  %v16869_v17 = vor.u32 %v18449_v61, %v16868_v54  ;;  %v16860_v1 = vld [vmem:[#allocation11 + $0x120] sm:$0xf]  ;;  %v16964_v51 = vld [vmem:[#allocation11 + $0x1f0] sm:$0xf] }
 0x8c5   :  { %11017 = vmatpush.bf16.msrb.mxu0 %v16753_v24  ;;  %v10302_v24 = vpop.f32.mrf.mxu3  ;;  %v16861_v48 = vor.u32 %v18447_v35, %v16860_v1  ;;  %v16948_v61 = vld [vmem:[#allocation11 + $0x1d0] sm:$0xf]  ;;  %v18467_v35 = vld [vmem:[#allocation11 + $0x1c4] sm:$0xf0] }
 0x8c6   :  { %v16862_v24 = vld [vmem:[#allocation11 + $0x128] sm:$0xf0] }
 0x8c7   :  { %11030 = vmatpush.bf16.msrb.mxu1 %v16817_v5  ;;  %10557 = vmatpush.bf16.msrb.mxu3 %v16617_v8  ;;  %v10393_v44 = vpop.f32.mrf.mxu2  ;;  %v16852_v5 = vld [vmem:[#allocation11 + $0x110] sm:$0xf]  ;;  %v18443_v8 = vld [vmem:[#allocation11 + $0x104] sm:$0xf0] }
 0x8c8   :  { %10989 = vmatpush.bf16.msra.mxu2 %v16893_v10  ;;  %v16845_v52 = vor.u32 %v18443_v8, %v16844_v2  ;;  %v16881_v44 = vor.u32 %v18450_v63, %v16878_v39  ;;  %v16857_v10 = vor.u32 %v18444_v4, %v16854_v13  ;;  %v16958_v63 = vld [vmem:[#allocation11 + $0x1e8] sm:$0xf0] }
 0x8c9   :  { %11018 = vmatpush.bf16.msrb.mxu0 %v16745_v58  ;;  %v16926_v4 = vld [vmem:[#allocation11 + $0x1a8] sm:$0xf0] }
 0x8cb   :  { %11031 = vmatpush.bf16.msrb.mxu1 %v16809_v57  ;;  %10558 = vmatpush.bf16.msrb.mxu3 %v16601_v45  ;;  %v16897_v57 = vor.u32 %v18454_v42, %v16894_v27  ;;  %v16916_v27 = vld [vmem:[#allocation11 + $0x190] sm:$0xf] }
 0x8cd   :  { %11019 = vmatpush.bf16.msrb.mxu0 %v16737_v36  ;;  %v16853_v36 = vor.u32 %v18445_v21, %v16852_v5 }
 0x8ce   :  { %10559 = vmatmul.bf16.vlgmr.msrb.gmra.mxu3 %v19268_v0  ;;  %v18453_v0 = vld [vmem:[#allocation11 + $0x154] sm:$0xf0]  ;;  %v10352_v56 = vpop.f32.mrf.mxu3 }
 0x8cf   :  { %11032 = vmatpush.bf16.msrb.mxu1 %v16801_v30  ;;  %v16885_v19 = vor.u32 %v18453_v0, %v16884_v47  ;;  %v10353_v59 = vadd.f32 %v10352_v56, %v10340_v53  ;;  %v18473_v47 = vld [vmem:[#allocation11 + $0x1f4] sm:$0xf0]  ;;  %v16846_v53 = vld [vmem:[#allocation11 + $0x108] sm:$0xf0] }
 0x8d0   :  { %v16965_v56 = vor.u32 %v18473_v47, %v16964_v51  ;;  %v16918_v51 = vld [vmem:[#allocation11 + $0x198] sm:$0xf0] }
 0x8d1   :  { %11020 = vmatpush.bf16.msrb.mxu0 %v16729_v55  ;;  %10990 = vmatpush.bf16.msra.mxu2 %v16885_v19  ;;  %v10565_v58 = vmax.f32 %v10353_v59, 0.0  ;;  %v8863_v55 = vperm.slane %v19305_v41, 3  ;;  %v18442_v19 = vld [vmem:[#allocation11 + $0x104] sm:$0xf] }
 0x8d2   :  { %11001 = vmatpush.bf16.msra.mxu3 %v16965_v56  ;;  %v16849_v22 = vor.u32 %v18442_v19, %v16846_v53  ;;  %v18458_v53 = vld [vmem:[#allocation11 + $0x184] sm:$0xf]  ;;  %v16910_v56 = vld [vmem:[#allocation11 + $0x188] sm:$0xf0] }
 0x8d3   :  { %11033 = vmatpush.bf16.msrb.mxu1 %v16793_v37  ;;  %v10569_v16 = vpack.c.bf16 %v10565_v58, %v10565_v58  ;;  %v18471_v58 = vld [vmem:[#allocation11 + $0x1e4] sm:$0xf0] }
 0x8d5   :  { %11021 = vmatpush.bf16.msrb.mxu0 %v16721_v26  ;;  %v19315_v20 = vpop.f32.mrf.mxu0  ;;  %10991 = vmatpush.bf16.msra.mxu2 %v16877_v60  ;;  %v16870_v26 = vld [vmem:[#allocation11 + $0x138] sm:$0xf0]  ;;  %v16956_v60 = vld [vmem:[#allocation11 + $0x1e0] sm:$0xf] }
 0x8d6   :  { %10983 = vmatmul.bf16.vlgmr.msra.gmra.mxu1 %v10569_v16  ;;  %v10354_v25 = vpop.f32.mrf.mxu3  ;;  %v16873_v46 = vor.u32 %v18448_v32, %v16870_v26  ;;  %v18466_v26 = vld [vmem:[#allocation11 + $0x1c4] sm:$0xf] }
 0x8d7   :  { %11034 = vmatpush.bf16.msrb.mxu1 %v16785_v6  ;;  %v19317_v18 = vpop.f32.mrf.mxu1  ;;  %v18446_v6 = vld [vmem:[#allocation11 + $0x124] sm:$0xf] }
 0x8d8   :  { %11022 = vmatmul.bf16.vlgmr.msrb.gmra.mxu0 %v10568_v62  ;;  %v16865_v50 = vor.u32 %v18446_v6, %v16862_v24  ;;  %v16934_v6 = vld [vmem:[#allocation11 + $0x1b8] sm:$0xf0] }
 0x8d9   :  { %10992 = vmatpush.bf16.msra.mxu2 %v16869_v17 }
 0x8dd   :  { %v10419_v14 = vpop.f32.mrf.mxu0  ;;  %10993 = vmatpush.bf16.msra.mxu2 %v16861_v48 }
 0x8de   :  { %v16957_v14 = vor.u32 %v18471_v58, %v16956_v60 }
 0x8df   :  { %v19320_v62 = vpop.f32.mrf.mxu2  ;;  %v10432_v9 = vpop.f32.mrf.mxu1 }
 0x8e0   :  { %11002 = vmatpush.bf16.msra.mxu3 %v16957_v14 }
 0x8e1   :  { %10994 = vmatpush.bf16.msra.mxu2 %v16853_v36  ;;  %v18465_v36 = vld [vmem:[#allocation11 + $0x1b4] sm:$0xf0] }
 0x8e5   :  { %10995 = vmatpush.bf16.msra.mxu2 %v16845_v52  ;;  %v16924_v52 = vld [vmem:[#allocation11 + $0x1a0] sm:$0xf] }
 0x8e6   :  { %11035 = vmatmul.bf16.vlgmr.msrb.gmra.mxu1 %v10569_v16  ;;  %v18469_v16 = vld [vmem:[#allocation11 + $0x1d4] sm:$0xf0] }
 0x8e7   :  { %v10445_v7 = vpop.f32.mrf.mxu2  ;;  %v16949_v17 = vor.u32 %v18469_v16, %v16948_v61 }
 0x8e8   :  { %v16932_v7 = vld [vmem:[#allocation11 + $0x1b0] sm:$0xf] }
 0x8e9   :  { %11040 = vmatpush.bf16.msrb.mxu2 %v16905_v34  ;;  %11003 = vmatpush.bf16.msra.mxu3 %v16949_v17  ;;  %v16933_v8 = vor.u32 %v18465_v36, %v16932_v7  ;;  %v18463_v34 = vld [vmem:[#allocation11 + $0x1a4] sm:$0xf0] }
 0x8ea   :  { %v16925_v42 = vor.u32 %v18463_v34, %v16924_v52  ;;  %v18488_v52 = vld [vmem:[#allocation14 + $0x70] sm:$0xff]  ;;  %v18479_v34 = vld [vmem:[#allocation14 + $0x28] sm:$0xff] }
 0x8ed   :  { %11041 = vmatpush.bf16.msrb.mxu2 %v16897_v57  ;;  %v18461_v57 = vld [vmem:[#allocation11 + $0x194] sm:$0xf0] }
 0x8ee   :  { %v10404_v28 = vpop.f32.mrf.mxu3 }
 0x8ef   :  { %v10405_v12 = vadd.f32 %v10404_v28, %v19309_v15  ;;  %v16940_v15 = vld [vmem:[#allocation11 + $0x1c0] sm:$0xf]  ;;  %v18470_v28 = vld [vmem:[#allocation11 + $0x1e4] sm:$0xf] }
 0x8f0   :  { %v16961_v39 = vor.u32 %v18470_v28, %v16958_v63  ;;  %v18484_v28 = vld [vmem:[#allocation14 + $0x50] sm:$0xff]  ;;  %v18483_v63 = vld [vmem:[#allocation14 + $0x48] sm:$0xff] }
 0x8f1   :  { %11042 = vmatpush.bf16.msrb.mxu2 %v16889_v38  ;;  %v10418_v59 = vadd.f32 %v19315_v20, %v10405_v12  ;;  %v16941_v20 = vor.u32 %v18467_v35, %v16940_v15  ;;  %v18472_v38 = vld [vmem:[#allocation11 + $0x1f4] sm:$0xf]  ;;  %v10636_v35 = vld [vmem:[#allocation13] sm:$0x3] }
 0x8f2   :  { %v10639_v36 = vperm.slane %v10636_v35, 1 }
 0x8f3   :  { %v10431_v54 = vadd.f32 %v19317_v18, %v10418_v59  ;;  %11004 = vmatpush.bf16.msra.mxu3 %v16941_v20  ;;  %v10638_v20 = vperm.slane %v10636_v35, 0  ;;  %v18519_v35 = vld [vmem:[#allocation19] ss:$0 sm:$0xff] }
 0x8f5   :  { %v10469_v45 = vpop.f32.mrf.mxu0  ;;  %11043 = vmatpush.bf16.msrb.mxu2 %v16881_v44  ;;  %v10444_v1 = vadd.f32 %v19320_v62, %v10431_v54  ;;  %v18468_v44 = vld [vmem:[#allocation11 + $0x1d4] sm:$0xf] }
 0x8f6   :  { %v10470_v11 = vadd.f32 %v10469_v45, %v8863_v55  ;;  %v10406_v29 = vpop.f32.mrf.mxu3  ;;  %v16917_v55 = vor.u32 %v18461_v57, %v16916_v27  ;;  %v18477_v27 = vld [vmem:[#allocation14 + $0x18] sm:$0xff] }
 0x8f7   :  { %v10482_v43 = vpop.f32.mrf.mxu1  ;;  %11005 = vmatpush.bf16.msra.mxu3 %v16933_v8  ;;  %v18464_v29 = vld [vmem:[#allocation11 + $0x1b4] sm:$0xf] }
 0x8f8   :  { %v10483_v30 = vadd.f32 %v10482_v43, %v10470_v11  ;;  %v16966_v11 = vld [vmem:[#allocation11 + $0x1f8] sm:$0xf0]  ;;  %v16909_v43 = vor.u32 %v18459_v49, %v16908_v33  ;;  %v16937_v24 = vor.u32 %v18464_v29, %v16934_v6 }
 0x8f9   :  { %11044 = vmatpush.bf16.msrb.mxu2 %v16873_v46 }
 0x8fb   :  { %11006 = vmatpush.bf16.msra.mxu3 %v16925_v42 }
 0x8fd   :  { %v10471_v41 = vpop.f32.mrf.mxu0  ;;  %11045 = vmatpush.bf16.msrb.mxu2 %v16865_v50  ;;  %v18462_v50 = vld [vmem:[#allocation11 + $0x1a4] sm:$0xf] }
 0x8fe   :  { %v16942_v41 = vld [vmem:[#allocation11 + $0x1c8] sm:$0xf0]  ;;  %v16929_v13 = vor.u32 %v18462_v50, %v16926_v4 }
 0x8ff   :  { %v10495_v31 = vpop.f32.mrf.mxu2  ;;  %v10484_v3 = vpop.f32.mrf.mxu1  ;;  %11007 = vmatpush.bf16.msra.mxu3 %v16917_v55  ;;  %v18476_v55 = vld [vmem:[#allocation14 + $0x10] sm:$0xff] }
 0x900   :  { %v19323_v37 = vadd.f32 %v10495_v31, %v10483_v30  ;;  %v16969_v30 = vor.u32 %v18472_v38, %v16966_v11  ;;  %v16950_v31 = vld [vmem:[#allocation11 + $0x1d8] sm:$0xf0]  ;;  %v16945_v3 = vor.u32 %v18466_v26, %v16942_v41  ;;  %v18487_v38 = vld [vmem:[#allocation14 + $0x68] sm:$0xff]  ;;  %v18474_v11 = vld [vmem:[#allocation14] sm:$0xff] }
 0x901   :  { %11046 = vmatpush.bf16.msrb.mxu2 %v16857_v10  ;;  %v16953_v32 = vor.u32 %v18468_v44, %v16950_v31  ;;  %v18460_v10 = vld [vmem:[#allocation11 + $0x194] sm:$0xf]  ;;  %v18497_v44 = vld [vmem:[%s19372_s9 + $0x38] sm:$0xff]  ;;  %v18496_v31 = vld [vmem:[%s19372_s9 + $0x30] sm:$0xff] }
 0x902   :  { %v16921_v19 = vor.u32 %v18460_v10, %v16918_v51  ;;  %v18495_v51 = vld [vmem:[%s19372_s9 + $0x28] sm:$0xff] }
 0x903   :  { %11008 = vmatpush.bf16.msra.mxu3 %v16909_v43  ;;  %v18486_v43 = vld [vmem:[#allocation14 + $0x60] sm:$0xff] }
 0x905   :  { %11047 = vmatpush.bf16.msrb.mxu2 %v16849_v22  ;;  %v16913_v22 = vor.u32 %v18458_v53, %v16910_v56  ;;  %v18491_v53 = vld [vmem:[%s19372_s9 + $0x8] sm:$0xff]  ;;  %v18490_v56 = vld [vmem:[%s19372_s9] sm:$0xff] }
 0x907   :  { %v10497_v0 = vpop.f32.mrf.mxu2  ;;  %11053 = vmatpush.bf16.msrb.mxu3 %v16969_v30  ;;  %v18485_v30 = vld [vmem:[#allocation14 + $0x58] sm:$0xff] }
 0x90b   :  { %11054 = vmatpush.bf16.msrb.mxu3 %v16961_v39  ;;  %v18482_v39 = vld [vmem:[#allocation14 + $0x40] sm:$0xff] }
 0x90f   :  { %11055 = vmatpush.bf16.msrb.mxu3 %v16953_v32 }
 0x911   :  { %v10456_v48 = vpop.f32.mrf.mxu3 }
 0x912   :  { %v10457_v5 = vadd.f32 %v10456_v48, %v10444_v1 }
 0x913   :  { %11056 = vmatpush.bf16.msrb.mxu3 %v16945_v3 }
 0x914   :  { %v10566_v21 = vmax.f32 %v10457_v5, 0.0 }
 0x915   :  { %v19328_v9 = vpop.f32.mrf.mxu0 }
 0x916   :  { %v10570_v40 = vpack.c.bf16 %v10566_v21, %v10566_v21 }
 0x917   :  { %v19330_v25 = vpop.f32.mrf.mxu1  ;;  %11057 = vmatpush.bf16.msrb.mxu3 %v16937_v24 }
 0x918   :  { %10996 = vmatmul.bf16.vlgmr.msra.gmra.mxu2 %v10570_v40 }
 0x919   :  { %v10458_v62 = vpop.f32.mrf.mxu3  ;;  %11298 = vmatpush.bf16.msra.mxu2 %v18497_v44 }
 0x91a   :  { %v18478_v62 = vld [vmem:[#allocation14 + $0x20] sm:$0xff] }
 0x91b   :  { %11058 = vmatpush.bf16.msrb.mxu3 %v16929_v13 }
 0x91d   :  { %v10523_v2 = vpop.f32.mrf.mxu0  ;;  %11299 = vmatpush.bf16.msra.mxu2 %v18496_v31 }
 0x91f   :  { %v10547_v18 = vpop.f32.mrf.mxu2  ;;  %v10536_v23 = vpop.f32.mrf.mxu1  ;;  %11059 = vmatpush.bf16.msrb.mxu3 %v16921_v19  ;;  %v18492_v19 = vld [vmem:[%s19372_s9 + $0x10] sm:$0xff] }
 0x920   :  { %v18480_v23 = vld [vmem:[#allocation14 + $0x30] sm:$0xff] }
 0x921   :  { %11300 = vmatpush.bf16.msra.mxu2 %v18495_v51 }
 0x923   :  { %11060 = vmatpush.bf16.msrb.mxu3 %v16913_v22 }
 0x927   :  { %v10549_v45 = vpop.f32.mrf.mxu2 }
 0x928   :  { %11048 = vmatmul.bf16.vlgmr.msrb.gmra.mxu2 %v10570_v40  ;;  %v18489_v40 = vld [vmem:[#allocation14 + $0x78] sm:$0xff]  ;;  %v18475_v45 = vld [vmem:[#allocation14 + $0x8] sm:$0xff] }
 0x929   :  { %11215 = vmatpush.bf16.msra.mxu1 %v18489_v40 }
 0x92d   :  { %11216 = vmatpush.bf16.msra.mxu1 %v18488_v52 }
 0x931   :  { %v10508_v46 = vpop.f32.mrf.mxu3  ;;  %11217 = vmatpush.bf16.msra.mxu1 %v18487_v38 }
 0x932   :  { %v10509_v12 = vadd.f32 %v10508_v46, %v19323_v37 }
 0x934   :  { %v10522_v60 = vadd.f32 %v19328_v9, %v10509_v12 }
 0x935   :  { %v10971_v0 = vpop.f32.mrf.mxu0  ;;  %11218 = vmatpush.bf16.msra.mxu1 %v18486_v43 }
 0x936   :  { %v10535_v58 = vadd.f32 %v19330_v25, %v10522_v60  ;;  %v10972_v5 = vadd.f32 %v10971_v0, %v10638_v20  ;;  %v18493_v0 = vld [vmem:[%s19372_s9 + $0x18] sm:$0xff] }
 0x938   :  { %v10548_v54 = vadd.f32 %v10547_v18, %v10535_v58  ;;  %v18481_v18 = vld [vmem:[#allocation14 + $0x38] sm:$0xff] }
 0x939   :  { %v10510_v47 = vpop.f32.mrf.mxu3  ;;  %11202 = vmatpush.bf16.msra.mxu0 %v18481_v18  ;;  %11219 = vmatpush.bf16.msra.mxu1 %v18485_v30 }
 0x93a   :  { %v18494_v47 = vld [vmem:[%s19372_s9 + $0x20] sm:$0xff] }
 0x93b   :  { %11301 = vmatpush.bf16.msra.mxu2 %v18494_v47 }
 0x93d   :  { %v10973_v59 = vpop.f32.mrf.mxu0  ;;  %11203 = vmatpush.bf16.msra.mxu0 %v18480_v23  ;;  %11220 = vmatpush.bf16.msra.mxu1 %v18484_v28 }
 0x93e   :  { %v18517_v59 = vld [vmem:[#allocation16] ss:$0 sm:$0xff] }
 0x93f   :  { %11302 = vmatpush.bf16.msra.mxu2 %v18493_v0 }
 0x941   :  { %11204 = vmatpush.bf16.msra.mxu0 %v18479_v34  ;;  %11221 = vmatpush.bf16.msra.mxu1 %v18483_v63 }
 0x943   :  { %11303 = vmatpush.bf16.msra.mxu2 %v18492_v19 }
 0x945   :  { %11205 = vmatpush.bf16.msra.mxu0 %v18478_v62  ;;  %11222 = vmatpush.bf16.msra.mxu1 %v18482_v39 }
 0x947   :  { %11304 = vmatpush.bf16.msra.mxu2 %v18491_v53 }
 0x949   :  { %11206 = vmatpush.bf16.msra.mxu0 %v18477_v27 }
 0x94b   :  { %11305 = vmatpush.bf16.msra.mxu2 %v18490_v56 }
 0x94d   :  { %11207 = vmatpush.bf16.msra.mxu0 %v18476_v55 }
 0x951   :  { %v10560_v61 = vpop.f32.mrf.mxu3  ;;  %11208 = vmatpush.bf16.msra.mxu0 %v18475_v45 }
 0x952   :  { %v10561_v16 = vadd.f32 %v10560_v61, %v10548_v54 }
 0x953   :  { %v10984_v21 = vpop.f32.mrf.mxu1 }
 0x954   :  { %v10567_v17 = vmax.f32 %v10561_v16, 0.0  ;;  %v10985_v37 = vadd.f32 %v10984_v21, %v10972_v5 }
 0x955   :  { %v11023_v14 = vpop.f32.mrf.mxu0  ;;  %11209 = vmatpush.bf16.msra.mxu0 %v18474_v11 }
 0x956   :  { %v10571_v1 = vpack.c.bf16 %v10567_v17, %v10567_v17  ;;  %v11024_v9 = vadd.f32 %v11023_v14, %v10639_v36  ;;  %v18518_v17 = vld [vmem:[#allocation17] ss:$0 sm:$0xff] }
 0x958   :  { %11009 = vmatmul.bf16.vlgmr.msra.gmra.mxu3 %v10571_v1 }
 0x959   :  { %v10562_v48 = vpop.f32.mrf.mxu3 }
 0x95b   :  { %v10986_v7 = vpop.f32.mrf.mxu1 }
 0x95d   :  { %v11025_v15 = vpop.f32.mrf.mxu0 }
 0x963   :  { %v11036_v2 = vpop.f32.mrf.mxu1 }
 0x964   :  { %v11037_v25 = vadd.f32 %v11036_v2, %v11024_v9 }
 0x968   :  { %11061 = vmatmul.bf16.vlgmr.msrb.gmra.mxu3 %v10571_v1 }
 0x96b   :  { %v11038_v8 = vpop.f32.mrf.mxu1 }
 0x99b   :  { %v10997_v42 = vpop.f32.mrf.mxu2 }
 0x99c   :  { %v10998_v32 = vadd.f32 %v10997_v42, %v10985_v37  ;;  %v18520_v37 = vld [vmem:[#allocation2] ss:$0 sm:$0xff] }
 0x9a3   :  { %v10999_v57 = vpop.f32.mrf.mxu2 }
 0x9ab   :  { %v11049_v33 = vpop.f32.mrf.mxu2 }
 0x9ac   :  { %v11050_v6 = vadd.f32 %v11049_v33, %v11037_v25 }
 0x9b3   :  { %v11051_v49 = vpop.f32.mrf.mxu2 }
 0x9db   :  { %v11010_v26 = vpop.f32.mrf.mxu3 }
 0x9dc   :  { %v11011_v41 = vadd.f32 %v11010_v26, %v10998_v32 }
 0x9de   :  { %v11066_v46 = vmax.f32 %v11011_v41, 0.0 }
 0x9e0   :  { %v11068_v3 = vpack.c.bf16 %v11066_v46, %v11066_v46 }
 0x9e2   :  { %11210 = vmatmul.bf16.vlgmr.msra.gmra.mxu0 %v11068_v3 }
 0x9e3   :  { %v11012_v29 = vpop.f32.mrf.mxu3 }
 0x9eb   :  { %v11062_v24 = vpop.f32.mrf.mxu3 }
 0x9ec   :  { %v11063_v50 = vadd.f32 %v11062_v24, %v11050_v6 }
 0x9ee   :  { %v11067_v4 = vmax.f32 %v11063_v50, 0.0 }
 0x9f0   :  { %v11069_v13 = vpack.c.bf16 %v11067_v4, %v11067_v4 }
 0x9f2   :  { %11223 = vmatmul.bf16.vlgmr.msra.gmra.mxu1 %v11069_v13 }
 0x9f3   :  { %v11064_v10 = vpop.f32.mrf.mxu3 }
 0xa5f   :  { %v11211_v22 = vpop.f32.mrf.mxu0 }
 0xa60   :  { %v11212_v60 = vadd.f32 %v18517_v59, %v11211_v22 }
 0xa67   :  { %v11213_v12 = vpop.f32.mrf.mxu0 }
 0xa6f   :  { %v11224_v58 = vpop.f32.mrf.mxu1 }
 0xa70   :  { %v11225_v14 = vadd.f32 %v11224_v58, %v11212_v60 }
 0xa72   :  { %v11228_v54 = vmax.f32 %v11225_v14, 0.0 }
 0xa74   :  { %v11229_v61 = vpack.c.bf16 %v11228_v54, %v11228_v54 }
 0xa76   :  { %11306 = vmatmul.bf16.vlgmr.msra.gmra.mxu2 %v11229_v61 }
 0xa77   :  { %v11226_v16 = vpop.f32.mrf.mxu1 }
 0xaf9   :  { %v11307_v1 = vpop.f32.mrf.mxu2 }
 0xafa   :  { %v11308_v15 = vadd.f32 %v18518_v17, %v11307_v1 }
 0xafc   :  { %v11311_v48 = vmax.f32 %v11308_v15, 0.0 }
 0xafe   :  { %v11316_v20 = vmul.f32 %v18519_v35, %v11311_v48 }
 0xb00   :  { %v11318_v5 = vsel %vm11317_vm0, %v11316_v20, 0.0 }
 0xb01   :  { %v11309_v21 = vpop.f32.mrf.mxu2  ;;  %11319 = vadd.xlane.f32.xlu0 %v11318_v5 }
 0xb74   :  { %v11320_v7 = vpop.xlane.xlu0 %11319 }
 0xb75   :  { %v11325_v36 = vadd.f32 %v18520_v37, %v11320_v7 }
 0xb77   :  { %11327 = vst.msk [vmem:[%s19376_s13] sm:$0xff] %vm11326_vm1, %v11325_v36 }
 0xb78   :  { %11332 = vsyncpa [#allocation4], 1 }
 0xb79   :  { %11333 = vsyncpa [#allocation6], 1 }
 0xb7a   :  { %11334 = vsyncpa [#allocation9], 1 }
 0xb7b   :  { %11335 = vsyncpa [#allocation12], 1 }
 0xb7c   :  { %11336 = vsyncpa [#allocation15], 1 }
 0xb7d   :  { %11337 = vsyncpa [#allocation18], 1 }

</bundles_post_ra>
